<compile_context>
chip_gen: v7x
topology: tpu7x:2x2x1
jax: 0.10.0
libtpu: 0.0.40
codegen_flags: <defaults>
</compile_context>

<pallas_src>
import functools

import jax
import jax.numpy as jnp
from jax import lax
from jax.experimental import pallas as pl
from jax.experimental.pallas import tpu as pltpu

EPS = 1e-5
# Scoped VMEM cap: ~48 MiB is safe on v7x (64 MiB physical) and leaves plenty
# of headroom on v5e/v6e (128 MiB).  Per-step working set here is only a few MB.
VMEM_LIMIT_BYTES = 48 * 1024 * 1024


def _round_up(x, m):
    return (x + m - 1) // m * m


def _pick_group(n):
    """Images per grid step: amortize the ~0.35us fixed per-step cost, but keep
    at least 2 grid steps so a megacore part can shard the 'parallel' axis."""
    for g in (8, 4, 2):
        if n % g == 0 and n // g >= 2:
            return g
    return 1


# --------------------------------------------------------------------------
# 3x3 "same" conv as 9 accumulating K=C matmuls (no materialized im2col).
# --------------------------------------------------------------------------
def _conv3x3_taps(read_rows, w_ref, *, base, M, Wp, C):
    """read_rows(start) returns an (M, C) bf16 slab of the zero-padded
    activation frame (flat Wp-wide rows).  The tap (dy, dx) for output pixel
    r = y*Wp + x lives at flat row base + dy*Wp + dx + r.  w_ref is the packed
    (9*C, C) bf16 weight, rows ordered (dy, dx, ci).  Returns the f32 conv
    output (M, C); columns x >= W contain garbage (callers mask only where
    needed)."""
    acc = None
    for dy in range(3):
        for dx in range(3):
            t = dy * 3 + dx
            tap = read_rows(base + dy * Wp + dx)                    # (M, C) bf16
            part = jnp.dot(tap, w_ref[t * C:(t + 1) * C, :],
                           preferred_element_type=jnp.float32)
            acc = part if acc is None else acc + part
    return acc


def _partial_stats(conv, st_ref, g, *, H, W, Wp, C):
    """Per-image BN partial sums over the H*W valid pixels, computed from the
    f32 conv accumulator (before the bf16 cast).  The (8, C) row padding keeps
    the per-image stats store / DMA full-sublane; host glue ignores rows 2..7."""
    v = conv.reshape(H, Wp, C)[:, :W, :].reshape(H * W, C)
    st_ref[g, 0:1, :] = jnp.sum(v, axis=0, keepdims=True)
    st_ref[g, 1:2, :] = jnp.sum(v * v, axis=0, keepdims=True)
    st_ref[g, 2:8, :] = jnp.zeros((6, C), jnp.float32)


# --------------------------------------------------------------------------
# pass 1: conv1 + per-image BN1 partial statistics
# --------------------------------------------------------------------------
def _conv1_kernel(xpad_ref, w1_ref, c1_ref, st1_ref, *, H, W, Wp, C, G):
    M = H * Wp
    for g in range(G):
        conv = _conv3x3_taps(
            lambda s, g=g: xpad_ref[g, pl.ds(s, M), :],
            w1_ref, base=0, M=M, Wp=Wp, C=C)
        # Stored unmasked (pad columns hold garbage); pass 2 masks h1 anyway.
        c1_ref[g, :, :] = conv.astype(jnp.bfloat16)
        _partial_stats(conv, st1_ref, g, H=H, W=W, Wp=Wp, C=C)


# --------------------------------------------------------------------------
# pass 2: bn1-affine + relu (fused) -> conv2 + per-image BN2 partial statistics
# --------------------------------------------------------------------------
def _conv2_kernel(c1_ref, s1_ref, t1_ref, w2_ref, c2_ref, st2_ref, frame_ref,
                  *, H, W, Wp, C, G, top):
    M = H * Wp
    base = top - Wp - 1
    rows = frame_ref.shape[0]
    tail = rows - (top + M)

    # Zero only the pad bands of the bf16 conv2 frame; the interior is fully
    # overwritten per image below.  (Re-zeroed every grid step: cheap, and
    # stays correct if the parallel grid axis is sharded across cores.)
    frame_ref[pl.ds(0, top), :] = jnp.zeros((top, C), jnp.bfloat16)
    frame_ref[pl.ds(top + M, tail), :] = jnp.zeros((tail, C), jnp.bfloat16)

    # Column mask built once per body: frame columns x >= W must be zero (they
    # double as the left/right zero padding of neighbouring frame rows).
    valid = lax.broadcasted_iota(jnp.int32, (H, Wp, C), 1) < W

    for g in range(G):
        h1 = jnp.maximum(
            c1_ref[g, :, :].astype(jnp.float32) * s1_ref[...] + t1_ref[...], 0.0)
        h1 = jnp.where(valid, h1.reshape(H, Wp, C), 0.0).reshape(M, C)
        frame_ref[pl.ds(top, M), :] = h1.astype(jnp.bfloat16)

        conv = _conv3x3_taps(
            lambda s: frame_ref[pl.ds(s, M), :],
            w2_ref, base=base, M=M, Wp=Wp, C=C)
        c2_ref[g, :, :] = conv.astype(jnp.bfloat16)
        _partial_stats(conv, st2_ref, g, H=H, W=W, Wp=Wp, C=C)


# --------------------------------------------------------------------------
# pass 3: bn2-affine + residual add (identity = original f32 x) + relu
# --------------------------------------------------------------------------
def _bn2_add_relu_kernel(c2_ref, x_ref, s2_ref, t2_ref, out_ref,
                         *, H, W, Wp, C, G):
    for g in range(G):
        y = c2_ref[g, :, :].astype(jnp.float32) * s2_ref[...] + t2_ref[...]
        y = y.reshape(H, Wp, C)[:, :W, :]
        out_ref[g, :, :, :] = jnp.maximum(y + x_ref[g, :, :, :], 0.0
                                          ).astype(out_ref.dtype)


# --------------------------------------------------------------------------
# host-side glue
# --------------------------------------------------------------------------
def _bn_scale_shift(stats, count, gamma, beta):
    """Combine per-image (sum, sum_sq) partials (rows 0,1 of the (N,8,C) stats)
    into training-mode BN affine.  E[x^2]-E[x]^2 in f32 is fine at these counts
    / magnitudes; switch to Welford for very large N*H*W."""
    s = jnp.sum(stats[:, 0, :], axis=0)
    ss = jnp.sum(stats[:, 1, :], axis=0)
    mean = s / count
    var = jnp.maximum(ss / count - mean * mean, 0.0)
    scale = gamma * lax.rsqrt(var + EPS)
    shift = beta - mean * scale
    return (scale.reshape(1, -1).astype(jnp.float32),
            shift.reshape(1, -1).astype(jnp.float32))


def basic_block_nhwc(x, w1, g1, b1, w2, g2, b2):
    """x: (N, H, W, C) f32 (channels-last).  w1, w2: (C, C, 3, 3) OIHW.
    Returns (N, H, W, C) f32.  Requires inplanes == planes (stride=1,
    downsample=None BasicBlock)."""
    N, H, W, C = x.shape
    assert w1.shape == (C, C, 3, 3) and w2.shape == (C, C, 3, 3)

    G = _pick_group(N)
    Hp = H + 2
    Wp = _round_up(W + 2, 8)                  # flat frame row width
    M = H * Wp
    FR = _round_up(Hp * Wp + 2, 16)           # tap loads stay in-bounds, bf16-tiled
    top = _round_up(Wp + 1, 16)               # zero band above the frame interior
    frame_rows = top + M + _round_up(Wp + 1, 16)

    # bf16 zero-padded input, flattened to Wp-wide rows (MXU operands are bf16
    # anyway; the residual in pass 3 reads the original f32 x, so it's exact).
    xpad = jnp.pad(x, ((0, 0), (1, 1), (1, Wp - W - 1), (0, 0)))
    xpad = jnp.pad(xpad.reshape(N, Hp * Wp, C),
                   ((0, 0), (0, FR - Hp * Wp), (0, 0))).astype(jnp.bfloat16)

    # Pack 3x3 weights as (9*C, C) bf16, rows ordered (dy, dx, ci).
    w1p = jnp.transpose(w1, (2, 3, 1, 0)).reshape(9 * C, C).astype(jnp.bfloat16)
    w2p = jnp.transpose(w2, (2, 3, 1, 0)).reshape(9 * C, C).astype(jnp.bfloat16)

    cparams = pltpu.CompilerParams(dimension_semantics=("parallel",),
                                   vmem_limit_bytes=VMEM_LIMIT_BYTES)
    conv_cost = pl.CostEstimate(
        flops=2 * N * M * 9 * C * C,
        transcendentals=0,
        bytes_accessed=(N * (FR + 2 * M) * C + 9 * C * C) * 2 + N * 8 * C * 4)

    img = lambda rows: pl.BlockSpec((G, rows, C), lambda n: (n, 0, 0))
    full2d = lambda a, b: pl.BlockSpec((a, b), lambda n: (0, 0))

    # ---- pass 1: conv1 (+ BN1 partial stats) ------------------------------
    c1, st1 = pl.pallas_call(
        functools.partial(_conv1_kernel, H=H, W=W, Wp=Wp, C=C, G=G),
        out_shape=(jax.ShapeDtypeStruct((N, M, C), jnp.bfloat16),
                   jax.ShapeDtypeStruct((N, 8, C), jnp.float32)),
        grid_spec=pltpu.PrefetchScalarGridSpec(
            num_scalar_prefetch=0, grid=(N // G,),
            in_specs=[img(FR), full2d(9 * C, C)],
            out_specs=(img(M), img(8))),
        compiler_params=cparams,
        cost_estimate=conv_cost,
    )(xpad, w1p)

    count = N * H * W
    scale1, shift1 = _bn_scale_shift(st1, count, g1, b1)

    # ---- pass 2: bn1 + relu -> conv2 (+ BN2 partial stats) ----------------
    c2, st2 = pl.pallas_call(
        functools.partial(_conv2_kernel, H=H, W=W, Wp=Wp, C=C, G=G, top=top),
        out_shape=(jax.ShapeDtypeStruct((N, M, C), jnp.bfloat16),
                   jax.ShapeDtypeStruct((N, 8, C), jnp.float32)),
        grid_spec=pltpu.PrefetchScalarGridSpec(
            num_scalar_prefetch=0, grid=(N // G,),
            in_specs=[img(M), full2d(1, C), full2d(1, C), full2d(9 * C, C)],
            out_specs=(img(M), img(8)),
            scratch_shapes=[pltpu.VMEM((frame_rows, C), jnp.bfloat16)]),
        compiler_params=cparams,
        cost_estimate=conv_cost,
    )(c1, scale1, shift1, w2p)

    scale2, shift2 = _bn_scale_shift(st2, count, g2, b2)

    # ---- pass 3: bn2 + residual add + relu --------------------------------
    out = pl.pallas_call(
        functools.partial(_bn2_add_relu_kernel, H=H, W=W, Wp=Wp, C=C, G=G),
        out_shape=jax.ShapeDtypeStruct((N, H, W, C), x.dtype),
        grid_spec=pltpu.PrefetchScalarGridSpec(
            num_scalar_prefetch=0, grid=(N // G,),
            in_specs=[img(M),
                      pl.BlockSpec((G, H, W, C), lambda n: (n, 0, 0, 0)),
                      full2d(1, C), full2d(1, C)],
            out_specs=pl.BlockSpec((G, H, W, C), lambda n: (n, 0, 0, 0))),
        compiler_params=cparams,
    )(c2, x, scale2, shift2)
    return out


def basic_block(x_nchw, w1, g1, b1, w2, g2, b2):
    """PyTorch-layout adapter: x (N, C, H, W) -> (N, C, H, W).  Prefer
    basic_block_nhwc when stacking blocks to avoid the boundary transposes."""
    x = jnp.transpose(x_nchw, (0, 2, 3, 1))
    out = basic_block_nhwc(x, w1, g1, b1, w2, g2, b2)
    return jnp.transpose(out, (0, 3, 1, 2))


# --------------------------------------------------------------------------
# pure-JAX reference (PyTorch NCHW semantics) for correctness checking
# --------------------------------------------------------------------------
def basic_block_reference(x_nchw, w1, g1, b1, w2, g2, b2):
    def conv(x, w):
        return lax.conv_general_dilated(
            x, w, window_strides=(1, 1), padding=((1, 1), (1, 1)),
            dimension_numbers=("NCHW", "OIHW", "NCHW"),
            precision=lax.Precision.HIGHEST)

    def bn(x, gamma, beta):
        m = jnp.mean(x, axis=(0, 2, 3), keepdims=True)
        v = jnp.mean((x - m) ** 2, axis=(0, 2, 3), keepdims=True)
        return (x - m) * lax.rsqrt(v + EPS) * gamma.reshape(1, -1, 1, 1) \
               + beta.reshape(1, -1, 1, 1)

    out = jnp.maximum(bn(conv(x_nchw, w1), g1, b1), 0.0)
    out = bn(conv(out, w2), g2, b2)
    return jnp.maximum(out + x_nchw, 0.0)


if __name__ == "__main__":
    # BasicBlock with inplanes == planes == 128 (e.g. a stride-1 block of
    # ResNet-18 layer2), batch=4 (exercises G=2 multi-image blocking with two
    # grid steps), spatial 16x16.  C=128 keeps vregs lane-dense.
    N, C, H, W = 4, 128, 16, 16
    key = jax.random.PRNGKey(0)
    ks = jax.random.split(key, 7)

    x = jax.random.normal(ks[0], (N, C, H, W), jnp.float32)
    w1 = jax.random.normal(ks[1], (C, C, 3, 3), jnp.float32) * 0.1   # conv1 (OIHW)
    w2 = jax.random.normal(ks[2], (C, C, 3, 3), jnp.float32) * 0.1   # conv2 (OIHW)
    g1 = 1.0 + 0.1 * jax.random.normal(ks[3], (C,), jnp.float32)     # bn1 gamma
    b1 = 0.1 * jax.random.normal(ks[4], (C,), jnp.float32)           # bn1 beta
    g2 = 1.0 + 0.1 * jax.random.normal(ks[5], (C,), jnp.float32)     # bn2 gamma
    b2 = 0.1 * jax.random.normal(ks[6], (C,), jnp.float32)           # bn2 beta

    out = jax.block_until_ready(jax.jit(basic_block)(x, w1, g1, b1, w2, g2, b2))
    ref = jax.block_until_ready(basic_block_reference(x, w1, g1, b1, w2, g2, b2))

    assert out.shape == (N, C, H, W)
    max_err = float(jnp.max(jnp.abs(out - ref)))
    mean_err = float(jnp.mean(jnp.abs(out - ref)))
    # bf16 MXU operands + bf16 inter-pass activations vs an f32 HIGHEST
    # reference: per-element error std is ~1.5-2% of the unit-variance BN
    # output, so the worst element over ~130k samples lands around 0.08; a
    # genuinely broken kernel produces O(1) errors.
    assert max_err < 0.15 and mean_err < 0.02, (max_err, mean_err)
    print("KERNEL_OK")
</pallas_src>

<mosaic_0001>
module attributes {stable_mosaic.version = 11 : i64} {
  func.func @_conv1_kernel(%arg0: i32, %arg1: memref<2x448x128xbf16, #tpu.memory_space<vmem>>, %arg2: memref<1152x128xbf16, #tpu.memory_space<vmem>>, %arg3: memref<2x384x128xbf16, #tpu.memory_space<vmem>>, %arg4: memref<2x8x128xf32, #tpu.memory_space<vmem>>) attributes {dimension_semantics = [#tpu.dimension_semantics<parallel>], iteration_bounds = array<i64: 2>, scalar_prefetch = 0 : i64, scratch_operands = 0 : i64, tpu.core_type = #tpu.core_type<tc>, window_params = [{transform_indices = @transform_0, window_bounds = array<i64: 2, 448, 128>}, {pipeline_mode = #tpu.pipeline_mode<synchronous>, transform_indices = @transform_1, window_bounds = array<i64: 1152, 128>}, {transform_indices = @transform_2, window_bounds = array<i64: 2, 384, 128>}, {transform_indices = @transform_3, window_bounds = array<i64: 2, 8, 128>}]} {
    %c0 = arith.constant 0 : index
    %c0_0 = arith.constant 0 : index
    %c0_1 = arith.constant 0 : index
    %0 = vector.load %arg1[%c0, %c0_0, %c0_1] : memref<2x448x128xbf16, #tpu.memory_space<vmem>>, vector<1x384x128xbf16>
    %1 = vector.shape_cast %0 : vector<1x384x128xbf16> to vector<384x128xbf16>
    %c0_2 = arith.constant 0 : index
    %c0_3 = arith.constant 0 : index
    %2 = vector.load %arg2[%c0_2, %c0_3] : memref<1152x128xbf16, #tpu.memory_space<vmem>>, vector<128x128xbf16>
    %cst = arith.constant dense<0.000000e+00> : vector<384x128xf32>
    %3 = tpu.matmul %1, %2, %cst {dimension_numbers = #tpu.dot_dimension_numbers<[1], [0], [0], [1], [0, 0, 1, 1], [], []>} : vector<384x128xbf16>, vector<128x128xbf16>, vector<384x128xf32> -> vector<384x128xf32>
    %c0_4 = arith.constant 0 : index
    %c1 = arith.constant 1 : index
    %c0_5 = arith.constant 0 : index
    %4 = vector.load %arg1[%c0_4, %c1, %c0_5] : memref<2x448x128xbf16, #tpu.memory_space<vmem>>, vector<1x384x128xbf16>
    %5 = vector.shape_cast %4 : vector<1x384x128xbf16> to vector<384x128xbf16>
    %c128 = arith.constant 128 : index
    %c0_6 = arith.constant 0 : index
    %6 = vector.load %arg2[%c128, %c0_6] : memref<1152x128xbf16, #tpu.memory_space<vmem>>, vector<128x128xbf16>
    %cst_7 = arith.constant dense<0.000000e+00> : vector<384x128xf32>
    %7 = tpu.matmul %5, %6, %cst_7 {dimension_numbers = #tpu.dot_dimension_numbers<[1], [0], [0], [1], [0, 0, 1, 1], [], []>} : vector<384x128xbf16>, vector<128x128xbf16>, vector<384x128xf32> -> vector<384x128xf32>
    %8 = arith.addf %3, %7 : vector<384x128xf32>
    %c0_8 = arith.constant 0 : index
    %c2 = arith.constant 2 : index
    %c0_9 = arith.constant 0 : index
    %9 = vector.load %arg1[%c0_8, %c2, %c0_9] : memref<2x448x128xbf16, #tpu.memory_space<vmem>>, vector<1x384x128xbf16>
    %10 = vector.shape_cast %9 : vector<1x384x128xbf16> to vector<384x128xbf16>
    %c256 = arith.constant 256 : index
    %c0_10 = arith.constant 0 : index
    %11 = vector.load %arg2[%c256, %c0_10] : memref<1152x128xbf16, #tpu.memory_space<vmem>>, vector<128x128xbf16>
    %cst_11 = arith.constant dense<0.000000e+00> : vector<384x128xf32>
    %12 = tpu.matmul %10, %11, %cst_11 {dimension_numbers = #tpu.dot_dimension_numbers<[1], [0], [0], [1], [0, 0, 1, 1], [], []>} : vector<384x128xbf16>, vector<128x128xbf16>, vector<384x128xf32> -> vector<384x128xf32>
    %13 = arith.addf %8, %12 : vector<384x128xf32>
    %c0_12 = arith.constant 0 : index
    %c24 = arith.constant 24 : index
    %c0_13 = arith.constant 0 : index
    %14 = vector.load %arg1[%c0_12, %c24, %c0_13] : memref<2x448x128xbf16, #tpu.memory_space<vmem>>, vector<1x384x128xbf16>
    %15 = vector.shape_cast %14 : vector<1x384x128xbf16> to vector<384x128xbf16>
    %c384 = arith.constant 384 : index
    %c0_14 = arith.constant 0 : index
    %16 = vector.load %arg2[%c384, %c0_14] : memref<1152x128xbf16, #tpu.memory_space<vmem>>, vector<128x128xbf16>
    %cst_15 = arith.constant dense<0.000000e+00> : vector<384x128xf32>
    %17 = tpu.matmul %15, %16, %cst_15 {dimension_numbers = #tpu.dot_dimension_numbers<[1], [0], [0], [1], [0, 0, 1, 1], [], []>} : vector<384x128xbf16>, vector<128x128xbf16>, vector<384x128xf32> -> vector<384x128xf32>
    %18 = arith.addf %13, %17 : vector<384x128xf32>
    %c0_16 = arith.constant 0 : index
    %c25 = arith.constant 25 : index
    %c0_17 = arith.constant 0 : index
    %19 = vector.load %arg1[%c0_16, %c25, %c0_17] : memref<2x448x128xbf16, #tpu.memory_space<vmem>>, vector<1x384x128xbf16>
    %20 = vector.shape_cast %19 : vector<1x384x128xbf16> to vector<384x128xbf16>
    %c512 = arith.constant 512 : index
    %c0_18 = arith.constant 0 : index
    %21 = vector.load %arg2[%c512, %c0_18] : memref<1152x128xbf16, #tpu.memory_space<vmem>>, vector<128x128xbf16>
    %cst_19 = arith.constant dense<0.000000e+00> : vector<384x128xf32>
    %22 = tpu.matmul %20, %21, %cst_19 {dimension_numbers = #tpu.dot_dimension_numbers<[1], [0], [0], [1], [0, 0, 1, 1], [], []>} : vector<384x128xbf16>, vector<128x128xbf16>, vector<384x128xf32> -> vector<384x128xf32>
    %23 = arith.addf %18, %22 : vector<384x128xf32>
    %c0_20 = arith.constant 0 : index
    %c26 = arith.constant 26 : index
    %c0_21 = arith.constant 0 : index
    %24 = vector.load %arg1[%c0_20, %c26, %c0_21] : memref<2x448x128xbf16, #tpu.memory_space<vmem>>, vector<1x384x128xbf16>
    %25 = vector.shape_cast %24 : vector<1x384x128xbf16> to vector<384x128xbf16>
    %c640 = arith.constant 640 : index
    %c0_22 = arith.constant 0 : index
    %26 = vector.load %arg2[%c640, %c0_22] : memref<1152x128xbf16, #tpu.memory_space<vmem>>, vector<128x128xbf16>
    %cst_23 = arith.constant dense<0.000000e+00> : vector<384x128xf32>
    %27 = tpu.matmul %25, %26, %cst_23 {dimension_numbers = #tpu.dot_dimension_numbers<[1], [0], [0], [1], [0, 0, 1, 1], [], []>} : vector<384x128xbf16>, vector<128x128xbf16>, vector<384x128xf32> -> vector<384x128xf32>
    %28 = arith.addf %23, %27 : vector<384x128xf32>
    %c0_24 = arith.constant 0 : index
    %c48 = arith.constant 48 : index
    %c0_25 = arith.constant 0 : index
    %29 = vector.load %arg1[%c0_24, %c48, %c0_25] : memref<2x448x128xbf16, #tpu.memory_space<vmem>>, vector<1x384x128xbf16>
    %30 = vector.shape_cast %29 : vector<1x384x128xbf16> to vector<384x128xbf16>
    %c768 = arith.constant 768 : index
    %c0_26 = arith.constant 0 : index
    %31 = vector.load %arg2[%c768, %c0_26] : memref<1152x128xbf16, #tpu.memory_space<vmem>>, vector<128x128xbf16>
    %cst_27 = arith.constant dense<0.000000e+00> : vector<384x128xf32>
    %32 = tpu.matmul %30, %31, %cst_27 {dimension_numbers = #tpu.dot_dimension_numbers<[1], [0], [0], [1], [0, 0, 1, 1], [], []>} : vector<384x128xbf16>, vector<128x128xbf16>, vector<384x128xf32> -> vector<384x128xf32>
    %33 = arith.addf %28, %32 : vector<384x128xf32>
    %c0_28 = arith.constant 0 : index
    %c49 = arith.constant 49 : index
    %c0_29 = arith.constant 0 : index
    %34 = vector.load %arg1[%c0_28, %c49, %c0_29] : memref<2x448x128xbf16, #tpu.memory_space<vmem>>, vector<1x384x128xbf16>
    %35 = vector.shape_cast %34 : vector<1x384x128xbf16> to vector<384x128xbf16>
    %c896 = arith.constant 896 : index
    %c0_30 = arith.constant 0 : index
    %36 = vector.load %arg2[%c896, %c0_30] : memref<1152x128xbf16, #tpu.memory_space<vmem>>, vector<128x128xbf16>
    %cst_31 = arith.constant dense<0.000000e+00> : vector<384x128xf32>
    %37 = tpu.matmul %35, %36, %cst_31 {dimension_numbers = #tpu.dot_dimension_numbers<[1], [0], [0], [1], [0, 0, 1, 1], [], []>} : vector<384x128xbf16>, vector<128x128xbf16>, vector<384x128xf32> -> vector<384x128xf32>
    %38 = arith.addf %33, %37 : vector<384x128xf32>
    %c0_32 = arith.constant 0 : index
    %c50 = arith.constant 50 : index
    %c0_33 = arith.constant 0 : index
    %39 = vector.load %arg1[%c0_32, %c50, %c0_33] : memref<2x448x128xbf16, #tpu.memory_space<vmem>>, vector<1x384x128xbf16>
    %40 = vector.shape_cast %39 : vector<1x384x128xbf16> to vector<384x128xbf16>
    %c1024 = arith.constant 1024 : index
    %c0_34 = arith.constant 0 : index
    %41 = vector.load %arg2[%c1024, %c0_34] : memref<1152x128xbf16, #tpu.memory_space<vmem>>, vector<128x128xbf16>
    %cst_35 = arith.constant dense<0.000000e+00> : vector<384x128xf32>
    %42 = tpu.matmul %40, %41, %cst_35 {dimension_numbers = #tpu.dot_dimension_numbers<[1], [0], [0], [1], [0, 0, 1, 1], [], []>} : vector<384x128xbf16>, vector<128x128xbf16>, vector<384x128xf32> -> vector<384x128xf32>
    %43 = arith.addf %38, %42 : vector<384x128xf32>
    %44 = arith.truncf %43 : vector<384x128xf32> to vector<384x128xbf16>
    %c0_36 = arith.constant 0 : index
    %c0_37 = arith.constant 0 : index
    %c0_38 = arith.constant 0 : index
    %45 = vector.load %arg3[%c0_36, %c0_37, %c0_38] : memref<2x384x128xbf16, #tpu.memory_space<vmem>>, vector<1x384x128xbf16>
    %46 = vector.shape_cast %45 : vector<1x384x128xbf16> to vector<384x128xbf16>
    %47 = vector.shape_cast %44 : vector<384x128xbf16> to vector<1x384x128xbf16>
    tpu.vector_store %arg3[%c0_36, %c0_37, %c0_38], %47 {strides = array<i32>} : memref<2x384x128xbf16, #tpu.memory_space<vmem>>, vector<1x384x128xbf16>,
    %48 = vector.shape_cast %43 : vector<384x128xf32> to vector<16x24x128xf32>
    %49 = vector.extract_strided_slice %48 {offsets = [0, 0, 0], sizes = [16, 16, 128], strides = [1, 1, 1]} : vector<16x24x128xf32> to vector<16x16x128xf32>
    %50 = vector.shape_cast %49 : vector<16x16x128xf32> to vector<256x128xf32>
    %cst_39 = arith.constant dense<0.000000e+00> : vector<128xf32>
    %51 = vector.multi_reduction <add>, %50, %cst_39 [0] : vector<256x128xf32> to vector<128xf32>
    %52 = vector.shape_cast %51 : vector<128xf32> to vector<1x128xf32>
    %c0_40 = arith.constant 0 : index
    %c0_41 = arith.constant 0 : index
    %c0_42 = arith.constant 0 : index
    %53 = vector.load %arg4[%c0_40, %c0_41, %c0_42] : memref<2x8x128xf32, #tpu.memory_space<vmem>>, vector<1x1x128xf32>
    %54 = vector.shape_cast %53 : vector<1x1x128xf32> to vector<1x128xf32>
    %55 = vector.shape_cast %52 : vector<1x128xf32> to vector<1x1x128xf32>
    tpu.vector_store %arg4[%c0_40, %c0_41, %c0_42], %55 {strides = array<i32>} : memref<2x8x128xf32, #tpu.memory_space<vmem>>, vector<1x1x128xf32>,
    %56 = arith.mulf %50, %50 : vector<256x128xf32>
    %cst_43 = arith.constant dense<0.000000e+00> : vector<128xf32>
    %57 = vector.multi_reduction <add>, %56, %cst_43 [0] : vector<256x128xf32> to vector<128xf32>
    %58 = vector.shape_cast %57 : vector<128xf32> to vector<1x128xf32>
    %c0_44 = arith.constant 0 : index
    %c1_45 = arith.constant 1 : index
    %c0_46 = arith.constant 0 : index
    %59 = vector.load %arg4[%c0_44, %c1_45, %c0_46] : memref<2x8x128xf32, #tpu.memory_space<vmem>>, vector<1x1x128xf32>
    %60 = vector.shape_cast %59 : vector<1x1x128xf32> to vector<1x128xf32>
    %61 = vector.shape_cast %58 : vector<1x128xf32> to vector<1x1x128xf32>
    tpu.vector_store %arg4[%c0_44, %c1_45, %c0_46], %61 {strides = array<i32>} : memref<2x8x128xf32, #tpu.memory_space<vmem>>, vector<1x1x128xf32>,
    %cst_47 = arith.constant 0.000000e+00 : f32
    %62 = vector.broadcast %cst_47 : f32 to vector<6x128xf32>
    %c0_48 = arith.constant 0 : index
    %c2_49 = arith.constant 2 : index
    %c0_50 = arith.constant 0 : index
    %63 = vector.load %arg4[%c0_48, %c2_49, %c0_50] : memref<2x8x128xf32, #tpu.memory_space<vmem>>, vector<1x6x128xf32>
    %64 = vector.shape_cast %63 : vector<1x6x128xf32> to vector<6x128xf32>
    %65 = vector.shape_cast %62 : vector<6x128xf32> to vector<1x6x128xf32>
    tpu.vector_store %arg4[%c0_48, %c2_49, %c0_50], %65 {strides = array<i32>} : memref<2x8x128xf32, #tpu.memory_space<vmem>>, vector<1x6x128xf32>,
    %c1_51 = arith.constant 1 : index
    %c0_52 = arith.constant 0 : index
    %c0_53 = arith.constant 0 : index
    %66 = vector.load %arg1[%c1_51, %c0_52, %c0_53] : memref<2x448x128xbf16, #tpu.memory_space<vmem>>, vector<1x384x128xbf16>
    %67 = vector.shape_cast %66 : vector<1x384x128xbf16> to vector<384x128xbf16>
    %c0_54 = arith.constant 0 : index
    %c0_55 = arith.constant 0 : index
    %68 = vector.load %arg2[%c0_54, %c0_55] : memref<1152x128xbf16, #tpu.memory_space<vmem>>, vector<128x128xbf16>
    %cst_56 = arith.constant dense<0.000000e+00> : vector<384x128xf32>
    %69 = tpu.matmul %67, %68, %cst_56 {dimension_numbers = #tpu.dot_dimension_numbers<[1], [0], [0], [1], [0, 0, 1, 1], [], []>} : vector<384x128xbf16>, vector<128x128xbf16>, vector<384x128xf32> -> vector<384x128xf32>
    %c1_57 = arith.constant 1 : index
    %c1_58 = arith.constant 1 : index
    %c0_59 = arith.constant 0 : index
    %70 = vector.load %arg1[%c1_57, %c1_58, %c0_59] : memref<2x448x128xbf16, #tpu.memory_space<vmem>>, vector<1x384x128xbf16>
    %71 = vector.shape_cast %70 : vector<1x384x128xbf16> to vector<384x128xbf16>
    %c128_60 = arith.constant 128 : index
    %c0_61 = arith.constant 0 : index
    %72 = vector.load %arg2[%c128_60, %c0_61] : memref<1152x128xbf16, #tpu.memory_space<vmem>>, vector<128x128xbf16>
    %cst_62 = arith.constant dense<0.000000e+00> : vector<384x128xf32>
    %73 = tpu.matmul %71, %72, %cst_62 {dimension_numbers = #tpu.dot_dimension_numbers<[1], [0], [0], [1], [0, 0, 1, 1], [], []>} : vector<384x128xbf16>, vector<128x128xbf16>, vector<384x128xf32> -> vector<384x128xf32>
    %74 = arith.addf %69, %73 : vector<384x128xf32>
    %c1_63 = arith.constant 1 : index
    %c2_64 = arith.constant 2 : index
    %c0_65 = arith.constant 0 : index
    %75 = vector.load %arg1[%c1_63, %c2_64, %c0_65] : memref<2x448x128xbf16, #tpu.memory_space<vmem>>, vector<1x384x128xbf16>
    %76 = vector.shape_cast %75 : vector<1x384x128xbf16> to vector<384x128xbf16>
    %c256_66 = arith.constant 256 : index
    %c0_67 = arith.constant 0 : index
    %77 = vector.load %arg2[%c256_66, %c0_67] : memref<1152x128xbf16, #tpu.memory_space<vmem>>, vector<128x128xbf16>
    %cst_68 = arith.constant dense<0.000000e+00> : vector<384x128xf32>
    %78 = tpu.matmul %76, %77, %cst_68 {dimension_numbers = #tpu.dot_dimension_numbers<[1], [0], [0], [1], [0, 0, 1, 1], [], []>} : vector<384x128xbf16>, vector<128x128xbf16>, vector<384x128xf32> -> vector<384x128xf32>
    %79 = arith.addf %74, %78 : vector<384x128xf32>
    %c1_69 = arith.constant 1 : index
    %c24_70 = arith.constant 24 : index
    %c0_71 = arith.constant 0 : index
    %80 = vector.load %arg1[%c1_69, %c24_70, %c0_71] : memref<2x448x128xbf16, #tpu.memory_space<vmem>>, vector<1x384x128xbf16>
    %81 = vector.shape_cast %80 : vector<1x384x128xbf16> to vector<384x128xbf16>
    %c384_72 = arith.constant 384 : index
    %c0_73 = arith.constant 0 : index
    %82 = vector.load %arg2[%c384_72, %c0_73] : memref<1152x128xbf16, #tpu.memory_space<vmem>>, vector<128x128xbf16>
    %cst_74 = arith.constant dense<0.000000e+00> : vector<384x128xf32>
    %83 = tpu.matmul %81, %82, %cst_74 {dimension_numbers = #tpu.dot_dimension_numbers<[1], [0], [0], [1], [0, 0, 1, 1], [], []>} : vector<384x128xbf16>, vector<128x128xbf16>, vector<384x128xf32> -> vector<384x128xf32>
    %84 = arith.addf %79, %83 : vector<384x128xf32>
    %c1_75 = arith.constant 1 : index
    %c25_76 = arith.constant 25 : index
    %c0_77 = arith.constant 0 : index
    %85 = vector.load %arg1[%c1_75, %c25_76, %c0_77] : memref<2x448x128xbf16, #tpu.memory_space<vmem>>, vector<1x384x128xbf16>
    %86 = vector.shape_cast %85 : vector<1x384x128xbf16> to vector<384x128xbf16>
    %c512_78 = arith.constant 512 : index
    %c0_79 = arith.constant 0 : index
    %87 = vector.load %arg2[%c512_78, %c0_79] : memref<1152x128xbf16, #tpu.memory_space<vmem>>, vector<128x128xbf16>
    %cst_80 = arith.constant dense<0.000000e+00> : vector<384x128xf32>
    %88 = tpu.matmul %86, %87, %cst_80 {dimension_numbers = #tpu.dot_dimension_numbers<[1], [0], [0], [1], [0, 0, 1, 1], [], []>} : vector<384x128xbf16>, vector<128x128xbf16>, vector<384x128xf32> -> vector<384x128xf32>
    %89 = arith.addf %84, %88 : vector<384x128xf32>
    %c1_81 = arith.constant 1 : index
    %c26_82 = arith.constant 26 : index
    %c0_83 = arith.constant 0 : index
    %90 = vector.load %arg1[%c1_81, %c26_82, %c0_83] : memref<2x448x128xbf16, #tpu.memory_space<vmem>>, vector<1x384x128xbf16>
    %91 = vector.shape_cast %90 : vector<1x384x128xbf16> to vector<384x128xbf16>
    %c640_84 = arith.constant 640 : index
    %c0_85 = arith.constant 0 : index
    %92 = vector.load %arg2[%c640_84, %c0_85] : memref<1152x128xbf16, #tpu.memory_space<vmem>>, vector<128x128xbf16>
    %cst_86 = arith.constant dense<0.000000e+00> : vector<384x128xf32>
    %93 = tpu.matmul %91, %92, %cst_86 {dimension_numbers = #tpu.dot_dimension_numbers<[1], [0], [0], [1], [0, 0, 1, 1], [], []>} : vector<384x128xbf16>, vector<128x128xbf16>, vector<384x128xf32> -> vector<384x128xf32>
    %94 = arith.addf %89, %93 : vector<384x128xf32>
    %c1_87 = arith.constant 1 : index
    %c48_88 = arith.constant 48 : index
    %c0_89 = arith.constant 0 : index
    %95 = vector.load %arg1[%c1_87, %c48_88, %c0_89] : memref<2x448x128xbf16, #tpu.memory_space<vmem>>, vector<1x384x128xbf16>
    %96 = vector.shape_cast %95 : vector<1x384x128xbf16> to vector<384x128xbf16>
    %c768_90 = arith.constant 768 : index
    %c0_91 = arith.constant 0 : index
    %97 = vector.load %arg2[%c768_90, %c0_91] : memref<1152x128xbf16, #tpu.memory_space<vmem>>, vector<128x128xbf16>
    %cst_92 = arith.constant dense<0.000000e+00> : vector<384x128xf32>
    %98 = tpu.matmul %96, %97, %cst_92 {dimension_numbers = #tpu.dot_dimension_numbers<[1], [0], [0], [1], [0, 0, 1, 1], [], []>} : vector<384x128xbf16>, vector<128x128xbf16>, vector<384x128xf32> -> vector<384x128xf32>
    %99 = arith.addf %94, %98 : vector<384x128xf32>
    %c1_93 = arith.constant 1 : index
    %c49_94 = arith.constant 49 : index
    %c0_95 = arith.constant 0 : index
    %100 = vector.load %arg1[%c1_93, %c49_94, %c0_95] : memref<2x448x128xbf16, #tpu.memory_space<vmem>>, vector<1x384x128xbf16>
    %101 = vector.shape_cast %100 : vector<1x384x128xbf16> to vector<384x128xbf16>
    %c896_96 = arith.constant 896 : index
    %c0_97 = arith.constant 0 : index
    %102 = vector.load %arg2[%c896_96, %c0_97] : memref<1152x128xbf16, #tpu.memory_space<vmem>>, vector<128x128xbf16>
    %cst_98 = arith.constant dense<0.000000e+00> : vector<384x128xf32>
    %103 = tpu.matmul %101, %102, %cst_98 {dimension_numbers = #tpu.dot_dimension_numbers<[1], [0], [0], [1], [0, 0, 1, 1], [], []>} : vector<384x128xbf16>, vector<128x128xbf16>, vector<384x128xf32> -> vector<384x128xf32>
    %104 = arith.addf %99, %103 : vector<384x128xf32>
    %c1_99 = arith.constant 1 : index
    %c50_100 = arith.constant 50 : index
    %c0_101 = arith.constant 0 : index
    %105 = vector.load %arg1[%c1_99, %c50_100, %c0_101] : memref<2x448x128xbf16, #tpu.memory_space<vmem>>, vector<1x384x128xbf16>
    %106 = vector.shape_cast %105 : vector<1x384x128xbf16> to vector<384x128xbf16>
    %c1024_102 = arith.constant 1024 : index
    %c0_103 = arith.constant 0 : index
    %107 = vector.load %arg2[%c1024_102, %c0_103] : memref<1152x128xbf16, #tpu.memory_space<vmem>>, vector<128x128xbf16>
    %cst_104 = arith.constant dense<0.000000e+00> : vector<384x128xf32>
    %108 = tpu.matmul %106, %107, %cst_104 {dimension_numbers = #tpu.dot_dimension_numbers<[1], [0], [0], [1], [0, 0, 1, 1], [], []>} : vector<384x128xbf16>, vector<128x128xbf16>, vector<384x128xf32> -> vector<384x128xf32>
    %109 = arith.addf %104, %108 : vector<384x128xf32>
    %110 = arith.truncf %109 : vector<384x128xf32> to vector<384x128xbf16>
    %c1_105 = arith.constant 1 : index
    %c0_106 = arith.constant 0 : index
    %c0_107 = arith.constant 0 : index
    %111 = vector.load %arg3[%c1_105, %c0_106, %c0_107] : memref<2x384x128xbf16, #tpu.memory_space<vmem>>, vector<1x384x128xbf16>
    %112 = vector.shape_cast %111 : vector<1x384x128xbf16> to vector<384x128xbf16>
    %113 = vector.shape_cast %110 : vector<384x128xbf16> to vector<1x384x128xbf16>
    tpu.vector_store %arg3[%c1_105, %c0_106, %c0_107], %113 {strides = array<i32>} : memref<2x384x128xbf16, #tpu.memory_space<vmem>>, vector<1x384x128xbf16>,
    %114 = vector.shape_cast %109 : vector<384x128xf32> to vector<16x24x128xf32>
    %115 = vector.extract_strided_slice %114 {offsets = [0, 0, 0], sizes = [16, 16, 128], strides = [1, 1, 1]} : vector<16x24x128xf32> to vector<16x16x128xf32>
    %116 = vector.shape_cast %115 : vector<16x16x128xf32> to vector<256x128xf32>
    %cst_108 = arith.constant dense<0.000000e+00> : vector<128xf32>
    %117 = vector.multi_reduction <add>, %116, %cst_108 [0] : vector<256x128xf32> to vector<128xf32>
    %118 = vector.shape_cast %117 : vector<128xf32> to vector<1x128xf32>
    %c1_109 = arith.constant 1 : index
    %c0_110 = arith.constant 0 : index
    %c0_111 = arith.constant 0 : index
    %119 = vector.load %arg4[%c1_109, %c0_110, %c0_111] : memref<2x8x128xf32, #tpu.memory_space<vmem>>, vector<1x1x128xf32>
    %120 = vector.shape_cast %119 : vector<1x1x128xf32> to vector<1x128xf32>
    %121 = vector.shape_cast %118 : vector<1x128xf32> to vector<1x1x128xf32>
    tpu.vector_store %arg4[%c1_109, %c0_110, %c0_111], %121 {strides = array<i32>} : memref<2x8x128xf32, #tpu.memory_space<vmem>>, vector<1x1x128xf32>,
    %122 = arith.mulf %116, %116 : vector<256x128xf32>
    %cst_112 = arith.constant dense<0.000000e+00> : vector<128xf32>
    %123 = vector.multi_reduction <add>, %122, %cst_112 [0] : vector<256x128xf32> to vector<128xf32>
    %124 = vector.shape_cast %123 : vector<128xf32> to vector<1x128xf32>
    %c1_113 = arith.constant 1 : index
    %c1_114 = arith.constant 1 : index
    %c0_115 = arith.constant 0 : index
    %125 = vector.load %arg4[%c1_113, %c1_114, %c0_115] : memref<2x8x128xf32, #tpu.memory_space<vmem>>, vector<1x1x128xf32>
    %126 = vector.shape_cast %125 : vector<1x1x128xf32> to vector<1x128xf32>
    %127 = vector.shape_cast %124 : vector<1x128xf32> to vector<1x1x128xf32>
    tpu.vector_store %arg4[%c1_113, %c1_114, %c0_115], %127 {strides = array<i32>} : memref<2x8x128xf32, #tpu.memory_space<vmem>>, vector<1x1x128xf32>,
    %cst_116 = arith.constant 0.000000e+00 : f32
    %128 = vector.broadcast %cst_116 : f32 to vector<6x128xf32>
    %c1_117 = arith.constant 1 : index
    %c2_118 = arith.constant 2 : index
    %c0_119 = arith.constant 0 : index
    %129 = vector.load %arg4[%c1_117, %c2_118, %c0_119] : memref<2x8x128xf32, #tpu.memory_space<vmem>>, vector<1x6x128xf32>
    %130 = vector.shape_cast %129 : vector<1x6x128xf32> to vector<6x128xf32>
    %131 = vector.shape_cast %128 : vector<6x128xf32> to vector<1x6x128xf32>
    tpu.vector_store %arg4[%c1_117, %c2_118, %c0_119], %131 {strides = array<i32>} : memref<2x8x128xf32, #tpu.memory_space<vmem>>, vector<1x6x128xf32>,
    return
  }
  func.func @transform_0(%arg0: i32) -> (i32, i32, i32) {
    %c0_i32 = arith.constant 0 : i32
    %c0_i32_0 = arith.constant 0 : i32
    %c0_i32_1 = arith.constant 0 : i32
    return %arg0, %c0_i32, %c0_i32_0 : i32, i32, i32
  }
  func.func @transform_1(%arg0: i32) -> (i32, i32) {
    %c0_i32 = arith.constant 0 : i32
    %c0_i32_0 = arith.constant 0 : i32
    %c0_i32_1 = arith.constant 0 : i32
    return %c0_i32, %c0_i32_0 : i32, i32
  }
  func.func @transform_2(%arg0: i32) -> (i32, i32, i32) {
    %c0_i32 = arith.constant 0 : i32
    %c0_i32_0 = arith.constant 0 : i32
    %c0_i32_1 = arith.constant 0 : i32
    return %arg0, %c0_i32, %c0_i32_0 : i32, i32, i32
  }
  func.func @transform_3(%arg0: i32) -> (i32, i32, i32) {
    %c0_i32 = arith.constant 0 : i32
    %c0_i32_0 = arith.constant 0 : i32
    %c0_i32_1 = arith.constant 0 : i32
    return %arg0, %c0_i32, %c0_i32_0 : i32, i32, i32
  }
}

module attributes {stable_mosaic.version = 11 : i64} {
  func.func @_conv2_kernel(%arg0: i32, %arg1: memref<2x384x128xbf16, #tpu.memory_space<vmem>>, %arg2: memref<1x128xf32, #tpu.memory_space<vmem>>, %arg3: memref<1x128xf32, #tpu.memory_space<vmem>>, %arg4: memref<1152x128xbf16, #tpu.memory_space<vmem>>, %arg5: memref<2x384x128xbf16, #tpu.memory_space<vmem>>, %arg6: memref<2x8x128xf32, #tpu.memory_space<vmem>>, %arg7: memref<448x128xbf16, #tpu.memory_space<vmem>>) attributes {dimension_semantics = [#tpu.dimension_semantics<parallel>], iteration_bounds = array<i64: 2>, scalar_prefetch = 0 : i64, scratch_operands = 1 : i64, tpu.core_type = #tpu.core_type<tc>, window_params = [{transform_indices = @transform_0, window_bounds = array<i64: 2, 384, 128>}, {pipeline_mode = #tpu.pipeline_mode<synchronous>, transform_indices = @transform_1, window_bounds = array<i64: 1, 128>}, {pipeline_mode = #tpu.pipeline_mode<synchronous>, transform_indices = @transform_2, window_bounds = array<i64: 1, 128>}, {pipeline_mode = #tpu.pipeline_mode<synchronous>, transform_indices = @transform_3, window_bounds = array<i64: 1152, 128>}, {transform_indices = @transform_4, window_bounds = array<i64: 2, 384, 128>}, {transform_indices = @transform_5, window_bounds = array<i64: 2, 8, 128>}]} {
    %cst = arith.constant 0.000000e+00 : bf16
    %0 = vector.broadcast %cst : bf16 to vector<32x128xbf16>
    %c0 = arith.constant 0 : index
    %c0_0 = arith.constant 0 : index
    %1 = vector.load %arg7[%c0, %c0_0] : memref<448x128xbf16, #tpu.memory_space<vmem>>, vector<32x128xbf16>
    tpu.vector_store %arg7[%c0, %c0_0], %0 {strides = array<i32>} : memref<448x128xbf16, #tpu.memory_space<vmem>>, vector<32x128xbf16>,
    %cst_1 = arith.constant 0.000000e+00 : bf16
    %2 = vector.broadcast %cst_1 : bf16 to vector<32x128xbf16>
    %c416 = arith.constant 416 : index
    %c0_2 = arith.constant 0 : index
    %3 = vector.load %arg7[%c416, %c0_2] : memref<448x128xbf16, #tpu.memory_space<vmem>>, vector<32x128xbf16>
    tpu.vector_store %arg7[%c416, %c0_2], %2 {strides = array<i32>} : memref<448x128xbf16, #tpu.memory_space<vmem>>, vector<32x128xbf16>,
    %4 = tpu.iota {dimensions = array<i32: 1>} : vector<16x24x128xi32>
    %c16_i32 = arith.constant 16 : i32
    %5 = vector.broadcast %c16_i32 : i32 to vector<16x24x128xi32>
    %6 = arith.cmpi slt, %4, %5 : vector<16x24x128xi32>
    %c0_3 = arith.constant 0 : index
    %c0_4 = arith.constant 0 : index
    %c0_5 = arith.constant 0 : index
    %7 = vector.load %arg1[%c0_3, %c0_4, %c0_5] : memref<2x384x128xbf16, #tpu.memory_space<vmem>>, vector<1x384x128xbf16>
    %8 = vector.shape_cast %7 : vector<1x384x128xbf16> to vector<384x128xbf16>
    %9 = arith.extf %8 : vector<384x128xbf16> to vector<384x128xf32>
    %c0_6 = arith.constant 0 : index
    %c0_7 = arith.constant 0 : index
    %10 = vector.load %arg2[%c0_6, %c0_7] : memref<1x128xf32, #tpu.memory_space<vmem>>, vector<1x128xf32>
    %11 = vector.broadcast %10 : vector<1x128xf32> to vector<384x128xf32>
    %12 = arith.mulf %9, %11 : vector<384x128xf32>
    %c0_8 = arith.constant 0 : index
    %c0_9 = arith.constant 0 : index
    %13 = vector.load %arg3[%c0_8, %c0_9] : memref<1x128xf32, #tpu.memory_space<vmem>>, vector<1x128xf32>
    %14 = vector.broadcast %13 : vector<1x128xf32> to vector<384x128xf32>
    %15 = arith.addf %12, %14 : vector<384x128xf32>
    %cst_10 = arith.constant 0.000000e+00 : f32
    %16 = vector.broadcast %cst_10 : f32 to vector<384x128xf32>
    %17 = arith.maximumf %15, %16 : vector<384x128xf32>
    %18 = vector.shape_cast %17 : vector<384x128xf32> to vector<16x24x128xf32>
    %cst_11 = arith.constant 0.000000e+00 : f32
    %19 = vector.broadcast %cst_11 : f32 to vector<16x24x128xf32>
    %20 = arith.select %6, %18, %19 : vector<16x24x128xi1>, vector<16x24x128xf32>
    %21 = vector.shape_cast %20 : vector<16x24x128xf32> to vector<384x128xf32>
    %22 = arith.truncf %21 : vector<384x128xf32> to vector<384x128xbf16>
    %c32 = arith.constant 32 : index
    %c0_12 = arith.constant 0 : index
    %23 = vector.load %arg7[%c32, %c0_12] : memref<448x128xbf16, #tpu.memory_space<vmem>>, vector<384x128xbf16>
    tpu.vector_store %arg7[%c32, %c0_12], %22 {strides = array<i32>} : memref<448x128xbf16, #tpu.memory_space<vmem>>, vector<384x128xbf16>,
    %c7 = arith.constant 7 : index
    %c0_13 = arith.constant 0 : index
    %24 = vector.load %arg7[%c7, %c0_13] : memref<448x128xbf16, #tpu.memory_space<vmem>>, vector<384x128xbf16>
    %c0_14 = arith.constant 0 : index
    %c0_15 = arith.constant 0 : index
    %25 = vector.load %arg4[%c0_14, %c0_15] : memref<1152x128xbf16, #tpu.memory_space<vmem>>, vector<128x128xbf16>
    %cst_16 = arith.constant dense<0.000000e+00> : vector<384x128xf32>
    %26 = tpu.matmul %24, %25, %cst_16 {dimension_numbers = #tpu.dot_dimension_numbers<[1], [0], [0], [1], [0, 0, 1, 1], [], []>} : vector<384x128xbf16>, vector<128x128xbf16>, vector<384x128xf32> -> vector<384x128xf32>
    %c8 = arith.constant 8 : index
    %c0_17 = arith.constant 0 : index
    %27 = vector.load %arg7[%c8, %c0_17] : memref<448x128xbf16, #tpu.memory_space<vmem>>, vector<384x128xbf16>
    %c128 = arith.constant 128 : index
    %c0_18 = arith.constant 0 : index
    %28 = vector.load %arg4[%c128, %c0_18] : memref<1152x128xbf16, #tpu.memory_space<vmem>>, vector<128x128xbf16>
    %cst_19 = arith.constant dense<0.000000e+00> : vector<384x128xf32>
    %29 = tpu.matmul %27, %28, %cst_19 {dimension_numbers = #tpu.dot_dimension_numbers<[1], [0], [0], [1], [0, 0, 1, 1], [], []>} : vector<384x128xbf16>, vector<128x128xbf16>, vector<384x128xf32> -> vector<384x128xf32>
    %30 = arith.addf %26, %29 : vector<384x128xf32>
    %c9 = arith.constant 9 : index
    %c0_20 = arith.constant 0 : index
    %31 = vector.load %arg7[%c9, %c0_20] : memref<448x128xbf16, #tpu.memory_space<vmem>>, vector<384x128xbf16>
    %c256 = arith.constant 256 : index
    %c0_21 = arith.constant 0 : index
    %32 = vector.load %arg4[%c256, %c0_21] : memref<1152x128xbf16, #tpu.memory_space<vmem>>, vector<128x128xbf16>
    %cst_22 = arith.constant dense<0.000000e+00> : vector<384x128xf32>
    %33 = tpu.matmul %31, %32, %cst_22 {dimension_numbers = #tpu.dot_dimension_numbers<[1], [0], [0], [1], [0, 0, 1, 1], [], []>} : vector<384x128xbf16>, vector<128x128xbf16>, vector<384x128xf32> -> vector<384x128xf32>
    %34 = arith.addf %30, %33 : vector<384x128xf32>
    %c31 = arith.constant 31 : index
    %c0_23 = arith.constant 0 : index
    %35 = vector.load %arg7[%c31, %c0_23] : memref<448x128xbf16, #tpu.memory_space<vmem>>, vector<384x128xbf16>
    %c384 = arith.constant 384 : index
    %c0_24 = arith.constant 0 : index
    %36 = vector.load %arg4[%c384, %c0_24] : memref<1152x128xbf16, #tpu.memory_space<vmem>>, vector<128x128xbf16>
    %cst_25 = arith.constant dense<0.000000e+00> : vector<384x128xf32>
    %37 = tpu.matmul %35, %36, %cst_25 {dimension_numbers = #tpu.dot_dimension_numbers<[1], [0], [0], [1], [0, 0, 1, 1], [], []>} : vector<384x128xbf16>, vector<128x128xbf16>, vector<384x128xf32> -> vector<384x128xf32>
    %38 = arith.addf %34, %37 : vector<384x128xf32>
    %c32_26 = arith.constant 32 : index
    %c0_27 = arith.constant 0 : index
    %39 = vector.load %arg7[%c32_26, %c0_27] : memref<448x128xbf16, #tpu.memory_space<vmem>>, vector<384x128xbf16>
    %c512 = arith.constant 512 : index
    %c0_28 = arith.constant 0 : index
    %40 = vector.load %arg4[%c512, %c0_28] : memref<1152x128xbf16, #tpu.memory_space<vmem>>, vector<128x128xbf16>
    %cst_29 = arith.constant dense<0.000000e+00> : vector<384x128xf32>
    %41 = tpu.matmul %39, %40, %cst_29 {dimension_numbers = #tpu.dot_dimension_numbers<[1], [0], [0], [1], [0, 0, 1, 1], [], []>} : vector<384x128xbf16>, vector<128x128xbf16>, vector<384x128xf32> -> vector<384x128xf32>
    %42 = arith.addf %38, %41 : vector<384x128xf32>
    %c33 = arith.constant 33 : index
    %c0_30 = arith.constant 0 : index
    %43 = vector.load %arg7[%c33, %c0_30] : memref<448x128xbf16, #tpu.memory_space<vmem>>, vector<384x128xbf16>
    %c640 = arith.constant 640 : index
    %c0_31 = arith.constant 0 : index
    %44 = vector.load %arg4[%c640, %c0_31] : memref<1152x128xbf16, #tpu.memory_space<vmem>>, vector<128x128xbf16>
    %cst_32 = arith.constant dense<0.000000e+00> : vector<384x128xf32>
    %45 = tpu.matmul %43, %44, %cst_32 {dimension_numbers = #tpu.dot_dimension_numbers<[1], [0], [0], [1], [0, 0, 1, 1], [], []>} : vector<384x128xbf16>, vector<128x128xbf16>, vector<384x128xf32> -> vector<384x128xf32>
    %46 = arith.addf %42, %45 : vector<384x128xf32>
    %c55 = arith.constant 55 : index
    %c0_33 = arith.constant 0 : index
    %47 = vector.load %arg7[%c55, %c0_33] : memref<448x128xbf16, #tpu.memory_space<vmem>>, vector<384x128xbf16>
    %c768 = arith.constant 768 : index
    %c0_34 = arith.constant 0 : index
    %48 = vector.load %arg4[%c768, %c0_34] : memref<1152x128xbf16, #tpu.memory_space<vmem>>, vector<128x128xbf16>
    %cst_35 = arith.constant dense<0.000000e+00> : vector<384x128xf32>
    %49 = tpu.matmul %47, %48, %cst_35 {dimension_numbers = #tpu.dot_dimension_numbers<[1], [0], [0], [1], [0, 0, 1, 1], [], []>} : vector<384x128xbf16>, vector<128x128xbf16>, vector<384x128xf32> -> vector<384x128xf32>
    %50 = arith.addf %46, %49 : vector<384x128xf32>
    %c56 = arith.constant 56 : index
    %c0_36 = arith.constant 0 : index
    %51 = vector.load %arg7[%c56, %c0_36] : memref<448x128xbf16, #tpu.memory_space<vmem>>, vector<384x128xbf16>
    %c896 = arith.constant 896 : index
    %c0_37 = arith.constant 0 : index
    %52 = vector.load %arg4[%c896, %c0_37] : memref<1152x128xbf16, #tpu.memory_space<vmem>>, vector<128x128xbf16>
    %cst_38 = arith.constant dense<0.000000e+00> : vector<384x128xf32>
    %53 = tpu.matmul %51, %52, %cst_38 {dimension_numbers = #tpu.dot_dimension_numbers<[1], [0], [0], [1], [0, 0, 1, 1], [], []>} : vector<384x128xbf16>, vector<128x128xbf16>, vector<384x128xf32> -> vector<384x128xf32>
    %54 = arith.addf %50, %53 : vector<384x128xf32>
    %c57 = arith.constant 57 : index
    %c0_39 = arith.constant 0 : index
    %55 = vector.load %arg7[%c57, %c0_39] : memref<448x128xbf16, #tpu.memory_space<vmem>>, vector<384x128xbf16>
    %c1024 = arith.constant 1024 : index
    %c0_40 = arith.constant 0 : index
    %56 = vector.load %arg4[%c1024, %c0_40] : memref<1152x128xbf16, #tpu.memory_space<vmem>>, vector<128x128xbf16>
    %cst_41 = arith.constant dense<0.000000e+00> : vector<384x128xf32>
    %57 = tpu.matmul %55, %56, %cst_41 {dimension_numbers = #tpu.dot_dimension_numbers<[1], [0], [0], [1], [0, 0, 1, 1], [], []>} : vector<384x128xbf16>, vector<128x128xbf16>, vector<384x128xf32> -> vector<384x128xf32>
    %58 = arith.addf %54, %57 : vector<384x128xf32>
    %59 = arith.truncf %58 : vector<384x128xf32> to vector<384x128xbf16>
    %c0_42 = arith.constant 0 : index
    %c0_43 = arith.constant 0 : index
    %c0_44 = arith.constant 0 : index
    %60 = vector.load %arg5[%c0_42, %c0_43, %c0_44] : memref<2x384x128xbf16, #tpu.memory_space<vmem>>, vector<1x384x128xbf16>
    %61 = vector.shape_cast %60 : vector<1x384x128xbf16> to vector<384x128xbf16>
    %62 = vector.shape_cast %59 : vector<384x128xbf16> to vector<1x384x128xbf16>
    tpu.vector_store %arg5[%c0_42, %c0_43, %c0_44], %62 {strides = array<i32>} : memref<2x384x128xbf16, #tpu.memory_space<vmem>>, vector<1x384x128xbf16>,
    %63 = vector.shape_cast %58 : vector<384x128xf32> to vector<16x24x128xf32>
    %64 = vector.extract_strided_slice %63 {offsets = [0, 0, 0], sizes = [16, 16, 128], strides = [1, 1, 1]} : vector<16x24x128xf32> to vector<16x16x128xf32>
    %65 = vector.shape_cast %64 : vector<16x16x128xf32> to vector<256x128xf32>
    %cst_45 = arith.constant dense<0.000000e+00> : vector<128xf32>
    %66 = vector.multi_reduction <add>, %65, %cst_45 [0] : vector<256x128xf32> to vector<128xf32>
    %67 = vector.shape_cast %66 : vector<128xf32> to vector<1x128xf32>
    %c0_46 = arith.constant 0 : index
    %c0_47 = arith.constant 0 : index
    %c0_48 = arith.constant 0 : index
    %68 = vector.load %arg6[%c0_46, %c0_47, %c0_48] : memref<2x8x128xf32, #tpu.memory_space<vmem>>, vector<1x1x128xf32>
    %69 = vector.shape_cast %68 : vector<1x1x128xf32> to vector<1x128xf32>
    %70 = vector.shape_cast %67 : vector<1x128xf32> to vector<1x1x128xf32>
    tpu.vector_store %arg6[%c0_46, %c0_47, %c0_48], %70 {strides = array<i32>} : memref<2x8x128xf32, #tpu.memory_space<vmem>>, vector<1x1x128xf32>,
    %71 = arith.mulf %65, %65 : vector<256x128xf32>
    %cst_49 = arith.constant dense<0.000000e+00> : vector<128xf32>
    %72 = vector.multi_reduction <add>, %71, %cst_49 [0] : vector<256x128xf32> to vector<128xf32>
    %73 = vector.shape_cast %72 : vector<128xf32> to vector<1x128xf32>
    %c0_50 = arith.constant 0 : index
    %c1 = arith.constant 1 : index
    %c0_51 = arith.constant 0 : index
    %74 = vector.load %arg6[%c0_50, %c1, %c0_51] : memref<2x8x128xf32, #tpu.memory_space<vmem>>, vector<1x1x128xf32>
    %75 = vector.shape_cast %74 : vector<1x1x128xf32> to vector<1x128xf32>
    %76 = vector.shape_cast %73 : vector<1x128xf32> to vector<1x1x128xf32>
    tpu.vector_store %arg6[%c0_50, %c1, %c0_51], %76 {strides = array<i32>} : memref<2x8x128xf32, #tpu.memory_space<vmem>>, vector<1x1x128xf32>,
    %cst_52 = arith.constant 0.000000e+00 : f32
    %77 = vector.broadcast %cst_52 : f32 to vector<6x128xf32>
    %c0_53 = arith.constant 0 : index
    %c2 = arith.constant 2 : index
    %c0_54 = arith.constant 0 : index
    %78 = vector.load %arg6[%c0_53, %c2, %c0_54] : memref<2x8x128xf32, #tpu.memory_space<vmem>>, vector<1x6x128xf32>
    %79 = vector.shape_cast %78 : vector<1x6x128xf32> to vector<6x128xf32>
    %80 = vector.shape_cast %77 : vector<6x128xf32> to vector<1x6x128xf32>
    tpu.vector_store %arg6[%c0_53, %c2, %c0_54], %80 {strides = array<i32>} : memref<2x8x128xf32, #tpu.memory_space<vmem>>, vector<1x6x128xf32>,
    %c1_55 = arith.constant 1 : index
    %c0_56 = arith.constant 0 : index
    %c0_57 = arith.constant 0 : index
    %81 = vector.load %arg1[%c1_55, %c0_56, %c0_57] : memref<2x384x128xbf16, #tpu.memory_space<vmem>>, vector<1x384x128xbf16>
    %82 = vector.shape_cast %81 : vector<1x384x128xbf16> to vector<384x128xbf16>
    %83 = arith.extf %82 : vector<384x128xbf16> to vector<384x128xf32>
    %c0_58 = arith.constant 0 : index
    %c0_59 = arith.constant 0 : index
    %84 = vector.load %arg2[%c0_58, %c0_59] : memref<1x128xf32, #tpu.memory_space<vmem>>, vector<1x128xf32>
    %85 = vector.broadcast %84 : vector<1x128xf32> to vector<384x128xf32>
    %86 = arith.mulf %83, %85 : vector<384x128xf32>
    %c0_60 = arith.constant 0 : index
    %c0_61 = arith.constant 0 : index
    %87 = vector.load %arg3[%c0_60, %c0_61] : memref<1x128xf32, #tpu.memory_space<vmem>>, vector<1x128xf32>
    %88 = vector.broadcast %87 : vector<1x128xf32> to vector<384x128xf32>
    %89 = arith.addf %86, %88 : vector<384x128xf32>
    %cst_62 = arith.constant 0.000000e+00 : f32
    %90 = vector.broadcast %cst_62 : f32 to vector<384x128xf32>
    %91 = arith.maximumf %89, %90 : vector<384x128xf32>
    %92 = vector.shape_cast %91 : vector<384x128xf32> to vector<16x24x128xf32>
    %cst_63 = arith.constant 0.000000e+00 : f32
    %93 = vector.broadcast %cst_63 : f32 to vector<16x24x128xf32>
    %94 = arith.select %6, %92, %93 : vector<16x24x128xi1>, vector<16x24x128xf32>
    %95 = vector.shape_cast %94 : vector<16x24x128xf32> to vector<384x128xf32>
    %96 = arith.truncf %95 : vector<384x128xf32> to vector<384x128xbf16>
    %c32_64 = arith.constant 32 : index
    %c0_65 = arith.constant 0 : index
    %97 = vector.load %arg7[%c32_64, %c0_65] : memref<448x128xbf16, #tpu.memory_space<vmem>>, vector<384x128xbf16>
    tpu.vector_store %arg7[%c32_64, %c0_65], %96 {strides = array<i32>} : memref<448x128xbf16, #tpu.memory_space<vmem>>, vector<384x128xbf16>,
    %c7_66 = arith.constant 7 : index
    %c0_67 = arith.constant 0 : index
    %98 = vector.load %arg7[%c7_66, %c0_67] : memref<448x128xbf16, #tpu.memory_space<vmem>>, vector<384x128xbf16>
    %c0_68 = arith.constant 0 : index
    %c0_69 = arith.constant 0 : index
    %99 = vector.load %arg4[%c0_68, %c0_69] : memref<1152x128xbf16, #tpu.memory_space<vmem>>, vector<128x128xbf16>
    %cst_70 = arith.constant dense<0.000000e+00> : vector<384x128xf32>
    %100 = tpu.matmul %98, %99, %cst_70 {dimension_numbers = #tpu.dot_dimension_numbers<[1], [0], [0], [1], [0, 0, 1, 1], [], []>} : vector<384x128xbf16>, vector<128x128xbf16>, vector<384x128xf32> -> vector<384x128xf32>
    %c8_71 = arith.constant 8 : index
    %c0_72 = arith.constant 0 : index
    %101 = vector.load %arg7[%c8_71, %c0_72] : memref<448x128xbf16, #tpu.memory_space<vmem>>, vector<384x128xbf16>
    %c128_73 = arith.constant 128 : index
    %c0_74 = arith.constant 0 : index
    %102 = vector.load %arg4[%c128_73, %c0_74] : memref<1152x128xbf16, #tpu.memory_space<vmem>>, vector<128x128xbf16>
    %cst_75 = arith.constant dense<0.000000e+00> : vector<384x128xf32>
    %103 = tpu.matmul %101, %102, %cst_75 {dimension_numbers = #tpu.dot_dimension_numbers<[1], [0], [0], [1], [0, 0, 1, 1], [], []>} : vector<384x128xbf16>, vector<128x128xbf16>, vector<384x128xf32> -> vector<384x128xf32>
    %104 = arith.addf %100, %103 : vector<384x128xf32>
    %c9_76 = arith.constant 9 : index
    %c0_77 = arith.constant 0 : index
    %105 = vector.load %arg7[%c9_76, %c0_77] : memref<448x128xbf16, #tpu.memory_space<vmem>>, vector<384x128xbf16>
    %c256_78 = arith.constant 256 : index
    %c0_79 = arith.constant 0 : index
    %106 = vector.load %arg4[%c256_78, %c0_79] : memref<1152x128xbf16, #tpu.memory_space<vmem>>, vector<128x128xbf16>
    %cst_80 = arith.constant dense<0.000000e+00> : vector<384x128xf32>
    %107 = tpu.matmul %105, %106, %cst_80 {dimension_numbers = #tpu.dot_dimension_numbers<[1], [0], [0], [1], [0, 0, 1, 1], [], []>} : vector<384x128xbf16>, vector<128x128xbf16>, vector<384x128xf32> -> vector<384x128xf32>
    %108 = arith.addf %104, %107 : vector<384x128xf32>
    %c31_81 = arith.constant 31 : index
    %c0_82 = arith.constant 0 : index
    %109 = vector.load %arg7[%c31_81, %c0_82] : memref<448x128xbf16, #tpu.memory_space<vmem>>, vector<384x128xbf16>
    %c384_83 = arith.constant 384 : index
    %c0_84 = arith.constant 0 : index
    %110 = vector.load %arg4[%c384_83, %c0_84] : memref<1152x128xbf16, #tpu.memory_space<vmem>>, vector<128x128xbf16>
    %cst_85 = arith.constant dense<0.000000e+00> : vector<384x128xf32>
    %111 = tpu.matmul %109, %110, %cst_85 {dimension_numbers = #tpu.dot_dimension_numbers<[1], [0], [0], [1], [0, 0, 1, 1], [], []>} : vector<384x128xbf16>, vector<128x128xbf16>, vector<384x128xf32> -> vector<384x128xf32>
    %112 = arith.addf %108, %111 : vector<384x128xf32>
    %c32_86 = arith.constant 32 : index
    %c0_87 = arith.constant 0 : index
    %113 = vector.load %arg7[%c32_86, %c0_87] : memref<448x128xbf16, #tpu.memory_space<vmem>>, vector<384x128xbf16>
    %c512_88 = arith.constant 512 : index
    %c0_89 = arith.constant 0 : index
    %114 = vector.load %arg4[%c512_88, %c0_89] : memref<1152x128xbf16, #tpu.memory_space<vmem>>, vector<128x128xbf16>
    %cst_90 = arith.constant dense<0.000000e+00> : vector<384x128xf32>
    %115 = tpu.matmul %113, %114, %cst_90 {dimension_numbers = #tpu.dot_dimension_numbers<[1], [0], [0], [1], [0, 0, 1, 1], [], []>} : vector<384x128xbf16>, vector<128x128xbf16>, vector<384x128xf32> -> vector<384x128xf32>
    %116 = arith.addf %112, %115 : vector<384x128xf32>
    %c33_91 = arith.constant 33 : index
    %c0_92 = arith.constant 0 : index
    %117 = vector.load %arg7[%c33_91, %c0_92] : memref<448x128xbf16, #tpu.memory_space<vmem>>, vector<384x128xbf16>
    %c640_93 = arith.constant 640 : index
    %c0_94 = arith.constant 0 : index
    %118 = vector.load %arg4[%c640_93, %c0_94] : memref<1152x128xbf16, #tpu.memory_space<vmem>>, vector<128x128xbf16>
    %cst_95 = arith.constant dense<0.000000e+00> : vector<384x128xf32>
    %119 = tpu.matmul %117, %118, %cst_95 {dimension_numbers = #tpu.dot_dimension_numbers<[1], [0], [0], [1], [0, 0, 1, 1], [], []>} : vector<384x128xbf16>, vector<128x128xbf16>, vector<384x128xf32> -> vector<384x128xf32>
    %120 = arith.addf %116, %119 : vector<384x128xf32>
    %c55_96 = arith.constant 55 : index
    %c0_97 = arith.constant 0 : index
    %121 = vector.load %arg7[%c55_96, %c0_97] : memref<448x128xbf16, #tpu.memory_space<vmem>>, vector<384x128xbf16>
    %c768_98 = arith.constant 768 : index
    %c0_99 = arith.constant 0 : index
    %122 = vector.load %arg4[%c768_98, %c0_99] : memref<1152x128xbf16, #tpu.memory_space<vmem>>, vector<128x128xbf16>
    %cst_100 = arith.constant dense<0.000000e+00> : vector<384x128xf32>
    %123 = tpu.matmul %121, %122, %cst_100 {dimension_numbers = #tpu.dot_dimension_numbers<[1], [0], [0], [1], [0, 0, 1, 1], [], []>} : vector<384x128xbf16>, vector<128x128xbf16>, vector<384x128xf32> -> vector<384x128xf32>
    %124 = arith.addf %120, %123 : vector<384x128xf32>
    %c56_101 = arith.constant 56 : index
    %c0_102 = arith.constant 0 : index
    %125 = vector.load %arg7[%c56_101, %c0_102] : memref<448x128xbf16, #tpu.memory_space<vmem>>, vector<384x128xbf16>
    %c896_103 = arith.constant 896 : index
    %c0_104 = arith.constant 0 : index
    %126 = vector.load %arg4[%c896_103, %c0_104] : memref<1152x128xbf16, #tpu.memory_space<vmem>>, vector<128x128xbf16>
    %cst_105 = arith.constant dense<0.000000e+00> : vector<384x128xf32>
    %127 = tpu.matmul %125, %126, %cst_105 {dimension_numbers = #tpu.dot_dimension_numbers<[1], [0], [0], [1], [0, 0, 1, 1], [], []>} : vector<384x128xbf16>, vector<128x128xbf16>, vector<384x128xf32> -> vector<384x128xf32>
    %128 = arith.addf %124, %127 : vector<384x128xf32>
    %c57_106 = arith.constant 57 : index
    %c0_107 = arith.constant 0 : index
    %129 = vector.load %arg7[%c57_106, %c0_107] : memref<448x128xbf16, #tpu.memory_space<vmem>>, vector<384x128xbf16>
    %c1024_108 = arith.constant 1024 : index
    %c0_109 = arith.constant 0 : index
    %130 = vector.load %arg4[%c1024_108, %c0_109] : memref<1152x128xbf16, #tpu.memory_space<vmem>>, vector<128x128xbf16>
    %cst_110 = arith.constant dense<0.000000e+00> : vector<384x128xf32>
    %131 = tpu.matmul %129, %130, %cst_110 {dimension_numbers = #tpu.dot_dimension_numbers<[1], [0], [0], [1], [0, 0, 1, 1], [], []>} : vector<384x128xbf16>, vector<128x128xbf16>, vector<384x128xf32> -> vector<384x128xf32>
    %132 = arith.addf %128, %131 : vector<384x128xf32>
    %133 = arith.truncf %132 : vector<384x128xf32> to vector<384x128xbf16>
    %c1_111 = arith.constant 1 : index
    %c0_112 = arith.constant 0 : index
    %c0_113 = arith.constant 0 : index
    %134 = vector.load %arg5[%c1_111, %c0_112, %c0_113] : memref<2x384x128xbf16, #tpu.memory_space<vmem>>, vector<1x384x128xbf16>
    %135 = vector.shape_cast %134 : vector<1x384x128xbf16> to vector<384x128xbf16>
    %136 = vector.shape_cast %133 : vector<384x128xbf16> to vector<1x384x128xbf16>
    tpu.vector_store %arg5[%c1_111, %c0_112, %c0_113], %136 {strides = array<i32>} : memref<2x384x128xbf16, #tpu.memory_space<vmem>>, vector<1x384x128xbf16>,
    %137 = vector.shape_cast %132 : vector<384x128xf32> to vector<16x24x128xf32>
    %138 = vector.extract_strided_slice %137 {offsets = [0, 0, 0], sizes = [16, 16, 128], strides = [1, 1, 1]} : vector<16x24x128xf32> to vector<16x16x128xf32>
    %139 = vector.shape_cast %138 : vector<16x16x128xf32> to vector<256x128xf32>
    %cst_114 = arith.constant dense<0.000000e+00> : vector<128xf32>
    %140 = vector.multi_reduction <add>, %139, %cst_114 [0] : vector<256x128xf32> to vector<128xf32>
    %141 = vector.shape_cast %140 : vector<128xf32> to vector<1x128xf32>
    %c1_115 = arith.constant 1 : index
    %c0_116 = arith.constant 0 : index
    %c0_117 = arith.constant 0 : index
    %142 = vector.load %arg6[%c1_115, %c0_116, %c0_117] : memref<2x8x128xf32, #tpu.memory_space<vmem>>, vector<1x1x128xf32>
    %143 = vector.shape_cast %142 : vector<1x1x128xf32> to vector<1x128xf32>
    %144 = vector.shape_cast %141 : vector<1x128xf32> to vector<1x1x128xf32>
    tpu.vector_store %arg6[%c1_115, %c0_116, %c0_117], %144 {strides = array<i32>} : memref<2x8x128xf32, #tpu.memory_space<vmem>>, vector<1x1x128xf32>,
    %145 = arith.mulf %139, %139 : vector<256x128xf32>
    %cst_118 = arith.constant dense<0.000000e+00> : vector<128xf32>
    %146 = vector.multi_reduction <add>, %145, %cst_118 [0] : vector<256x128xf32> to vector<128xf32>
    %147 = vector.shape_cast %146 : vector<128xf32> to vector<1x128xf32>
    %c1_119 = arith.constant 1 : index
    %c1_120 = arith.constant 1 : index
    %c0_121 = arith.constant 0 : index
    %148 = vector.load %arg6[%c1_119, %c1_120, %c0_121] : memref<2x8x128xf32, #tpu.memory_space<vmem>>, vector<1x1x128xf32>
    %149 = vector.shape_cast %148 : vector<1x1x128xf32> to vector<1x128xf32>
    %150 = vector.shape_cast %147 : vector<1x128xf32> to vector<1x1x128xf32>
    tpu.vector_store %arg6[%c1_119, %c1_120, %c0_121], %150 {strides = array<i32>} : memref<2x8x128xf32, #tpu.memory_space<vmem>>, vector<1x1x128xf32>,
    %cst_122 = arith.constant 0.000000e+00 : f32
    %151 = vector.broadcast %cst_122 : f32 to vector<6x128xf32>
    %c1_123 = arith.constant 1 : index
    %c2_124 = arith.constant 2 : index
    %c0_125 = arith.constant 0 : index
    %152 = vector.load %arg6[%c1_123, %c2_124, %c0_125] : memref<2x8x128xf32, #tpu.memory_space<vmem>>, vector<1x6x128xf32>
    %153 = vector.shape_cast %152 : vector<1x6x128xf32> to vector<6x128xf32>
    %154 = vector.shape_cast %151 : vector<6x128xf32> to vector<1x6x128xf32>
    tpu.vector_store %arg6[%c1_123, %c2_124, %c0_125], %154 {strides = array<i32>} : memref<2x8x128xf32, #tpu.memory_space<vmem>>, vector<1x6x128xf32>,
    return
  }
  func.func @transform_0(%arg0: i32) -> (i32, i32, i32) {
    %c0_i32 = arith.constant 0 : i32
    %c0_i32_0 = arith.constant 0 : i32
    %c0_i32_1 = arith.constant 0 : i32
    return %arg0, %c0_i32, %c0_i32_0 : i32, i32, i32
  }
  func.func @transform_1(%arg0: i32) -> (i32, i32) {
    %c0_i32 = arith.constant 0 : i32
    %c0_i32_0 = arith.constant 0 : i32
    %c0_i32_1 = arith.constant 0 : i32
    return %c0_i32, %c0_i32_0 : i32, i32
  }
  func.func @transform_2(%arg0: i32) -> (i32, i32) {
    %c0_i32 = arith.constant 0 : i32
    %c0_i32_0 = arith.constant 0 : i32
    %c0_i32_1 = arith.constant 0 : i32
    return %c0_i32, %c0_i32_0 : i32, i32
  }
  func.func @transform_3(%arg0: i32) -> (i32, i32) {
    %c0_i32 = arith.constant 0 : i32
    %c0_i32_0 = arith.constant 0 : i32
    %c0_i32_1 = arith.constant 0 : i32
    return %c0_i32, %c0_i32_0 : i32, i32
  }
  func.func @transform_4(%arg0: i32) -> (i32, i32, i32) {
    %c0_i32 = arith.constant 0 : i32
    %c0_i32_0 = arith.constant 0 : i32
    %c0_i32_1 = arith.constant 0 : i32
    return %arg0, %c0_i32, %c0_i32_0 : i32, i32, i32
  }
  func.func @transform_5(%arg0: i32) -> (i32, i32, i32) {
    %c0_i32 = arith.constant 0 : i32
    %c0_i32_0 = arith.constant 0 : i32
    %c0_i32_1 = arith.constant 0 : i32
    return %arg0, %c0_i32, %c0_i32_0 : i32, i32, i32
  }
}

module attributes {stable_mosaic.version = 11 : i64} {
  func.func @_bn2_add_relu_kernel(%arg0: i32, %arg1: memref<2x384x128xbf16, #tpu.memory_space<vmem>>, %arg2: memref<2x16x16x128xf32, #tpu.memory_space<vmem>>, %arg3: memref<1x128xf32, #tpu.memory_space<vmem>>, %arg4: memref<1x128xf32, #tpu.memory_space<vmem>>, %arg5: memref<2x16x16x128xf32, #tpu.memory_space<vmem>>) attributes {dimension_semantics = [#tpu.dimension_semantics<parallel>], iteration_bounds = array<i64: 2>, scalar_prefetch = 0 : i64, scratch_operands = 0 : i64, tpu.core_type = #tpu.core_type<tc>, window_params = [{transform_indices = @transform_0, window_bounds = array<i64: 2, 384, 128>}, {transform_indices = @transform_1, window_bounds = array<i64: 2, 16, 16, 128>}, {pipeline_mode = #tpu.pipeline_mode<synchronous>, transform_indices = @transform_2, window_bounds = array<i64: 1, 128>}, {pipeline_mode = #tpu.pipeline_mode<synchronous>, transform_indices = @transform_3, window_bounds = array<i64: 1, 128>}, {transform_indices = @transform_4, window_bounds = array<i64: 2, 16, 16, 128>}]} {
    %c0 = arith.constant 0 : index
    %c0_0 = arith.constant 0 : index
    %c0_1 = arith.constant 0 : index
    %0 = vector.load %arg1[%c0, %c0_0, %c0_1] : memref<2x384x128xbf16, #tpu.memory_space<vmem>>, vector<1x384x128xbf16>
    %1 = vector.shape_cast %0 : vector<1x384x128xbf16> to vector<384x128xbf16>
    %2 = arith.extf %1 : vector<384x128xbf16> to vector<384x128xf32>
    %c0_2 = arith.constant 0 : index
    %c0_3 = arith.constant 0 : index
    %3 = vector.load %arg3[%c0_2, %c0_3] : memref<1x128xf32, #tpu.memory_space<vmem>>, vector<1x128xf32>
    %4 = vector.broadcast %3 : vector<1x128xf32> to vector<384x128xf32>
    %5 = arith.mulf %2, %4 : vector<384x128xf32>
    %c0_4 = arith.constant 0 : index
    %c0_5 = arith.constant 0 : index
    %6 = vector.load %arg4[%c0_4, %c0_5] : memref<1x128xf32, #tpu.memory_space<vmem>>, vector<1x128xf32>
    %7 = vector.broadcast %6 : vector<1x128xf32> to vector<384x128xf32>
    %8 = arith.addf %5, %7 : vector<384x128xf32>
    %9 = vector.shape_cast %8 : vector<384x128xf32> to vector<16x24x128xf32>
    %10 = vector.extract_strided_slice %9 {offsets = [0, 0, 0], sizes = [16, 16, 128], strides = [1, 1, 1]} : vector<16x24x128xf32> to vector<16x16x128xf32>
    %c0_6 = arith.constant 0 : index
    %c0_7 = arith.constant 0 : index
    %c0_8 = arith.constant 0 : index
    %c0_9 = arith.constant 0 : index
    %11 = vector.load %arg2[%c0_6, %c0_7, %c0_8, %c0_9] : memref<2x16x16x128xf32, #tpu.memory_space<vmem>>, vector<1x16x16x128xf32>
    %12 = vector.shape_cast %11 : vector<1x16x16x128xf32> to vector<16x16x128xf32>
    %13 = arith.addf %10, %12 : vector<16x16x128xf32>
    %cst = arith.constant 0.000000e+00 : f32
    %14 = vector.broadcast %cst : f32 to vector<16x16x128xf32>
    %15 = arith.maximumf %13, %14 : vector<16x16x128xf32>
    %c0_10 = arith.constant 0 : index
    %c0_11 = arith.constant 0 : index
    %c0_12 = arith.constant 0 : index
    %c0_13 = arith.constant 0 : index
    %16 = vector.load %arg5[%c0_10, %c0_11, %c0_12, %c0_13] : memref<2x16x16x128xf32, #tpu.memory_space<vmem>>, vector<1x16x16x128xf32>
    %17 = vector.shape_cast %16 : vector<1x16x16x128xf32> to vector<16x16x128xf32>
    %18 = vector.shape_cast %15 : vector<16x16x128xf32> to vector<1x16x16x128xf32>
    tpu.vector_store %arg5[%c0_10, %c0_11, %c0_12, %c0_13], %18 {strides = array<i32>} : memref<2x16x16x128xf32, #tpu.memory_space<vmem>>, vector<1x16x16x128xf32>,
    %c1 = arith.constant 1 : index
    %c0_14 = arith.constant 0 : index
    %c0_15 = arith.constant 0 : index
    %19 = vector.load %arg1[%c1, %c0_14, %c0_15] : memref<2x384x128xbf16, #tpu.memory_space<vmem>>, vector<1x384x128xbf16>
    %20 = vector.shape_cast %19 : vector<1x384x128xbf16> to vector<384x128xbf16>
    %21 = arith.extf %20 : vector<384x128xbf16> to vector<384x128xf32>
    %c0_16 = arith.constant 0 : index
    %c0_17 = arith.constant 0 : index
    %22 = vector.load %arg3[%c0_16, %c0_17] : memref<1x128xf32, #tpu.memory_space<vmem>>, vector<1x128xf32>
    %23 = vector.broadcast %22 : vector<1x128xf32> to vector<384x128xf32>
    %24 = arith.mulf %21, %23 : vector<384x128xf32>
    %c0_18 = arith.constant 0 : index
    %c0_19 = arith.constant 0 : index
    %25 = vector.load %arg4[%c0_18, %c0_19] : memref<1x128xf32, #tpu.memory_space<vmem>>, vector<1x128xf32>
    %26 = vector.broadcast %25 : vector<1x128xf32> to vector<384x128xf32>
    %27 = arith.addf %24, %26 : vector<384x128xf32>
    %28 = vector.shape_cast %27 : vector<384x128xf32> to vector<16x24x128xf32>
    %29 = vector.extract_strided_slice %28 {offsets = [0, 0, 0], sizes = [16, 16, 128], strides = [1, 1, 1]} : vector<16x24x128xf32> to vector<16x16x128xf32>
    %c1_20 = arith.constant 1 : index
    %c0_21 = arith.constant 0 : index
    %c0_22 = arith.constant 0 : index
    %c0_23 = arith.constant 0 : index
    %30 = vector.load %arg2[%c1_20, %c0_21, %c0_22, %c0_23] : memref<2x16x16x128xf32, #tpu.memory_space<vmem>>, vector<1x16x16x128xf32>
    %31 = vector.shape_cast %30 : vector<1x16x16x128xf32> to vector<16x16x128xf32>
    %32 = arith.addf %29, %31 : vector<16x16x128xf32>
    %cst_24 = arith.constant 0.000000e+00 : f32
    %33 = vector.broadcast %cst_24 : f32 to vector<16x16x128xf32>
    %34 = arith.maximumf %32, %33 : vector<16x16x128xf32>
    %c1_25 = arith.constant 1 : index
    %c0_26 = arith.constant 0 : index
    %c0_27 = arith.constant 0 : index
    %c0_28 = arith.constant 0 : index
    %35 = vector.load %arg5[%c1_25, %c0_26, %c0_27, %c0_28] : memref<2x16x16x128xf32, #tpu.memory_space<vmem>>, vector<1x16x16x128xf32>
    %36 = vector.shape_cast %35 : vector<1x16x16x128xf32> to vector<16x16x128xf32>
    %37 = vector.shape_cast %34 : vector<16x16x128xf32> to vector<1x16x16x128xf32>
    tpu.vector_store %arg5[%c1_25, %c0_26, %c0_27, %c0_28], %37 {strides = array<i32>} : memref<2x16x16x128xf32, #tpu.memory_space<vmem>>, vector<1x16x16x128xf32>,
    return
  }
  func.func @transform_0(%arg0: i32) -> (i32, i32, i32) {
    %c0_i32 = arith.constant 0 : i32
    %c0_i32_0 = arith.constant 0 : i32
    %c0_i32_1 = arith.constant 0 : i32
    return %arg0, %c0_i32, %c0_i32_0 : i32, i32, i32
  }
  func.func @transform_1(%arg0: i32) -> (i32, i32, i32, i32) {
    %c0_i32 = arith.constant 0 : i32
    %c0_i32_0 = arith.constant 0 : i32
    %c0_i32_1 = arith.constant 0 : i32
    %c0_i32_2 = arith.constant 0 : i32
    return %arg0, %c0_i32, %c0_i32_0, %c0_i32_1 : i32, i32, i32, i32
  }
  func.func @transform_2(%arg0: i32) -> (i32, i32) {
    %c0_i32 = arith.constant 0 : i32
    %c0_i32_0 = arith.constant 0 : i32
    %c0_i32_1 = arith.constant 0 : i32
    return %c0_i32, %c0_i32_0 : i32, i32
  }
  func.func @transform_3(%arg0: i32) -> (i32, i32) {
    %c0_i32 = arith.constant 0 : i32
    %c0_i32_0 = arith.constant 0 : i32
    %c0_i32_1 = arith.constant 0 : i32
    return %c0_i32, %c0_i32_0 : i32, i32
  }
  func.func @transform_4(%arg0: i32) -> (i32, i32, i32, i32) {
    %c0_i32 = arith.constant 0 : i32
    %c0_i32_0 = arith.constant 0 : i32
    %c0_i32_1 = arith.constant 0 : i32
    %c0_i32_2 = arith.constant 0 : i32
    return %arg0, %c0_i32, %c0_i32_0, %c0_i32_1 : i32, i32, i32, i32
  }
}

</mosaic_0001>

<bundles_post_ra>
// kernel: basic_block.5
= control target key start
LH: loop header
LB: loop body
LE: loop exit
PB: predicated region body
PF: predicated region fallthrough
CT: control target
= control target key end

     0   :  { %9 = vsyncpa [#allocation3], 0  ;;  %s1608_s0 = inlined_call_operand.vmem [shape: bf16[4,384,128], index: 0, kind: input, shape index: {}]   ;;  %s1609_s1 = inlined_call_operand.vmem [shape: f32[4,16,16,128], index: 1, kind: input, shape index: {}]   ;;  %s1610_s2 = inlined_call_operand.vmem [shape: f32[1,128], index: 2, kind: input, shape index: {}]   ;;  %s1611_s3 = inlined_call_operand.vmem [shape: f32[1,128], index: 3, kind: input, shape index: {}]   ;;  %s1612_s4 = inlined_call_operand.hbm [shape: f32[4,16,16,128], index: 4, kind: output, shape index: {}]  }
   0x1   :  { %11 = vsyncpa [#allocation3 + $0x1], 0  ;;  %s1191_s15 = smov 0   ;;  %s1193_s16 = smov 0  }
   0x2   :  { %s1195_s17 = smov 0   ;;  %s1197_s18 = smov 0  }
   0x3 LB: > { %s1212_s19 = sadd.s32 4294967295, %s1161_s18   ;;  %s859_s20 = sadd.s32 4294967294, %s1161_s18   ;;  %s1161_s18 = sphi %s1197_s18, %s1618_s18   ;;  %s1157_s17 = sphi %s1195_s17, %s1617_s17   ;;  %s1153_s16 = sphi %s1193_s16, %s1616_s16   ;;  %s1149_s15 = sphi %s1191_s15, %s1615_s15  }
   0x4   : > { %s1216_s21 = sadd.s32 1, %s1161_s18   ;;  %s118_s22 = sadd.s32 1, %s1157_s17 }
   0x5   : > { %s115_s23 = ssub.s32 %s1161_s18, %s1216_s21  ;;  %p128_p0 = scmp.ne.s32.totalorder %s1157_s17, %s1153_s16 }
   0x6   : > { %p116_p1 = scmp.eq.s32.totalorder %s115_s23, 0  ;;  %p129_p2 = scmp.eq.s32.totalorder %s1212_s19, 1 }
   0x7   : > { %p134_p3 = scmp.ne.s32.totalorder %s1153_s16, %s1149_s15  ;;  %p135_p4 = scmp.eq.s32.totalorder %s859_s20, 1 }
   0x8   : > { %s1227_s24 = scalar_select %p116_p1, %s1157_s17, %s118_s22  }
   0x9   : > { %p1229_p5 = por %p129_p2, %p128_p0  ;;  %p1233_p6 = por %p135_p4, %p134_p3 }
   0xa   : > { %p862_p7 = scmp.ge.s32.totalorder %s1161_s18, 1  ;;  %p179_p8 = scmp.lt.s32.totalorder %s1161_s18, 3 }
   0xc   : > { %p180_p9 = pnand %p862_p7, %p179_p8 }
   0xd   : > { %s864_s27 = sshll.u32 (!%p180_p9), %s1212_s19, 1  ;;  %v1254_v1 = vld [vmem:[%s1610_s2] ss:$0 sm:$0xff] (!%p180_p9)  ;;  %s209_s12 = sand.u32 (!%p180_p9), 1, %s1153_s16  }
   0xe   : > { %183 = sbr.rel (%p180_p9) target bundleno = 124 (0x7c), region = 36  ;;  %p213_p10 = scmp.lt.s32.totalorder (!%p180_p9), %s864_s27, 3  ;;  %v1262_v8 = vld [vmem:[%s1611_s3] ss:$0 sm:$0xff] (!%p180_p9) }
   0xf   : > { %s1277_s20 = sshll.u32 (!%p180_p9), %s209_s12, 9  ;;  %s977_s23 = sshll.u32 (!%p180_p9), %s1212_s19, 13 }
  0x10   : > { %s1297_s22 = scalar_lea.vmem (!%p180_p9), [#allocation2], %s1277_s20  ;;  %s1567_s30 = scalar_lea.sflag (!%p180_p9), [#allocation3], %s209_s12 }
  0x15   : > { %s1620_s27 = smov (!%p213_p10, %s864_s27), 3 }
  0x16   : > { %s1057_s28 = smul.u32 192, %s1620_s27  ;;  %s975_s29 = sshll.u32 %s1620_s27, 8 }
  0x17   : > { %s1248_s9 = scalar_lea.vmem %s1609_s1, %s975_s29  ;;  %s785_s27 = sshll.u32 %s1297_s22, 4  ;;  %s1559_s27 = int_to_ptr.vmem [resolvable:$true] %s785_s27 }
  0x18   : > { %s1243_s6 = scalar_lea.vmem %s1608_s0, %s1057_s28  ;;  %v369_v13 = vld [vmem:[%s1248_s9] sm:$0xff]  ;;  %v370_v17 = vld [vmem:[%s1248_s9 + $0x8] sm:$0xff]  ;;  %v371_v18 = vld [vmem:[%s1248_s9 + $0x10] sm:$0xff]  ;;  %s1557_s29 = scalar_lea.hbm %s1612_s4, %s977_s23 }
  0x19   : > { %v979_v0 = vld [vmem:[%s1243_s6] sm:$0xff]   ;;  %v229_v2 = vld [vmem:[%s1243_s6 + $0xc] sm:$0xff]   ;;  %v1042_v7 = vld [vmem:[%s1243_s6 + $0x18] sm:$0xff]   ;;  %s1099_s5 = scalar_lea.vmem %s1559_s27, 8192 }
  0x1a   : > { %v980_v3 = vunpack.c.l.bf16 %v979_v0  ;;  %v981_v4 = vunpack.c.h.bf16 %v979_v0  ;;  %v261_v5 = vunpack.c.l.bf16 %v229_v2  ;;  %v262_v6 = vunpack.c.h.bf16 %v229_v2  ;;  %v233_v11 = vld [vmem:[%s1243_s6 + $0x24] sm:$0xff]   ;;  %v372_v19 = vld [vmem:[%s1248_s9 + $0x18] sm:$0xff]  ;;  %v375_v38 = vld [vmem:[%s1248_s9 + $0x30] sm:$0xff]  ;;  %p1100_p11 = scmp.ne.s32.totalorder %s1559_s27, %s1099_s5 }
  0x1b   : > { %v984_v9 = vunpack.c.l.bf16 %v1042_v7  ;;  %v985_v10 = vunpack.c.h.bf16 %v1042_v7  ;;  %v265_v22 = vunpack.c.l.bf16 %v233_v11  ;;  %v266_v23 = vunpack.c.h.bf16 %v233_v11  ;;  %v373_v28 = vld [vmem:[%s1248_s9 + $0x20] sm:$0xff]  ;;  %v374_v29 = vld [vmem:[%s1248_s9 + $0x28] sm:$0xff]  ;;  %v376_v39 = vld [vmem:[%s1248_s9 + $0x38] sm:$0xff] }
  0x1c   : > { %v298_v12 = vmul.f32 %v980_v3, %v1254_v1  ;;  %v299_v14 = vmul.f32 %v981_v4, %v1254_v1  ;;  %v300_v15 = vmul.f32 %v1254_v1, %v261_v5  ;;  %v301_v16 = vmul.f32 %v1254_v1, %v262_v6  ;;  %v1043_v44 = vld [vmem:[%s1243_s6 + $0x30] sm:$0xff]   ;;  %v237_v45 = vld [vmem:[%s1243_s6 + $0x3c] sm:$0xff]   ;;  %v1044_v50 = vld [vmem:[%s1243_s6 + $0x48] sm:$0xff]   ;;  %p1101_p12 = pnand %p1100_p11, %p1229_p5 }
  0x1d   : > { %v302_v20 = vmul.f32 %v984_v9, %v1254_v1  ;;  %v303_v21 = vmul.f32 %v985_v10, %v1254_v1  ;;  %v304_v32 = vmul.f32 %v1254_v1, %v265_v22  ;;  %v305_v33 = vmul.f32 %v1254_v1, %v266_v23  ;;  %v241_v59 = vld [vmem:[%s1243_s6 + $0x54] sm:$0xff]   ;;  %v377_v2 = vld [vmem:[%s1248_s9 + $0x40] sm:$0xff]  ;;  %v378_v6 = vld [vmem:[%s1248_s9 + $0x48] sm:$0xff] }
  0x1e   : > { %v337_v24 = vadd.f32 %v1262_v8, %v298_v12  ;;  %v338_v25 = vadd.f32 %v1262_v8, %v299_v14  ;;  %v339_v26 = vadd.f32 %v1262_v8, %v300_v15  ;;  %v340_v27 = vadd.f32 %v1262_v8, %v301_v16  ;;  %v379_v7 = vld [vmem:[%s1248_s9 + $0x50] sm:$0xff]  ;;  %v380_v9 = vld [vmem:[%s1248_s9 + $0x58] sm:$0xff]  ;;  %p1102_p13 = pneg %p1101_p12 }
  0x1f   : > { %v341_v30 = vadd.f32 %v1262_v8, %v302_v20  ;;  %v342_v31 = vadd.f32 %v1262_v8, %v303_v21  ;;  %v343_v42 = vadd.f32 %v1262_v8, %v304_v32  ;;  %v344_v43 = vadd.f32 %v1262_v8, %v305_v33 }
  0x20   : > { %v401_v34 = vadd.f32 %v369_v13, %v337_v24  ;;  %v402_v35 = vadd.f32 %v370_v17, %v338_v25  ;;  %v403_v36 = vadd.f32 %v371_v18, %v339_v26  ;;  %v404_v37 = vadd.f32 %v372_v19, %v340_v27  ;;  %v381_v18 = vld [vmem:[%s1248_s9 + $0x60] sm:$0xff]  ;;  %v382_v19 = vld [vmem:[%s1248_s9 + $0x68] sm:$0xff] }
  0x21   : > { %v405_v40 = vadd.f32 %v373_v28, %v341_v30  ;;  %v406_v41 = vadd.f32 %v374_v29, %v342_v31  ;;  %v407_v53 = vadd.f32 %v375_v38, %v343_v42  ;;  %v408_v54 = vadd.f32 %v376_v39, %v344_v43  ;;  %v383_v28 = vld [vmem:[%s1248_s9 + $0x70] sm:$0xff]  ;;  %v384_v29 = vld [vmem:[%s1248_s9 + $0x78] sm:$0xff] }
  0x22   : > { %v433_v46 = vmax.f32 %v401_v34, 0.0  ;;  %v434_v47 = vmax.f32 %v402_v35, 0.0  ;;  %v435_v48 = vmax.f32 %v403_v36, 0.0  ;;  %v436_v49 = vmax.f32 %v404_v37, 0.0  ;;  %v1045_v34 = vld [vmem:[%s1243_s6 + $0x60] sm:$0xff]   ;;  %v245_v35 = vld [vmem:[%s1243_s6 + $0x6c] sm:$0xff]  }
  0x23   : > { %v437_v51 = vmax.f32 %v405_v40, 0.0  ;;  %v438_v52 = vmax.f32 %v406_v41, 0.0  ;;  %v988_v55 = vunpack.c.l.bf16 %v1043_v44  ;;  %v989_v56 = vunpack.c.h.bf16 %v1043_v44  ;;  %v1046_v40 = vld [vmem:[%s1243_s6 + $0x78] sm:$0xff]  }
  0x24   : > { %465 = vst [vmem:[%s1297_s22] sm:$0xff] %v433_v46  ;;  %466 = vst [vmem:[%s1297_s22 + $0x8] sm:$0xff] %v434_v47  ;;  %v269_v57 = vunpack.c.l.bf16 %v237_v45  ;;  %v270_v58 = vunpack.c.h.bf16 %v237_v45  ;;  %v439_v60 = vmax.f32 %v407_v53, 0.0  ;;  %v440_v61 = vmax.f32 %v408_v54, 0.0 }
  0x25   : > { %467 = vst [vmem:[%s1297_s22 + $0x10] sm:$0xff] %v435_v48  ;;  %468 = vst [vmem:[%s1297_s22 + $0x18] sm:$0xff] %v436_v49  ;;  %v992_v62 = vunpack.c.l.bf16 %v1044_v50  ;;  %v993_v63 = vunpack.c.h.bf16 %v1044_v50  ;;  %v306_v0 = vmul.f32 %v988_v55, %v1254_v1  ;;  %v307_v3 = vmul.f32 %v989_v56, %v1254_v1  ;;  %v249_v49 = vld [vmem:[%s1243_s6 + $0x84] sm:$0xff]  }
  0x26   : > { %469 = vst [vmem:[%s1297_s22 + $0x20] sm:$0xff] %v437_v51  ;;  %470 = vst [vmem:[%s1297_s22 + $0x28] sm:$0xff] %v438_v52  ;;  %v308_v4 = vmul.f32 %v1254_v1, %v269_v57  ;;  %v309_v5 = vmul.f32 %v1254_v1, %v270_v58  ;;  %v273_v12 = vunpack.c.l.bf16 %v241_v59  ;;  %v274_v13 = vunpack.c.h.bf16 %v241_v59  ;;  %v385_v55 = vld [vmem:[%s1248_s9 + $0x80] sm:$0xff]  ;;  %v386_v59 = vld [vmem:[%s1248_s9 + $0x88] sm:$0xff] }
  0x27   : > { %471 = vst [vmem:[%s1297_s22 + $0x30] sm:$0xff] %v439_v60  ;;  %472 = vst [vmem:[%s1297_s22 + $0x38] sm:$0xff] %v440_v61  ;;  %v310_v10 = vmul.f32 %v992_v62, %v1254_v1  ;;  %v311_v11 = vmul.f32 %v993_v63, %v1254_v1  ;;  %v345_v14 = vadd.f32 %v1262_v8, %v306_v0  ;;  %v996_v45 = vunpack.c.l.bf16 %v1045_v34  ;;  %v387_v60 = vld [vmem:[%s1248_s9 + $0x90] sm:$0xff]  ;;  %v388_v61 = vld [vmem:[%s1248_s9 + $0x98] sm:$0xff] }
  0x28   : > { %v346_v15 = vadd.f32 %v1262_v8, %v307_v3  ;;  %v347_v16 = vadd.f32 %v1262_v8, %v308_v4  ;;  %v348_v17 = vadd.f32 %v1262_v8, %v309_v5  ;;  %v312_v22 = vmul.f32 %v1254_v1, %v273_v12 }
  0x29   : > { %v349_v20 = vadd.f32 %v1262_v8, %v310_v10  ;;  %v350_v21 = vadd.f32 %v1262_v8, %v311_v11  ;;  %v313_v23 = vmul.f32 %v1254_v1, %v274_v13  ;;  %v409_v24 = vadd.f32 %v377_v2, %v345_v14 }
  0x2a   : > { %v410_v25 = vadd.f32 %v378_v6, %v346_v15  ;;  %v411_v26 = vadd.f32 %v379_v7, %v347_v16  ;;  %v412_v27 = vadd.f32 %v380_v9, %v348_v17  ;;  %v351_v32 = vadd.f32 %v1262_v8, %v312_v22  ;;  %v389_v7 = vld [vmem:[%s1248_s9 + $0xa0] sm:$0xff]  ;;  %v390_v9 = vld [vmem:[%s1248_s9 + $0xa8] sm:$0xff] }
  0x2b   : > { %v413_v30 = vadd.f32 %v381_v18, %v349_v20  ;;  %v414_v31 = vadd.f32 %v382_v19, %v350_v21  ;;  %v352_v33 = vadd.f32 %v1262_v8, %v313_v23  ;;  %v441_v36 = vmax.f32 %v409_v24, 0.0  ;;  %v391_v18 = vld [vmem:[%s1248_s9 + $0xb0] sm:$0xff]  ;;  %v392_v19 = vld [vmem:[%s1248_s9 + $0xb8] sm:$0xff] }
  0x2c   : > { %v442_v37 = vmax.f32 %v410_v25, 0.0  ;;  %v443_v38 = vmax.f32 %v411_v26, 0.0  ;;  %v444_v39 = vmax.f32 %v412_v27, 0.0  ;;  %v415_v43 = vadd.f32 %v383_v28, %v351_v32  ;;  %v1047_v24 = vld [vmem:[%s1243_s6 + $0x90] sm:$0xff]   ;;  %v253_v25 = vld [vmem:[%s1243_s6 + $0x9c] sm:$0xff]  }
  0x2d   : > { %v445_v41 = vmax.f32 %v413_v30, 0.0  ;;  %v446_v42 = vmax.f32 %v414_v31, 0.0  ;;  %v416_v44 = vadd.f32 %v384_v29, %v352_v33  ;;  %473 = vst [vmem:[%s1297_s22 + $0x40] sm:$0xff] %v441_v36  ;;  %v997_v46 = vunpack.c.h.bf16 %v1045_v34  ;;  %v1048_v30 = vld [vmem:[%s1243_s6 + $0xa8] sm:$0xff]  }
  0x2e   : > { %474 = vst [vmem:[%s1297_s22 + $0x48] sm:$0xff] %v442_v37  ;;  %475 = vst [vmem:[%s1297_s22 + $0x50] sm:$0xff] %v443_v38  ;;  %v277_v47 = vunpack.c.l.bf16 %v245_v35  ;;  %v278_v48 = vunpack.c.h.bf16 %v245_v35  ;;  %v447_v50 = vmax.f32 %v415_v43, 0.0  ;;  %v1000_v52 = vunpack.c.l.bf16 %v1046_v40 }
  0x2f   : > { %476 = vst [vmem:[%s1297_s22 + $0x58] sm:$0xff] %v444_v39  ;;  %477 = vst [vmem:[%s1297_s22 + $0x60] sm:$0xff] %v445_v41  ;;  %v448_v51 = vmax.f32 %v416_v44, 0.0  ;;  %v1001_v53 = vunpack.c.h.bf16 %v1046_v40  ;;  %v314_v54 = vmul.f32 %v996_v45, %v1254_v1  ;;  %v315_v56 = vmul.f32 %v997_v46, %v1254_v1  ;;  %v257_v39 = vld [vmem:[%s1243_s6 + $0xb4] sm:$0xff]   ;;  %v393_v45 = vld [vmem:[%s1248_s9 + $0xc0] sm:$0xff] }
  0x30   : > { %478 = vst [vmem:[%s1297_s22 + $0x68] sm:$0xff] %v446_v42  ;;  %v316_v57 = vmul.f32 %v1254_v1, %v277_v47  ;;  %v317_v58 = vmul.f32 %v1254_v1, %v278_v48  ;;  %479 = vst [vmem:[%s1297_s22 + $0x70] sm:$0xff] %v447_v50  ;;  %v318_v62 = vmul.f32 %v1000_v52, %v1254_v1  ;;  %v281_v0 = vunpack.c.l.bf16 %v249_v49  ;;  %v395_v50 = vld [vmem:[%s1248_s9 + $0xd0] sm:$0xff] }
  0x31   : > { %480 = vst [vmem:[%s1297_s22 + $0x78] sm:$0xff] %v448_v51  ;;  %v319_v63 = vmul.f32 %v1001_v53, %v1254_v1  ;;  %v282_v2 = vunpack.c.h.bf16 %v249_v49  ;;  %v353_v3 = vadd.f32 %v1262_v8, %v314_v54  ;;  %v354_v4 = vadd.f32 %v1262_v8, %v315_v56  ;;  %v394_v49 = vld [vmem:[%s1248_s9 + $0xc8] sm:$0xff]  ;;  %v396_v51 = vld [vmem:[%s1248_s9 + $0xd8] sm:$0xff] }
  0x32   : > { %v355_v5 = vadd.f32 %v1262_v8, %v316_v57  ;;  %v356_v6 = vadd.f32 %v1262_v8, %v317_v58  ;;  %v357_v10 = vadd.f32 %v1262_v8, %v318_v62  ;;  %v320_v12 = vmul.f32 %v1254_v1, %v281_v0 }
  0x33   : > { %v358_v11 = vadd.f32 %v1262_v8, %v319_v63  ;;  %v321_v13 = vmul.f32 %v1254_v1, %v282_v2  ;;  %v417_v14 = vadd.f32 %v385_v55, %v353_v3  ;;  %v418_v15 = vadd.f32 %v386_v59, %v354_v4 }
  0x34   : > { %v419_v16 = vadd.f32 %v387_v60, %v355_v5  ;;  %v420_v17 = vadd.f32 %v388_v61, %v356_v6  ;;  %v421_v20 = vadd.f32 %v389_v7, %v357_v10  ;;  %v359_v22 = vadd.f32 %v1262_v8, %v320_v12  ;;  %v397_v60 = vld [vmem:[%s1248_s9 + $0xe0] sm:$0xff]  ;;  %v398_v61 = vld [vmem:[%s1248_s9 + $0xe8] sm:$0xff]  ;;  %v399_v7 = vld [vmem:[%s1248_s9 + $0xf0] sm:$0xff] }
  0x35   : > { %v422_v21 = vadd.f32 %v390_v9, %v358_v11  ;;  %v360_v23 = vadd.f32 %v1262_v8, %v321_v13  ;;  %v449_v26 = vmax.f32 %v417_v14, 0.0  ;;  %v450_v27 = vmax.f32 %v418_v15, 0.0  ;;  %v400_v9 = vld [vmem:[%s1248_s9 + $0xf8] sm:$0xff]  ;;  %v1049_v14 = vld [vmem:[%s1243_s6 + $0xc0] sm:$0xff]   ;;  %v873_v15 = vld [vmem:[%s1243_s6 + $0xcc] sm:$0xff]  }
  0x36   : > { %v451_v28 = vmax.f32 %v419_v16, 0.0  ;;  %v452_v29 = vmax.f32 %v420_v17, 0.0  ;;  %v453_v31 = vmax.f32 %v421_v20, 0.0  ;;  %v423_v33 = vadd.f32 %v391_v18, %v359_v22  ;;  %v1050_v20 = vld [vmem:[%s1243_s6 + $0xd8] sm:$0xff]  }
  0x37   : > { %v454_v32 = vmax.f32 %v422_v21, 0.0  ;;  %v424_v34 = vadd.f32 %v392_v19, %v360_v23  ;;  %481 = vst [vmem:[%s1297_s22 + $0x80] sm:$0xff] %v449_v26  ;;  %482 = vst [vmem:[%s1297_s22 + $0x88] sm:$0xff] %v450_v27  ;;  %v1004_v35 = vunpack.c.l.bf16 %v1047_v24  ;;  %v1005_v36 = vunpack.c.h.bf16 %v1047_v24 }
  0x38   : > { %483 = vst [vmem:[%s1297_s22 + $0x90] sm:$0xff] %v451_v28  ;;  %484 = vst [vmem:[%s1297_s22 + $0x98] sm:$0xff] %v452_v29  ;;  %v285_v37 = vunpack.c.l.bf16 %v253_v25  ;;  %v286_v38 = vunpack.c.h.bf16 %v253_v25  ;;  %v455_v40 = vmax.f32 %v423_v33, 0.0  ;;  %v1008_v42 = vunpack.c.l.bf16 %v1048_v30  ;;  %v877_v29 = vld [vmem:[%s1243_s6 + $0xe4] sm:$0xff]  }
  0x39   : > { %485 = vst [vmem:[%s1297_s22 + $0xa0] sm:$0xff] %v453_v31  ;;  %486 = vst [vmem:[%s1297_s22 + $0xa8] sm:$0xff] %v454_v32  ;;  %v456_v41 = vmax.f32 %v424_v34, 0.0  ;;  %v1009_v43 = vunpack.c.h.bf16 %v1048_v30  ;;  %v322_v44 = vmul.f32 %v1004_v35, %v1254_v1  ;;  %v323_v46 = vmul.f32 %v1005_v36, %v1254_v1  ;;  %v905_v35 = vld [vmem:[%s1248_s9 + $0x100] sm:$0xff] }
  0x3a   : > { %v324_v47 = vmul.f32 %v1254_v1, %v285_v37  ;;  %v325_v48 = vmul.f32 %v1254_v1, %v286_v38  ;;  %487 = vst [vmem:[%s1297_s22 + $0xb0] sm:$0xff] %v455_v40  ;;  %v326_v52 = vmul.f32 %v1008_v42, %v1254_v1  ;;  %v289_v54 = vunpack.c.l.bf16 %v257_v39  ;;  %v907_v40 = vld [vmem:[%s1248_s9 + $0x110] sm:$0xff] }
  0x3b   : > { %488 = vst [vmem:[%s1297_s22 + $0xb8] sm:$0xff] %v456_v41  ;;  %v327_v53 = vmul.f32 %v1009_v43, %v1254_v1  ;;  %v290_v55 = vunpack.c.h.bf16 %v257_v39  ;;  %v361_v56 = vadd.f32 %v1262_v8, %v322_v44  ;;  %v362_v57 = vadd.f32 %v1262_v8, %v323_v46  ;;  %v906_v39 = vld [vmem:[%s1248_s9 + $0x108] sm:$0xff]  ;;  %v908_v41 = vld [vmem:[%s1248_s9 + $0x118] sm:$0xff] }
  0x3c   : > { %v363_v58 = vadd.f32 %v1262_v8, %v324_v47  ;;  %v364_v59 = vadd.f32 %v1262_v8, %v325_v48  ;;  %v365_v62 = vadd.f32 %v1262_v8, %v326_v52  ;;  %v328_v0 = vmul.f32 %v1254_v1, %v289_v54 }
  0x3d   : > { %v366_v63 = vadd.f32 %v1262_v8, %v327_v53  ;;  %v329_v2 = vmul.f32 %v1254_v1, %v290_v55  ;;  %v425_v3 = vadd.f32 %v393_v45, %v361_v56  ;;  %v426_v4 = vadd.f32 %v394_v49, %v362_v57 }
  0x3e   : > { %v427_v5 = vadd.f32 %v395_v50, %v363_v58  ;;  %v428_v6 = vadd.f32 %v396_v51, %v364_v59  ;;  %v429_v10 = vadd.f32 %v397_v60, %v365_v62  ;;  %v367_v12 = vadd.f32 %v1262_v8, %v328_v0  ;;  %v909_v50 = vld [vmem:[%s1248_s9 + $0x120] sm:$0xff]  ;;  %v910_v51 = vld [vmem:[%s1248_s9 + $0x128] sm:$0xff]  ;;  %v911_v60 = vld [vmem:[%s1248_s9 + $0x130] sm:$0xff] }
  0x3f   : > { %v430_v11 = vadd.f32 %v398_v61, %v366_v63  ;;  %v368_v13 = vadd.f32 %v1262_v8, %v329_v2  ;;  %v457_v16 = vmax.f32 %v425_v3, 0.0  ;;  %v458_v17 = vmax.f32 %v426_v4, 0.0  ;;  %v912_v61 = vld [vmem:[%s1248_s9 + $0x138] sm:$0xff]  ;;  %v1051_v3 = vld [vmem:[%s1243_s6 + $0xf0] sm:$0xff]  }
  0x40   : > { %v459_v18 = vmax.f32 %v427_v5, 0.0  ;;  %v460_v19 = vmax.f32 %v428_v6, 0.0  ;;  %v461_v21 = vmax.f32 %v429_v10, 0.0  ;;  %v431_v23 = vadd.f32 %v399_v7, %v367_v12  ;;  %v881_v4 = vld [vmem:[%s1243_s6 + $0xfc] sm:$0xff]   ;;  %v1052_v10 = vld [vmem:[%s1243_s6 + $0x108] sm:$0xff]  }
  0x41   : > { %v462_v22 = vmax.f32 %v430_v11, 0.0  ;;  %v432_v24 = vadd.f32 %v400_v9, %v368_v13  ;;  %489 = vst [vmem:[%s1297_s22 + $0xc0] sm:$0xff] %v457_v16  ;;  %490 = vst [vmem:[%s1297_s22 + $0xc8] sm:$0xff] %v458_v17  ;;  %v1012_v25 = vunpack.c.l.bf16 %v1049_v14  ;;  %v1013_v26 = vunpack.c.h.bf16 %v1049_v14 }
  0x42   : > { %491 = vst [vmem:[%s1297_s22 + $0xd0] sm:$0xff] %v459_v18  ;;  %492 = vst [vmem:[%s1297_s22 + $0xd8] sm:$0xff] %v460_v19  ;;  %v532_v27 = vunpack.c.l.bf16 %v873_v15  ;;  %v533_v28 = vunpack.c.h.bf16 %v873_v15  ;;  %v463_v30 = vmax.f32 %v431_v23, 0.0  ;;  %v1016_v32 = vunpack.c.l.bf16 %v1050_v20  ;;  %v885_v19 = vld [vmem:[%s1243_s6 + $0x114] sm:$0xff]  }
  0x43   : > { %493 = vst [vmem:[%s1297_s22 + $0xe0] sm:$0xff] %v461_v21  ;;  %494 = vst [vmem:[%s1297_s22 + $0xe8] sm:$0xff] %v462_v22  ;;  %v464_v31 = vmax.f32 %v432_v24, 0.0  ;;  %v1017_v33 = vunpack.c.h.bf16 %v1050_v20  ;;  %v569_v34 = vmul.f32 %v1012_v25, %v1254_v1  ;;  %v570_v36 = vmul.f32 %v1013_v26, %v1254_v1  ;;  %v913_v25 = vld [vmem:[%s1248_s9 + $0x140] sm:$0xff] }
  0x44   : > { %v571_v37 = vmul.f32 %v1254_v1, %v532_v27  ;;  %v572_v38 = vmul.f32 %v1254_v1, %v533_v28  ;;  %495 = vst [vmem:[%s1297_s22 + $0xf0] sm:$0xff] %v463_v30  ;;  %v573_v42 = vmul.f32 %v1016_v32, %v1254_v1  ;;  %v536_v44 = vunpack.c.l.bf16 %v877_v29  ;;  %v915_v30 = vld [vmem:[%s1248_s9 + $0x150] sm:$0xff] }
  0x45   : > { %496 = vst [vmem:[%s1297_s22 + $0xf8] sm:$0xff] %v464_v31  ;;  %v574_v43 = vmul.f32 %v1017_v33, %v1254_v1  ;;  %v537_v45 = vunpack.c.h.bf16 %v877_v29  ;;  %v608_v46 = vadd.f32 %v1262_v8, %v569_v34  ;;  %v609_v47 = vadd.f32 %v1262_v8, %v570_v36  ;;  %v914_v29 = vld [vmem:[%s1248_s9 + $0x148] sm:$0xff]  ;;  %v916_v31 = vld [vmem:[%s1248_s9 + $0x158] sm:$0xff] }
  0x46   : > { %v610_v48 = vadd.f32 %v1262_v8, %v571_v37  ;;  %v611_v49 = vadd.f32 %v1262_v8, %v572_v38  ;;  %v612_v52 = vadd.f32 %v1262_v8, %v573_v42  ;;  %v575_v54 = vmul.f32 %v1254_v1, %v536_v44 }
  0x47   : > { %v613_v53 = vadd.f32 %v1262_v8, %v574_v43  ;;  %v576_v55 = vmul.f32 %v1254_v1, %v537_v45  ;;  %v673_v56 = vadd.f32 %v905_v35, %v608_v46  ;;  %v674_v57 = vadd.f32 %v906_v39, %v609_v47 }
  0x48   : > { %v675_v58 = vadd.f32 %v907_v40, %v610_v48  ;;  %v676_v59 = vadd.f32 %v908_v41, %v611_v49  ;;  %v677_v62 = vadd.f32 %v909_v50, %v612_v52  ;;  %v614_v0 = vadd.f32 %v1262_v8, %v575_v54  ;;  %v917_v40 = vld [vmem:[%s1248_s9 + $0x160] sm:$0xff]  ;;  %v918_v41 = vld [vmem:[%s1248_s9 + $0x168] sm:$0xff]  ;;  %v919_v50 = vld [vmem:[%s1248_s9 + $0x170] sm:$0xff] }
  0x49   : > { %v678_v63 = vadd.f32 %v910_v51, %v613_v53  ;;  %v615_v2 = vadd.f32 %v1262_v8, %v576_v55  ;;  %v705_v5 = vmax.f32 %v673_v56, 0.0  ;;  %v706_v6 = vmax.f32 %v674_v57, 0.0  ;;  %v920_v51 = vld [vmem:[%s1248_s9 + $0x178] sm:$0xff]  ;;  %v1053_v56 = vld [vmem:[%s1243_s6 + $0x120] sm:$0xff]   ;;  %v889_v57 = vld [vmem:[%s1243_s6 + $0x12c] sm:$0xff]  }
  0x4a   : > { %v707_v7 = vmax.f32 %v675_v58, 0.0  ;;  %v708_v9 = vmax.f32 %v676_v59, 0.0  ;;  %v709_v11 = vmax.f32 %v677_v62, 0.0  ;;  %v679_v13 = vadd.f32 %v911_v60, %v614_v0  ;;  %v1054_v62 = vld [vmem:[%s1243_s6 + $0x138] sm:$0xff]  }
  0x4b   : > { %v710_v12 = vmax.f32 %v678_v63, 0.0  ;;  %v680_v14 = vadd.f32 %v912_v61, %v615_v2  ;;  %937 = vst [vmem:[%s1297_s22 + $0x100] sm:$0xff] %v705_v5  ;;  %938 = vst [vmem:[%s1297_s22 + $0x108] sm:$0xff] %v706_v6  ;;  %v1020_v15 = vunpack.c.l.bf16 %v1051_v3  ;;  %v1021_v16 = vunpack.c.h.bf16 %v1051_v3 }
  0x4c   : > { %939 = vst [vmem:[%s1297_s22 + $0x110] sm:$0xff] %v707_v7  ;;  %940 = vst [vmem:[%s1297_s22 + $0x118] sm:$0xff] %v708_v9  ;;  %v540_v17 = vunpack.c.l.bf16 %v881_v4  ;;  %v541_v18 = vunpack.c.h.bf16 %v881_v4  ;;  %v711_v20 = vmax.f32 %v679_v13, 0.0  ;;  %v1024_v22 = vunpack.c.l.bf16 %v1052_v10  ;;  %v893_v9 = vld [vmem:[%s1243_s6 + $0x144] sm:$0xff]  }
  0x4d   : > { %941 = vst [vmem:[%s1297_s22 + $0x120] sm:$0xff] %v709_v11  ;;  %942 = vst [vmem:[%s1297_s22 + $0x128] sm:$0xff] %v710_v12  ;;  %v712_v21 = vmax.f32 %v680_v14, 0.0  ;;  %v1025_v23 = vunpack.c.h.bf16 %v1052_v10  ;;  %v577_v24 = vmul.f32 %v1020_v15, %v1254_v1  ;;  %v578_v26 = vmul.f32 %v1021_v16, %v1254_v1  ;;  %v921_v15 = vld [vmem:[%s1248_s9 + $0x180] sm:$0xff] }
  0x4e   : > { %v579_v27 = vmul.f32 %v1254_v1, %v540_v17  ;;  %v580_v28 = vmul.f32 %v1254_v1, %v541_v18  ;;  %943 = vst [vmem:[%s1297_s22 + $0x130] sm:$0xff] %v711_v20  ;;  %v581_v32 = vmul.f32 %v1024_v22, %v1254_v1  ;;  %v544_v34 = vunpack.c.l.bf16 %v885_v19  ;;  %v923_v20 = vld [vmem:[%s1248_s9 + $0x190] sm:$0xff] }
  0x4f   : > { %944 = vst [vmem:[%s1297_s22 + $0x138] sm:$0xff] %v712_v21  ;;  %v582_v33 = vmul.f32 %v1025_v23, %v1254_v1  ;;  %v545_v35 = vunpack.c.h.bf16 %v885_v19  ;;  %v616_v36 = vadd.f32 %v1262_v8, %v577_v24  ;;  %v617_v37 = vadd.f32 %v1262_v8, %v578_v26  ;;  %v922_v19 = vld [vmem:[%s1248_s9 + $0x188] sm:$0xff]  ;;  %v924_v21 = vld [vmem:[%s1248_s9 + $0x198] sm:$0xff] }
  0x50   : > { %v618_v38 = vadd.f32 %v1262_v8, %v579_v27  ;;  %v619_v39 = vadd.f32 %v1262_v8, %v580_v28  ;;  %v620_v42 = vadd.f32 %v1262_v8, %v581_v32  ;;  %v583_v44 = vmul.f32 %v1254_v1, %v544_v34 }
  0x51   : > { %v621_v43 = vadd.f32 %v1262_v8, %v582_v33  ;;  %v584_v45 = vmul.f32 %v1254_v1, %v545_v35  ;;  %v681_v46 = vadd.f32 %v913_v25, %v616_v36  ;;  %v682_v47 = vadd.f32 %v914_v29, %v617_v37 }
  0x52   : > { %v683_v48 = vadd.f32 %v915_v30, %v618_v38  ;;  %v684_v49 = vadd.f32 %v916_v31, %v619_v39  ;;  %v685_v52 = vadd.f32 %v917_v40, %v620_v42  ;;  %v622_v54 = vadd.f32 %v1262_v8, %v583_v44  ;;  %v925_v30 = vld [vmem:[%s1248_s9 + $0x1a0] sm:$0xff]  ;;  %v926_v31 = vld [vmem:[%s1248_s9 + $0x1a8] sm:$0xff]  ;;  %v927_v40 = vld [vmem:[%s1248_s9 + $0x1b0] sm:$0xff] }
  0x53   : > { %v686_v53 = vadd.f32 %v918_v41, %v621_v43  ;;  %v623_v55 = vadd.f32 %v1262_v8, %v584_v45  ;;  %v713_v58 = vmax.f32 %v681_v46, 0.0  ;;  %v714_v59 = vmax.f32 %v682_v47, 0.0  ;;  %v928_v41 = vld [vmem:[%s1248_s9 + $0x1b8] sm:$0xff]  ;;  %v1055_v46 = vld [vmem:[%s1243_s6 + $0x150] sm:$0xff]  }
  0x54   : > { %v715_v60 = vmax.f32 %v683_v48, 0.0  ;;  %v716_v61 = vmax.f32 %v684_v49, 0.0  ;;  %v717_v63 = vmax.f32 %v685_v52, 0.0  ;;  %v687_v2 = vadd.f32 %v919_v50, %v622_v54  ;;  %v897_v47 = vld [vmem:[%s1243_s6 + $0x15c] sm:$0xff]   ;;  %v1056_v52 = vld [vmem:[%s1243_s6 + $0x168] sm:$0xff]  }
  0x55   : > { %v718_v0 = vmax.f32 %v686_v53, 0.0  ;;  %v688_v3 = vadd.f32 %v920_v51, %v623_v55  ;;  %945 = vst [vmem:[%s1297_s22 + $0x140] sm:$0xff] %v713_v58  ;;  %946 = vst [vmem:[%s1297_s22 + $0x148] sm:$0xff] %v714_v59  ;;  %v1028_v4 = vunpack.c.l.bf16 %v1053_v56  ;;  %v1029_v5 = vunpack.c.h.bf16 %v1053_v56 }
  0x56   : > { %947 = vst [vmem:[%s1297_s22 + $0x150] sm:$0xff] %v715_v60  ;;  %948 = vst [vmem:[%s1297_s22 + $0x158] sm:$0xff] %v716_v61  ;;  %v548_v6 = vunpack.c.l.bf16 %v889_v57  ;;  %v549_v7 = vunpack.c.h.bf16 %v889_v57  ;;  %v719_v10 = vmax.f32 %v687_v2, 0.0  ;;  %v1032_v12 = vunpack.c.l.bf16 %v1054_v62  ;;  %v901_v61 = vld [vmem:[%s1243_s6 + $0x174] sm:$0xff]   ;;  %s1163_s6 = smov [#allocation2]  }
  0x57   : > { %949 = vst [vmem:[%s1297_s22 + $0x160] sm:$0xff] %v717_v63  ;;  %950 = vst [vmem:[%s1297_s22 + $0x168] sm:$0xff] %v718_v0  ;;  %v720_v11 = vmax.f32 %v688_v3, 0.0  ;;  %v1033_v13 = vunpack.c.h.bf16 %v1054_v62  ;;  %v585_v14 = vmul.f32 %v1028_v4, %v1254_v1  ;;  %v586_v16 = vmul.f32 %v1029_v5, %v1254_v1  ;;  %v929_v4 = vld [vmem:[%s1248_s9 + $0x1c0] sm:$0xff]  ;;  %s1103_s7 = sshll.u32 %s1163_s6, 4  ;;  %s1104_s7 = int_to_ptr.vmem [resolvable:$false] %s1103_s7 }
  0x58   : > { %v587_v17 = vmul.f32 %v1254_v1, %v548_v6  ;;  %v588_v18 = vmul.f32 %v1254_v1, %v549_v7  ;;  %951 = vst [vmem:[%s1297_s22 + $0x170] sm:$0xff] %v719_v10  ;;  %v589_v22 = vmul.f32 %v1032_v12, %v1254_v1  ;;  %v552_v24 = vunpack.c.l.bf16 %v893_v9  ;;  %v931_v10 = vld [vmem:[%s1248_s9 + $0x1d0] sm:$0xff]  ;;  %s1105_s8 = scalar_lea.vmem %s1104_s7, 16384  ;;  %p1106_p0 = scmp.lt.s32.totalorder %s1559_s27, %s1104_s7 }
  0x59   : > { %952 = vst [vmem:[%s1297_s22 + $0x178] sm:$0xff] %v720_v11  ;;  %v590_v23 = vmul.f32 %v1033_v13, %v1254_v1  ;;  %v553_v25 = vunpack.c.h.bf16 %v893_v9  ;;  %v624_v26 = vadd.f32 %v1262_v8, %v585_v14  ;;  %v625_v27 = vadd.f32 %v1262_v8, %v586_v16  ;;  %v930_v9 = vld [vmem:[%s1248_s9 + $0x1c8] sm:$0xff]  ;;  %v932_v11 = vld [vmem:[%s1248_s9 + $0x1d8] sm:$0xff]  ;;  %p1107_p1 = scmp.lt.s32.totalorder %s1105_s8, %s1099_s5 }
  0x5a   : > { %v626_v28 = vadd.f32 %v1262_v8, %v587_v17  ;;  %v627_v29 = vadd.f32 %v1262_v8, %v588_v18  ;;  %v628_v32 = vadd.f32 %v1262_v8, %v589_v22  ;;  %v591_v34 = vmul.f32 %v1254_v1, %v552_v24 }
  0x5b   : > { %v629_v33 = vadd.f32 %v1262_v8, %v590_v23  ;;  %v592_v35 = vmul.f32 %v1254_v1, %v553_v25  ;;  %v689_v36 = vadd.f32 %v921_v15, %v624_v26  ;;  %v690_v37 = vadd.f32 %v922_v19, %v625_v27  ;;  %p1108_p2 = por %p1107_p1, %p1106_p0 }
  0x5c   : > { %v691_v38 = vadd.f32 %v923_v20, %v626_v28  ;;  %v692_v39 = vadd.f32 %v924_v21, %v627_v29  ;;  %v693_v42 = vadd.f32 %v925_v30, %v628_v32  ;;  %v630_v44 = vadd.f32 %v1262_v8, %v591_v34  ;;  %v933_v20 = vld [vmem:[%s1248_s9 + $0x1e0] sm:$0xff]  ;;  %v934_v21 = vld [vmem:[%s1248_s9 + $0x1e8] sm:$0xff]  ;;  %v935_v30 = vld [vmem:[%s1248_s9 + $0x1f0] sm:$0xff] }
  0x5d   : > { %v694_v43 = vadd.f32 %v926_v31, %v629_v33  ;;  %v631_v45 = vadd.f32 %v1262_v8, %v592_v35  ;;  %v721_v48 = vmax.f32 %v689_v36, 0.0  ;;  %v722_v49 = vmax.f32 %v690_v37, 0.0  ;;  %v936_v31 = vld [vmem:[%s1248_s9 + $0x1f8] sm:$0xff]  ;;  %p1109_p3 = pnand %p1108_p2, %p1102_p13 }
  0x5e   : > { %v723_v50 = vmax.f32 %v691_v38, 0.0  ;;  %v724_v51 = vmax.f32 %v692_v39, 0.0  ;;  %v725_v53 = vmax.f32 %v693_v42, 0.0  ;;  %v695_v55 = vadd.f32 %v927_v40, %v630_v44 }
  0x5f   : > { %v726_v54 = vmax.f32 %v694_v43, 0.0  ;;  %v696_v56 = vadd.f32 %v928_v41, %v631_v45  ;;  %953 = vst [vmem:[%s1297_s22 + $0x180] sm:$0xff] %v721_v48  ;;  %954 = vst [vmem:[%s1297_s22 + $0x188] sm:$0xff] %v722_v49  ;;  %v1036_v57 = vunpack.c.l.bf16 %v1055_v46  ;;  %v1037_v58 = vunpack.c.h.bf16 %v1055_v46 }
  0x60   : > { %955 = vst [vmem:[%s1297_s22 + $0x190] sm:$0xff] %v723_v50  ;;  %956 = vst [vmem:[%s1297_s22 + $0x198] sm:$0xff] %v724_v51  ;;  %v556_v59 = vunpack.c.l.bf16 %v897_v47  ;;  %v557_v60 = vunpack.c.h.bf16 %v897_v47  ;;  %v727_v62 = vmax.f32 %v695_v55, 0.0  ;;  %v1040_v0 = vunpack.c.l.bf16 %v1056_v52 }
  0x61   : > { %957 = vst [vmem:[%s1297_s22 + $0x1a0] sm:$0xff] %v725_v53  ;;  %958 = vst [vmem:[%s1297_s22 + $0x1a8] sm:$0xff] %v726_v54  ;;  %v728_v63 = vmax.f32 %v696_v56, 0.0  ;;  %v1041_v2 = vunpack.c.h.bf16 %v1056_v52  ;;  %v593_v3 = vmul.f32 %v1036_v57, %v1254_v1  ;;  %v594_v5 = vmul.f32 %v1037_v58, %v1254_v1 }
  0x62   : > { %v595_v6 = vmul.f32 %v1254_v1, %v556_v59  ;;  %v596_v7 = vmul.f32 %v1254_v1, %v557_v60  ;;  %959 = vst [vmem:[%s1297_s22 + $0x1b0] sm:$0xff] %v727_v62  ;;  %v597_v12 = vmul.f32 %v1040_v0, %v1254_v1  ;;  %v560_v14 = vunpack.c.l.bf16 %v901_v61 }
  0x63   : > { %960 = vst [vmem:[%s1297_s22 + $0x1b8] sm:$0xff] %v728_v63  ;;  %v598_v13 = vmul.f32 %v1041_v2, %v1254_v1  ;;  %v561_v15 = vunpack.c.h.bf16 %v901_v61  ;;  %v632_v16 = vadd.f32 %v1262_v8, %v593_v3  ;;  %v633_v17 = vadd.f32 %v1262_v8, %v594_v5 }
  0x64   : > { %v634_v18 = vadd.f32 %v1262_v8, %v595_v6  ;;  %v635_v19 = vadd.f32 %v1262_v8, %v596_v7  ;;  %v636_v22 = vadd.f32 %v1262_v8, %v597_v12  ;;  %v599_v24 = vmul.f32 %v1254_v1, %v560_v14 }
  0x65   : > { %v637_v23 = vadd.f32 %v1262_v8, %v598_v13  ;;  %v600_v25 = vmul.f32 %v1254_v1, %v561_v15  ;;  %v697_v26 = vadd.f32 %v929_v4, %v632_v16  ;;  %v698_v27 = vadd.f32 %v930_v9, %v633_v17 }
  0x66   : > { %v699_v28 = vadd.f32 %v931_v10, %v634_v18  ;;  %v700_v29 = vadd.f32 %v932_v11, %v635_v19  ;;  %v701_v32 = vadd.f32 %v933_v20, %v636_v22  ;;  %v638_v34 = vadd.f32 %v1262_v8, %v599_v24 }
  0x67   : > { %v702_v33 = vadd.f32 %v934_v21, %v637_v23  ;;  %v639_v35 = vadd.f32 %v1262_v8, %v600_v25  ;;  %v729_v1 = vmax.f32 %v697_v26, 0.0  ;;  %v730_v36 = vmax.f32 %v698_v27, 0.0 }
  0x68   : > { %v731_v37 = vmax.f32 %v699_v28, 0.0  ;;  %v732_v38 = vmax.f32 %v700_v29, 0.0  ;;  %v733_v39 = vmax.f32 %v701_v32, 0.0  ;;  %v703_v41 = vadd.f32 %v935_v30, %v638_v34 }
  0x69   : > { %v734_v40 = vmax.f32 %v702_v33, 0.0  ;;  %v704_v42 = vadd.f32 %v936_v31, %v639_v35  ;;  %961 = vst [vmem:[%s1297_s22 + $0x1c0] sm:$0xff] %v729_v1  ;;  %962 = vst [vmem:[%s1297_s22 + $0x1c8] sm:$0xff] %v730_v36 }
  0x6a   : > { %963 = vst [vmem:[%s1297_s22 + $0x1d0] sm:$0xff] %v731_v37  ;;  %964 = vst [vmem:[%s1297_s22 + $0x1d8] sm:$0xff] %v732_v38  ;;  %v735_v8 = vmax.f32 %v703_v41, 0.0 }
  0x6b   : > { %965 = vst [vmem:[%s1297_s22 + $0x1e0] sm:$0xff] %v733_v39  ;;  %966 = vst [vmem:[%s1297_s22 + $0x1e8] sm:$0xff] %v734_v40  ;;  %v736_v43 = vmax.f32 %v704_v42, 0.0 }
  0x6c   : > { %967 = vst [vmem:[%s1297_s22 + $0x1f0] sm:$0xff] %v735_v8 }
  0x6d   : > { %968 = vst [vmem:[%s1297_s22 + $0x1f8] sm:$0xff] %v736_v43 }
  0x6e   : > { %1112 = shalt.err (!%p1109_p3)
}
  0x6f   : > { %s1113_s9 = scalar_lea.hbm %s1557_s29, 8192  ;;  %s1117_s12 = scalar_lea.hbm %s1612_s4, 16384 }
  0x70   : > { %p1114_p4 = scmp.ne.s32.totalorder %s1557_s29, %s1113_s9  ;;  %p1118_p9 = scmp.lt.u32.totalorder %s1557_s29, %s1612_s4 }
  0x71   : > { %p1119_p10 = scmp.lt.u32.totalorder %s1117_s12, %s1113_s9  ;;  %p1121_p12 = scmp.lt.u32.totalorder %s1113_s9, %s1557_s29 }
  0x72   : > { %p1115_p7 = pnand %p1114_p4, %p1229_p5 }
  0x73   : > { %p1120_p11 = por %p1119_p10, %p1118_p9 }
  0x74   : > { %p1116_p8 = pneg %p1115_p7 }
  0x75   : > { %p1122_p13 = por %p1121_p12, %p1120_p11 }
  0x77   : > { %p1123_p0 = pnand %p1122_p13, %p1116_p8 }
  0x79   : > { %1126 = shalt.err (!%p1123_p0)
}
  0x7a   : > { %s1164_s20 = smov 128   ;;  %s1165_s22 = smov 8  }
  0x7b   : > { %1058 = dma.vmem_to_hbm [thread:$0]  (%p1229_p5), %s1559_s27, 8192, %s1557_s29, %s1567_s30, %s1164_s20, %s1164_s20, %s1165_s22  }
  0x7c PF: > { %p1064_p1 = scmp.ge.s32.totalorder %s1161_s18, 2  ;;  %s800_s23 = sand.u32 1, %s1149_s15  }
  0x7d   : > { %s801_s19 = scalar_lea.sflag [#allocation3], %s800_s23 }
  0x7e   : > { %p1061_p2 = pnand %p1064_p1, %p1233_p6 }
  0x80   : > { %1144 = dma.done.wait (!%p1061_p2), %s801_s19, 8192  }
  0x81   : > { %1146 = vsyncadd (!%p1061_p2), %s801_s19, 4294959104  ;;  %p14_p3 = scmp.ge.s32.totalorder %s1216_s21, 4   ;;  %s1615_s15 = smov %s1153_s16 }
  0x82   : > { %s1616_s16 = smov %s1157_s17  ;;  %s1617_s17 = smov %s1227_s24 }
  0x83   : > { %s1618_s18 = smov %s1216_s21  ;;  %16 = sbr.rel (!%p14_p3) target bundleno = 3 (0x3), region = 77 }
  0x8a   :  { %806 = vsyncpa [#allocation3], 1 }
  0x8b   :  { %808 = vsyncpa [#allocation3 + $0x1], 1 }

// kernel: basic_block.4
= control target key start
LH: loop header
LB: loop body
LE: loop exit
PB: predicated region body
PF: predicated region fallthrough
CT: control target
= control target key end

     0   :  { %s14191_s18 = smov 0   ;;  %s16927_s0 = inlined_call_operand.vmem [shape: bf16[4,384,128], index: 0, kind: input, shape index: {}]   ;;  %s16928_s1 = inlined_call_operand.vmem [shape: f32[1,128], index: 1, kind: input, shape index: {}]   ;;  %s16929_s2 = inlined_call_operand.vmem [shape: f32[1,128], index: 2, kind: input, shape index: {}]   ;;  %s16930_s3 = inlined_call_operand.vmem [shape: bf16[1152,128], index: 3, kind: input, shape index: {}]   ;;  %s16931_s4 = inlined_call_operand.vmem [shape: bf16[4,384,128], index: 4, kind: output, shape index: {0}]   ;;  %s16932_s5 = inlined_call_operand.vmem [shape: f32[4,8,128], index: 5, kind: output, shape index: {1}]  }
   0x1 LB: > { %s10635_s19 = sadd.s32 4294967295, %s14157_s18   ;;  %p10639_p0 = scmp.ge.s32.totalorder %s14157_s18, 1  ;;  %s14157_s18 = sphi %s14191_s18, %s16_s18  }
   0x2   : > { %p192_p1 = scmp.lt.s32.totalorder %s14157_s18, 3 }
   0x4   : > { %p193_p2 = pnand %p10639_p0, %p192_p1 }
   0x6   : > { %196 = sbr.rel (%p193_p2) target bundleno = 1151 (0x47f), region = 36 }
   0xd   : > { %v13960_v0 = vld [vmem:[%s16930_s3 + $0x40] sm:$0xff]   ;;  %v14159_v2 = vmov 0   ;;  %v13962_v3 = vld [vmem:[%s16930_s3 + $0x48] sm:$0xff]   ;;  %v13964_v5 = vld [vmem:[%s16930_s3 + $0x50] sm:$0xff]   ;;  %s10640_s7 = sshll.u32 %s10635_s19, 1  ;;  %vm692_vm0 = vcmask 1043456  }
   0xe   : > { %v13961_v1 = vld [vmem:[%s16930_s3 + $0x40] sm:$0xff]   ;;  %248 = vst [vmem:[#allocation2] sm:$0xff] %v14159_v2  ;;  %249 = vst [vmem:[#allocation2 + $0x8] sm:$0xff] %v14159_v2  ;;  %12029 = vmatprep.subr.bf16.mxu0 %v13960_v0  ;;  %v13963_v4 = vld [vmem:[%s16930_s3 + $0x48] sm:$0xff]   ;;  %p228_p3 = scmp.lt.s32.totalorder %s10640_s7, 3  ;;  %v14242_v12 = vrot.slane %v14159_v2, 4 }
   0xf   : > { %250 = vst [vmem:[#allocation2 + $0xd0] sm:$0xff] %v14159_v2  ;;  %251 = vst [vmem:[#allocation2 + $0xd8] sm:$0xff] %v14159_v2  ;;  %12030 = vmatpush3.bf16.msra.mxu0 %v13960_v0  ;;  %12605 = vmatprep.subr.bf16.mxu1 %v13961_v1  ;;  %v13965_v6 = vld [vmem:[%s16930_s3 + $0x50] sm:$0xff]   ;;  %v13966_v7 = vld [vmem:[%s16930_s3 + $0x58] sm:$0xff]   ;;  %vm1039_vm1 = vsmask.f32 4352 }
  0x10   : > { %12606 = vmatpush3.bf16.msra.mxu1 %v13961_v1  ;;  %12031 = vmatprep.subr.bf16.mxu0 %v13962_v3  ;;  %s17673_s7 = smov (!%p228_p3, %s10640_s7), 3  ;;  %v13967_v8 = vld [vmem:[%s16930_s3 + $0x58] sm:$0xff]   ;;  %v13968_v9 = vld [vmem:[%s16930_s3 + $0x60] sm:$0xff]   ;;  %v13970_v11 = vld [vmem:[%s16930_s3 + $0x68] sm:$0xff]   ;;  %vm1578_vm2 = vsmask.f32 3328 }
  0x11   : > { %12607 = vmatprep.subr.bf16.mxu1 %v13963_v4  ;;  %s13949_s12 = smul.u32 192, %s17673_s7  ;;  %v13969_v10 = vld [vmem:[%s16930_s3 + $0x60] sm:$0xff]   ;;  %v13971_v16 = vld [vmem:[%s16930_s3 + $0x68] sm:$0xff]   ;;  %v13972_v25 = vld [vmem:[%s16930_s3 + $0x70] sm:$0xff]   ;;  %vm2074_vm3 = vsmask.f32 256 }
  0x12   : > { %v14248_v15 = vld [vmem:[%s16928_s1] ss:$0 sm:$0xff]  ;;  %v13973_v34 = vld [vmem:[%s16930_s3 + $0x70] sm:$0xff]   ;;  %v13974_v48 = vld [vmem:[%s16930_s3 + $0x78] sm:$0xff]   ;;  %vm2994_vm4 = vsmask.f32 7424 }
  0x13   : > { %12032 = vmatpush3.bf16.msra.mxu0 %v13962_v3  ;;  %s14237_s20 = scalar_lea.vmem %s16927_s0, %s13949_s12  ;;  %v14257_v21 = vld [vmem:[%s16929_s2] ss:$0 sm:$0xff]  ;;  %v13975_v53 = vld [vmem:[%s16930_s3 + $0x78] sm:$0xff]   ;;  %s10645_s24 = sshll.u32 %s17673_s7, 3 }
  0x14   : > { %12608 = vmatpush3.bf16.msra.mxu1 %v13963_v4  ;;  %12033 = vmatprep.subr.bf16.mxu0 %v13964_v5  ;;  %v11088_v14 = vld [vmem:[%s14237_s20] sm:$0xff]   ;;  %v262_v32 = vld [vmem:[%s14237_s20 + $0xc] sm:$0xff]   ;;  %v11391_v43 = vld [vmem:[%s14237_s20 + $0x18] sm:$0xff]   ;;  %s16859_s27 = scalar_lea.vmem %s16932_s5, %s10645_s24  ;;  %s16870_s30 = scalar_lea.vmem %s16931_s4, %s13949_s12 }
  0x15   : > { %12609 = vmatprep.subr.bf16.mxu1 %v13965_v6  ;;  %v650_v13 = vld [vmem:[#allocation2] sm:$0xf0]  ;;  %v11089_v18 = vunpack.c.l.bf16 %v11088_v14  ;;  %v11090_v19 = vunpack.c.h.bf16 %v11088_v14  ;;  %v10771_v33 = vld [vmem:[%s14237_s20 + $0xcc] sm:$0xff]   ;;  %v310_v38 = vunpack.c.l.bf16 %v262_v32  ;;  %v311_v42 = vunpack.c.h.bf16 %v262_v32 }
  0x16   : > { %v693_v17 = vrot.slane %v650_v13, 4  ;;  %v11421_v20 = vld [vmem:[%s14237_s20 + $0xc0] sm:$0xff]   ;;  %v5454_v41 = vunpack.c.l.bf16 %v10771_v33  ;;  %v5455_v47 = vunpack.c.h.bf16 %v10771_v33  ;;  %v11093_v57 = vunpack.c.l.bf16 %v11391_v43 }
  0x17   : > { %12034 = vmatpush3.bf16.msra.mxu0 %v13964_v5  ;;  %v11241_v22 = vunpack.c.l.bf16 %v11421_v20  ;;  %v11242_v23 = vunpack.c.h.bf16 %v11421_v20  ;;  %v5794_v24 = vld [vmem:[#allocation2] sm:$0xf0]  ;;  %v362_v27 = vmul.f32 %v11089_v18, %v14248_v15  ;;  %v363_v28 = vmul.f32 %v11090_v19, %v14248_v15 }
  0x18   : > { %12610 = vmatpush3.bf16.msra.mxu1 %v13965_v6  ;;  %12035 = vmatprep.subr.bf16.mxu0 %v13966_v7  ;;  %v695_v26 = vsel %vm692_vm0, %v693_v17, %v14242_v12  ;;  %v5836_v29 = vrot.slane %v5794_v24, 4  ;;  %v365_v46 = vmul.f32 %v14248_v15, %v310_v38  ;;  %v5509_v51 = vmul.f32 %v14248_v15, %v5454_v41  ;;  %v13976_v63 = vld [vmem:[%s16930_s3] sm:$0xff]   ;;  %v11422_v6 = vld [vmem:[%s14237_s20 + $0xd8] sm:$0xff]   ;;  %v13978_v24 = vld [vmem:[%s16930_s3 + $0x8] sm:$0xff]  }
  0x19   : > { %12611 = vmatprep.subr.bf16.mxu1 %v13967_v8  ;;  %v5506_v30 = vmul.f32 %v11241_v22, %v14248_v15  ;;  %v5507_v31 = vmul.f32 %v11242_v23, %v14248_v15  ;;  %12045 = vmatprep.mubr.bf16.mxu0 %v695_v26  ;;  %v417_v35 = vadd.f32 %v14257_v21, %v362_v27  ;;  %v11094_v61 = vunpack.c.h.bf16 %v11391_v43  ;;  %v13977_v3 = vld [vmem:[%s16930_s3] sm:$0xff]   ;;  %v11392_v38 = vld [vmem:[%s14237_s20 + $0x30] sm:$0xff]  }
  0x1a   : > { %v418_v36 = vadd.f32 %v14257_v21, %v363_v28  ;;  %v5838_v37 = vsel %vm692_vm0, %v5836_v29, %v14242_v12  ;;  %v366_v52 = vmul.f32 %v14248_v15, %v311_v42  ;;  %v420_v55 = vadd.f32 %v14257_v21, %v365_v46  ;;  %v10777_v28 = vld [vmem:[%s14237_s20 + $0xe4] sm:$0xff]  }
  0x1b   : > { %12036 = vmatpush3.bf16.msra.mxu0 %v13966_v7  ;;  %v5561_v39 = vadd.f32 %v14257_v21, %v5506_v30  ;;  %v5562_v40 = vadd.f32 %v14257_v21, %v5507_v31  ;;  %12621 = vmatprep.mubr.bf16.mxu1 %v5838_v37  ;;  %v465_v44 = vmax.f32 %v417_v35, 0.0  ;;  %v5510_v56 = vmul.f32 %v14248_v15, %v5455_v47  ;;  %v13980_v47 = vld [vmem:[%s16930_s3 + $0x10] sm:$0xff]  }
  0x1c   : > { %12612 = vmatpush3.bf16.msra.mxu1 %v13967_v8  ;;  %12037 = vmatprep.subr.bf16.mxu0 %v13968_v9  ;;  %v466_v45 = vmax.f32 %v418_v36, 0.0  ;;  %v5564_v59 = vadd.f32 %v14257_v21, %v5509_v51  ;;  %v421_v60 = vadd.f32 %v14257_v21, %v366_v52  ;;  %v468_v0 = vmax.f32 %v420_v55, 0.0  ;;  %v13981_v52 = vld [vmem:[%s16930_s3 + $0x10] sm:$0xff]  }
  0x1d   : > { %12613 = vmatprep.subr.bf16.mxu1 %v13969_v10  ;;  %v5609_v49 = vmax.f32 %v5561_v39, 0.0  ;;  %v5610_v50 = vmax.f32 %v5562_v40, 0.0  ;;  %v5565_v1 = vadd.f32 %v14257_v21, %v5510_v56  ;;  %v368_v2 = vmul.f32 %v11093_v57, %v14248_v15 }
  0x1e   : > { %v14289_v54 = vpack.c.bf16 %v466_v45, %v465_v44  ;;  %v5612_v5 = vmax.f32 %v5564_v59, 0.0  ;;  %v16933_v8 = vmov 0.0   ;;  %v11245_v22 = vunpack.c.l.bf16 %v11422_v6 }
  0x1f   : > { %12038 = vmatpush3.bf16.msra.mxu0 %v13968_v9  ;;  %v5705_v58 = vpack.c.bf16 %v5610_v50, %v5609_v49  ;;  %v14308_v9 = vpack.c.bf16 %v468_v0, %v16933_v8  ;;  %v423_v17 = vadd.f32 %v14257_v21, %v368_v2  ;;  %v11246_v27 = vunpack.c.h.bf16 %v11422_v6  ;;  %v11423_v0 = vld [vmem:[%s14237_s20 + $0xf0] sm:$0xff]  }
  0x20   : > { %12614 = vmatpush3.bf16.msra.mxu1 %v13969_v10  ;;  %12039 = vmatprep.subr.bf16.mxu0 %v13970_v11  ;;  %17183 = vst [vmem:[#allocation3_spill] sm:$0xff] %v14289_v54  ;;  %v696_v62 = vrot.slane %v14289_v54, 4  ;;  %v469_v10 = vmax.f32 %v421_v60, 0.0  ;;  %v5706_v14 = vpack.c.bf16 %v5612_v5, %v16933_v8  ;;  %v5512_v32 = vmul.f32 %v11245_v22, %v14248_v15  ;;  %v13983_v22 = vld [vmem:[%s16930_s3 + $0x18] sm:$0xff]  }
  0x21   : > { %12615 = vmatprep.subr.bf16.mxu1 %v13971_v16  ;;  %5729 = vst [vmem:[#allocation2 + $0x10] sm:$0xff] %v5705_v58  ;;  %v5839_v4 = vrot.slane %v5705_v58, 4  ;;  %17184 = vst [vmem:[#allocation4_spill] sm:$0xff] %v14308_v9  ;;  %v698_v18 = vrot.slane %v14308_v9, 4  ;;  %v471_v26 = vmax.f32 %v423_v17, 0.0  ;;  %v5513_v36 = vmul.f32 %v11246_v27, %v14248_v15 }
  0x22   : > { %v697_v7 = vsel %vm692_vm0, %v14242_v12, %v696_v62  ;;  %586 = vst [vmem:[#allocation2 + $0x18] sm:$0xff] %v14308_v9  ;;  %v14318_v19 = vpack.c.bf16 %v16933_v8, %v469_v10  ;;  %v5841_v23 = vrot.slane %v5706_v14, 4  ;;  %v5567_v41 = vadd.f32 %v14257_v21, %v5512_v32 }
  0x23   : > { %12040 = vmatpush3.bf16.msra.mxu0 %v13970_v11  ;;  %v5613_v11 = vmax.f32 %v5565_v1, 0.0  ;;  %v5840_v13 = vsel %vm692_vm0, %v14242_v12, %v5839_v4  ;;  %v268_v12 = vld [vmem:[%s14237_s20 + $0x24] sm:$0xff]   ;;  %v699_v29 = vsel %vm692_vm0, %v696_v62, %v698_v18  ;;  %v5460_v42 = vunpack.c.l.bf16 %v10777_v28 }
  0x24   : > { %12616 = vmatpush3.bf16.msra.mxu1 %v13971_v16  ;;  %12041 = vmatprep.subr.bf16.mxu0 %v13972_v25  ;;  %v369_v16 = vmul.f32 %v11094_v61, %v14248_v15  ;;  %17185 = vst [vmem:[#allocation5_spill] sm:$0xff] %v14318_v19  ;;  %v14331_v30 = vrot.slane %v14318_v19, 4  ;;  %v5842_v33 = vsel %vm692_vm0, %v5839_v4, %v5841_v23  ;;  %v316_v37 = vunpack.c.l.bf16 %v268_v12 }
  0x25   : > { %12617 = vmatprep.subr.bf16.mxu1 %v13973_v34  ;;  %v14321_v20 = vpack.c.bf16 %v16933_v8, %v5613_v11  ;;  %v5568_v44 = vadd.f32 %v14257_v21, %v5513_v36  ;;  %v317_v46 = vunpack.c.h.bf16 %v268_v12  ;;  %v5515_v49 = vmul.f32 %v14248_v15, %v5460_v42  ;;  %v13982_v11 = vld [vmem:[%s16930_s3 + $0x18] sm:$0xff]  }
  0x26   : > { %17186 = vst [vmem:[#allocation6_spill] sm:$0xff] %v14331_v30  ;;  %v701_v39 = vsel %vm692_vm0, %v698_v18, %v14331_v30  ;;  %v371_v45 = vmul.f32 %v14248_v15, %v316_v37  ;;  %v5461_v50 = vunpack.c.h.bf16 %v10777_v28  ;;  %v11097_v51 = vunpack.c.l.bf16 %v11392_v38  ;;  %v274_v18 = vld [vmem:[%s14237_s20 + $0x3c] sm:$0xff]  }
  0x27   : > { %12042 = vmatpush3.bf16.msra.mxu0 %v13972_v25  ;;  %v424_v25 = vadd.f32 %v14257_v21, %v369_v16  ;;  %5731 = vst [vmem:[#allocation2 + $0x20] sm:$0xff] %v14321_v20  ;;  %v5843_v31 = vrot.slane %v14321_v20, 4  ;;  %v5616_v57 = vmax.f32 %v5568_v44, 0.0  ;;  %v372_v59 = vmul.f32 %v14248_v15, %v317_v46  ;;  %v10783_v36 = vld [vmem:[%s14237_s20 + $0xfc] sm:$0xff]   ;;  %v11393_v46 = vld [vmem:[%s14237_s20 + $0x48] sm:$0xff]  }
  0x28   : > { %12618 = vmatpush3.bf16.msra.mxu1 %v13973_v34  ;;  %12043 = vmatprep.subr.bf16.mxu0 %v13974_v48  ;;  %v13979_v34 = vld [vmem:[%s16930_s3 + $0x8] sm:$0xff]   ;;  %v426_v58 = vadd.f32 %v14257_v21, %v371_v45  ;;  %v5570_v60 = vadd.f32 %v14257_v21, %v5515_v49  ;;  %v5516_v61 = vmul.f32 %v14248_v15, %v5461_v50  ;;  %v11098_v62 = vunpack.c.h.bf16 %v11392_v38  ;;  %v13984_v20 = vld [vmem:[%s16930_s3 + $0x20] sm:$0xff]  }
  0x29   : > { %12619 = vmatprep.subr.bf16.mxu1 %v13975_v53  ;;  %v472_v35 = vmax.f32 %v424_v25, 0.0  ;;  %v5844_v40 = vsel %vm692_vm0, %v5841_v23, %v5843_v31  ;;  %v14361_v55 = vld [vmem:[#allocation2 + $0x18] sm:$0xf0]  ;;  %v427_v4 = vadd.f32 %v14257_v21, %v372_v59  ;;  %v11249_v17 = vunpack.c.l.bf16 %v11423_v0 }
  0x2a   : > { %17189 = vst [vmem:[#allocation9_spill] sm:$0xff] %v14361_v55  ;;  %v5618_v5 = vmax.f32 %v5570_v60, 0.0  ;;  %v5571_v6 = vadd.f32 %v14257_v21, %v5516_v61  ;;  %v5466_v50 = vunpack.c.l.bf16 %v10783_v36  ;;  %v323_v59 = vunpack.c.h.bf16 %v274_v18 }
  0x2b   : > { %12044 = vmatpush3.bf16.msra.mxu0 %v13974_v48  ;;  %v14348_v43 = vpack.c.bf16 %v472_v35, %v471_v26  ;;  %v5615_v48 = vmax.f32 %v5567_v41, 0.0  ;;  %v475_v16 = vmax.f32 %v427_v4, 0.0  ;;  %v5518_v35 = vmul.f32 %v11249_v17, %v14248_v15 }
  0x2c   : > { %12620 = vmatpush3.bf16.msra.mxu1 %v13975_v53  ;;  %12093 = vmatprep.subr.bf16.mxu0 %v13976_v63  ;;  %v14359_v53 = vld [vmem:[#allocation2 + $0x18] sm:$0xf8]  ;;  %v5709_v12 = vpack.c.bf16 %v5618_v5, %v16933_v8  ;;  %v5619_v23 = vmax.f32 %v5571_v6, 0.0  ;;  %v11101_v4 = vunpack.c.l.bf16 %v11393_v46  ;;  %v11102_v5 = vunpack.c.h.bf16 %v11393_v46 }
  0x2d   : > { %12669 = vmatprep.subr.bf16.mxu1 %v13977_v3  ;;  %17187 = vst [vmem:[#allocation7_spill] sm:$0xff] %v14348_v43  ;;  %17188 = vst [vmem:[#allocation8_spill] sm:$0xff] %v14359_v53  ;;  %v702_v56 = vrot.slane %v14348_v43, 4  ;;  %v5708_v2 = vpack.c.bf16 %v5616_v57, %v5615_v48  ;;  %v14396_v28 = vpack.c.bf16 %v16933_v8, %v475_v16 }
  0x2e   : > { %12046 = vmatmul.mubr.bf16.vlgmr.msra.gmra.mrb[0].mxu0 %v697_v7  ;;  %5730 = vst [vmem:[#allocation2 + $0x18] sm:$0xff] %v5706_v14  ;;  %v375_v7 = vmul.f32 %v11098_v62, %v14248_v15  ;;  %5733 = vst [vmem:[#allocation2 + $0x30] sm:$0xff] %v5709_v12  ;;  %v5847_v32 = vrot.slane %v5709_v12, 4  ;;  %v5573_v44 = vadd.f32 %v14257_v21, %v5518_v35  ;;  %v10789_v35 = vld [vmem:[%s14237_s20 + $0x114] sm:$0xff]  }
  0x2f   : > { %12094 = vmatpush3.bf16.msra.mxu0 %v13976_v63  ;;  %12622 = vmatmul.mubr.bf16.vlgmr.msra.gmra.mrb[0].mxu1 %v5840_v13  ;;  %v374_v63 = vmul.f32 %v11097_v51, %v14248_v15  ;;  %v14372_v1 = vsel %vm692_vm0, %v14331_v30, %v702_v56  ;;  %5732 = vst [vmem:[#allocation2 + $0x28] sm:$0xff] %v5708_v2  ;;  %v5845_v14 = vrot.slane %v5708_v2, 4  ;;  %17192 = vst [vmem:[#allocation12_spill] sm:$0xff] %v14396_v28  ;;  %v14427_v51 = vld [vmem:[%s14237_s20 + $0x108] sm:$0xff]  }
  0x30   : > { %12670 = vmatpush3.bf16.msra.mxu1 %v13977_v3  ;;  %12049 = vmatprep.mubr.bf16.mxu0 %v699_v29  ;;  %17190 = vst [vmem:[#allocation10_spill] sm:$0xff] %v14372_v1  ;;  %v474_v3 = vmax.f32 %v426_v58, 0.0  ;;  %v11250_v29 = vunpack.c.h.bf16 %v11423_v0  ;;  %v706_v38 = vrot.slane %v14396_v28, 4  ;;  %v5621_v57 = vmax.f32 %v5573_v44, 0.0  ;;  %v13987_v0 = vld [vmem:[%s16930_s3 + $0x28] sm:$0xff]  }
  0x31   : > { %12625 = vmatprep.mubr.bf16.mxu1 %v5842_v33  ;;  %12095 = vmatprep.subr.bf16.mxu0 %v13978_v24  ;;  %v429_v10 = vadd.f32 %v14257_v21, %v374_v63  ;;  %v5846_v27 = vsel %vm692_vm0, %v5843_v31, %v5845_v14  ;;  %v14399_v33 = vpack.c.bf16 %v16933_v8, %v5619_v23  ;;  %v13985_v31 = vld [vmem:[%s16930_s3 + $0x20] sm:$0xff]   ;;  %v5467_v63 = vunpack.c.h.bf16 %v10783_v36 }
  0x32   : > { %12671 = vmatprep.subr.bf16.mxu1 %v13979_v34  ;;  %v14382_v13 = vpack.c.bf16 %v474_v3, %v16933_v8  ;;  %v5848_v41 = vsel %vm692_vm0, %v5845_v14, %v5847_v32  ;;  %v5521_v62 = vmul.f32 %v14248_v15, %v5466_v50  ;;  %v378_v3 = vmul.f32 %v14248_v15, %v323_v59  ;;  %v11394_v59 = vld [vmem:[%s14237_s20 + $0x60] sm:$0xff]  }
  0x33   : > { %12096 = vmatpush3.bf16.msra.mxu0 %v13978_v24  ;;  %v430_v24 = vadd.f32 %v14257_v21, %v375_v7  ;;  %v477_v25 = vmax.f32 %v429_v10, 0.0  ;;  %5734 = vst [vmem:[#allocation2 + $0x38] sm:$0xff] %v14399_v33  ;;  %v5849_v45 = vrot.slane %v14399_v33, 4  ;;  %v380_v16 = vmul.f32 %v11101_v4, %v14248_v15 }
  0x34   : > { %12672 = vmatpush3.bf16.msra.mxu1 %v13979_v34  ;;  %12097 = vmatprep.subr.bf16.mxu0 %v13980_v47  ;;  %17191 = vst [vmem:[#allocation11_spill] sm:$0xff] %v14382_v13  ;;  %v704_v26 = vrot.slane %v14382_v13, 4  ;;  %v5576_v10 = vadd.f32 %v14257_v21, %v5521_v62  ;;  %v433_v14 = vadd.f32 %v14257_v21, %v378_v3  ;;  %v14504_v3 = vld [vmem:[%s16930_s3 + $0x80] sm:$0xff]   ;;  %v14818_v30 = vshrl.u32 %v14348_v43, 16 }
  0x35   : > { %12673 = vmatprep.subr.bf16.mxu1 %v13981_v52  ;;  %v478_v34 = vmax.f32 %v430_v24, 0.0  ;;  %v5850_v58 = vsel %vm692_vm0, %v5847_v32, %v5849_v45  ;;  %v381_v17 = vmul.f32 %v11102_v5, %v14248_v15  ;;  %v435_v32 = vadd.f32 %v14257_v21, %v380_v16 }
  0x36   : > { %12050 = vmatmul.mubr.bf16.gmra.mrb[4].mxu0 %v701_v39  ;;  %v14410_v37 = vsel %vm692_vm0, %v702_v56, %v704_v26  ;;  %v5519_v39 = vmul.f32 %v11250_v29, %v14248_v15  ;;  %v5624_v24 = vmax.f32 %v5576_v10, 0.0  ;;  %v481_v29 = vmax.f32 %v433_v14, 0.0  ;;  %17241 = vst [vmem:[#allocation60_spill] sm:$0xff] %v14818_v30 }
  0x37   : > { %12626 = vmatmul.mubr.bf16.gmra.mrb[4].mxu1 %v5844_v40  ;;  %12053 = vmatprep.mubr.bf16.mxu0 %v14372_v1  ;;  %17193 = vst [vmem:[#allocation13_spill] sm:$0xff] %v14410_v37  ;;  %v322_v40 = vunpack.c.l.bf16 %v274_v18  ;;  %v14416_v42 = vpack.c.bf16 %v478_v34, %v477_v25  ;;  %v11253_v18 = vunpack.c.l.bf16 %v14427_v51  ;;  %v436_v33 = vadd.f32 %v14257_v21, %v381_v17  ;;  %v13993_v17 = vld [vmem:[%s16930_s3 + $0x80] sm:$0xff]  }
  0x38   : > { %12098 = vmatpush3.bf16.msra.mxu0 %v13980_v47  ;;  %12674 = vmatpush3.bf16.msra.mxu1 %v13981_v52  ;;  %v14422_v47 = vsel %vm692_vm0, %v704_v26, %v706_v38  ;;  %v5574_v48 = vadd.f32 %v14257_v21, %v5519_v39  ;;  %v13986_v52 = vld [vmem:[%s16930_s3 + $0x28] sm:$0xff]   ;;  %v14459_v26 = vld [vmem:[%s14237_s20 + $0x54] sm:$0xff]   ;;  %v11254_v34 = vunpack.c.h.bf16 %v14427_v51 }
  0x39   : > { %12629 = vmatprep.mubr.bf16.mxu1 %v5846_v27  ;;  %12099 = vmatprep.subr.bf16.mxu0 %v13982_v11  ;;  %17194 = vst [vmem:[#allocation14_spill] sm:$0xff] %v14416_v42  ;;  %17195 = vst [vmem:[#allocation15_spill] sm:$0xff] %v14422_v47  ;;  %v377_v49 = vmul.f32 %v14248_v15, %v322_v40  ;;  %v708_v56 = vrot.slane %v14416_v42, 4  ;;  %v13989_v27 = vld [vmem:[%s16930_s3 + $0x30] sm:$0xff]   ;;  %v13990_v39 = vld [vmem:[%s16930_s3 + $0x38] sm:$0xff]   ;;  %v14475_v40 = vpack.c.bf16 %v16933_v8, %v481_v29 }
  0x3a   : > { %12675 = vmatprep.subr.bf16.mxu1 %v13983_v22  ;;  %v5622_v60 = vmax.f32 %v5574_v48, 0.0  ;;  %v484_v44 = vmax.f32 %v436_v33, 0.0  ;;  %v5524_v46 = vmul.f32 %v11253_v18, %v14248_v15  ;;  %v5525_v50 = vmul.f32 %v11254_v34, %v14248_v15  ;;  %v13991_v51 = vld [vmem:[%s16930_s3 + $0x38] sm:$0xff]  }
  0x3b   : > { %v432_v61 = vadd.f32 %v14257_v21, %v377_v49  ;;  %v14442_v2 = vsel %vm692_vm0, %v706_v38, %v708_v56  ;;  %17198 = vst [vmem:[#allocation18_spill] sm:$0xff] %v14475_v40  ;;  %v329_v16 = vunpack.c.h.bf16 %v14459_v26 }
  0x3c   : > { %12100 = vmatpush3.bf16.msra.mxu0 %v13982_v11  ;;  %12676 = vmatpush3.bf16.msra.mxu1 %v13983_v22  ;;  %17196 = vst [vmem:[#allocation16_spill] sm:$0xff] %v14442_v2  ;;  %v5711_v6 = vpack.c.bf16 %v5622_v60, %v5621_v57  ;;  %v5522_v11 = vmul.f32 %v14248_v15, %v5467_v63  ;;  %v13988_v22 = vld [vmem:[%s16930_s3 + $0x30] sm:$0xff]   ;;  %v5472_v63 = vunpack.c.l.bf16 %v10789_v35 }
  0x3d   : > { %12101 = vmatprep.subr.bf16.mxu0 %v13984_v20  ;;  %12677 = vmatprep.subr.bf16.mxu1 %v13985_v31  ;;  %v480_v7 = vmax.f32 %v432_v61, 0.0  ;;  %v5579_v57 = vadd.f32 %v14257_v21, %v5524_v46  ;;  %v5580_v62 = vadd.f32 %v14257_v21, %v5525_v50  ;;  %v384_v29 = vmul.f32 %v14248_v15, %v329_v16 }
  0x3e   : > { %12054 = vmatmul.mubr.bf16.gmra.mrb[8].mxu0 %v14410_v37  ;;  %5735 = vst [vmem:[#allocation2 + $0x40] sm:$0xff] %v5711_v6  ;;  %v5851_v12 = vrot.slane %v5711_v6, 4  ;;  %v5577_v25 = vadd.f32 %v14257_v21, %v5522_v11  ;;  %v5527_v14 = vmul.f32 %v14248_v15, %v5472_v63 }
  0x3f   : > { %12630 = vmatmul.mubr.bf16.gmra.mrb[8].mxu1 %v5848_v41  ;;  %12057 = vmatprep.mubr.bf16.mxu0 %v14422_v47  ;;  %v14455_v23 = vpack.c.bf16 %v480_v7, %v16933_v8  ;;  %v483_v41 = vmax.f32 %v435_v32, 0.0  ;;  %v5627_v6 = vmax.f32 %v5579_v57, 0.0  ;;  %v5628_v11 = vmax.f32 %v5580_v62, 0.0  ;;  %v10795_v62 = vld [vmem:[%s14237_s20 + $0x12c] sm:$0xff]  }
  0x40   : > { %12633 = vmatprep.mubr.bf16.mxu1 %v5850_v58  ;;  %12102 = vmatpush3.bf16.msra.mxu0 %v13984_v20  ;;  %v5852_v36 = vsel %vm692_vm0, %v5849_v45, %v5851_v12  ;;  %v5625_v38 = vmax.f32 %v5577_v25, 0.0  ;;  %v328_v58 = vunpack.c.l.bf16 %v14459_v26  ;;  %v11106_v32 = vunpack.c.h.bf16 %v11394_v59 }
  0x41   : > { %12678 = vmatpush3.bf16.msra.mxu1 %v13985_v31  ;;  %12103 = vmatprep.subr.bf16.mxu0 %v13986_v52  ;;  %17197 = vst [vmem:[#allocation17_spill] sm:$0xff] %v14455_v23  ;;  %v710_v20 = vrot.slane %v14455_v23, 4  ;;  %v5712_v31 = vpack.c.bf16 %v5624_v24, %v16933_v8  ;;  %v11105_v24 = vunpack.c.l.bf16 %v11394_v59  ;;  %v5714_v25 = vpack.c.bf16 %v5628_v11, %v5627_v6 }
  0x42   : > { %12679 = vmatprep.subr.bf16.mxu1 %v13987_v0  ;;  %v14483_v48 = vpack.c.bf16 %v16933_v8, %v5625_v38  ;;  %v383_v7 = vmul.f32 %v14248_v15, %v328_v58  ;;  %v387_v38 = vmul.f32 %v11106_v32, %v14248_v15 }
  0x43   : > { %v14480_v45 = vsel %vm692_vm0, %v708_v56, %v710_v20  ;;  %5736 = vst [vmem:[#allocation2 + $0x48] sm:$0xff] %v5712_v31  ;;  %v5853_v49 = vrot.slane %v5712_v31, 4  ;;  %v14491_v56 = vpack.c.bf16 %v484_v44, %v483_v41  ;;  %v386_v34 = vmul.f32 %v11105_v24, %v14248_v15  ;;  %5738 = vst [vmem:[#allocation2 + $0x58] sm:$0xff] %v5714_v25  ;;  %v11395_v24 = vld [vmem:[%s14237_s20 + $0x78] sm:$0xff]  }
  0x44   : > { %12104 = vmatpush3.bf16.msra.mxu0 %v13986_v52  ;;  %17199 = vst [vmem:[#allocation19_spill] sm:$0xff] %v14480_v45  ;;  %v712_v52 = vrot.slane %v14475_v40, 4  ;;  %5737 = vst [vmem:[#allocation2 + $0x50] sm:$0xff] %v14483_v48  ;;  %v5855_v61 = vrot.slane %v14483_v48, 4  ;;  %v439_v31 = vadd.f32 %v14257_v21, %v384_v29  ;;  %v5478_v29 = vunpack.c.l.bf16 %v10795_v62 }
  0x45   : > { %12680 = vmatpush3.bf16.msra.mxu1 %v13987_v0  ;;  %12105 = vmatprep.subr.bf16.mxu0 %v13988_v22  ;;  %17200 = vst [vmem:[#allocation20_spill] sm:$0xff] %v14491_v56  ;;  %v5854_v60 = vsel %vm692_vm0, %v5851_v12, %v5853_v49  ;;  %v11425_v0 = vld [vmem:[%s14237_s20 + $0x120] sm:$0xff]   ;;  %v714_v5 = vrot.slane %v14491_v56, 4  ;;  %v5473_v12 = vunpack.c.h.bf16 %v10789_v35  ;;  %v441_v44 = vadd.f32 %v14257_v21, %v386_v34 }
  0x46   : > { %12058 = vmatmul.mubr.bf16.gmra.mrb[12].mxu0 %v14442_v2  ;;  %12681 = vmatprep.subr.bf16.mxu1 %v13989_v27  ;;  %v14507_v4 = vsel %vm692_vm0, %v710_v20, %v712_v52  ;;  %v5856_v10 = vsel %vm692_vm0, %v5853_v49, %v5855_v61  ;;  %v5857_v20 = vrot.slane %v5714_v25, 4  ;;  %v11258_v46 = vunpack.c.h.bf16 %v11425_v0 }
  0x47   : > { %12634 = vmatmul.mubr.bf16.gmra.mrb[12].mxu1 %v5852_v36  ;;  %12061 = vmatprep.mubr.bf16.mxu0 %v14480_v45  ;;  %17201 = vst [vmem:[#allocation21_spill] sm:$0xff] %v14507_v4  ;;  %v14518_v18 = vsel %vm692_vm0, %v712_v52, %v714_v5  ;;  %v5528_v33 = vmul.f32 %v14248_v15, %v5473_v12  ;;  %v11257_v36 = vunpack.c.l.bf16 %v11425_v0  ;;  %v487_v50 = vmax.f32 %v439_v31, 0.0  ;;  %v286_v52 = vld [vmem:[%s14237_s20 + $0x6c] sm:$0xff]  }
  0x48   : > { %12106 = vmatpush3.bf16.msra.mxu0 %v13988_v22  ;;  %12637 = vmatprep.mubr.bf16.mxu1 %v5854_v60  ;;  %17202 = vst [vmem:[#allocation22_spill] sm:$0xff] %v14518_v18  ;;  %v438_v22 = vadd.f32 %v14257_v21, %v383_v7  ;;  %v5858_v49 = vsel %vm692_vm0, %v5855_v61, %v5857_v20  ;;  %v489_v59 = vmax.f32 %v441_v44, 0.0  ;;  %v335_v34 = vunpack.c.h.bf16 %v286_v52 }
  0x49   : > { %12682 = vmatpush3.bf16.msra.mxu1 %v13989_v27  ;;  %12107 = vmatprep.subr.bf16.mxu0 %v13990_v39  ;;  %v5582_v27 = vadd.f32 %v14257_v21, %v5527_v14  ;;  %v5583_v41 = vadd.f32 %v14257_v21, %v5528_v33  ;;  %v5530_v60 = vmul.f32 %v11257_v36, %v14248_v15  ;;  %v334_v14 = vunpack.c.l.bf16 %v286_v52  ;;  %v11426_v36 = vld [vmem:[%s14237_s20 + $0x138] sm:$0xff]  }
  0x4a   : > { %12683 = vmatprep.subr.bf16.mxu1 %v13991_v51  ;;  %v486_v26 = vmax.f32 %v438_v22, 0.0  ;;  %v14543_v0 = vpack.c.bf16 %v16933_v8, %v487_v50  ;;  %v5531_v61 = vmul.f32 %v11258_v46, %v14248_v15  ;;  %v5533_v31 = vmul.f32 %v14248_v15, %v5478_v29 }
  0x4b   : > { %v5630_v35 = vmax.f32 %v5582_v27, 0.0  ;;  %v5631_v58 = vmax.f32 %v5583_v41, 0.0  ;;  %v5585_v11 = vadd.f32 %v14257_v21, %v5530_v60  ;;  %v390_v46 = vmul.f32 %v14248_v15, %v335_v34 }
  0x4c   : > { %12108 = vmatpush3.bf16.msra.mxu0 %v13990_v39  ;;  %v14531_v39 = vpack.c.bf16 %v486_v26, %v16933_v8  ;;  %17204 = vst [vmem:[#allocation24_spill] sm:$0xff] %v14543_v0  ;;  %v5586_v12 = vadd.f32 %v14257_v21, %v5531_v61  ;;  %v5588_v50 = vadd.f32 %v14257_v21, %v5533_v31  ;;  %v11110_v52 = vunpack.c.h.bf16 %v11395_v24 }
  0x4d   : > { %12684 = vmatpush3.bf16.msra.mxu1 %v13991_v51  ;;  %12157 = vmatprep.subr.bf16.mxu0 %v14504_v3  ;;  %v5715_v48 = vpack.c.bf16 %v5630_v35, %v16933_v8  ;;  %v442_v51 = vadd.f32 %v14257_v21, %v387_v38  ;;  %v5633_v25 = vmax.f32 %v5585_v11, 0.0  ;;  %v5479_v38 = vunpack.c.h.bf16 %v10795_v62 }
  0x4e   : > { %12062 = vmatmul.mubr.bf16.gmra.mrb[16].mxu0 %v14507_v4  ;;  %12733 = vmatprep.subr.bf16.mxu1 %v13993_v17  ;;  %17203 = vst [vmem:[#allocation23_spill] sm:$0xff] %v14531_v39  ;;  %v716_v57 = vrot.slane %v14531_v39, 4  ;;  %v718_v17 = vrot.slane %v14543_v0, 4  ;;  %v5634_v33 = vmax.f32 %v5586_v12, 0.0  ;;  %v11261_v60 = vunpack.c.l.bf16 %v11426_v36 }
  0x4f   : > { %12638 = vmatmul.mubr.bf16.gmra.mrb[16].mxu1 %v5856_v10  ;;  %12065 = vmatprep.mubr.bf16.mxu0 %v14518_v18  ;;  %5739 = vst [vmem:[#allocation2 + $0x60] sm:$0xff] %v5715_v48  ;;  %v5859_v63 = vrot.slane %v5715_v48, 4  ;;  %v490_v6 = vmax.f32 %v442_v51, 0.0  ;;  %v5716_v10 = vpack.c.bf16 %v16933_v8, %v5631_v58  ;;  %v11109_v48 = vunpack.c.l.bf16 %v11395_v24 }
  0x50   : > { %12641 = vmatprep.mubr.bf16.mxu1 %v5858_v49  ;;  %v14547_v7 = vsel %vm692_vm0, %v714_v5, %v716_v57  ;;  %v389_v5 = vmul.f32 %v14248_v15, %v334_v14  ;;  %v14560_v32 = vsel %vm692_vm0, %v716_v57, %v718_v17  ;;  %v5717_v44 = vpack.c.bf16 %v5634_v33, %v5633_v25 }
  0x51   : > { %17205 = vst [vmem:[#allocation25_spill] sm:$0xff] %v14547_v7  ;;  %v5860_v16 = vsel %vm692_vm0, %v5857_v20, %v5859_v63  ;;  %v14553_v22 = vpack.c.bf16 %v490_v6, %v489_v59  ;;  %5740 = vst [vmem:[#allocation2 + $0x68] sm:$0xff] %v5716_v10  ;;  %v5861_v27 = vrot.slane %v5716_v10, 4  ;;  %v5534_v51 = vmul.f32 %v14248_v15, %v5479_v38 }
  0x52   : > { %17207 = vst [vmem:[#allocation27_spill] sm:$0xff] %v14560_v32  ;;  %v444_v20 = vadd.f32 %v14257_v21, %v389_v5  ;;  %5741 = vst [vmem:[#allocation2 + $0x70] sm:$0xff] %v5717_v44  ;;  %v5863_v57 = vrot.slane %v5717_v44, 4  ;;  %v445_v58 = vadd.f32 %v14257_v21, %v390_v46  ;;  %v392_v59 = vmul.f32 %v11109_v48, %v14248_v15 }
  0x53   : > { %17206 = vst [vmem:[#allocation26_spill] sm:$0xff] %v14553_v22  ;;  %v720_v26 = vrot.slane %v14553_v22, 4  ;;  %v5862_v35 = vsel %vm692_vm0, %v5859_v63, %v5861_v27  ;;  %v5636_v63 = vmax.f32 %v5588_v50, 0.0  ;;  %v5589_v6 = vadd.f32 %v14257_v21, %v5534_v51 }
  0x54   : > { %v492_v49 = vmax.f32 %v444_v20, 0.0  ;;  %v393_v61 = vmul.f32 %v11110_v52, %v14248_v15  ;;  %v5864_v10 = vsel %vm692_vm0, %v5861_v27, %v5863_v57  ;;  %v493_v11 = vmax.f32 %v445_v58, 0.0  ;;  %v11396_v52 = vld [vmem:[%s14237_s20 + $0x90] sm:$0xff]  }
  0x55   : > { %v14569_v41 = vsel %vm692_vm0, %v718_v17, %v720_v26  ;;  %v447_v14 = vadd.f32 %v14257_v21, %v392_v59  ;;  %v292_v17 = vld [vmem:[%s14237_s20 + $0x84] sm:$0xff]   ;;  %v5718_v24 = vpack.c.bf16 %v5636_v63, %v16933_v8  ;;  %v5637_v25 = vmax.f32 %v5589_v6, 0.0 }
  0x56   : > { %12066 = vmatmul.mubr.bf16.gmra.mrb[20].mxu0 %v14547_v7  ;;  %17208 = vst [vmem:[#allocation28_spill] sm:$0xff] %v14569_v41  ;;  %v14577_v62 = vpack.c.bf16 %v492_v49, %v16933_v8  ;;  %v448_v5 = vadd.f32 %v14257_v21, %v393_v61  ;;  %v14589_v29 = vpack.c.bf16 %v16933_v8, %v493_v11  ;;  %v340_v48 = vunpack.c.l.bf16 %v292_v17  ;;  %v11427_v11 = vld [vmem:[%s14237_s20 + $0x150] sm:$0xff]  }
  0x57   : > { %12642 = vmatmul.mubr.bf16.gmra.mrb[20].mxu1 %v5860_v16  ;;  %12069 = vmatprep.mubr.bf16.mxu0 %v14560_v32  ;;  %v11262_v16 = vunpack.c.h.bf16 %v11426_v36  ;;  %v495_v33 = vmax.f32 %v447_v14, 0.0  ;;  %v5536_v27 = vmul.f32 %v11261_v60, %v14248_v15  ;;  %5742 = vst [vmem:[#allocation2 + $0x78] sm:$0xff] %v5718_v24  ;;  %v14598_v20 = vpack.c.bf16 %v16933_v8, %v5637_v25 }
  0x58   : > { %12645 = vmatprep.mubr.bf16.mxu1 %v5862_v35  ;;  %17209 = vst [vmem:[#allocation29_spill] sm:$0xff] %v14577_v62  ;;  %v722_v12 = vrot.slane %v14577_v62, 4  ;;  %17210 = vst [vmem:[#allocation30_spill] sm:$0xff] %v14589_v29  ;;  %v10801_v35 = vld [vmem:[%s14237_s20 + $0x144] sm:$0xff]   ;;  %v5865_v31 = vrot.slane %v5718_v24, 4  ;;  %v496_v38 = vmax.f32 %v448_v5, 0.0  ;;  %v11113_v25 = vunpack.c.l.bf16 %v11396_v52 }
  0x59   : > { %v5537_v34 = vmul.f32 %v11262_v16, %v14248_v15  ;;  %v724_v44 = vrot.slane %v14589_v29, 4  ;;  %v5591_v46 = vadd.f32 %v14257_v21, %v5536_v27  ;;  %5743 = vst [vmem:[#allocation2 + $0x80] sm:$0xff] %v14598_v20  ;;  %v5867_v49 = vrot.slane %v14598_v20, 4  ;;  %v14626_v16 = vld [vmem:[%s16929_s2] ss:$0 sm:$0xff] }
  0x5a   : > { %v14595_v36 = vsel %vm692_vm0, %v720_v26, %v722_v12  ;;  %v5866_v26 = vsel %vm692_vm0, %v5863_v57, %v5865_v31  ;;  %v14607_v50 = vpack.c.bf16 %v496_v38, %v495_v33  ;;  %v5484_v51 = vunpack.c.l.bf16 %v10801_v35 }
  0x5b   : > { %17211 = vst [vmem:[#allocation31_spill] sm:$0xff] %v14595_v36  ;;  %v5592_v15 = vadd.f32 %v14257_v21, %v5537_v34  ;;  %v14611_v58 = vsel %vm692_vm0, %v722_v12, %v724_v44  ;;  %v5639_v59 = vmax.f32 %v5591_v46, 0.0  ;;  %v14616_v21 = vld [vmem:[%s16928_s1] ss:$0 sm:$0xff]  ;;  %v5868_v57 = vsel %vm692_vm0, %v5865_v31, %v5867_v49 }
  0x5c   : > { %17212 = vst [vmem:[#allocation32_spill] sm:$0xff] %v14607_v50  ;;  %17213 = vst [vmem:[#allocation33_spill] sm:$0xff] %v14611_v58  ;;  %v395_v63 = vmul.f32 %v14616_v21, %v340_v48  ;;  %v726_v6 = vrot.slane %v14607_v50, 4  ;;  %v5539_v61 = vmul.f32 %v14616_v21, %v5484_v51  ;;  %v5485_v24 = vunpack.c.h.bf16 %v10801_v35 }
  0x5d   : > { %v5640_v60 = vmax.f32 %v5592_v15, 0.0  ;;  %v11114_v34 = vunpack.c.h.bf16 %v11396_v52  ;;  %v398_v46 = vmul.f32 %v14616_v21, %v11113_v25  ;;  %v11265_v48 = vunpack.c.l.bf16 %v11427_v11 }
  0x5e   : > { %12070 = vmatmul.mubr.bf16.gmra.mrb[24].mxu0 %v14569_v41  ;;  %v450_v12 = vadd.f32 %v14626_v16, %v395_v63  ;;  %v14630_v5 = vsel %vm692_vm0, %v724_v44, %v726_v6  ;;  %v5594_v33 = vadd.f32 %v14626_v16, %v5539_v61  ;;  %v5540_v38 = vmul.f32 %v14616_v21, %v5485_v24 }
  0x5f   : > { %12646 = vmatmul.mubr.bf16.gmra.mrb[24].mxu1 %v5864_v10  ;;  %12073 = vmatprep.mubr.bf16.mxu0 %v14595_v36  ;;  %v341_v10 = vunpack.c.h.bf16 %v292_v17  ;;  %v5720_v14 = vpack.c.bf16 %v5640_v60, %v5639_v59  ;;  %17214 = vst [vmem:[#allocation34_spill] sm:$0xff] %v14630_v5  ;;  %v399_v15 = vmul.f32 %v14616_v21, %v11114_v34  ;;  %v11266_v61 = vunpack.c.h.bf16 %v11427_v11 }
  0x60   : > { %12649 = vmatprep.mubr.bf16.mxu1 %v5866_v26  ;;  %v498_v17 = vmax.f32 %v450_v12, 0.0  ;;  %v5642_v35 = vmax.f32 %v5594_v33, 0.0  ;;  %v5595_v52 = vadd.f32 %v14626_v16, %v5540_v38  ;;  %v453_v59 = vadd.f32 %v14626_v16, %v398_v46 }
  0x61   : > { %v396_v27 = vmul.f32 %v14616_v21, %v341_v10  ;;  %5744 = vst [vmem:[#allocation2 + $0x88] sm:$0xff] %v5720_v14  ;;  %v5869_v31 = vrot.slane %v5720_v14, 4  ;;  %v298_v10 = vld [vmem:[%s14237_s20 + $0x9c] sm:$0xff]   ;;  %v5542_v25 = vmul.f32 %v14616_v21, %v11265_v48  ;;  %v14797_v45 = vshrl.u32 %v14318_v19, 16 }
  0x62   : > { %v14641_v26 = vpack.c.bf16 %v498_v17, %v16933_v8  ;;  %v14647_v60 = vpack.c.bf16 %v5642_v35, %v16933_v8  ;;  %v5643_v12 = vmax.f32 %v5595_v52, 0.0  ;;  %v501_v24 = vmax.f32 %v453_v59, 0.0 }
  0x63   : > { %v451_v44 = vadd.f32 %v14626_v16, %v396_v27  ;;  %v5870_v51 = vsel %vm692_vm0, %v5867_v49, %v5869_v31  ;;  %v10807_v49 = vld [vmem:[%s14237_s20 + $0x15c] sm:$0xff]   ;;  %v5543_v17 = vmul.f32 %v14616_v21, %v11266_v61  ;;  %v5597_v46 = vadd.f32 %v14626_v16, %v5542_v25  ;;  %v11428_v61 = vld [vmem:[%s14237_s20 + $0x168] sm:$0xff]   ;;  %17237 = vst [vmem:[#allocation56_spill] sm:$0xff] %v14797_v45 }
  0x64   : > { %17215 = vst [vmem:[#allocation35_spill] sm:$0xff] %v14641_v26  ;;  %v728_v14 = vrot.slane %v14641_v26, 4  ;;  %5745 = vst [vmem:[#allocation2 + $0x90] sm:$0xff] %v14647_v60  ;;  %v5871_v33 = vrot.slane %v14647_v60, 4  ;;  %v14664_v38 = vpack.c.bf16 %v16933_v8, %v5643_v12  ;;  %v346_v35 = vunpack.c.l.bf16 %v298_v10 }
  0x65   : > { %v499_v63 = vmax.f32 %v451_v44, 0.0  ;;  %v347_v25 = vunpack.c.h.bf16 %v298_v10  ;;  %v1078_v47 = vrot.slane %v14797_v45, 3 }
  0x66   : > { %12074 = vmatmul.mubr.bf16.gmra.mrb[28].mxu0 %v14611_v58  ;;  %v14661_v11 = vsel %vm692_vm0, %v726_v6, %v728_v14  ;;  %v5872_v44 = vsel %vm692_vm0, %v5869_v31, %v5871_v33  ;;  %5746 = vst [vmem:[#allocation2 + $0x98] sm:$0xff] %v14664_v38  ;;  %v5645_v6 = vmax.f32 %v5597_v46, 0.0  ;;  %v5873_v52 = vrot.slane %v14664_v38, 4 }
  0x67   : > { %12650 = vmatmul.mubr.bf16.gmra.mrb[28].mxu1 %v5868_v57  ;;  %12077 = vmatprep.mubr.bf16.mxu0 %v14630_v5  ;;  %v454_v57 = vadd.f32 %v14626_v16, %v399_v15  ;;  %v14657_v27 = vpack.c.bf16 %v16933_v8, %v499_v63  ;;  %17217 = vst [vmem:[#allocation37_spill] sm:$0xff] %v14661_v11  ;;  %v5490_v63 = vunpack.c.l.bf16 %v10807_v49  ;;  %v11270_v58 = vunpack.c.h.bf16 %v11428_v61 }
  0x68   : > { %12653 = vmatprep.mubr.bf16.mxu1 %v5870_v51  ;;  %v5598_v51 = vadd.f32 %v14626_v16, %v5543_v17  ;;  %v401_v59 = vmul.f32 %v14616_v21, %v346_v35  ;;  %v5491_v35 = vunpack.c.h.bf16 %v10807_v49 }
  0x69   : > { %17216 = vst [vmem:[#allocation36_spill] sm:$0xff] %v14657_v27  ;;  %v502_v34 = vmax.f32 %v454_v57, 0.0  ;;  %v730_v15 = vrot.slane %v14657_v27, 4  ;;  %v11397_v57 = vld [vmem:[%s14237_s20 + $0xa8] sm:$0xff]   ;;  %v5545_v46 = vmul.f32 %v14616_v21, %v5490_v63  ;;  %v17221_v63 = vmov 0.0  }
  0x6a   : > { %v456_v17 = vadd.f32 %v14626_v16, %v401_v59  ;;  %v11269_v59 = vunpack.c.l.bf16 %v11428_v61  ;;  %v5549_v61 = vmul.f32 %v14616_v21, %v11270_v58 }
  0x6b   : > { %v14669_v48 = vpack.c.bf16 %v502_v34, %v501_v24  ;;  %v14679_v31 = vsel %vm692_vm0, %v728_v14, %v730_v15  ;;  %v5646_v24 = vmax.f32 %v5598_v51, 0.0  ;;  %v5874_v34 = vsel %vm692_vm0, %v5871_v33, %v5873_v52 }
  0x6c   : > { %17219 = vst [vmem:[#allocation39_spill] sm:$0xff] %v14679_v31  ;;  %v402_v14 = vmul.f32 %v14616_v21, %v347_v25  ;;  %v11117_v51 = vunpack.c.l.bf16 %v11397_v57  ;;  %v504_v10 = vmax.f32 %v456_v17, 0.0  ;;  %v5546_v33 = vmul.f32 %v14616_v21, %v5491_v35 }
  0x6d   : > { %17218 = vst [vmem:[#allocation38_spill] sm:$0xff] %v14669_v48  ;;  %v732_v12 = vrot.slane %v14669_v48, 4 }
  0x6e   : > { %12078 = vmatmul.mubr.bf16.gmra.mrb[32].mxu0 %v14661_v11  ;;  %v11118_v11 = vunpack.c.h.bf16 %v11397_v57 }
  0x6f   : > { %12654 = vmatmul.mubr.bf16.gmra.mrb[32].mxu1 %v5872_v44  ;;  %12081 = vmatprep.mubr.bf16.mxu0 %v14679_v31  ;;  %v14687_v8 = vsel %vm692_vm0, %v730_v15, %v732_v12  ;;  %v14689_v44 = vpack.c.bf16 %v5646_v24, %v5645_v6  ;;  %v5600_v31 = vadd.f32 %v14626_v16, %v5545_v46  ;;  %v304_v46 = vld [vmem:[%s14237_s20 + $0xb4] sm:$0xf] }
  0x70   : > { %17220 = vst [vmem:[#allocation40_spill] sm:$0xff] %v14687_v8  ;;  %12657 = vmatprep.mubr.bf16.mxu1 %v5874_v34  ;;  %v457_v15 = vadd.f32 %v14626_v16, %v402_v14  ;;  %v404_v6 = vmul.f32 %v14616_v21, %v11117_v51  ;;  %v14699_v24 = vpack.c.bf16 %v504_v10, %v17221_v63  ;;  %v352_v58 = vunpack.c.l.bf16 %v304_v46 }
  0x71   : > { %5747 = vst [vmem:[#allocation2 + $0xa0] sm:$0xff] %v14689_v44  ;;  %v5875_v49 = vrot.slane %v14689_v44, 4  ;;  %v5648_v25 = vmax.f32 %v5600_v31, 0.0  ;;  %v5601_v34 = vadd.f32 %v14626_v16, %v5546_v33  ;;  %v405_v17 = vmul.f32 %v14616_v21, %v11118_v11  ;;  %v10813_v33 = vld [vmem:[%s14237_s20 + $0x174] sm:$0xf] }
  0x72   : > { %17222 = vst [vmem:[#allocation41_spill] sm:$0xff] %v14699_v24  ;;  %v505_v35 = vmax.f32 %v457_v15, 0.0  ;;  %v459_v5 = vadd.f32 %v14626_v16, %v404_v6  ;;  %v734_v14 = vrot.slane %v14699_v24, 4  ;;  %v5548_v15 = vmul.f32 %v14616_v21, %v11269_v59 }
  0x73   : > { %v5876_v57 = vsel %vm692_vm0, %v5873_v52, %v5875_v49  ;;  %v14709_v51 = vpack.c.bf16 %v5648_v25, %v17221_v63  ;;  %v5649_v10 = vmax.f32 %v5601_v34, 0.0  ;;  %v460_v31 = vadd.f32 %v14626_v16, %v405_v17 }
  0x74   : > { %v14714_v11 = vpack.c.bf16 %v17221_v63, %v505_v35  ;;  %v507_v52 = vmax.f32 %v459_v5, 0.0  ;;  %v14719_v6 = vsel %vm692_vm0, %v732_v12, %v734_v14  ;;  %v5603_v5 = vadd.f32 %v14626_v16, %v5548_v15 }
  0x75   : > { %17224 = vst [vmem:[#allocation43_spill] sm:$0xff] %v14719_v6  ;;  %5748 = vst [vmem:[#allocation2 + $0xa8] sm:$0xff] %v14709_v51  ;;  %v14723_v25 = vpack.c.bf16 %v17221_v63, %v5649_v10  ;;  %v5877_v34 = vrot.slane %v14709_v51, 4  ;;  %v508_v17 = vmax.f32 %v460_v31, 0.0  ;;  %v5604_v59 = vadd.f32 %v14626_v16, %v5549_v61 }
  0x76   : > { %12082 = vmatmul.mubr.bf16.gmra.mrb[36].mxu0 %v14687_v8  ;;  %17223 = vst [vmem:[#allocation42_spill] sm:$0xff] %v14714_v11  ;;  %v5496_v8 = vunpack.c.l.bf16 %v10813_v33  ;;  %v407_v15 = vmul.f32 %v14616_v21, %v352_v58  ;;  %v609_v33 = vld [vmem:[#allocation2] sm:$0xf8] }
  0x77   : > { %12658 = vmatmul.mubr.bf16.gmra.mrb[36].mxu1 %v5876_v57  ;;  %17225 = vst [vmem:[#allocation44_spill] sm:$0xff] %v14723_v25  ;;  %12085 = vmatprep.mubr.bf16.mxu0 %v14719_v6  ;;  %v736_v57 = vrot.slane %v14714_v11, 4  ;;  %5749 = vst [vmem:[#allocation2 + $0xb0] sm:$0xff] %v14723_v25  ;;  %v5878_v12 = vsel %vm692_vm0, %v5875_v49, %v5877_v34  ;;  %v5879_v35 = vrot.slane %v14723_v25, 4  ;;  %v5651_v6 = vmax.f32 %v5603_v5, 0.0 }
  0x78   : > { %v14733_v10 = vpack.c.bf16 %v508_v17, %v507_v52  ;;  %12661 = vmatprep.mubr.bf16.mxu1 %v5878_v12  ;;  %v5652_v36 = vmax.f32 %v5604_v59, 0.0  ;;  %v5551_v49 = vmul.f32 %v14616_v21, %v5496_v8  ;;  %v462_v52 = vadd.f32 %v14626_v16, %v407_v15  ;;  %v14747_v17 = vld [vmem:[#allocation2] sm:$0xff] }
  0x79   : > { %v14736_v31 = vsel %vm692_vm0, %v734_v14, %v736_v57  ;;  %v5880_v61 = vsel %vm692_vm0, %v5877_v34, %v5879_v35  ;;  %v16944_v14 = vshrl.u32 %v14747_v17, 16  ;;  %v16946_v34 = vshll.u32 %v14747_v17, 16  ;;  %v5753_v12 = vld [vmem:[#allocation2] sm:$0xf8] }
  0x7a   : > { %17226 = vst [vmem:[#allocation45_spill] sm:$0xff] %v14733_v10  ;;  %17227 = vst [vmem:[#allocation46_spill] sm:$0xff] %v14736_v31  ;;  %v14741_v46 = vrot.slane %v14733_v10, 4  ;;  %v14744_v41 = vpack.c.bf16 %v5652_v36, %v5651_v6  ;;  %v510_v8 = vmax.f32 %v462_v52, 0.0  ;;  %v5606_v36 = vadd.f32 %v14626_v16, %v5551_v49 }
  0x7b   : > { %v1041_v6 = vshrl.u32 %v609_v33, 16  ;;  %v1044_v59 = vshll.u32 %v609_v33, 16  ;;  %v1054_v16 = vrot.slane %v16946_v34, 4  ;;  %v14772_v33 = vshrl.u32 %v14289_v54, 16 }
  0x7c   : > { %17228 = vst [vmem:[#allocation47_spill] sm:$0xff] %v14741_v46  ;;  %17229 = vst [vmem:[#allocation48_spill] sm:$0xff] %v14744_v41  ;;  %v14753_v5 = vsel %vm692_vm0, %v736_v57, %v14741_v46  ;;  %v16943_v21 = vrot.slane %v14744_v41, 4  ;;  %v14761_v58 = vpack.c.bf16 %v510_v8, %v17221_v63  ;;  %v5654_v15 = vmax.f32 %v5606_v36, 0.0 }
  0x7d   : > { %17230 = vst [vmem:[#allocation49_spill] sm:$0xff] %v14753_v5  ;;  %5750 = vst [vmem:[#allocation2 + $0xb8] sm:$0xff] %v14744_v41  ;;  %v1043_v49 = vrot.slane %v1041_v6, 3  ;;  %v1046_v52 = vrot.slane %v1044_v59, 4  ;;  %v14775_v8 = vshll.u32 %v14289_v54, 16  ;;  %v14779_v36 = vshrl.u32 %v14308_v9, 16 }
  0x7e   : > { %12086 = vmatmul.mubr.bf16.gmra.mrb[40].mxu0 %v14736_v31  ;;  %17231 = vst [vmem:[#allocation50_spill] sm:$0xff] %v14761_v58  ;;  %v5882_v57 = vsel %vm692_vm0, %v5879_v35, %v16943_v21  ;;  %607 = vst [vmem:[#allocation2 + $0xc0] sm:$0xff] %v14761_v58  ;;  %v6183_v35 = vshrl.u32 %v5753_v12, 16  ;;  %v5727_v21 = vpack.c.bf16 %v5654_v15, %v17221_v63  ;;  %v14859_v63 = vld [vmem:[#allocation2 + $0x30] sm:$0xff] }
  0x7f   : > { %12662 = vmatmul.mubr.bf16.gmra.mrb[40].mxu1 %v5880_v61  ;;  %12089 = vmatprep.mubr.bf16.mxu0 %v14753_v5  ;;  %v1051_v61 = vrot.slane %v16944_v14, 3  ;;  %17232 = vst [vmem:[#allocation51_spill] sm:$0xff] %v14772_v33  ;;  %17233 = vst [vmem:[#allocation52_spill] sm:$0xff] %v14775_v8  ;;  %v14782_v14 = vshll.u32 %v14308_v9, 16  ;;  %v14784_v5 = vld [vmem:[#allocation2 + $0x10] sm:$0xff]  ;;  %v1047_v59 = vor.u32 %v1046_v52, %v1043_v49  ;;  %v1063_v15 = vrot.slane %v14775_v8, 4 }
  0x80   : > { %12665 = vmatprep.mubr.bf16.mxu1 %v5882_v57  ;;  %v6186_v57 = vshll.u32 %v5753_v12, 16  ;;  %17234 = vst [vmem:[#allocation53_spill] sm:$0xff] %v14779_v36  ;;  %v1060_v12 = vrot.slane %v14772_v33, 3  ;;  %v6185_v32 = vrot.slane %v6183_v35, 3  ;;  %v14803_v49 = vshll.u32 %v14318_v19, 16  ;;  %v14807_v35 = vld [vmem:[#allocation2 + $0x18] sm:$0xff] }
  0x81   : > { %17235 = vst [vmem:[#allocation54_spill] sm:$0xff] %v14782_v14  ;;  %v14787_v34 = vor.u32 %v1054_v16, %v1051_v61  ;;  %v1069_v61 = vrot.slane %v14779_v36, 3  ;;  %v1072_v16 = vrot.slane %v14782_v14, 4  ;;  %17239 = vst [vmem:[#allocation58_spill] sm:$0xff] %v14807_v35  ;;  %v17243_v31 = vshll.u32 %v14784_v5, 16  ;;  %v14853_v9 = vld [vmem:[#allocation2 + $0x28] sm:$0xff] }
  0x82   : > { %v6188_v4 = vrot.slane %v6186_v57, 4  ;;  %17238 = vst [vmem:[#allocation57_spill] sm:$0xff] %v14803_v49  ;;  %v1064_v1 = vor.u32 %v1063_v15, %v1060_v12  ;;  %v17242_v57 = vshrl.u32 %v14784_v5, 16  ;;  %v17245_v12 = vshrl.u32 %v14807_v35, 16  ;;  %17250 = vst [vmem:[#allocation64_spill] sm:$0xff] %v14853_v9 }
  0x83   : > { %v1056_v52 = vsel %vm1039_vm1, %v1047_v59, %v14787_v34  ;;  %v6205_v53 = vrot.slane %v17243_v31, 4  ;;  %v14849_v19 = vshll.u32 %v14382_v13, 16  ;;  %17251 = vst [vmem:[#allocation65_spill] sm:$0xff] %v14859_v63 }
  0x84   : > { %v6189_v59 = vor.u32 %v6188_v4, %v6185_v32  ;;  %v6202_v55 = vrot.slane %v17242_v57, 3  ;;  %v6211_v15 = vrot.slane %v17245_v12, 3  ;;  %v13994_v12 = vld [vmem:[%s16930_s3 + $0x88] sm:$0xff]  }
  0x85   : > { %v14792_v7 = vld [vmem:[#allocation2 + $0xc0] sm:$0xf]  ;;  %17249 = vst [vmem:[#allocation63_spill] sm:$0xff] %v14849_v19 }
  0x86   : > { %v14794_v18 = vld [vmem:[#allocation2 + $0xc0] sm:$0x1f]  ;;  %v740_v6 = vrot.slane %v14792_v7, 4 }
  0x87   : > { %17236 = vst [vmem:[#allocation55_spill] sm:$0xff] %v14794_v18  ;;  %5751 = vst [vmem:[#allocation2 + $0xc0] sm:$0xff] %v5727_v21  ;;  %v14813_v21 = vld [vmem:[#allocation2 + $0x20] sm:$0xff]  ;;  %v6198_v18 = vsel %vm1039_vm1, %v6189_v59, %v14787_v34 }
  0x88   : > { %v741_v2 = vsel %vm692_vm0, %v14741_v46, %v740_v6  ;;  %17240 = vst [vmem:[#allocation59_spill] sm:$0xff] %v14813_v21  ;;  %v16963_v37 = vshll.u32 %v14813_v21, 16  ;;  %v14825_v6 = vshll.u32 %v14348_v43, 16  ;;  %v1073_v46 = vor.u32 %v1072_v16, %v1069_v61 }
  0x89   : > { %12090 = vmatmul.mubr.bf16.gmra.mrb[44].mxu0 %v741_v2  ;;  %v1081_v2 = vrot.slane %v14803_v49, 4  ;;  %v17247_v32 = vshrl.u32 %v14813_v21, 16  ;;  %v14838_v43 = vshrl.u32 %v14382_v13, 16  ;;  %v1065_v16 = vsel %vm1039_vm1, %v14787_v34, %v1064_v1  ;;  %v13996_v13 = vld [vmem:[%s16930_s3 + $0x90] sm:$0xff]  }
  0x8a   : > { %12109 = vmatprep.mubr.bf16.mxu0 %v1056_v52  ;;  %17244 = vst [vmem:[#allocation61_spill] sm:$0xff] %v14825_v6  ;;  %v17246_v52 = vshll.u32 %v14807_v35, 16  ;;  %v6223_v31 = vrot.slane %v16963_v37, 4  ;;  %v1090_v37 = vrot.slane %v14825_v6, 4  ;;  %v6206_v6 = vor.u32 %v6205_v53, %v6202_v55 }
  0x8b   : > { %v6220_v57 = vrot.slane %v17247_v32, 3  ;;  %17248 = vst [vmem:[#allocation62_spill] sm:$0xff] %v14838_v43  ;;  %v1074_v49 = vsel %vm1039_vm1, %v1064_v1, %v1073_v46  ;;  %v14867_v45 = vor.u32 %v1081_v2, %v1078_v47  ;;  %v1096_v59 = vrot.slane %v14838_v43, 3 }
  0x8c   : > { %v6214_v4 = vrot.slane %v17246_v52, 4  ;;  %v1087_v52 = vrot.slane %v14818_v30, 3  ;;  %v17252_v30 = vrot.slane %v14744_v41, 4  ;;  %v1099_v21 = vrot.slane %v14849_v19, 4 }
  0x8d   : > { %17253 = vst [vmem:[#allocation66_spill] sm:$0xff] %v14867_v45  ;;  %v14869_v54 = vor.u32 %v6223_v31, %v6220_v57  ;;  %v14878_v53 = vshrl.u32 %v14396_v28, 16  ;;  %v14881_v55 = vshll.u32 %v14396_v28, 16  ;;  %v17256_v1 = vshrl.u32 %v14853_v9, 16 }
  0x8e   : > { %v14840_v61 = vld [vmem:[#allocation2 + $0xc0] sm:$0xf]  ;;  %v6215_v58 = vor.u32 %v6214_v4, %v6211_v15  ;;  %v17258_v15 = vshrl.u32 %v14859_v63, 16  ;;  %v14894_v57 = vshrl.u32 %v14416_v42, 16  ;;  %v1083_v31 = vsel %vm1039_vm1, %v1073_v46, %v14867_v45  ;;  %v13995_v46 = vld [vmem:[%s16930_s3 + $0x88] sm:$0xff]  }
  0x8f   : > { %v5883_v32 = vrot.slane %v14840_v61, 4  ;;  %17254 = vst [vmem:[#allocation67_spill] sm:$0xff] %v14878_v53  ;;  %17255 = vst [vmem:[#allocation68_spill] sm:$0xff] %v14881_v55  ;;  %v6229_v47 = vrot.slane %v17256_v1, 3  ;;  %v1105_v1 = vrot.slane %v14878_v53, 3  ;;  %v14928_v28 = vshrl.u32 %v14455_v23, 16 }
  0x90   : > { %v6238_v4 = vrot.slane %v17258_v15, 3  ;;  %17260 = vst [vmem:[#allocation69_spill] sm:$0xff] %v14894_v57  ;;  %v1114_v15 = vrot.slane %v14894_v57, 3 }
  0x91   : > { %v5884_v35 = vsel %vm692_vm0, %v17252_v30, %v5883_v32  ;;  %12110 = vmatmul.mubr.bf16.vlgmr.msra.gmra.mrb[0].mxu0 %v1065_v16  ;;  %v1091_v30 = vor.u32 %v1090_v37, %v1087_v52  ;;  %v6216_v16 = vsel %vm1039_vm1, %v6206_v6, %v6215_v58  ;;  %v14904_v52 = vsel %vm1039_vm1, %v6215_v58, %v14869_v54 }
  0x92   : > { %12666 = vmatmul.mubr.bf16.gmra.mrb[44].mxu1 %v5884_v35  ;;  %12158 = vmatpush3.bf16.msra.mxu0 %v14504_v3  ;;  %v17257_v35 = vshll.u32 %v14853_v9, 16  ;;  %v17259_v3 = vshll.u32 %v14859_v63, 16  ;;  %v1100_v32 = vor.u32 %v1099_v21, %v1096_v59  ;;  %17265 = vst [vmem:[#allocation74_spill] sm:$0xff] %v14928_v28 }
  0x93   : > { %12685 = vmatprep.mubr.bf16.mxu1 %v6198_v18  ;;  %12113 = vmatprep.mubr.bf16.mxu0 %v1074_v49  ;;  %v6207_v18 = vsel %vm1039_vm1, %v14787_v34, %v6206_v6  ;;  %v14897_v49 = vshll.u32 %v14416_v42, 16  ;;  %v1108_v34 = vrot.slane %v14881_v55, 4  ;;  %v14917_v58 = vsel %vm1039_vm1, %v14867_v45, %v1091_v30  ;;  %v14944_v42 = vld [vmem:[#allocation2 + $0x48] sm:$0xff] }
  0x94   : > { %12159 = vmatprep.subr.bf16.mxu0 %v13994_v12  ;;  %v6232_v2 = vrot.slane %v17257_v35, 4  ;;  %v6241_v37 = vrot.slane %v17259_v3, 4  ;;  %v14908_v35 = vld [vmem:[#allocation2 + $0x38] sm:$0xff]  ;;  %17263 = vst [vmem:[#allocation72_spill] sm:$0xff] %v14917_v58  ;;  %17269 = vst [vmem:[#allocation78_spill] sm:$0xff] %v14944_v42  ;;  %v14954_v45 = vsel %vm1039_vm1, %v1091_v30, %v1100_v32 }
  0x95   : > { %17261 = vst [vmem:[#allocation70_spill] sm:$0xff] %v14897_v49  ;;  %17262 = vst [vmem:[#allocation71_spill] sm:$0xff] %v14908_v35  ;;  %v1117_v3 = vrot.slane %v14897_v49, 4  ;;  %v17272_v57 = vshll.u32 %v14908_v35, 16 }
  0x96   : > { %12160 = vmatpush3.bf16.msra.mxu0 %v13994_v12  ;;  %v6233_v21 = vor.u32 %v6232_v2, %v6229_v47  ;;  %v14919_v6 = vor.u32 %v6241_v37, %v6238_v4  ;;  %v14921_v12 = vld [vmem:[#allocation2 + $0x40] sm:$0xff]  ;;  %v14933_v47 = vld [vmem:[%s16930_s3 + $0x90] sm:$0xff]   ;;  %v14936_v2 = vshll.u32 %v14455_v23, 16  ;;  %v14939_v4 = vshrl.u32 %v14475_v40, 16  ;;  %17270 = vst [vmem:[#allocation79_spill] sm:$0xff] %v14954_v45 }
  0x97   : > { %12161 = vmatprep.subr.bf16.mxu0 %v13996_v13  ;;  %17264 = vst [vmem:[#allocation73_spill] sm:$0xff] %v14921_v12  ;;  %v14942_v37 = vshll.u32 %v14475_v40, 16  ;;  %v1109_v23 = vor.u32 %v1108_v34, %v1105_v1  ;;  %v17271_v40 = vshrl.u32 %v14908_v35, 16  ;;  %v6250_v59 = vrot.slane %v17272_v57, 4 }
  0x98   : > { %17266 = vst [vmem:[#allocation75_spill] sm:$0xff] %v14936_v2  ;;  %17267 = vst [vmem:[#allocation76_spill] sm:$0xff] %v14939_v4  ;;  %v17273_v63 = vshrl.u32 %v14921_v12, 16  ;;  %v14972_v57 = vsel %vm1039_vm1, %v6233_v21, %v14919_v6  ;;  %v17275_v1 = vshll.u32 %v14921_v12, 16  ;;  %v1126_v53 = vrot.slane %v14936_v2, 4 }
  0x99   : > { %12114 = vmatmul.mubr.bf16.gmra.mrb[4].mxu0 %v1083_v31  ;;  %17268 = vst [vmem:[#allocation77_spill] sm:$0xff] %v14942_v37  ;;  %v14115_v31 = vld [vmem:[%s16930_s3 + $0x80] sm:$0xff]   ;;  %v6247_v49 = vrot.slane %v17271_v40, 3  ;;  %v6234_v40 = vsel %vm1039_vm1, %v14869_v54, %v6233_v21  ;;  %v1135_v30 = vrot.slane %v14942_v37, 4  ;;  %v1118_v21 = vor.u32 %v1117_v3, %v1114_v15  ;;  %v13999_v3 = vld [vmem:[%s16930_s3 + $0x98] sm:$0xff]  }
  0x9a   : > { %12686 = vmatmul.mubr.bf16.vlgmr.msra.gmra.mrb[0].mxu1 %v6207_v18  ;;  %v13998_v18 = vld [vmem:[%s16930_s3 + $0x98] sm:$0xff]   ;;  %12117 = vmatprep.mubr.bf16.mxu0 %v14917_v58  ;;  %v6256_v55 = vrot.slane %v17273_v63, 3  ;;  %v6259_v34 = vrot.slane %v17275_v1, 4  ;;  %v1123_v63 = vrot.slane %v14928_v28, 3  ;;  %v1132_v58 = vrot.slane %v14939_v4, 3  ;;  %v14000_v54 = vld [vmem:[%s16930_s3 + $0xa0] sm:$0xff]  }
  0x9b   : > { %12734 = vmatpush3.bf16.msra.mxu1 %v14115_v31  ;;  %12689 = vmatprep.mubr.bf16.mxu1 %v6216_v16  ;;  %v14964_v31 = vld [vmem:[#allocation2 + $0x50] sm:$0xff]  ;;  %v17276_v16 = vshrl.u32 %v14944_v42, 16  ;;  %v14989_v1 = vshrl.u32 %v14491_v56, 16  ;;  %v14992_v12 = vshll.u32 %v14491_v56, 16  ;;  %v6251_v15 = vor.u32 %v6250_v59, %v6247_v49 }
  0x9c   : > { %12735 = vmatprep.subr.bf16.mxu1 %v13995_v46  ;;  %17274 = vst [vmem:[#allocation80_spill] sm:$0xff] %v14964_v31  ;;  %12162 = vmatpush3.bf16.msra.mxu0 %v13996_v13  ;;  %v14986_v13 = vsel %vm1039_vm1, %v1100_v32, %v1109_v23  ;;  %v17281_v19 = vshrl.u32 %v14964_v31, 16  ;;  %v15002_v32 = vshrl.u32 %v14531_v39, 16  ;;  %v15008_v56 = vshll.u32 %v14531_v39, 16 }
  0x9d   : > { %v6265_v35 = vrot.slane %v17276_v16, 3  ;;  %12163 = vmatprep.subr.bf16.mxu0 %v13998_v18  ;;  %17277 = vst [vmem:[#allocation81_spill] sm:$0xff] %v14986_v13  ;;  %17278 = vst [vmem:[#allocation82_spill] sm:$0xff] %v14989_v1  ;;  %v17280_v16 = vshll.u32 %v14944_v42, 16  ;;  %v15010_v42 = vld [vmem:[#allocation2 + $0x58] sm:$0xff]  ;;  %v1127_v49 = vor.u32 %v1126_v53, %v1123_v63  ;;  %v1136_v59 = vor.u32 %v1135_v30, %v1132_v58 }
  0x9e   : > { %17279 = vst [vmem:[#allocation83_spill] sm:$0xff] %v14992_v12  ;;  %v6274_v43 = vrot.slane %v17281_v19, 3  ;;  %17283 = vst [vmem:[#allocation84_spill] sm:$0xff] %v15002_v32  ;;  %v1141_v39 = vrot.slane %v14989_v1, 3  ;;  %v15027_v53 = vsel %vm1039_vm1, %v1109_v23, %v1118_v21  ;;  %v1150_v30 = vrot.slane %v15002_v32, 3 }
  0x9f   : > { %12736 = vmatpush3.bf16.msra.mxu1 %v13995_v46  ;;  %v6268_v9 = vrot.slane %v17280_v16, 4  ;;  %v17282_v46 = vshll.u32 %v14964_v31, 16  ;;  %17284 = vst [vmem:[#allocation85_spill] sm:$0xff] %v15008_v56  ;;  %17285 = vst [vmem:[#allocation86_spill] sm:$0xff] %v15010_v42  ;;  %v1144_v16 = vrot.slane %v14992_v12, 4  ;;  %v15022_v31 = vld [vmem:[#allocation2 + $0x60] sm:$0xff] }
  0xa0   : > { %12737 = vmatprep.subr.bf16.mxu1 %v14933_v47  ;;  %12164 = vmatpush3.bf16.msra.mxu0 %v13998_v18  ;;  %v14002_v18 = vld [vmem:[%s16930_s3 + $0xa8] sm:$0xff]   ;;  %17286 = vst [vmem:[#allocation87_spill] sm:$0xff] %v15022_v31  ;;  %17287 = vst [vmem:[#allocation88_spill] sm:$0xff] %v15027_v53  ;;  %v17288_v63 = vshrl.u32 %v15010_v42, 16  ;;  %v17289_v23 = vshll.u32 %v15010_v42, 16  ;;  %v15123_v42 = vld [vmem:[#allocation2 + $0x78] sm:$0xff] }
  0xa1   : > { %v6277_v37 = vrot.slane %v17282_v46, 4  ;;  %12118 = vmatmul.mubr.bf16.gmra.mrb[8].mxu0 %v14954_v45  ;;  %v6260_v46 = vor.u32 %v6259_v34, %v6256_v55  ;;  %v6269_v55 = vor.u32 %v6268_v9, %v6265_v35  ;;  %12165 = vmatprep.subr.bf16.mxu0 %v14000_v54  ;;  %v1153_v34 = vrot.slane %v15008_v56, 4  ;;  %v15094_v56 = vld [vmem:[#allocation2 + $0x70] sm:$0xff] }
  0xa2   : > { %12690 = vmatmul.mubr.bf16.gmra.mrb[4].mxu1 %v14904_v52  ;;  %12121 = vmatprep.mubr.bf16.mxu0 %v14986_v13  ;;  %v6283_v19 = vrot.slane %v17288_v63, 3  ;;  %v6286_v52 = vrot.slane %v17289_v23, 4  ;;  %v15042_v9 = vshrl.u32 %v14543_v0, 16  ;;  %v15056_v63 = vsel %vm1039_vm1, %v1127_v49, %v1136_v59  ;;  %17299 = vst [vmem:[#allocation96_spill] sm:$0xff] %v15094_v56 }
  0xa3   : > { %12693 = vmatprep.mubr.bf16.mxu1 %v6234_v40  ;;  %12738 = vmatpush3.bf16.msra.mxu1 %v14933_v47  ;;  %v15030_v58 = vor.u32 %v6277_v37, %v6274_v43  ;;  %v14001_v40 = vld [vmem:[%s16930_s3 + $0xa0] sm:$0xff]   ;;  %v6252_v43 = vsel %vm1039_vm1, %v14919_v6, %v6251_v15  ;;  %v15047_v35 = vsel %vm1039_vm1, %v6251_v15, %v6260_v46  ;;  %v15053_v37 = vshll.u32 %v14543_v0, 16  ;;  %v14003_v15 = vld [vmem:[%s16930_s3 + $0xa8] sm:$0xff]  }
  0xa4   : > { %12739 = vmatprep.subr.bf16.mxu1 %v13999_v3  ;;  %17290 = vst [vmem:[#allocation89_spill] sm:$0xff] %v15042_v9  ;;  %12166 = vmatpush3.bf16.msra.mxu0 %v14000_v54  ;;  %v15050_v47 = vsel %vm1039_vm1, %v1118_v21, %v1127_v49  ;;  %17293 = vst [vmem:[#allocation92_spill] sm:$0xff] %v15056_v63  ;;  %v1145_v23 = vor.u32 %v1144_v16, %v1141_v39  ;;  %v17294_v13 = vshrl.u32 %v15022_v31, 16  ;;  %v14006_v16 = vld [vmem:[%s16930_s3 + $0xb8] sm:$0xff]  }
  0xa5   : > { %17291 = vst [vmem:[#allocation90_spill] sm:$0xff] %v15050_v47  ;;  %17292 = vst [vmem:[#allocation91_spill] sm:$0xff] %v15053_v37  ;;  %12167 = vmatprep.subr.bf16.mxu0 %v14002_v18  ;;  %v17295_v45 = vshll.u32 %v15022_v31, 16  ;;  %v15066_v21 = vsel %vm1039_vm1, %v6260_v46, %v6269_v55  ;;  %v15070_v0 = vsel %vm1039_vm1, %v6269_v55, %v15030_v58  ;;  %v15073_v39 = vshrl.u32 %v14553_v22, 16 }
  0xa6   : > { %v6292_v54 = vrot.slane %v17294_v13, 3  ;;  %v15076_v13 = vshll.u32 %v14553_v22, 16  ;;  %v15084_v46 = vor.u32 %v1153_v34, %v1150_v30  ;;  %v6287_v49 = vor.u32 %v6286_v52, %v6283_v19  ;;  %v14005_v19 = vld [vmem:[%s16930_s3 + $0xb0] sm:$0xff]  }
  0xa7   : > { %v6295_v6 = vrot.slane %v17295_v45, 4  ;;  %12740 = vmatpush3.bf16.msra.mxu1 %v13999_v3  ;;  %17296 = vst [vmem:[#allocation93_spill] sm:$0xff] %v15073_v39  ;;  %v14004_v45 = vld [vmem:[%s16930_s3 + $0xb0] sm:$0xff]   ;;  %v1159_v55 = vrot.slane %v15042_v9, 3  ;;  %v15087_v3 = vld [vmem:[#allocation2 + $0x68] sm:$0xff]  ;;  %v1162_v22 = vrot.slane %v15053_v37, 4  ;;  %v15100_v30 = vsel %vm1039_vm1, %v1136_v59, %v1145_v23 }
  0xa8   : > { %17297 = vst [vmem:[#allocation94_spill] sm:$0xff] %v15076_v13  ;;  %17298 = vst [vmem:[#allocation95_spill] sm:$0xff] %v15087_v3  ;;  %v17031_v31 = vshrl.u32 %v15087_v3, 16  ;;  %12741 = vmatprep.subr.bf16.mxu1 %v14001_v40  ;;  %12168 = vmatpush3.bf16.msra.mxu0 %v14002_v18  ;;  %v15108_v34 = vshll.u32 %v14577_v62, 16  ;;  %v1168_v52 = vrot.slane %v15073_v39, 3  ;;  %v15116_v59 = vshrl.u32 %v14589_v29, 16 }
  0xa9   : > { %12122 = vmatmul.mubr.bf16.gmra.mrb[12].mxu0 %v15027_v53  ;;  %17300 = vst [vmem:[#allocation97_spill] sm:$0xff] %v15100_v30  ;;  %v15102_v18 = vor.u32 %v6295_v6, %v6292_v54  ;;  %v15119_v54 = vshll.u32 %v14589_v29, 16  ;;  %12169 = vmatprep.subr.bf16.mxu0 %v14004_v45  ;;  %v15134_v29 = vsel %vm1039_vm1, %v15030_v58, %v6287_v49  ;;  %v15138_v39 = vld [vmem:[#allocation2 + $0x80] sm:$0xff]  ;;  %v17310_v53 = vshll.u32 %v15094_v56, 16 }
  0xaa   : > { %12694 = vmatmul.mubr.bf16.gmra.mrb[8].mxu1 %v14972_v57  ;;  %12125 = vmatprep.mubr.bf16.mxu0 %v15050_v47  ;;  %v15105_v57 = vshrl.u32 %v14577_v62, 16  ;;  %17302 = vst [vmem:[#allocation99_spill] sm:$0xff] %v15108_v34  ;;  %17303 = vst [vmem:[#allocation100_spill] sm:$0xff] %v15116_v59  ;;  %v6301_v6 = vrot.slane %v17031_v31, 3  ;;  %v17306_v31 = vshll.u32 %v15087_v3, 16  ;;  %v14007_v47 = vld [vmem:[%s16930_s3 + $0xb8] sm:$0xff]   ;;  %v1163_v9 = vor.u32 %v1162_v22, %v1159_v55 }
  0xab   : > { %12697 = vmatprep.mubr.bf16.mxu1 %v6252_v43  ;;  %v1171_v43 = vrot.slane %v15076_v13, 4  ;;  %12742 = vmatpush3.bf16.msra.mxu1 %v14001_v40  ;;  %17304 = vst [vmem:[#allocation101_spill] sm:$0xff] %v15119_v54  ;;  %v15130_v40 = vsel %vm1039_vm1, %v1145_v23, %v15084_v46  ;;  %17307 = vst [vmem:[#allocation103_spill] sm:$0xff] %v15138_v39  ;;  %v17309_v23 = vshrl.u32 %v15094_v56, 16  ;;  %v6313_v58 = vrot.slane %v17310_v53, 4 }
  0xac   : > { %17301 = vst [vmem:[#allocation98_spill] sm:$0xff] %v15105_v57  ;;  %12743 = vmatprep.subr.bf16.mxu1 %v14003_v15  ;;  %12170 = vmatpush3.bf16.msra.mxu0 %v14004_v45  ;;  %17305 = vst [vmem:[#allocation102_spill] sm:$0xff] %v15130_v40  ;;  %v6304_v13 = vrot.slane %v17306_v31, 4  ;;  %v15144_v45 = vld [vmem:[%s16930_s3 + $0xc0] sm:$0xff]   ;;  %v1177_v37 = vrot.slane %v15105_v57, 3  ;;  %v1180_v31 = vrot.slane %v15108_v34, 4  ;;  %v15157_v3 = vsel %vm1039_vm1, %v6287_v49, %v15102_v18 }
  0xad   : > { %12171 = vmatprep.subr.bf16.mxu0 %v14006_v16  ;;  %17308 = vst [vmem:[#allocation104_spill] sm:$0xff] %v15144_v45  ;;  %v6310_v62 = vrot.slane %v17309_v23, 3  ;;  %v1186_v32 = vrot.slane %v15116_v59, 3  ;;  %v1189_v23 = vrot.slane %v15119_v54, 4  ;;  %v17311_v53 = vshrl.u32 %v15123_v42, 16 }
  0xae   : > { %v17312_v57 = vshll.u32 %v15123_v42, 16  ;;  %v17313_v12 = vshrl.u32 %v14598_v20, 16  ;;  %v15168_v4 = vshrl.u32 %v14607_v50, 16  ;;  %v17315_v22 = vshll.u32 %v15138_v39, 16 }
  0xaf   : > { %12744 = vmatpush3.bf16.msra.mxu1 %v14003_v15  ;;  %v6319_v56 = vrot.slane %v17311_v53, 3  ;;  %v15175_v49 = vshll.u32 %v14607_v50, 16  ;;  %v15178_v55 = vshrl.u32 %v14641_v26, 16 }
  0xb0   : > { %v6322_v34 = vrot.slane %v17312_v57, 4  ;;  %v6328_v1 = vrot.slane %v17313_v12, 3  ;;  %17314 = vst [vmem:[#allocation105_spill] sm:$0xff] %v15168_v4  ;;  %12745 = vmatprep.subr.bf16.mxu1 %v14005_v19  ;;  %12172 = vmatpush3.bf16.msra.mxu0 %v14006_v16  ;;  %v6331_v15 = vrot.slane %v17315_v22, 4  ;;  %v15181_v12 = vshll.u32 %v14641_v26, 16  ;;  %v15185_v57 = vld [vmem:[#allocation2 + $0x88] sm:$0xff] }
  0xb1   : > { %12126 = vmatmul.mubr.bf16.gmra.mrb[16].mxu0 %v15056_v63  ;;  %17316 = vst [vmem:[#allocation106_spill] sm:$0xff] %v15175_v49  ;;  %17317 = vst [vmem:[#allocation107_spill] sm:$0xff] %v15178_v55  ;;  %v1172_v16 = vor.u32 %v1171_v43, %v1168_v52  ;;  %v15192_v63 = vld [vmem:[%s16930_s3 + $0xc0] sm:$0xff]   ;;  %12221 = vmatprep.subr.bf16.mxu0 %v15144_v45  ;;  %v15205_v52 = vsel %vm1039_vm1, %v15084_v46, %v1163_v9  ;;  %v15211_v26 = vshll.u32 %v14669_v48, 16 }
  0xb2   : > { %12698 = vmatmul.mubr.bf16.gmra.mrb[12].mxu1 %v15047_v35  ;;  %17318 = vst [vmem:[#allocation108_spill] sm:$0xff] %v15181_v12  ;;  %12129 = vmatprep.mubr.bf16.mxu0 %v15100_v30  ;;  %v6305_v35 = vor.u32 %v6304_v13, %v6301_v6  ;;  %17319 = vst [vmem:[#allocation109_spill] sm:$0xff] %v15185_v57  ;;  %v15200_v13 = vshll.u32 %v14657_v27, 16  ;;  %v6314_v43 = vor.u32 %v6313_v58, %v6310_v62 }
  0xb3   : > { %12701 = vmatprep.mubr.bf16.mxu1 %v15066_v21  ;;  %17320 = vst [vmem:[#allocation110_spill] sm:$0xff] %v15192_v63  ;;  %v15197_v21 = vshrl.u32 %v14657_v27, 16  ;;  %12746 = vmatpush3.bf16.msra.mxu1 %v14005_v19  ;;  %17323 = vst [vmem:[#allocation113_spill] sm:$0xff] %v15205_v52  ;;  %v15208_v6 = vshrl.u32 %v14669_v48, 16  ;;  %v1195_v50 = vrot.slane %v15168_v4, 3  ;;  %v1198_v22 = vrot.slane %v15175_v49, 4 }
  0xb4   : > { %17322 = vst [vmem:[#allocation112_spill] sm:$0xff] %v15200_v13  ;;  %17325 = vst [vmem:[#allocation115_spill] sm:$0xff] %v15211_v26  ;;  %12747 = vmatprep.subr.bf16.mxu1 %v14007_v47  ;;  %v1204_v19 = vrot.slane %v15178_v55, 3  ;;  %v1207_v53 = vrot.slane %v15181_v12, 4  ;;  %v15218_v30 = vsel %vm1039_vm1, %v1163_v9, %v1172_v16  ;;  %v6306_v62 = vsel %vm1039_vm1, %v15102_v18, %v6305_v35 }
  0xb5   : > { %17321 = vst [vmem:[#allocation111_spill] sm:$0xff] %v15197_v21  ;;  %17324 = vst [vmem:[#allocation114_spill] sm:$0xff] %v15208_v6  ;;  %v17327_v46 = vshrl.u32 %v15185_v57, 16  ;;  %v17328_v48 = vshll.u32 %v15185_v57, 16  ;;  %v17329_v45 = vshrl.u32 %v14647_v60, 16  ;;  %v17330_v49 = vshll.u32 %v14647_v60, 16 }
  0xb6   : > { %17326 = vst [vmem:[#allocation116_spill] sm:$0xff] %v15218_v30  ;;  %v1213_v12 = vrot.slane %v15197_v21, 3  ;;  %v1216_v9 = vrot.slane %v15200_v13, 4  ;;  %v1222_v39 = vrot.slane %v15208_v6, 3  ;;  %v1225_v18 = vrot.slane %v15211_v26, 4 }
  0xb7   : > { %v6337_v58 = vrot.slane %v17327_v46, 3  ;;  %v6340_v27 = vrot.slane %v17328_v48, 4  ;;  %v6346_v4 = vrot.slane %v17329_v45, 3  ;;  %v6349_v55 = vrot.slane %v17330_v49, 4  ;;  %12748 = vmatpush3.bf16.msra.mxu1 %v14007_v47 }
  0xb8   : > { %12797 = vmatprep.subr.bf16.mxu1 %v15192_v63  ;;  %v15240_v48 = vsel %vm1039_vm1, %v6305_v35, %v6314_v43  ;;  %v1181_v45 = vor.u32 %v1180_v31, %v1177_v37  ;;  %v1190_v46 = vor.u32 %v1189_v23, %v1186_v32  ;;  %v6323_v57 = vor.u32 %v6322_v34, %v6319_v56 }
  0xb9   : > { %12130 = vmatmul.mubr.bf16.gmra.mrb[20].mxu0 %v15130_v40  ;;  %v6332_v26 = vor.u32 %v6331_v15, %v6328_v1  ;;  %v1199_v63 = vor.u32 %v1198_v22, %v1195_v50  ;;  %v1208_v6 = vor.u32 %v1207_v53, %v1204_v19  ;;  %v15246_v13 = vor.u32 %v6349_v55, %v6346_v4 }
  0xba   : > { %12702 = vmatmul.mubr.bf16.gmra.mrb[16].mxu1 %v15070_v0  ;;  %12133 = vmatprep.mubr.bf16.mxu0 %v15205_v52  ;;  %v6341_v0 = vor.u32 %v6340_v27, %v6337_v58  ;;  %v1217_v40 = vor.u32 %v1216_v9, %v1213_v12  ;;  %v15248_v35 = vor.u32 %v1225_v18, %v1222_v39  ;;  %v17331_v37 = vshrl.u32 %v14664_v38, 16 }
  0xbb   : > { %12705 = vmatprep.mubr.bf16.mxu1 %v15134_v29  ;;  %v17332_v49 = vshll.u32 %v14664_v38, 16  ;;  %v17333_v29 = vshrl.u32 %v14689_v44, 16  ;;  %v17334_v56 = vshll.u32 %v14689_v44, 16  ;;  %v15259_v50 = vshrl.u32 %v14699_v24, 16 }
  0xbc   : > { %v6355_v31 = vrot.slane %v17331_v37, 3  ;;  %v15262_v27 = vshll.u32 %v14699_v24, 16  ;;  %v15265_v4 = vsel %vm1039_vm1, %v1172_v16, %v1181_v45  ;;  %v15268_v32 = vsel %vm1039_vm1, %v1181_v45, %v1190_v46 }
  0xbd   : > { %v6358_v47 = vrot.slane %v17332_v49, 4  ;;  %v6364_v52 = vrot.slane %v17333_v29, 3  ;;  %v6367_v1 = vrot.slane %v17334_v56, 4  ;;  %17335 = vst [vmem:[#allocation117_spill] sm:$0xff] %v15259_v50  ;;  %17337 = vst [vmem:[#allocation119_spill] sm:$0xff] %v15265_v4  ;;  %v6324_v39 = vsel %vm1039_vm1, %v6314_v43, %v6323_v57 }
  0xbe   : > { %17336 = vst [vmem:[#allocation118_spill] sm:$0xff] %v15262_v27  ;;  %17338 = vst [vmem:[#allocation120_spill] sm:$0xff] %v15268_v32  ;;  %v15272_v34 = vshrl.u32 %v14714_v11, 16  ;;  %v15275_v23 = vsel %vm1039_vm1, %v6323_v57, %v6332_v26  ;;  %v15278_v15 = vsel %vm1039_vm1, %v1190_v46, %v1199_v63  ;;  %v15281_v55 = vsel %vm1039_vm1, %v1199_v63, %v1208_v6  ;;  %v14124_v29 = vld [vmem:[#allocation2] sm:$0xf0] }
  0xbf   : > { %17340 = vst [vmem:[#allocation122_spill] sm:$0xff] %v15278_v15  ;;  %17341 = vst [vmem:[#allocation123_spill] sm:$0xff] %v15281_v55  ;;  %v15284_v12 = vshll.u32 %v14714_v11, 16  ;;  %v15287_v16 = vsel %vm1039_vm1, %v6332_v26, %v6341_v0  ;;  %v15291_v53 = vsel %vm1039_vm1, %v6341_v0, %v15246_v13  ;;  %v15294_v22 = vsel %vm1039_vm1, %v1208_v6, %v1217_v40 }
  0xc0   : > { %17339 = vst [vmem:[#allocation121_spill] sm:$0xff] %v15272_v34  ;;  %17343 = vst [vmem:[#allocation125_spill] sm:$0xff] %v15294_v22  ;;  %v15298_v57 = vsel %vm1039_vm1, %v1217_v40, %v15248_v35  ;;  %v6359_v63 = vor.u32 %v6358_v47, %v6355_v31  ;;  %v15302_v43 = vor.u32 %v6367_v1, %v6364_v52  ;;  %v1231_v26 = vrot.slane %v15259_v50, 3 }
  0xc1   : > { %17342 = vst [vmem:[#allocation124_spill] sm:$0xff] %v15284_v12  ;;  %17344 = vst [vmem:[#allocation126_spill] sm:$0xff] %v15298_v57  ;;  %12134 = vmatmul.mubr.bf16.gmra.mrb[24].mxu0 %v15218_v30  ;;  %v1234_v19 = vrot.slane %v15262_v27, 4  ;;  %v1240_v6 = vrot.slane %v15272_v34, 3  ;;  %v17087_v58 = vshrl.u32 %v14709_v51, 16  ;;  %v17089_v40 = vshll.u32 %v14709_v51, 16 }
  0xc2   : > { %12706 = vmatmul.mubr.bf16.gmra.mrb[20].mxu1 %v15157_v3  ;;  %12137 = vmatprep.mubr.bf16.mxu0 %v15265_v4  ;;  %v17090_v3 = vshrl.u32 %v14723_v25, 16  ;;  %v1243_v9 = vrot.slane %v15284_v12, 4  ;;  %v15314_v18 = vshrl.u32 %v14733_v10, 16  ;;  %v15317_v46 = vshll.u32 %v14733_v10, 16 }
  0xc3   : > { %12709 = vmatprep.mubr.bf16.mxu1 %v6306_v62  ;;  %v1256_v62 = vshrl.u32 %v14792_v7, 16  ;;  %v1259_v45 = vshll.u32 %v14792_v7, 16  ;;  %v1235_v0 = vor.u32 %v1234_v19, %v1231_v26  ;;  %v6398_v37 = vshrl.u32 %v14840_v61, 16 }
  0xc4   : > { %17345 = vst [vmem:[#allocation127_spill] sm:$0xff] %v15314_v18  ;;  %17346 = vst [vmem:[#allocation128_spill] sm:$0xff] %v15317_v46  ;;  %v6401_v31 = vshll.u32 %v14840_v61, 16  ;;  %v1580_v56 = vshrl.u32 %v14124_v29, 16  ;;  %v6373_v1 = vrot.slane %v17087_v58, 3  ;;  %v6376_v52 = vrot.slane %v17089_v40, 4 }
  0xc5   : > { %v6382_v7 = vrot.slane %v17090_v3, 3  ;;  %v1583_v4 = vshll.u32 %v14124_v29, 16  ;;  %v1244_v47 = vor.u32 %v1243_v9, %v1240_v6  ;;  %v17347_v49 = vshll.u32 %v14723_v25, 16 }
  0xc6   : > { %v1249_v19 = vrot.slane %v15314_v18, 3  ;;  %v1252_v61 = vrot.slane %v15317_v46, 4  ;;  %v1258_v30 = vrot.slane %v1256_v62, 3  ;;  %v1261_v10 = vrot.slane %v1259_v45, 4 }
  0xc7   : > { %v6385_v26 = vrot.slane %v17347_v49, 4  ;;  %v17348_v11 = vshrl.u32 %v14744_v41, 16  ;;  %v17349_v24 = vshll.u32 %v14744_v41, 16  ;;  %v6400_v6 = vrot.slane %v6398_v37, 3 }
  0xc8   : > { %v6403_v9 = vrot.slane %v6401_v31, 4  ;;  %v1582_v29 = vrot.slane %v1580_v56, 4  ;;  %v17350_v49 = vshrl.u32 %v14747_v17, 16  ;;  %v1585_v62 = vrot.slane %v1583_v4, 5  ;;  %v14125_v31 = vld [vmem:[#allocation2] sm:$0xf0] }
  0xc9   : > { %v6391_v58 = vrot.slane %v17348_v11, 3  ;;  %v6394_v40 = vrot.slane %v17349_v24, 4  ;;  %12138 = vmatmul.mubr.bf16.gmra.mrb[28].mxu0 %v15268_v32  ;;  %v17351_v45 = vshll.u32 %v14747_v17, 16  ;;  %v1591_v41 = vrot.slane %v14772_v33, 4 }
  0xca   : > { %12710 = vmatmul.mubr.bf16.gmra.mrb[24].mxu1 %v15240_v48  ;;  %v1587_v3 = vrot.slane %v17350_v49, 4  ;;  %12141 = vmatprep.mubr.bf16.mxu0 %v15278_v15  ;;  %v1592_v24 = vrot.slane %v14775_v8, 5  ;;  %v15350_v48 = vsel %vm1039_vm1, %v15246_v13, %v6359_v63  ;;  %v15354_v37 = vsel %vm1039_vm1, %v6359_v63, %v15302_v43 }
  0xcb   : > { %12713 = vmatprep.mubr.bf16.mxu1 %v6324_v39  ;;  %v1588_v11 = vrot.slane %v17351_v45, 5  ;;  %v6721_v39 = vshrl.u32 %v14125_v31, 16  ;;  %v6724_v56 = vshll.u32 %v14125_v31, 16  ;;  %v15358_v4 = vsel %vm1039_vm1, %v15248_v35, %v1235_v0 }
  0xcc   : > { %17352 = vst [vmem:[#allocation129_spill] sm:$0xff] %v15358_v4  ;;  %v15361_v17 = vsel %vm1039_vm1, %v1235_v0, %v1244_v47  ;;  %v6377_v49 = vor.u32 %v6376_v52, %v6373_v1  ;;  %v6386_v45 = vor.u32 %v6385_v26, %v6382_v7  ;;  %v15363_v15 = vor.u32 %v1252_v61, %v1249_v19  ;;  %v17358_v1 = vld [vmem:[#allocation56_spill] sm:$0xff] }
  0xcd   : > { %17353 = vst [vmem:[#allocation130_spill] sm:$0xff] %v15361_v17  ;;  %v1262_v13 = vor.u32 %v1261_v10, %v1258_v30  ;;  %v6395_v32 = vor.u32 %v6394_v40, %v6391_v58  ;;  %v6404_v8 = vor.u32 %v6403_v9, %v6400_v6  ;;  %v1586_v63 = vor.u32 %v1585_v62, %v1582_v29  ;;  %v17360_v9 = vld [vmem:[#allocation76_spill] sm:$0xff]  ;;  %v17361_v62 = vld [vmem:[#allocation77_spill] sm:$0xff] }
  0xce   : > { %17354 = vst [vmem:[#allocation131_spill] sm:$0xff] %v15363_v15  ;;  %v15365_v33 = vor.u32 %v1588_v11, %v1587_v3  ;;  %v1593_v46 = vor.u32 %v1592_v24, %v1591_v41  ;;  %v6723_v31 = vrot.slane %v6721_v39, 4  ;;  %v6726_v18 = vrot.slane %v6724_v56, 5  ;;  %v17362_v24 = vld [vmem:[#allocation58_spill] sm:$0xff] }
  0xcf   : > { %v1595_v35 = vrot.slane %v14779_v36, 4  ;;  %v1596_v25 = vrot.slane %v14782_v14, 5  ;;  %v15371_v52 = vsel %vm1039_vm1, %v15302_v43, %v6377_v49  ;;  %v15374_v0 = vsel %vm1039_vm1, %v6377_v49, %v6386_v45  ;;  %v17418_v36 = vld [vmem:[#allocation115_spill] sm:$0xff] }
  0xd0   : > { %v17355_v10 = vshrl.u32 %v14784_v5, 16  ;;  %v17356_v58 = vshll.u32 %v14784_v5, 16  ;;  %v15384_v41 = vsel %vm1039_vm1, %v1244_v47, %v15363_v15  ;;  %v15388_v43 = vsel %vm1039_vm1, %v15363_v15, %v1262_v13 }
  0xd1   : > { %12142 = vmatmul.mubr.bf16.gmra.mrb[32].mxu0 %v15281_v55  ;;  %17357 = vst [vmem:[#allocation132_spill] sm:$0xff] %v15384_v41  ;;  %v15391_v3 = vsel %vm1039_vm1, %v6386_v45, %v6395_v32  ;;  %v15396_v5 = vsel %vm1039_vm1, %v6395_v32, %v6404_v8  ;;  %v15404_v47 = vsel %vm1578_vm2, %v15365_v33, %v1593_v46  ;;  %v1620_v61 = vrot.slane %v14936_v2, 5  ;;  %v17359_v8 = vld [vmem:[#allocation57_spill] sm:$0xff] }
  0xd2   : > { %v6732_v30 = vrot.slane %v17355_v10, 4  ;;  %v6733_v40 = vrot.slane %v17356_v58, 5  ;;  %12714 = vmatmul.mubr.bf16.gmra.mrb[28].mxu1 %v15275_v23  ;;  %12145 = vmatprep.mubr.bf16.mxu0 %v15294_v22  ;;  %v15400_v23 = vsel %vm1578_vm2, %v1586_v63, %v15365_v33  ;;  %v6727_v26 = vor.u32 %v6726_v18, %v6723_v31  ;;  %v17386_v2 = vld [vmem:[#allocation93_spill] sm:$0xff] }
  0xd3   : > { %12717 = vmatprep.mubr.bf16.mxu1 %v15287_v16  ;;  %v15407_v19 = vor.u32 %v1596_v25, %v1595_v35  ;;  %v1619_v16 = vrot.slane %v14928_v28, 4  ;;  %v1623_v29 = vrot.slane %v17360_v9, 4  ;;  %v1624_v11 = vrot.slane %v17361_v62, 5  ;;  %v17364_v25 = vld [vmem:[#allocation78_spill] sm:$0xff] }
  0xd4   : > { %v15411_v6 = vor.u32 %v6733_v40, %v6732_v30  ;;  %v17363_v39 = vshrl.u32 %v17362_v24, 16  ;;  %v17365_v18 = vshrl.u32 %v17364_v25, 16  ;;  %v17366_v13 = vshll.u32 %v17364_v25, 16  ;;  %v17368_v30 = vld [vmem:[#allocation80_spill] sm:$0xff]  ;;  %v17387_v28 = vld [vmem:[#allocation94_spill] sm:$0xff] }
  0xd5   : > { %v15420_v49 = vor.u32 %v1620_v61, %v1619_v16  ;;  %v17367_v31 = vshll.u32 %v17362_v24, 16  ;;  %v1625_v10 = vor.u32 %v1624_v11, %v1623_v29  ;;  %v17369_v58 = vshrl.u32 %v17368_v30, 16  ;;  %v17371_v24 = vld [vmem:[#allocation82_spill] sm:$0xff] }
  0xd6   : > { %v15418_v56 = vrot.slane %v17363_v39, 4  ;;  %v6760_v45 = vrot.slane %v17365_v18, 4  ;;  %v6761_v63 = vrot.slane %v17366_v13, 5  ;;  %v17370_v32 = vshll.u32 %v17368_v30, 16  ;;  %v17373_v13 = vld [vmem:[#allocation83_spill] sm:$0xff] }
  0xd7   : > { %v15428_v35 = vrot.slane %v17367_v31, 5  ;;  %v6764_v40 = vrot.slane %v17369_v58, 4  ;;  %v15436_v16 = vsel %vm1578_vm2, %v6727_v26, %v15365_v33  ;;  %v15440_v61 = vsel %vm1578_vm2, %v1593_v46, %v15407_v19  ;;  %v17375_v26 = vld [vmem:[#allocation60_spill] sm:$0xff]  ;;  %v17376_v58 = vld [vmem:[#allocation85_spill] sm:$0xff] }
  0xd8   : > { %v6765_v39 = vrot.slane %v17370_v32, 5  ;;  %v15442_v25 = vor.u32 %v6761_v63, %v6760_v45  ;;  %v1627_v18 = vrot.slane %v17371_v24, 4  ;;  %v15447_v29 = vsel %vm1578_vm2, %v15420_v49, %v1625_v10  ;;  %v17374_v32 = vld [vmem:[#allocation84_spill] sm:$0xff]  ;;  %v17377_v63 = vld [vmem:[#allocation86_spill] sm:$0xff]  ;;  %v17383_v24 = vld [vmem:[#allocation89_spill] sm:$0xff] }
  0xd9   : > { %17372 = vst [vmem:[#allocation56_spill] sm:$0xff] %v15447_v29  ;;  %v1628_v31 = vrot.slane %v17373_v13, 5  ;;  %v1631_v30 = vrot.slane %v17374_v32, 4  ;;  %12146 = vmatmul.mubr.bf16.gmra.mrb[36].mxu0 %v15298_v57  ;;  %v1632_v45 = vrot.slane %v17376_v58, 5  ;;  %v17378_v7 = vshrl.u32 %v17377_v63, 16 }
  0xda   : > { %v6766_v11 = vor.u32 %v6765_v39, %v6764_v40  ;;  %12718 = vmatmul.mubr.bf16.gmra.mrb[32].mxu1 %v15291_v53  ;;  %v17379_v22 = vshll.u32 %v17377_v63, 16  ;;  %12149 = vmatprep.mubr.bf16.mxu0 %v15358_v4  ;;  %v17380_v39 = vld [vmem:[#allocation87_spill] sm:$0xff]  ;;  %v1635_v63 = vrot.slane %v17383_v24, 4  ;;  %v1639_v9 = vrot.slane %v17386_v2, 4 }
  0xdb   : > { %v6768_v15 = vrot.slane %v17378_v7, 4  ;;  %12721 = vmatprep.mubr.bf16.mxu1 %v15350_v48  ;;  %v1629_v53 = vor.u32 %v1628_v31, %v1627_v18  ;;  %v17381_v57 = vshrl.u32 %v17380_v39, 16  ;;  %v17382_v58 = vshll.u32 %v17380_v39, 16  ;;  %v17392_v39 = vld [vmem:[#allocation96_spill] sm:$0xff]  ;;  %v17397_v24 = vld [vmem:[#allocation99_spill] sm:$0xff] }
  0xdc   : > { %v6769_v55 = vrot.slane %v17379_v22, 5  ;;  %v15463_v40 = vsel %vm1578_vm2, %v15442_v25, %v6766_v11  ;;  %v1633_v32 = vor.u32 %v1632_v45, %v1631_v30  ;;  %v17384_v22 = vld [vmem:[#allocation91_spill] sm:$0xff]  ;;  %v1640_v18 = vrot.slane %v17387_v28, 5 }
  0xdd   : > { %v6772_v46 = vrot.slane %v17381_v57, 4  ;;  %v6773_v13 = vrot.slane %v17382_v58, 5  ;;  %v1636_v62 = vrot.slane %v17384_v22, 5  ;;  %v15472_v48 = vsel %vm1578_vm2, %v1625_v10, %v1629_v53 }
  0xde   : > { %v6770_v7 = vor.u32 %v6769_v55, %v6768_v15  ;;  %17385 = vst [vmem:[#allocation57_spill] sm:$0xff] %v15472_v48  ;;  %v15477_v31 = vsel %vm1578_vm2, %v1629_v53, %v1633_v32  ;;  %v17389_v15 = vld [vmem:[#allocation95_spill] sm:$0xff]  ;;  %v1641_v10 = vor.u32 %v1640_v18, %v1639_v9  ;;  %v17393_v22 = vshrl.u32 %v17392_v39, 16 }
  0xdf   : > { %v6774_v4 = vor.u32 %v6773_v13, %v6772_v46  ;;  %17388 = vst [vmem:[#allocation58_spill] sm:$0xff] %v15477_v31  ;;  %v1637_v30 = vor.u32 %v1636_v62, %v1635_v63  ;;  %v17390_v55 = vshrl.u32 %v17389_v15, 16  ;;  %v17391_v13 = vshll.u32 %v17389_v15, 16  ;;  %v17396_v62 = vld [vmem:[#allocation98_spill] sm:$0xff] }
  0xe0   : > { %v15480_v57 = vsel %vm1578_vm2, %v6766_v11, %v6770_v7  ;;  %v6780_v28 = vrot.slane %v17393_v22, 4  ;;  %v17395_v11 = vshll.u32 %v17392_v39, 16  ;;  %v1643_v63 = vrot.slane %v17396_v62, 4  ;;  %v17415_v62 = vld [vmem:[#allocation112_spill] sm:$0xff] }
  0xe1   : > { %v6776_v58 = vrot.slane %v17390_v55, 4  ;;  %v15485_v45 = vsel %vm1578_vm2, %v6770_v7, %v6774_v4  ;;  %v6777_v46 = vrot.slane %v17391_v13, 5  ;;  %v15492_v53 = vsel %vm1578_vm2, %v1633_v32, %v1637_v30  ;;  %12150 = vmatmul.mubr.bf16.gmra.mrb[40].mxu0 %v15361_v17  ;;  %v17402_v17 = vld [vmem:[#allocation103_spill] sm:$0xff] }
  0xe2   : > { %17394 = vst [vmem:[#allocation78_spill] sm:$0xff] %v15492_v53  ;;  %v6781_v2 = vrot.slane %v17395_v11, 5  ;;  %v1644_v55 = vrot.slane %v17397_v24, 5  ;;  %v15499_v7 = vsel %vm1578_vm2, %v1637_v30, %v1641_v10  ;;  %v1647_v18 = vrot.slane %v15116_v59, 4  ;;  %12722 = vmatmul.mubr.bf16.gmra.mrb[36].mxu1 %v15354_v37  ;;  %12153 = vmatprep.mubr.bf16.mxu0 %v15384_v41  ;;  %v17410_v41 = vld [vmem:[#allocation109_spill] sm:$0xff] }
  0xe3   : > { %17398 = vst [vmem:[#allocation80_spill] sm:$0xff] %v15499_v7  ;;  %v6778_v9 = vor.u32 %v6777_v46, %v6776_v58  ;;  %v1648_v15 = vrot.slane %v15119_v54, 5  ;;  %v17399_v13 = vshrl.u32 %v15123_v42, 16  ;;  %v17400_v11 = vshll.u32 %v15123_v42, 16  ;;  %12725 = vmatprep.mubr.bf16.mxu1 %v15371_v52  ;;  %v17405_v52 = vld [vmem:[#allocation105_spill] sm:$0xff] }
  0xe4   : > { %v6782_v32 = vor.u32 %v6781_v2, %v6780_v28  ;;  %v1645_v22 = vor.u32 %v1644_v55, %v1643_v63  ;;  %v17401_v37 = vshrl.u32 %v14598_v20, 16  ;;  %v17403_v28 = vshll.u32 %v17402_v17, 16  ;;  %v17408_v20 = vld [vmem:[#allocation107_spill] sm:$0xff] }
  0xe5   : > { %v6784_v39 = vrot.slane %v17399_v13, 4  ;;  %v6785_v24 = vrot.slane %v17400_v11, 5  ;;  %v15512_v30 = vsel %vm1578_vm2, %v6774_v4, %v6778_v9  ;;  %v1649_v58 = vor.u32 %v1648_v15, %v1647_v18  ;;  %v17407_v18 = vld [vmem:[#allocation106_spill] sm:$0xff] }
  0xe6   : > { %v6788_v46 = vrot.slane %v17401_v37, 4  ;;  %v6789_v2 = vrot.slane %v17403_v28, 5  ;;  %v15519_v63 = vsel %vm1578_vm2, %v6778_v9, %v6782_v32  ;;  %v15522_v42 = vsel %vm1578_vm2, %v1641_v10, %v1645_v22  ;;  %v17409_v28 = vld [vmem:[#allocation108_spill] sm:$0xff] }
  0xe7   : > { %17404 = vst [vmem:[#allocation60_spill] sm:$0xff] %v15522_v42  ;;  %v6786_v55 = vor.u32 %v6785_v24, %v6784_v39  ;;  %v1651_v13 = vrot.slane %v17405_v52, 4  ;;  %v15526_v11 = vsel %vm1578_vm2, %v1645_v22, %v1649_v58  ;;  %v1652_v15 = vrot.slane %v17407_v18, 5 }
  0xe8   : > { %17406 = vst [vmem:[#allocation86_spill] sm:$0xff] %v15526_v11  ;;  %v6790_v4 = vor.u32 %v6789_v2, %v6788_v46  ;;  %v1655_v37 = vrot.slane %v17408_v20, 4  ;;  %v1656_v9 = vrot.slane %v17409_v28, 5  ;;  %v17411_v54 = vshrl.u32 %v17410_v41, 16 }
  0xe9   : > { %v15531_v17 = vsel %vm1578_vm2, %v6782_v32, %v6786_v55  ;;  %v17412_v24 = vshll.u32 %v17410_v41, 16  ;;  %v1653_v22 = vor.u32 %v1652_v15, %v1651_v13  ;;  %v17413_v46 = vshrl.u32 %v14647_v60, 16  ;;  %12154 = vmatmul.mubr.bf16.gmra.mrb[44].mxu0 %v15388_v43 }
  0xea   : > { %v6792_v10 = vrot.slane %v17411_v54, 4  ;;  %v15539_v52 = vsel %vm1578_vm2, %v6786_v55, %v6790_v4  ;;  %v17414_v18 = vshll.u32 %v14647_v60, 16  ;;  %v1657_v32 = vor.u32 %v1656_v9, %v1655_v37  ;;  %12726 = vmatmul.mubr.bf16.gmra.mrb[40].mxu1 %v15374_v0  ;;  %12173 = vmatprep.mubr.bf16.mxu0 %v15400_v23 }
  0xeb   : > { %v6793_v39 = vrot.slane %v17412_v24, 5  ;;  %v6796_v2 = vrot.slane %v17413_v46, 4  ;;  %v1659_v28 = vrot.slane %v15197_v21, 4  ;;  %v1660_v14 = vrot.slane %v17415_v62, 5  ;;  %v17417_v24 = vld [vmem:[#allocation114_spill] sm:$0xff]  ;;  %12729 = vmatprep.mubr.bf16.mxu1 %v15391_v3 }
  0xec   : > { %v6797_v20 = vrot.slane %v17414_v18, 5  ;;  %v15548_v54 = vsel %vm1578_vm2, %v1649_v58, %v1653_v22  ;;  %v1663_v55 = vrot.slane %v17417_v24, 4  ;;  %v1664_v13 = vrot.slane %v17418_v36, 5  ;;  %v14014_v62 = vld [vmem:[%s16930_s3 + $0xd8] sm:$0xff]  }
  0xed   : > { %v6794_v59 = vor.u32 %v6793_v39, %v6792_v10  ;;  %17416 = vst [vmem:[#allocation87_spill] sm:$0xff] %v15548_v54  ;;  %v15555_v60 = vsel %vm1578_vm2, %v1653_v22, %v1657_v32  ;;  %v1661_v15 = vor.u32 %v1660_v14, %v1659_v28  ;;  %v17420_v37 = vshrl.u32 %v14664_v38, 16 }
  0xee   : > { %v6798_v41 = vor.u32 %v6797_v20, %v6796_v2  ;;  %17419 = vst [vmem:[#allocation95_spill] sm:$0xff] %v15555_v60  ;;  %v1665_v0 = vor.u32 %v1664_v13, %v1663_v55  ;;  %v17421_v43 = vshll.u32 %v14664_v38, 16  ;;  %v17422_v10 = vshrl.u32 %v14689_v44, 16 }
  0xef   : > { %v15558_v18 = vsel %vm1578_vm2, %v6790_v4, %v6794_v59  ;;  %v6800_v58 = vrot.slane %v17420_v37, 4  ;;  %v15572_v4 = vsel %vm1578_vm2, %v1657_v32, %v1661_v15  ;;  %v17424_v14 = vshll.u32 %v14689_v44, 16 }
  0xf0   : > { %v15565_v20 = vsel %vm1578_vm2, %v6794_v59, %v6798_v41  ;;  %v6801_v9 = vrot.slane %v17421_v43, 5  ;;  %v6804_v39 = vrot.slane %v17422_v10, 4  ;;  %17423 = vst [vmem:[#allocation96_spill] sm:$0xff] %v15572_v4  ;;  %v1667_v3 = vrot.slane %v15259_v50, 4  ;;  %v17455_v50 = vld [vmem:[#allocation68_spill] sm:$0xff] }
  0xf1   : > { %v6805_v28 = vrot.slane %v17424_v14, 5  ;;  %v1668_v23 = vrot.slane %v15262_v27, 5  ;;  %v15579_v59 = vsel %vm1578_vm2, %v1661_v15, %v1665_v0  ;;  %v1671_v38 = vrot.slane %v15272_v34, 4  ;;  %v17428_v14 = vld [vmem:[#allocation44_spill] sm:$0xff]  ;;  %12174 = vmatmul.mubr.bf16.vlgmr.msra.gmra.mrb[0].mxu0 %v15404_v47  ;;  %v17454_v34 = vld [vmem:[#allocation67_spill] sm:$0xff] }
  0xf2   : > { %17425 = vst [vmem:[#allocation103_spill] sm:$0xff] %v15579_v59  ;;  %v6802_v22 = vor.u32 %v6801_v9, %v6800_v58  ;;  %v1672_v46 = vrot.slane %v15284_v12, 5  ;;  %v17426_v32 = vshrl.u32 %v14709_v51, 16  ;;  %v17427_v44 = vshll.u32 %v14709_v51, 16  ;;  %12730 = vmatmul.mubr.bf16.gmra.mrb[44].mxu1 %v15396_v5  ;;  %12177 = vmatprep.mubr.bf16.mxu0 %v15440_v61 }
  0xf3   : > { %v6806_v2 = vor.u32 %v6805_v28, %v6804_v39  ;;  %v1669_v55 = vor.u32 %v1668_v23, %v1667_v3  ;;  %v17429_v15 = vshrl.u32 %v17428_v14, 16  ;;  %v17430_v58 = vshll.u32 %v17428_v14, 16  ;;  %v14010_v39 = vld [vmem:[%s16930_s3 + $0xc8] sm:$0xff]   ;;  %12749 = vmatprep.mubr.bf16.mxu1 %v15436_v16 }
  0xf4   : > { %v6808_v13 = vrot.slane %v17426_v32, 4  ;;  %v6809_v37 = vrot.slane %v17427_v44, 5  ;;  %v15588_v43 = vsel %vm1578_vm2, %v6798_v41, %v6802_v22  ;;  %v1673_v10 = vor.u32 %v1672_v46, %v1671_v38  ;;  %v17432_v41 = vld [vmem:[#allocation127_spill] sm:$0xff]  ;;  %v17433_v38 = vld [vmem:[#allocation61_spill] sm:$0xff]  ;;  %v17435_v14 = vld [vmem:[#allocation128_spill] sm:$0xff] }
  0xf5   : > { %v6812_v27 = vrot.slane %v17429_v15, 4  ;;  %v6813_v9 = vrot.slane %v17430_v58, 5  ;;  %v15598_v28 = vsel %vm1578_vm2, %v6802_v22, %v6806_v2  ;;  %v15601_v51 = vsel %vm1578_vm2, %v1665_v0, %v1669_v55 }
  0xf6   : > { %17431 = vst [vmem:[#allocation109_spill] sm:$0xff] %v15601_v51  ;;  %v6810_v3 = vor.u32 %v6809_v37, %v6808_v13  ;;  %v1675_v23 = vrot.slane %v17432_v41, 4  ;;  %v1604_v46 = vrot.slane %v17433_v38, 5  ;;  %v15606_v32 = vsel %vm1578_vm2, %v1669_v55, %v1673_v10  ;;  %v17439_v37 = vld [vmem:[#allocation48_spill] sm:$0xff] }
  0xf7   : > { %17434 = vst [vmem:[#allocation44_spill] sm:$0xff] %v15606_v32  ;;  %v6814_v44 = vor.u32 %v6813_v9, %v6812_v27  ;;  %v1676_v15 = vrot.slane %v17435_v14, 5  ;;  %v17436_v22 = vrot.slane %v17358_v1, 4  ;;  %v17437_v0 = vrot.slane %v17359_v8, 5  ;;  %v17442_v14 = vld [vmem:[#allocation104_spill] sm:$0xff] }
  0xf8   : > { %v15618_v13 = vsel %vm1578_vm2, %v6806_v2, %v6810_v3  ;;  %v17440_v41 = vshrl.u32 %v17439_v37, 16  ;;  %v17441_v27 = vshll.u32 %v17439_v37, 16  ;;  %12222 = vmatpush3.bf16.msra.mxu0 %v17442_v14  ;;  %v6738_v5 = vor.u32 %v15428_v35, %v15418_v56  ;;  %v14012_v2 = vld [vmem:[%s16930_s3 + $0xd0] sm:$0xff]  }
  0xf9   : > { %v15615_v58 = vor.u32 %v17437_v0, %v17436_v22  ;;  %v15629_v47 = vsel %vm1578_vm2, %v6810_v3, %v6814_v44  ;;  %v15631_v22 = vor.u32 %v1676_v15, %v1675_v23  ;;  %12223 = vmatprep.subr.bf16.mxu0 %v14010_v39  ;;  %v17444_v14 = vrot.slane %v17375_v26, 4  ;;  %v17446_v3 = vld [vmem:[#allocation59_spill] sm:$0xff] }
  0xfa   : > { %v6816_v55 = vrot.slane %v17440_v41, 4  ;;  %v6817_v9 = vrot.slane %v17441_v27, 5  ;;  %v6735_v35 = vsel %vm1578_vm2, %v15365_v33, %v15411_v6  ;;  %v17447_v61 = vshrl.u32 %v17446_v3, 16  ;;  %v17450_v27 = vld [vmem:[#allocation63_spill] sm:$0xff] }
  0xfb   : > { %17438 = vst [vmem:[#allocation61_spill] sm:$0xff] %v15615_v58  ;;  %17443 = vst [vmem:[#allocation48_spill] sm:$0xff] %v15631_v22  ;;  %v1605_v16 = vor.u32 %v1604_v46, %v17444_v14  ;;  %v15643_v56 = vsel %vm1578_vm2, %v1673_v10, %v15631_v22  ;;  %v17448_v15 = vshll.u32 %v17446_v3, 16  ;;  %v1602_v46 = vsel %vm1578_vm2, %v15407_v19, %v15615_v58  ;;  %v14011_v14 = vld [vmem:[%s16930_s3 + $0xc8] sm:$0xff]  }
  0xfc   : > { %v15637_v41 = vor.u32 %v6817_v9, %v6816_v55  ;;  %17445 = vst [vmem:[#allocation104_spill] sm:$0xff] %v15643_v56  ;;  %v6740_v23 = vrot.slane %v17447_v61, 4  ;;  %v6739_v10 = vsel %vm1578_vm2, %v15411_v6, %v6738_v5  ;;  %12224 = vmatpush3.bf16.msra.mxu0 %v14010_v39  ;;  %v17449_v55 = vld [vmem:[#allocation62_spill] sm:$0xff]  ;;  %v1608_v9 = vrot.slane %v17450_v27, 5  ;;  %v17451_v3 = vld [vmem:[#allocation64_spill] sm:$0xff]  ;;  %12750 = vmatmul.mubr.bf16.vlgmr.msra.gmra.mrb[0].mxu1 %v6735_v35 }
  0xfd   : > { %v6741_v0 = vrot.slane %v17448_v15, 5  ;;  %v1607_v33 = vrot.slane %v17449_v55, 4  ;;  %v17452_v61 = vshrl.u32 %v17451_v3, 16  ;;  %v17453_v15 = vshll.u32 %v17451_v3, 16  ;;  %12225 = vmatprep.subr.bf16.mxu0 %v14012_v2  ;;  %12178 = vmatmul.mubr.bf16.gmra.mrb[4].mxu0 %v1602_v46 }
  0xfe   : > { %v15654_v37 = vsel %vm1578_vm2, %v6814_v44, %v15637_v41  ;;  %v1611_v19 = vrot.slane %v17454_v34, 4  ;;  %v1612_v36 = vrot.slane %v17455_v50, 5  ;;  %v15674_v6 = vsel %vm1578_vm2, %v15615_v58, %v1605_v16  ;;  %12753 = vmatprep.mubr.bf16.mxu1 %v6739_v10  ;;  %v14013_v58 = vld [vmem:[%s16930_s3 + $0xd0] sm:$0xff]  }
  0xff   : > { %v6744_v44 = vrot.slane %v17452_v61, 4  ;;  %v6745_v12 = vrot.slane %v17453_v15, 5  ;;  %17456 = vst [vmem:[#allocation59_spill] sm:$0xff] %v15674_v6  ;;  %v6742_v39 = vor.u32 %v6741_v0, %v6740_v23  ;;  %v17457_v61 = vld [vmem:[#allocation110_spill] sm:$0xff]  ;;  %v1609_v3 = vor.u32 %v1608_v9, %v1607_v33  ;;  %12181 = vmatprep.mubr.bf16.mxu0 %v15674_v6  ;;  %v17458_v23 = vld [vmem:[#allocation65_spill] sm:$0xff] }
 0x100   : > { %12798 = vmatpush3.bf16.msra.mxu1 %v17457_v61  ;;  %v1613_v24 = vor.u32 %v1612_v36, %v1611_v19  ;;  %12226 = vmatpush3.bf16.msra.mxu0 %v14012_v2  ;;  %v17459_v0 = vshrl.u32 %v17458_v23, 16  ;;  %v17461_v33 = vshll.u32 %v17458_v23, 16  ;;  %v14015_v23 = vld [vmem:[%s16930_s3 + $0xd8] sm:$0xff]  }
 0x101   : > { %12799 = vmatprep.subr.bf16.mxu1 %v14011_v14  ;;  %v6746_v15 = vor.u32 %v6745_v12, %v6744_v44  ;;  %v6743_v35 = vsel %vm1578_vm2, %v6738_v5, %v6742_v39  ;;  %12227 = vmatprep.subr.bf16.mxu0 %v14014_v62  ;;  %v15688_v10 = vsel %vm1578_vm2, %v1605_v16, %v1609_v3  ;;  %v17462_v12 = vld [vmem:[#allocation69_spill] sm:$0xff]  ;;  %v17463_v44 = vld [vmem:[#allocation70_spill] sm:$0xff]  ;;  %v17465_v5 = vld [vmem:[#allocation71_spill] sm:$0xff] }
 0x102   : > { %v6748_v46 = vrot.slane %v17459_v0, 4  ;;  %17460 = vst [vmem:[#allocation62_spill] sm:$0xff] %v15688_v10  ;;  %v6749_v9 = vrot.slane %v17461_v33, 5  ;;  %v1615_v36 = vrot.slane %v17462_v12, 4  ;;  %v1616_v19 = vrot.slane %v17463_v44, 5  ;;  %v14016_v16 = vld [vmem:[%s16930_s3 + $0xe0] sm:$0xff]  }
 0x103   : > { %v6747_v61 = vsel %vm1578_vm2, %v6742_v39, %v6746_v15  ;;  %v15696_v2 = vsel %vm1578_vm2, %v1609_v3, %v1613_v24  ;;  %v17466_v6 = vshrl.u32 %v17465_v5, 16 }
 0x104   : > { %12800 = vmatpush3.bf16.msra.mxu1 %v14011_v14  ;;  %17464 = vst [vmem:[#allocation63_spill] sm:$0xff] %v15696_v2  ;;  %v17467_v14 = vshll.u32 %v17465_v5, 16  ;;  %12228 = vmatpush3.bf16.msra.mxu0 %v14014_v62  ;;  %v6750_v39 = vor.u32 %v6749_v9, %v6748_v46  ;;  %v1617_v3 = vor.u32 %v1616_v19, %v1615_v36  ;;  %v14017_v62 = vld [vmem:[%s16930_s3 + $0xe0] sm:$0xff]  }
 0x105   : > { %v6752_v0 = vrot.slane %v17466_v6, 4  ;;  %12801 = vmatprep.subr.bf16.mxu1 %v14013_v58  ;;  %12754 = vmatmul.mubr.bf16.gmra.mrb[4].mxu1 %v6743_v35  ;;  %v14018_v6 = vld [vmem:[%s16930_s3 + $0xe8] sm:$0xff]  }
 0x106   : > { %v6753_v21 = vrot.slane %v17467_v14, 5  ;;  %12182 = vmatmul.mubr.bf16.gmra.mrb[8].mxu0 %v15688_v10  ;;  %12757 = vmatprep.mubr.bf16.mxu1 %v6747_v61  ;;  %v6751_v35 = vsel %vm1578_vm2, %v6746_v15, %v6750_v39  ;;  %v15718_v5 = vsel %vm1578_vm2, %v1613_v24, %v1617_v3  ;;  %v17469_v61 = vld [vmem:[#allocation73_spill] sm:$0xff]  ;;  %v15727_v19 = vsel %vm1578_vm2, %v1617_v3, %v15420_v49  ;;  %v14019_v24 = vld [vmem:[%s16930_s3 + $0xe8] sm:$0xff]  }
 0x107   : > { %12185 = vmatprep.mubr.bf16.mxu0 %v15696_v2  ;;  %12229 = vmatprep.subr.bf16.mxu0 %v14016_v16  ;;  %17468 = vst [vmem:[#allocation64_spill] sm:$0xff] %v15718_v5  ;;  %v17470_v46 = vshrl.u32 %v17469_v61, 16  ;;  %v17471_v36 = vshll.u32 %v17469_v61, 16  ;;  %17472 = vst [vmem:[#allocation68_spill] sm:$0xff] %v15727_v19  ;;  %v14020_v15 = vld [vmem:[%s16930_s3 + $0xf0] sm:$0xff]  }
 0x108   : > { %v6754_v33 = vor.u32 %v6753_v21, %v6752_v0  ;;  %12802 = vmatpush3.bf16.msra.mxu1 %v14013_v58  ;;  %12230 = vmatpush3.bf16.msra.mxu0 %v14016_v16  ;;  %v14022_v0 = vld [vmem:[%s16930_s3 + $0xf8] sm:$0xff]   ;;  %v14021_v14 = vld [vmem:[%s16930_s3 + $0xf0] sm:$0xff]   ;;  %v2033_v61 = vld [vmem:[#allocation2 + $0x8] sm:$0x80] }
 0x109   : > { %12803 = vmatprep.subr.bf16.mxu1 %v14015_v23  ;;  %12231 = vmatprep.subr.bf16.mxu0 %v14018_v6  ;;  %v6756_v9 = vrot.slane %v17470_v46, 4  ;;  %v6757_v21 = vrot.slane %v17471_v36, 5  ;;  %v6703_v36 = vld [vmem:[#allocation2 + $0xc0] sm:$0x1f]  ;;  %v17488_v10 = vld [vmem:[#allocation93_spill] sm:$0xff] }
 0x10a   : > { %v6755_v58 = vsel %vm1578_vm2, %v6750_v39, %v6754_v33  ;;  %v14023_v39 = vld [vmem:[%s16930_s3 + $0xf8] sm:$0xff]  }
 0x10b   : > { %v6758_v49 = vor.u32 %v6757_v21, %v6756_v9  ;;  %v2076_v21 = vshrl.u32 %v2033_v61, 16  ;;  %v15818_v61 = vld [vmem:[#allocation2 + $0x20] sm:$0xff] }
 0x10c   : > { %12804 = vmatpush3.bf16.msra.mxu1 %v14015_v23  ;;  %12232 = vmatpush3.bf16.msra.mxu0 %v14018_v6  ;;  %v15749_v6 = vld [vmem:[%s16930_s3 + $0x100] sm:$0xff]  }
 0x10d   : > { %12805 = vmatprep.subr.bf16.mxu1 %v14017_v62  ;;  %12758 = vmatmul.mubr.bf16.gmra.mrb[8].mxu1 %v6751_v35  ;;  %v6759_v16 = vsel %vm1578_vm2, %v6754_v33, %v6758_v49  ;;  %v6763_v23 = vsel %vm1578_vm2, %v6758_v49, %v15442_v25  ;;  %v15760_v25 = vld [vmem:[%s16930_s3 + $0x100] sm:$0xff]   ;;  %v17473_v33 = vmov 0.0   ;;  %v2078_v49 = vrot.slane %v2076_v21, 7  ;;  %v17478_v21 = vld [vmem:[#allocation54_spill] sm:$0xff] }
 0x10e   : > { %12186 = vmatmul.mubr.bf16.gmra.mrb[12].mxu0 %v15718_v5  ;;  %12761 = vmatprep.mubr.bf16.mxu1 %v6755_v58  ;;  %v17475_v58 = vld [vmem:[#allocation51_spill] sm:$0xff]  ;;  %v15938_v5 = vld [vmem:[#allocation2 + $0x68] sm:$0xff] }
 0x10f   : > { %12189 = vmatprep.mubr.bf16.mxu0 %v15727_v19  ;;  %12233 = vmatprep.subr.bf16.mxu0 %v14020_v15 }
 0x110   : > { %12806 = vmatpush3.bf16.msra.mxu1 %v14017_v62  ;;  %12234 = vmatpush3.bf16.msra.mxu0 %v14020_v15  ;;  %v2082_v15 = vrot.slane %v17475_v58, 7 }
 0x111   : > { %12807 = vmatprep.subr.bf16.mxu1 %v14019_v24  ;;  %12235 = vmatprep.subr.bf16.mxu0 %v14022_v0 }
 0x114   : > { %12808 = vmatpush3.bf16.msra.mxu1 %v14019_v24  ;;  %12236 = vmatpush3.bf16.msra.mxu0 %v14022_v0  ;;  %v15803_v24 = vld [vmem:[#allocation2 + $0x10] sm:$0xff] }
 0x115   : > { %12809 = vmatprep.subr.bf16.mxu1 %v14021_v14  ;;  %12762 = vmatmul.mubr.bf16.gmra.mrb[12].mxu1 %v6759_v16 }
 0x116   : > { %12190 = vmatmul.mubr.bf16.gmra.mrb[16].mxu0 %v15447_v29  ;;  %12765 = vmatprep.mubr.bf16.mxu1 %v6763_v23  ;;  %v7220_v23 = vshrl.u32 %v15803_v24, 16  ;;  %v17487_v29 = vld [vmem:[#allocation89_spill] sm:$0xff] }
 0x117   : > { %12193 = vmatprep.mubr.bf16.mxu0 %v15472_v48  ;;  %12285 = vmatprep.subr.bf16.mxu0 %v15749_v6 }
 0x118   : > { %12810 = vmatpush3.bf16.msra.mxu1 %v14021_v14  ;;  %v17476_v14 = vld [vmem:[#allocation52_spill] sm:$0xff] }
 0x119   : > { %12811 = vmatprep.subr.bf16.mxu1 %v14023_v39  ;;  %v2085_v16 = vor.u32 %v2082_v15, %v17476_v14 }
 0x11c   : > { %12812 = vmatpush3.bf16.msra.mxu1 %v14023_v39  ;;  %v7174_v39 = vld [vmem:[#allocation2 + $0x8] sm:$0x80] }
 0x11d   : > { %12861 = vmatprep.subr.bf16.mxu1 %v15760_v25  ;;  %12766 = vmatmul.mubr.bf16.gmra.mrb[16].mxu1 %v15463_v40  ;;  %v10814_v40 = vld [vmem:[%s14237_s20 + $0x178] sm:$0xf] }
 0x11e   : > { %12194 = vmatmul.mubr.bf16.gmra.mrb[20].mxu0 %v15477_v31  ;;  %12769 = vmatprep.mubr.bf16.mxu1 %v15480_v57  ;;  %v5497_v57 = vunpack.c.l.bf16 %v10814_v40  ;;  %v17484_v31 = vld [vmem:[#allocation84_spill] sm:$0xff] }
 0x11f   : > { %12197 = vmatprep.mubr.bf16.mxu0 %v15492_v53  ;;  %v2162_v48 = vrot.slane %v17484_v31, 7  ;;  %v2178_v31 = vrot.slane %v17488_v10, 7 }
 0x125   : > { %12770 = vmatmul.mubr.bf16.gmra.mrb[20].mxu1 %v15485_v45  ;;  %v15779_v45 = vld [vmem:[%s16928_s1] ss:$0 sm:$0xff] }
 0x126   : > { %12198 = vmatmul.mubr.bf16.gmra.mrb[24].mxu0 %v15499_v7  ;;  %12773 = vmatprep.mubr.bf16.mxu1 %v15512_v30  ;;  %v5552_v3 = vmul.f32 %v15779_v45, %v5497_v57  ;;  %v15787_v30 = vld [vmem:[%s16929_s2] ss:$0 sm:$0xff]  ;;  %v15911_v7 = vld [vmem:[#allocation2 + $0x58] sm:$0xff] }
 0x127   : > { %12201 = vmatprep.mubr.bf16.mxu0 %v15522_v42 }
 0x12d   : > { %12774 = vmatmul.mubr.bf16.gmra.mrb[24].mxu1 %v15519_v63  ;;  %v5607_v63 = vadd.f32 %v15787_v30, %v5552_v3  ;;  %v17477_v3 = vld [vmem:[#allocation53_spill] sm:$0xff] }
 0x12e   : > { %12202 = vmatmul.mubr.bf16.gmra.mrb[28].mxu0 %v15526_v11  ;;  %12777 = vmatprep.mubr.bf16.mxu1 %v15531_v17 }
 0x12f   : > { %12205 = vmatprep.mubr.bf16.mxu0 %v15548_v54  ;;  %v5655_v17 = vmax.f32 %v5607_v63, 0.0  ;;  %v2090_v63 = vrot.slane %v17477_v3, 7 }
 0x131   : > { %v15793_v62 = vpack.c.bf16 %v17473_v33, %v5655_v17  ;;  %v15814_v17 = vld [vmem:[#allocation2 + $0x18] sm:$0xff] }
 0x133   : > { %5752 = vst [vmem:[#allocation2 + $0xc8] sm:$0xff] %v15793_v62 }
 0x135   : > { %12778 = vmatmul.mubr.bf16.gmra.mrb[28].mxu1 %v15539_v52  ;;  %v17474_v52 = vld [vmem:[#allocation55_spill] sm:$0xff] }
 0x136   : > { %12206 = vmatmul.mubr.bf16.gmra.mrb[32].mxu0 %v15555_v60  ;;  %12781 = vmatprep.mubr.bf16.mxu1 %v15558_v18  ;;  %v1680_v35 = vshrl.u32 %v17474_v52, 16  ;;  %v1683_v18 = vshll.u32 %v17474_v52, 16  ;;  %v7216_v52 = vshrl.u32 %v7174_v39, 16 }
 0x137   : > { %12209 = vmatprep.mubr.bf16.mxu0 %v15572_v4 }
 0x138   : > { %v1682_v46 = vrot.slane %v1680_v35, 4  ;;  %v1685_v9 = vrot.slane %v1683_v18, 5  ;;  %v7222_v35 = vrot.slane %v7220_v23, 7  ;;  %v7223_v18 = vshll.u32 %v15803_v24, 16 }
 0x13a   : > { %v1686_v0 = vor.u32 %v1685_v9, %v1682_v46  ;;  %v2098_v46 = vrot.slane %v17358_v1, 7 }
 0x13d   : > { %12782 = vmatmul.mubr.bf16.gmra.mrb[32].mxu1 %v15565_v20  ;;  %v6821_v20 = vshrl.u32 %v6703_v36, 16 }
 0x13e   : > { %12210 = vmatmul.mubr.bf16.gmra.mrb[36].mxu0 %v15579_v59  ;;  %12785 = vmatprep.mubr.bf16.mxu1 %v15588_v43  ;;  %v6824_v43 = vshll.u32 %v6703_v36, 16  ;;  %v7228_v36 = vshrl.u32 %v15814_v17, 16  ;;  %v15882_v59 = vld [vmem:[#allocation2 + $0x48] sm:$0xff] }
 0x13f   : > { %12213 = vmatprep.mubr.bf16.mxu0 %v15601_v51  ;;  %v6823_v40 = vrot.slane %v6821_v20, 4  ;;  %v2093_v20 = vor.u32 %v2090_v63, %v17478_v21 }
 0x140   : > { %v6826_v57 = vrot.slane %v6824_v43, 5  ;;  %v7236_v43 = vshrl.u32 %v15818_v61, 16  ;;  %v7230_v39 = vrot.slane %v7228_v36, 7  ;;  %v15841_v36 = vld [vmem:[#allocation2 + $0x30] sm:$0xff] }
 0x142   : > { %v6827_v9 = vor.u32 %v6826_v57, %v6823_v40  ;;  %v2094_v40 = vsel %vm2074_vm3, %v2082_v15, %v2093_v20  ;;  %v2106_v57 = vrot.slane %v17375_v26, 7 }
 0x144   : > { %v6828_v23 = vsel %vm1578_vm2, %v15637_v41, %v6827_v9  ;;  %v2114_v9 = vrot.slane %v17449_v55, 7 }
 0x145   : > { %12786 = vmatmul.mubr.bf16.gmra.mrb[36].mxu1 %v15598_v28  ;;  %v1687_v28 = vsel %vm1578_vm2, %v15631_v22, %v1686_v0  ;;  %v7218_v0 = vrot.slane %v7216_v52, 7 }
 0x146   : > { %12214 = vmatmul.mubr.bf16.gmra.mrb[40].mxu0 %v15606_v32  ;;  %12789 = vmatprep.mubr.bf16.mxu1 %v15618_v13  ;;  %v2086_v13 = vsel %vm2074_vm3, %v2078_v49, %v2085_v16  ;;  %v7225_v49 = vor.u32 %v7223_v18, %v7222_v35  ;;  %v2101_v16 = vor.u32 %v2098_v46, %v17359_v8  ;;  %v14026_v18 = vld [vmem:[%s16930_s3 + $0x108] sm:$0xff]   ;;  %v7255_v32 = vshll.u32 %v15841_v36, 16 }
 0x147   : > { %12217 = vmatprep.mubr.bf16.mxu0 %v15643_v56  ;;  %v14027_v56 = vld [vmem:[%s16930_s3 + $0x108] sm:$0xff]  }
 0x148   : > { %v7226_v52 = vsel %vm2074_vm3, %v7218_v0, %v7225_v49  ;;  %v2102_v41 = vsel %vm2074_vm3, %v2090_v63, %v2101_v16  ;;  %v7252_v49 = vshrl.u32 %v15841_v36, 16  ;;  %v14028_v63 = vld [vmem:[%s16930_s3 + $0x110] sm:$0xff]   ;;  %v2117_v16 = vor.u32 %v2114_v9, %v17450_v27 }
 0x14a   : > { %v7254_v22 = vrot.slane %v7252_v49, 7 }
 0x14c   : > { %v7257_v49 = vor.u32 %v7255_v32, %v7254_v22 }
 0x14d   : > { %12790 = vmatmul.mubr.bf16.gmra.mrb[40].mxu1 %v15629_v47  ;;  %v7231_v47 = vshll.u32 %v15814_v17, 16 }
 0x14e   : > { %12218 = vmatmul.mubr.bf16.gmra.mrb[44].mxu0 %v1687_v28  ;;  %12793 = vmatprep.mubr.bf16.mxu1 %v15654_v37  ;;  %v7238_v37 = vrot.slane %v7236_v43, 7  ;;  %v7239_v28 = vshll.u32 %v15818_v61, 16  ;;  %v2109_v43 = vor.u32 %v2106_v57, %v17433_v38 }
 0x14f   : > { %12237 = vmatprep.mubr.bf16.mxu0 %v2086_v13  ;;  %v15833_v13 = vld [vmem:[#allocation2 + $0x28] sm:$0xff]  ;;  %v7233_v15 = vor.u32 %v7231_v47, %v7230_v39 }
 0x150   : > { %v7244_v20 = vshrl.u32 %v15833_v13, 16  ;;  %v7241_v0 = vor.u32 %v7239_v28, %v7238_v37  ;;  %v2122_v28 = vrot.slane %v17454_v34, 7  ;;  %v16025_v34 = vld [vmem:[#allocation2 + $0xb0] sm:$0xff] }
 0x152   : > { %v7246_v47 = vrot.slane %v7244_v20, 7  ;;  %v14030_v20 = vld [vmem:[%s16930_s3 + $0x118] sm:$0xff]  }
 0x154   : > { %v7258_v4 = vsel %vm2074_vm3, %v7246_v47, %v7257_v49 }
 0x155   : > { %12794 = vmatmul.mubr.bf16.gmra.mrb[44].mxu1 %v6828_v23  ;;  %v7234_v23 = vsel %vm2074_vm3, %v7222_v35, %v7233_v15  ;;  %v2130_v35 = vrot.slane %v17462_v12, 7  ;;  %v15863_v15 = vld [vmem:[#allocation2 + $0x40] sm:$0xff]  ;;  %v17503_v12 = vld [vmem:[#allocation117_spill] sm:$0xff] }
 0x156   : > { %12238 = vmatmul.mubr.bf16.vlgmr.msra.gmra.mrb[0].mxu0 %v2094_v40  ;;  %12813 = vmatprep.mubr.bf16.mxu1 %v7226_v52  ;;  %v7247_v40 = vshll.u32 %v15833_v13, 16  ;;  %v7242_v52 = vsel %vm2074_vm3, %v7230_v39, %v7241_v0  ;;  %v7268_v0 = vshrl.u32 %v15863_v15, 16  ;;  %v7271_v32 = vshll.u32 %v15863_v15, 16 }
 0x157   : > { %12286 = vmatpush3.bf16.msra.mxu0 %v15749_v6  ;;  %12241 = vmatprep.mubr.bf16.mxu0 %v2102_v41  ;;  %v2110_v6 = vsel %vm2074_vm3, %v2098_v46, %v2109_v43  ;;  %v15856_v41 = vld [vmem:[#allocation2 + $0x38] sm:$0xff]  ;;  %v2118_v46 = vsel %vm2074_vm3, %v2106_v57, %v2117_v16  ;;  %v2125_v43 = vor.u32 %v2122_v28, %v17455_v50  ;;  %v14029_v16 = vld [vmem:[%s16930_s3 + $0x110] sm:$0xff]  }
 0x158   : > { %12287 = vmatprep.subr.bf16.mxu0 %v14026_v18  ;;  %v7249_v39 = vor.u32 %v7247_v40, %v7246_v47  ;;  %v2133_v57 = vor.u32 %v2130_v35, %v17463_v44  ;;  %v7276_v47 = vshrl.u32 %v15882_v59, 16 }
 0x15b   : > { %12288 = vmatpush3.bf16.msra.mxu0 %v14026_v18  ;;  %v7260_v18 = vshrl.u32 %v15856_v41, 16 }
 0x15c   : > { %12289 = vmatprep.subr.bf16.mxu0 %v14028_v63 }
 0x15d   : > { %12814 = vmatmul.mubr.bf16.vlgmr.msra.gmra.mrb[0].mxu1 %v7234_v23  ;;  %v7250_v23 = vsel %vm2074_vm3, %v7238_v37, %v7249_v39  ;;  %v7262_v40 = vrot.slane %v7260_v18, 7  ;;  %v17480_v37 = vld [vmem:[#allocation76_spill] sm:$0xff]  ;;  %v15890_v18 = vld [vmem:[#allocation2 + $0x50] sm:$0xff] }
 0x15e   : > { %12242 = vmatmul.mubr.bf16.gmra.mrb[4].mxu0 %v2110_v6  ;;  %12862 = vmatpush3.bf16.msra.mxu1 %v15760_v25  ;;  %v7263_v25 = vshll.u32 %v15856_v41, 16  ;;  %v2126_v6 = vsel %vm2074_vm3, %v2114_v9, %v2125_v43  ;;  %v2146_v39 = vrot.slane %v17480_v37, 7  ;;  %v14031_v9 = vld [vmem:[%s16930_s3 + $0x118] sm:$0xff]   ;;  %v7284_v54 = vshrl.u32 %v15890_v18, 16  ;;  %v15990_v37 = vld [vmem:[#allocation2 + $0x90] sm:$0xff] }
 0x15f   : > { %12817 = vmatprep.mubr.bf16.mxu1 %v7242_v52  ;;  %12863 = vmatprep.subr.bf16.mxu1 %v14027_v56  ;;  %v17479_v52 = vld [vmem:[#allocation74_spill] sm:$0xff]  ;;  %v7287_v42 = vshll.u32 %v15890_v18, 16 }
 0x160   : > { %12245 = vmatprep.mubr.bf16.mxu0 %v2118_v46  ;;  %12290 = vmatpush3.bf16.msra.mxu0 %v14028_v63  ;;  %v2138_v51 = vrot.slane %v17479_v52, 7  ;;  %v7270_v46 = vrot.slane %v7268_v0, 7  ;;  %v2134_v63 = vsel %vm2074_vm3, %v2122_v28, %v2133_v57  ;;  %v7265_v43 = vor.u32 %v7263_v25, %v7262_v40  ;;  %v14034_v28 = vld [vmem:[%s16930_s3 + $0x128] sm:$0xff]   ;;  %v17481_v0 = vld [vmem:[#allocation75_spill] sm:$0xff] }
 0x161   : > { %12291 = vmatprep.subr.bf16.mxu0 %v14030_v20  ;;  %v7286_v53 = vrot.slane %v7284_v54, 7  ;;  %v7292_v54 = vshrl.u32 %v15911_v7, 16 }
 0x162   : > { %12864 = vmatpush3.bf16.msra.mxu1 %v14027_v56  ;;  %v14032_v56 = vld [vmem:[%s16930_s3 + $0x120] sm:$0xff]   ;;  %v2141_v49 = vor.u32 %v2138_v51, %v17481_v0  ;;  %v7273_v57 = vor.u32 %v7271_v32, %v7270_v46  ;;  %v7266_v25 = vsel %vm2074_vm3, %v7254_v22, %v7265_v43 }
 0x163   : > { %12865 = vmatprep.subr.bf16.mxu1 %v14029_v16  ;;  %v15915_v22 = vld [vmem:[#allocation2 + $0x60] sm:$0xff] }
 0x164   : > { %12292 = vmatpush3.bf16.msra.mxu0 %v14030_v20  ;;  %v17482_v20 = vld [vmem:[#allocation77_spill] sm:$0xff]  ;;  %v2142_v32 = vsel %vm2074_vm3, %v2130_v35, %v2141_v49 }
 0x165   : > { %12818 = vmatmul.mubr.bf16.gmra.mrb[4].mxu1 %v7250_v23  ;;  %v2149_v60 = vor.u32 %v2146_v39, %v17482_v20  ;;  %12293 = vmatprep.subr.bf16.mxu0 %v14032_v56  ;;  %v14033_v23 = vld [vmem:[%s16930_s3 + $0x120] sm:$0xff]   ;;  %v14036_v35 = vld [vmem:[%s16930_s3 + $0x130] sm:$0xff]   ;;  %v17500_v20 = vld [vmem:[#allocation114_spill] sm:$0xff] }
 0x166   : > { %12246 = vmatmul.mubr.bf16.gmra.mrb[8].mxu0 %v2126_v6  ;;  %12821 = vmatprep.mubr.bf16.mxu1 %v7258_v4  ;;  %v7278_v6 = vrot.slane %v7276_v47, 7  ;;  %v7279_v4 = vshll.u32 %v15882_v59, 16  ;;  %v7300_v47 = vshrl.u32 %v15915_v22, 16  ;;  %v17486_v49 = vld [vmem:[#allocation85_spill] sm:$0xff]  ;;  %v2226_v0 = vrot.slane %v17500_v20, 7 }
 0x167   : > { %12249 = vmatprep.mubr.bf16.mxu0 %v2134_v63  ;;  %12866 = vmatpush3.bf16.msra.mxu1 %v14029_v16  ;;  %v7274_v16 = vsel %vm2074_vm3, %v7262_v40, %v7273_v57  ;;  %v17483_v63 = vld [vmem:[#allocation82_spill] sm:$0xff]  ;;  %v14035_v40 = vld [vmem:[%s16930_s3 + $0x128] sm:$0xff]   ;;  %v2165_v57 = vor.u32 %v2162_v48, %v17486_v49 }
 0x168   : > { %12867 = vmatprep.subr.bf16.mxu1 %v14031_v9  ;;  %12294 = vmatpush3.bf16.msra.mxu0 %v14032_v56  ;;  %v2154_v11 = vrot.slane %v17483_v63, 7  ;;  %v2150_v56 = vsel %vm2074_vm3, %v2138_v51, %v2149_v60  ;;  %v7281_v43 = vor.u32 %v7279_v4, %v7278_v6  ;;  %v14038_v60 = vld [vmem:[%s16930_s3 + $0x138] sm:$0xff]   ;;  %v17485_v51 = vld [vmem:[#allocation83_spill] sm:$0xff]  ;;  %v7302_v19 = vrot.slane %v7300_v47, 7  ;;  %v17492_v63 = vld [vmem:[#allocation100_spill] sm:$0xff] }
 0x169   : > { %12295 = vmatprep.subr.bf16.mxu0 %v14034_v28  ;;  %v17490_v47 = vld [vmem:[#allocation94_spill] sm:$0xff]  ;;  %v2194_v49 = vrot.slane %v17492_v63, 7 }
 0x16a   : > { %v7282_v4 = vsel %vm2074_vm3, %v7270_v46, %v7281_v43  ;;  %v2166_v2 = vsel %vm2074_vm3, %v2154_v11, %v2165_v57  ;;  %v15946_v46 = vld [vmem:[%s16930_s3 + $0x140] sm:$0xff]   ;;  %v14039_v43 = vld [vmem:[%s16930_s3 + $0x138] sm:$0xff]  }
 0x16b   : > { %12868 = vmatpush3.bf16.msra.mxu1 %v14031_v9  ;;  %v2157_v9 = vor.u32 %v2154_v11, %v17485_v51  ;;  %v7308_v11 = vshrl.u32 %v15938_v5, 16  ;;  %v15973_v51 = vld [vmem:[#allocation2 + $0x80] sm:$0xff] }
 0x16c   : > { %12869 = vmatprep.subr.bf16.mxu1 %v14033_v23  ;;  %12296 = vmatpush3.bf16.msra.mxu0 %v14034_v28  ;;  %v7289_v28 = vor.u32 %v7287_v42, %v7286_v53  ;;  %v2170_v42 = vrot.slane %v17487_v29, 7 }
 0x16d   : > { %12822 = vmatmul.mubr.bf16.gmra.mrb[8].mxu1 %v7266_v25  ;;  %12297 = vmatprep.subr.bf16.mxu0 %v14036_v35  ;;  %v14037_v25 = vld [vmem:[%s16930_s3 + $0x130] sm:$0xff]  }
 0x16e   : > { %12250 = vmatmul.mubr.bf16.gmra.mrb[12].mxu0 %v2142_v32  ;;  %12825 = vmatprep.mubr.bf16.mxu1 %v7274_v16  ;;  %v7294_v32 = vrot.slane %v7292_v54, 7  ;;  %v7295_v16 = vshll.u32 %v15911_v7, 16 }
 0x16f   : > { %12253 = vmatprep.mubr.bf16.mxu0 %v2150_v56  ;;  %12870 = vmatpush3.bf16.msra.mxu1 %v14033_v23  ;;  %v2158_v56 = vsel %vm2074_vm3, %v2146_v39, %v2157_v9  ;;  %v7303_v23 = vshll.u32 %v15915_v22, 16  ;;  %v15948_v39 = vld [vmem:[#allocation2 + $0x70] sm:$0xff] }
 0x170   : > { %12871 = vmatprep.subr.bf16.mxu1 %v14035_v40  ;;  %12298 = vmatpush3.bf16.msra.mxu0 %v14036_v35  ;;  %v7290_v35 = vsel %vm2074_vm3, %v7278_v6, %v7289_v28  ;;  %v7297_v6 = vor.u32 %v7295_v16, %v7294_v32  ;;  %v2181_v28 = vor.u32 %v2178_v31, %v17490_v47  ;;  %v7316_v57 = vshrl.u32 %v15948_v39, 16 }
 0x171   : > { %12299 = vmatprep.subr.bf16.mxu0 %v14038_v60  ;;  %v7305_v9 = vor.u32 %v7303_v23, %v7302_v19  ;;  %v7310_v16 = vrot.slane %v7308_v11, 7  ;;  %v7319_v29 = vshll.u32 %v15948_v39, 16  ;;  %v7332_v11 = vshrl.u32 %v15973_v51, 16 }
 0x172   : > { %v2182_v47 = vsel %vm2074_vm3, %v2170_v42, %v2181_v28 }
 0x173   : > { %12872 = vmatpush3.bf16.msra.mxu1 %v14035_v40  ;;  %v17489_v40 = vld [vmem:[#allocation91_spill] sm:$0xff] }
 0x174   : > { %12873 = vmatprep.subr.bf16.mxu1 %v14037_v25  ;;  %12300 = vmatpush3.bf16.msra.mxu0 %v14038_v60  ;;  %v2173_v54 = vor.u32 %v2170_v42, %v17489_v40  ;;  %v15961_v60 = vld [vmem:[%s16930_s3 + $0x140] sm:$0xff]   ;;  %v7318_v40 = vrot.slane %v7316_v57, 7 }
 0x175   : > { %12826 = vmatmul.mubr.bf16.gmra.mrb[12].mxu1 %v7282_v4  ;;  %12349 = vmatprep.subr.bf16.mxu0 %v15946_v46  ;;  %v7298_v4 = vsel %vm2074_vm3, %v7286_v53, %v7297_v6 }
 0x176   : > { %12254 = vmatmul.mubr.bf16.gmra.mrb[16].mxu0 %v2158_v56  ;;  %12829 = vmatprep.mubr.bf16.mxu1 %v7290_v35  ;;  %v15965_v56 = vld [vmem:[#allocation2 + $0x78] sm:$0xff]  ;;  %v2174_v23 = vsel %vm2074_vm3, %v2162_v48, %v2173_v54  ;;  %v7306_v35 = vsel %vm2074_vm3, %v7294_v32, %v7305_v9  ;;  %v17493_v32 = vld [vmem:[#allocation99_spill] sm:$0xff]  ;;  %v7321_v42 = vor.u32 %v7319_v29, %v7318_v40  ;;  %v17494_v54 = vld [vmem:[#allocation101_spill] sm:$0xff] }
 0x177   : > { %12257 = vmatprep.mubr.bf16.mxu0 %v2166_v2  ;;  %12874 = vmatpush3.bf16.msra.mxu1 %v14037_v25  ;;  %v7311_v2 = vshll.u32 %v15938_v5, 16  ;;  %v17491_v25 = vld [vmem:[#allocation98_spill] sm:$0xff]  ;;  %v7324_v53 = vshrl.u32 %v15965_v56, 16  ;;  %v2197_v9 = vor.u32 %v2194_v49, %v17494_v54  ;;  %v7327_v57 = vshll.u32 %v15965_v56, 16  ;;  %v17496_v54 = vld [vmem:[#allocation107_spill] sm:$0xff] }
 0x178   : > { %12875 = vmatprep.subr.bf16.mxu1 %v14039_v43  ;;  %v2186_v10 = vrot.slane %v17491_v25, 7 }
 0x179   : > { %v7313_v48 = vor.u32 %v7311_v2, %v7310_v16  ;;  %v7326_v28 = vrot.slane %v7324_v53, 7  ;;  %v7335_v2 = vshll.u32 %v15973_v51, 16  ;;  %v2210_v53 = vrot.slane %v17496_v54, 7 }
 0x17a   : > { %v2189_v6 = vor.u32 %v2186_v10, %v17493_v32  ;;  %v2198_v29 = vsel %vm2074_vm3, %v2186_v10, %v2197_v9 }
 0x17b   : > { %12876 = vmatpush3.bf16.msra.mxu1 %v14039_v43  ;;  %v17495_v43 = vld [vmem:[#allocation105_spill] sm:$0xff]  ;;  %v7314_v25 = vsel %vm2074_vm3, %v7302_v19, %v7313_v48  ;;  %v7329_v32 = vor.u32 %v7327_v57, %v7326_v28  ;;  %v17497_v19 = vld [vmem:[#allocation106_spill] sm:$0xff] }
 0x17c   : > { %12925 = vmatprep.subr.bf16.mxu1 %v15961_v60  ;;  %v2202_v63 = vrot.slane %v17495_v43, 7 }
 0x17d   : > { %12830 = vmatmul.mubr.bf16.gmra.mrb[16].mxu1 %v7298_v4  ;;  %v2190_v4 = vsel %vm2074_vm3, %v2178_v31, %v2189_v6  ;;  %v7330_v10 = vsel %vm2074_vm3, %v7318_v40, %v7329_v32  ;;  %v16007_v40 = vld [vmem:[#allocation2 + $0xa0] sm:$0xff] }
 0x17e   : > { %12258 = vmatmul.mubr.bf16.gmra.mrb[20].mxu0 %v2174_v23  ;;  %12833 = vmatprep.mubr.bf16.mxu1 %v7306_v35  ;;  %v7334_v23 = vrot.slane %v7332_v11, 7  ;;  %v7322_v35 = vsel %vm2074_vm3, %v7310_v16, %v7321_v42  ;;  %v2205_v48 = vor.u32 %v2202_v63, %v17497_v19  ;;  %v17498_v11 = vld [vmem:[#allocation108_spill] sm:$0xff]  ;;  %v7348_v16 = vshrl.u32 %v15990_v37, 16  ;;  %v305_v42 = vld [vmem:[%s14237_s20 + $0xb8] sm:$0xf]  ;;  %v17499_v19 = vld [vmem:[#allocation111_spill] sm:$0xff] }
 0x17f   : > { %12261 = vmatprep.mubr.bf16.mxu0 %v2182_v47  ;;  %v15985_v47 = vld [vmem:[#allocation2 + $0x88] sm:$0xff]  ;;  %v2213_v43 = vor.u32 %v2210_v53, %v17498_v11 }
 0x180   : > { %v7340_v31 = vshrl.u32 %v15985_v47, 16  ;;  %v7337_v6 = vor.u32 %v7335_v2, %v7334_v23  ;;  %v2206_v9 = vsel %vm2074_vm3, %v2194_v49, %v2205_v48  ;;  %v7351_v2 = vshll.u32 %v15990_v37, 16 }
 0x181   : > { %v2214_v11 = vsel %vm2074_vm3, %v2202_v63, %v2213_v43  ;;  %v7350_v52 = vrot.slane %v7348_v16, 7  ;;  %v17502_v63 = vld [vmem:[#allocation115_spill] sm:$0xff] }
 0x182   : > { %v7342_v57 = vrot.slane %v7340_v31, 7  ;;  %v7338_v54 = vsel %vm2074_vm3, %v7326_v28, %v7337_v6  ;;  %v17501_v28 = vld [vmem:[#allocation112_spill] sm:$0xff]  ;;  %v7364_v31 = vshrl.u32 %v16007_v40, 16  ;;  %v2229_v43 = vor.u32 %v2226_v0, %v17502_v63 }
 0x185   : > { %12834 = vmatmul.mubr.bf16.gmra.mrb[20].mxu1 %v7314_v25  ;;  %v7343_v25 = vshll.u32 %v15985_v47, 16 }
 0x186   : > { %12262 = vmatmul.mubr.bf16.gmra.mrb[24].mxu0 %v2190_v4  ;;  %12837 = vmatprep.mubr.bf16.mxu1 %v7322_v35  ;;  %v16000_v4 = vld [vmem:[#allocation2 + $0x98] sm:$0xff]  ;;  %v2218_v35 = vrot.slane %v17499_v19, 7 }
 0x187   : > { %12265 = vmatprep.mubr.bf16.mxu0 %v2198_v29  ;;  %v353_v29 = vunpack.c.l.bf16 %v305_v42  ;;  %v7356_v49 = vshrl.u32 %v16000_v4, 16  ;;  %v7345_v32 = vor.u32 %v7343_v25, %v7342_v57  ;;  %v7353_v42 = vor.u32 %v7351_v2, %v7350_v52  ;;  %v16019_v25 = vld [vmem:[#allocation2 + $0xa8] sm:$0xff] }
 0x188   : > { %v2221_v48 = vor.u32 %v2218_v35, %v17501_v28  ;;  %v7359_v20 = vshll.u32 %v16000_v4, 16  ;;  %v2230_v2 = vsel %vm2074_vm3, %v2218_v35, %v2229_v43  ;;  %v17507_v35 = vld [vmem:[#allocation50_spill] sm:$0xff] }
 0x189   : > { %v408_v6 = vmul.f32 %v15779_v45, %v353_v29  ;;  %v7358_v16 = vrot.slane %v7356_v49, 7  ;;  %v7346_v19 = vsel %vm2074_vm3, %v7334_v23, %v7345_v32  ;;  %v7354_v45 = vsel %vm2074_vm3, %v7342_v57, %v7353_v42  ;;  %v17504_v29 = vld [vmem:[#allocation121_spill] sm:$0xff]  ;;  %v17505_v23 = vld [vmem:[#allocation118_spill] sm:$0xff] }
 0x18a   : > { %v2242_v49 = vrot.slane %v17504_v29, 7  ;;  %v7372_v32 = vshrl.u32 %v16019_v25, 16  ;;  %v7380_v57 = vshrl.u32 %v16025_v34, 16  ;;  %v16032_v42 = vshrl.u32 %v17507_v35, 16 }
 0x18b   : > { %v463_v28 = vadd.f32 %v15787_v30, %v408_v6  ;;  %v7361_v63 = vor.u32 %v7359_v20, %v7358_v16  ;;  %v17506_v30 = vld [vmem:[#allocation124_spill] sm:$0xff] }
 0x18c   : > { %v2245_v6 = vor.u32 %v2242_v49, %v17506_v30  ;;  %17508 = vst [vmem:[#allocation110_spill] sm:$0xff] %v16032_v42  ;;  %v7374_v43 = vrot.slane %v7372_v32, 7  ;;  %v7382_v30 = vrot.slane %v7380_v57, 7 }
 0x18d   : > { %12838 = vmatmul.mubr.bf16.gmra.mrb[24].mxu1 %v7330_v10  ;;  %v2234_v10 = vrot.slane %v17503_v12, 7  ;;  %v7362_v20 = vsel %vm2074_vm3, %v7350_v52, %v7361_v63  ;;  %v2258_v52 = vrot.slane %v16032_v42, 7  ;;  %v16050_v63 = vld [vmem:[#allocation2 + $0xc0] sm:$0xff] }
 0x18e   : > { %12266 = vmatmul.mubr.bf16.gmra.mrb[28].mxu0 %v2206_v9  ;;  %12841 = vmatprep.mubr.bf16.mxu1 %v7338_v54  ;;  %v2222_v9 = vsel %vm2074_vm3, %v2210_v53, %v2221_v48  ;;  %v7366_v54 = vrot.slane %v7364_v31, 7  ;;  %v511_v31 = vmax.f32 %v463_v28, 0.0  ;;  %v7383_v28 = vshll.u32 %v16025_v34, 16 }
 0x18f   : > { %12269 = vmatprep.mubr.bf16.mxu0 %v2214_v11  ;;  %v7367_v11 = vshll.u32 %v16007_v40, 16  ;;  %v2237_v53 = vor.u32 %v2234_v10, %v17505_v23  ;;  %v2246_v12 = vsel %vm2074_vm3, %v2234_v10, %v2245_v6  ;;  %v16044_v23 = vld [vmem:[#allocation2 + $0xb8] sm:$0xff]  ;;  %v17162_v57 = vshrl.u32 %v16050_v63, 16 }
 0x191   : > { %v7369_v48 = vor.u32 %v7367_v11, %v7366_v54  ;;  %v16041_v11 = vpack.c.bf16 %v17473_v33, %v511_v31  ;;  %v7385_v31 = vor.u32 %v7383_v28, %v7382_v30 }
 0x193   : > { %v7370_v29 = vsel %vm2074_vm3, %v7358_v16, %v7369_v48  ;;  %17510 = vst [vmem:[#allocation65_spill] sm:$0xff] %v16041_v11  ;;  %v7388_v48 = vshrl.u32 %v16044_v23, 16  ;;  %v16055_v10 = vshrl.u32 %v16041_v11, 16  ;;  %v7386_v42 = vsel %vm2074_vm3, %v7374_v43, %v7385_v31 }
 0x194   : > { %v7407_v31 = vshll.u32 %v15793_v62, 16 }
 0x195   : > { %12842 = vmatmul.mubr.bf16.gmra.mrb[28].mxu1 %v7346_v19  ;;  %v2238_v19 = vsel %vm2074_vm3, %v2226_v0, %v2237_v53  ;;  %v16048_v0 = vshll.u32 %v17507_v35, 16  ;;  %v17512_v53 = vld [vmem:[#allocation128_spill] sm:$0xff]  ;;  %17513 = vst [vmem:[#allocation71_spill] sm:$0xff] %v16055_v10 }
 0x196   : > { %12270 = vmatmul.mubr.bf16.gmra.mrb[32].mxu0 %v2222_v9  ;;  %12845 = vmatprep.mubr.bf16.mxu1 %v7354_v45  ;;  %v7375_v9 = vshll.u32 %v16019_v25, 16  ;;  %v17509_v45 = vld [vmem:[#allocation127_spill] sm:$0xff] }
 0x197   : > { %12273 = vmatprep.mubr.bf16.mxu0 %v2230_v2  ;;  %v2250_v2 = vrot.slane %v17509_v45, 7  ;;  %17511 = vst [vmem:[#allocation70_spill] sm:$0xff] %v16048_v0  ;;  %v2261_v6 = vor.u32 %v16048_v0, %v2258_v52  ;;  %v7398_v45 = vrot.slane %v17162_v57, 7  ;;  %v17163_v0 = vshll.u32 %v16050_v63, 16 }
 0x198   : > { %v7377_v16 = vor.u32 %v7375_v9, %v7374_v43  ;;  %v16064_v9 = vshll.u32 %v16041_v11, 16 }
 0x199   : > { %v2253_v32 = vor.u32 %v2250_v2, %v17512_v53  ;;  %v2262_v28 = vsel %vm2074_vm3, %v2250_v2, %v2261_v6  ;;  %v17515_v6 = vld [vmem:[#allocation3_spill] sm:$0xff] }
 0x19a   : > { %v7378_v33 = vsel %vm2074_vm3, %v7366_v54, %v7377_v16  ;;  %17514 = vst [vmem:[#allocation73_spill] sm:$0xff] %v16064_v9  ;;  %v7404_v16 = vshrl.u32 %v15793_v62, 16  ;;  %v17517_v62 = vld [vmem:[#allocation5_spill] sm:$0xff] }
 0x19d   : > { %12846 = vmatmul.mubr.bf16.gmra.mrb[32].mxu1 %v7362_v20  ;;  %v7391_v20 = vshll.u32 %v16044_v23, 16 }
 0x19e   : > { %12274 = vmatmul.mubr.bf16.gmra.mrb[36].mxu0 %v2238_v19  ;;  %12849 = vmatprep.mubr.bf16.mxu1 %v7370_v29  ;;  %v2254_v19 = vsel %vm2074_vm3, %v2242_v49, %v2253_v32  ;;  %v7390_v29 = vrot.slane %v7388_v48, 7  ;;  %v7401_v32 = vor.u32 %v17163_v0, %v7398_v45  ;;  %v7406_v48 = vrot.slane %v7404_v16, 7  ;;  %v17522_v16 = vld [vmem:[#allocation17_spill] sm:$0xff] }
 0x19f   : > { %12277 = vmatprep.mubr.bf16.mxu0 %v2246_v12  ;;  %v2266_v12 = vrot.slane %v16055_v10, 7 }
 0x1a0   : > { %v7393_v54 = vor.u32 %v7391_v20, %v7390_v29 }
 0x1a1   : > { %v2269_v49 = vor.u32 %v16064_v9, %v2266_v12  ;;  %v14045_v12 = vld [vmem:[%s16930_s3 + $0x150] sm:$0xff]  }
 0x1a2   : > { %v7394_v43 = vsel %vm2074_vm3, %v7382_v30, %v7393_v54  ;;  %v17516_v30 = vld [vmem:[#allocation4_spill] sm:$0xff]  ;;  %v17521_v54 = vld [vmem:[#allocation14_spill] sm:$0xff] }
 0x1a3   : > { %v2270_v2 = vsel %vm2074_vm3, %v2258_v52, %v2269_v49  ;;  %v14044_v52 = vld [vmem:[%s16930_s3 + $0x150] sm:$0xff]   ;;  %v14049_v49 = vld [vmem:[%s16930_s3 + $0x160] sm:$0xff]  }
 0x1a5   : > { %12850 = vmatmul.mubr.bf16.gmra.mrb[36].mxu1 %v7378_v33  ;;  %v7402_v33 = vsel %vm2074_vm3, %v7390_v29, %v7401_v32  ;;  %v17518_v29 = vld [vmem:[#allocation7_spill] sm:$0xff]  ;;  %v14054_v32 = vld [vmem:[%s16930_s3 + $0x178] sm:$0xff]  }
 0x1a6   : > { %12278 = vmatmul.mubr.bf16.gmra.mrb[40].mxu0 %v2254_v19  ;;  %12853 = vmatprep.mubr.bf16.mxu1 %v7386_v42  ;;  %v7409_v42 = vor.u32 %v7407_v31, %v7406_v48  ;;  %v14042_v19 = vld [vmem:[%s16930_s3 + $0x148] sm:$0xff]   ;;  %v17525_v31 = vld [vmem:[#allocation23_spill] sm:$0xff] }
 0x1a7   : > { %12281 = vmatprep.mubr.bf16.mxu0 %v2262_v28  ;;  %v14050_v28 = vld [vmem:[%s16930_s3 + $0x168] sm:$0xff]  }
 0x1a8   : > { %v7410_v20 = vsel %vm2074_vm3, %v7398_v45, %v7409_v42  ;;  %v14043_v45 = vld [vmem:[%s16930_s3 + $0x148] sm:$0xff]   ;;  %v17528_v42 = vld [vmem:[#allocation29_spill] sm:$0xff] }
 0x1a9   : > { %v17524_v48 = vld [vmem:[#allocation20_spill] sm:$0xff] }
 0x1ad   : > { %12854 = vmatmul.mubr.bf16.gmra.mrb[40].mxu1 %v7394_v43  ;;  %v17523_v43 = vld [vmem:[#allocation18_spill] sm:$0xff] }
 0x1ae   : > { %12282 = vmatmul.mubr.bf16.gmra.mrb[44].mxu0 %v2270_v2  ;;  %12857 = vmatprep.mubr.bf16.mxu1 %v7402_v33  ;;  %v14053_v2 = vld [vmem:[%s16930_s3 + $0x170] sm:$0xff]   ;;  %v16153_v33 = vld [vmem:[%s16930_s3 + $0x180] sm:$0xff]  }
 0x1af   : > { %12301 = vmatprep.mubr.bf16.mxu0 %v17515_v6  ;;  %v17529_v6 = vld [vmem:[#allocation30_spill] sm:$0xff] }
 0x1b5   : > { %12858 = vmatmul.mubr.bf16.gmra.mrb[44].mxu1 %v7410_v20  ;;  %v17530_v20 = vld [vmem:[#allocation32_spill] sm:$0xff] }
 0x1b6   : > { %12302 = vmatmul.mubr.bf16.vlgmr.msra.gmra.mrb[0].mxu0 %v17516_v30  ;;  %12877 = vmatprep.mubr.bf16.mxu1 %v15803_v24  ;;  %v14046_v24 = vld [vmem:[%s16930_s3 + $0x158] sm:$0xff]  }
 0x1b7   : > { %12350 = vmatpush3.bf16.msra.mxu0 %v15946_v46  ;;  %12305 = vmatprep.mubr.bf16.mxu0 %v17517_v62  ;;  %v17519_v46 = vld [vmem:[#allocation11_spill] sm:$0xff] }
 0x1b8   : > { %12351 = vmatprep.subr.bf16.mxu0 %v14042_v19 }
 0x1bb   : > { %12352 = vmatpush3.bf16.msra.mxu0 %v14042_v19  ;;  %v8093_v19 = vld [vmem:[#allocation2 + $0x10] sm:$0xff] }
 0x1bc   : > { %12353 = vmatprep.subr.bf16.mxu0 %v14044_v52  ;;  %v8137_v30 = vshll.u32 %v8093_v19, 16 }
 0x1bd   : > { %12878 = vmatmul.mubr.bf16.vlgmr.msra.gmra.mrb[0].mxu1 %v15814_v17  ;;  %v14048_v17 = vld [vmem:[%s16930_s3 + $0x160] sm:$0xff]  }
 0x1be   : > { %12306 = vmatmul.mubr.bf16.gmra.mrb[4].mxu0 %v17518_v29  ;;  %12926 = vmatpush3.bf16.msra.mxu1 %v15961_v60  ;;  %v17520_v60 = vld [vmem:[#allocation12_spill] sm:$0xff] }
 0x1bf   : > { %12881 = vmatprep.mubr.bf16.mxu1 %v15818_v61  ;;  %12927 = vmatprep.subr.bf16.mxu1 %v14043_v45  ;;  %v14047_v61 = vld [vmem:[%s16930_s3 + $0x158] sm:$0xff]  }
 0x1c0   : > { %12309 = vmatprep.mubr.bf16.mxu0 %v17519_v46  ;;  %12354 = vmatpush3.bf16.msra.mxu0 %v14044_v52  ;;  %v8135_v52 = vshrl.u32 %v8093_v19, 16  ;;  %v3021_v46 = vrot.slane %v17433_v38, 1 }
 0x1c1   : > { %12355 = vmatprep.subr.bf16.mxu0 %v14046_v24 }
 0x1c2   : > { %12928 = vmatpush3.bf16.msra.mxu1 %v14043_v45 }
 0x1c3   : > { %12929 = vmatprep.subr.bf16.mxu1 %v14045_v12 }
 0x1c4   : > { %12356 = vmatpush3.bf16.msra.mxu0 %v14046_v24 }
 0x1c5   : > { %12882 = vmatmul.mubr.bf16.gmra.mrb[4].mxu1 %v15833_v13  ;;  %12357 = vmatprep.subr.bf16.mxu0 %v14048_v17  ;;  %v14052_v13 = vld [vmem:[%s16930_s3 + $0x170] sm:$0xff]  }
 0x1c6   : > { %12310 = vmatmul.mubr.bf16.gmra.mrb[8].mxu0 %v17520_v60  ;;  %12885 = vmatprep.mubr.bf16.mxu1 %v15841_v36  ;;  %v14051_v36 = vld [vmem:[%s16930_s3 + $0x168] sm:$0xff]  }
 0x1c7   : > { %12313 = vmatprep.mubr.bf16.mxu0 %v17521_v54  ;;  %12930 = vmatpush3.bf16.msra.mxu1 %v14045_v12  ;;  %v8096_v12 = vld [vmem:[#allocation2 + $0x28] sm:$0xff] }
 0x1c8   : > { %12931 = vmatprep.subr.bf16.mxu1 %v14047_v61  ;;  %12358 = vmatpush3.bf16.msra.mxu0 %v14048_v17  ;;  %v14128_v54 = vld [vmem:[#allocation2 + $0xc8] sm:$0xff] }
 0x1c9   : > { %12359 = vmatprep.subr.bf16.mxu0 %v14050_v28 }
 0x1cb   : > { %12932 = vmatpush3.bf16.msra.mxu1 %v14047_v61 }
 0x1cc   : > { %12933 = vmatprep.subr.bf16.mxu1 %v14049_v49  ;;  %12360 = vmatpush3.bf16.msra.mxu0 %v14050_v28 }
 0x1cd   : > { %12886 = vmatmul.mubr.bf16.gmra.mrb[8].mxu1 %v15856_v41  ;;  %12361 = vmatprep.subr.bf16.mxu0 %v14052_v13  ;;  %v16140_v41 = vld [vmem:[%s16930_s3 + $0x180] sm:$0xff]  }
 0x1ce   : > { %12314 = vmatmul.mubr.bf16.gmra.mrb[12].mxu0 %v17522_v16  ;;  %12889 = vmatprep.mubr.bf16.mxu1 %v15863_v15  ;;  %v14055_v15 = vld [vmem:[%s16930_s3 + $0x178] sm:$0xff]   ;;  %v3029_v16 = vrot.slane %v17450_v27, 1  ;;  %v16217_v27 = vshrl.u32 %v8096_v12, 16 }
 0x1cf   : > { %12317 = vmatprep.mubr.bf16.mxu0 %v17523_v43  ;;  %12934 = vmatpush3.bf16.msra.mxu1 %v14049_v49 }
 0x1d0   : > { %12935 = vmatprep.subr.bf16.mxu1 %v14051_v36  ;;  %12362 = vmatpush3.bf16.msra.mxu0 %v14052_v13  ;;  %v8097_v13 = vld [vmem:[#allocation2 + $0x30] sm:$0xff] }
 0x1d1   : > { %12363 = vmatprep.subr.bf16.mxu0 %v14054_v32 }
 0x1d3   : > { %12936 = vmatpush3.bf16.msra.mxu1 %v14051_v36  ;;  %v3025_v36 = vor.u32 %v3021_v46, %v17375_v26 }
 0x1d4   : > { %12937 = vmatprep.subr.bf16.mxu1 %v14053_v2  ;;  %12364 = vmatpush3.bf16.msra.mxu0 %v14054_v32 }
 0x1d5   : > { %12890 = vmatmul.mubr.bf16.gmra.mrb[12].mxu1 %v15882_v59  ;;  %12413 = vmatprep.subr.bf16.mxu0 %v16140_v41  ;;  %v17526_v59 = vld [vmem:[#allocation24_spill] sm:$0xff] }
 0x1d6   : > { %12318 = vmatmul.mubr.bf16.gmra.mrb[16].mxu0 %v17524_v48  ;;  %12893 = vmatprep.mubr.bf16.mxu1 %v15890_v18  ;;  %v17527_v18 = vld [vmem:[#allocation26_spill] sm:$0xff]  ;;  %v16212_v48 = vshll.u32 %v8097_v13, 16 }
 0x1d7   : > { %12321 = vmatprep.mubr.bf16.mxu0 %v17525_v31  ;;  %12938 = vmatpush3.bf16.msra.mxu1 %v14053_v2  ;;  %v8098_v2 = vld [vmem:[#allocation2 + $0x38] sm:$0xff]  ;;  %v3037_v31 = vrot.slane %v17455_v50, 1 }
 0x1d8   : > { %12939 = vmatprep.subr.bf16.mxu1 %v14055_v15  ;;  %v8168_v50 = vrot.slane %v16212_v48, 1 }
 0x1db   : > { %12940 = vmatpush3.bf16.msra.mxu1 %v14055_v15  ;;  %v14060_v15 = vld [vmem:[%s16930_s3 + $0x190] sm:$0xff]  }
 0x1dc   : > { %12989 = vmatprep.subr.bf16.mxu1 %v16153_v33 }
 0x1dd   : > { %12894 = vmatmul.mubr.bf16.gmra.mrb[16].mxu1 %v15911_v7  ;;  %v17531_v7 = vld [vmem:[#allocation35_spill] sm:$0xff] }
 0x1de   : > { %12322 = vmatmul.mubr.bf16.gmra.mrb[20].mxu0 %v17526_v59  ;;  %12897 = vmatprep.mubr.bf16.mxu1 %v15915_v22  ;;  %v17532_v22 = vld [vmem:[#allocation36_spill] sm:$0xff]  ;;  %v3030_v59 = vsel %vm2994_vm4, %v3025_v36, %v3029_v16 }
 0x1df   : > { %12325 = vmatprep.mubr.bf16.mxu0 %v17527_v18  ;;  %v16220_v18 = vshrl.u32 %v8097_v13, 16  ;;  %v17542_v13 = vld [vmem:[#allocation76_spill] sm:$0xff] }
 0x1e5   : > { %12898 = vmatmul.mubr.bf16.gmra.mrb[20].mxu1 %v15938_v5  ;;  %v17533_v5 = vld [vmem:[#allocation38_spill] sm:$0xff] }
 0x1e6   : > { %12326 = vmatmul.mubr.bf16.gmra.mrb[24].mxu0 %v17528_v42  ;;  %12901 = vmatprep.mubr.bf16.mxu1 %v15948_v39  ;;  %v17534_v39 = vld [vmem:[#allocation41_spill] sm:$0xff]  ;;  %v16222_v42 = vshll.u32 %v8098_v2, 16 }
 0x1e7   : > { %12329 = vmatprep.mubr.bf16.mxu0 %v17529_v6 }
 0x1e8   : > { %v8176_v19 = vrot.slane %v16222_v42, 1 }
 0x1ed   : > { %12902 = vmatmul.mubr.bf16.gmra.mrb[24].mxu1 %v15965_v56  ;;  %v17535_v56 = vld [vmem:[#allocation42_spill] sm:$0xff] }
 0x1ee   : > { %12330 = vmatmul.mubr.bf16.gmra.mrb[28].mxu0 %v17530_v20  ;;  %12905 = vmatprep.mubr.bf16.mxu1 %v15973_v51  ;;  %v3000_v51 = vrot.slane %v17476_v14, 1  ;;  %v8139_v14 = vrot.slane %v8137_v30, 1  ;;  %v14059_v20 = vld [vmem:[%s16930_s3 + $0x188] sm:$0xff]   ;;  %v17539_v30 = vld [vmem:[#allocation75_spill] sm:$0xff] }
 0x1ef   : > { %12333 = vmatprep.mubr.bf16.mxu0 %v17531_v7 }
 0x1f5   : > { %12906 = vmatmul.mubr.bf16.gmra.mrb[28].mxu1 %v15985_v47  ;;  %v17536_v47 = vld [vmem:[#allocation45_spill] sm:$0xff] }
 0x1f6   : > { %12334 = vmatmul.mubr.bf16.gmra.mrb[32].mxu0 %v17532_v22  ;;  %12909 = vmatprep.mubr.bf16.mxu1 %v15990_v37  ;;  %v3001_v37 = vor.u32 %v3000_v51, %v17475_v58  ;;  %v3013_v58 = vrot.slane %v17359_v8, 1  ;;  %v14058_v8 = vld [vmem:[%s16930_s3 + $0x188] sm:$0xff]   ;;  %v3045_v22 = vrot.slane %v17463_v44, 1  ;;  %v8172_v51 = vor.u32 %v16220_v18, %v8168_v50 }
 0x1f7   : > { %12337 = vmatprep.mubr.bf16.mxu0 %v17533_v5  ;;  %v14062_v5 = vld [vmem:[%s16930_s3 + $0x198] sm:$0xff]   ;;  %v3053_v44 = vrot.slane %v17539_v30, 1  ;;  %v8103_v30 = vld [vmem:[#allocation2 + $0x60] sm:$0xff] }
 0x1f8   : > { %v3017_v24 = vor.u32 %v3013_v58, %v17358_v1 }
 0x1fa   : > { %v3022_v1 = vsel %vm2994_vm4, %v3017_v24, %v3021_v46  ;;  %v14063_v24 = vld [vmem:[%s16930_s3 + $0x198] sm:$0xff]  }
 0x1fd   : > { %12910 = vmatmul.mubr.bf16.gmra.mrb[32].mxu1 %v16000_v4  ;;  %v3005_v4 = vrot.slane %v17478_v21, 1  ;;  %v8095_v21 = vld [vmem:[#allocation2 + $0x20] sm:$0xff] }
 0x1fe   : > { %12338 = vmatmul.mubr.bf16.gmra.mrb[36].mxu0 %v17534_v39  ;;  %12913 = vmatprep.mubr.bf16.mxu1 %v16007_v40  ;;  %v8094_v40 = vld [vmem:[#allocation2 + $0x18] sm:$0xff]  ;;  %v16191_v61 = vshll.u32 %v8095_v21, 16  ;;  %v16195_v28 = vshrl.u32 %v8095_v21, 16  ;;  %v17537_v39 = vld [vmem:[#allocation67_spill] sm:$0xff] }
 0x1ff   : > { %12341 = vmatprep.mubr.bf16.mxu0 %v17535_v56  ;;  %v3006_v62 = vsel %vm2994_vm4, %v3001_v37, %v3005_v4  ;;  %v8142_v45 = vshll.u32 %v8094_v40, 16  ;;  %v8146_v17 = vshrl.u32 %v8094_v40, 16  ;;  %v3041_v56 = vor.u32 %v3037_v31, %v17537_v39  ;;  %v17538_v37 = vld [vmem:[#allocation69_spill] sm:$0xff] }
 0x200   : > { %v8152_v49 = vrot.slane %v16191_v61, 1  ;;  %v14061_v40 = vld [vmem:[%s16930_s3 + $0x190] sm:$0xff]  }
 0x201   : > { %v8144_v29 = vrot.slane %v8142_v45, 1  ;;  %v3046_v45 = vsel %vm2994_vm4, %v3041_v56, %v3045_v22  ;;  %v17544_v39 = vld [vmem:[#allocation85_spill] sm:$0xff] }
 0x202   : > { %v8156_v32 = vor.u32 %v16195_v28, %v8152_v49  ;;  %v3077_v56 = vrot.slane %v17544_v39, 1 }
 0x203   : > { %v8148_v38 = vor.u32 %v8146_v17, %v8144_v29  ;;  %v17540_v17 = vld [vmem:[#allocation77_spill] sm:$0xff] }
 0x205   : > { %12914 = vmatmul.mubr.bf16.gmra.mrb[36].mxu1 %v16019_v25  ;;  %v8140_v25 = vor.u32 %v8139_v14, %v8135_v52  ;;  %v8153_v26 = vsel %vm2994_vm4, %v8148_v38, %v8152_v49  ;;  %v16245_v52 = vshrl.u32 %v8098_v2, 16 }
 0x206   : > { %12342 = vmatmul.mubr.bf16.gmra.mrb[40].mxu0 %v17536_v47  ;;  %12917 = vmatprep.mubr.bf16.mxu1 %v16025_v34  ;;  %v3009_v34 = vor.u32 %v3005_v4, %v17477_v3  ;;  %v16197_v3 = vshll.u32 %v8096_v12, 16  ;;  %v8099_v47 = vld [vmem:[#allocation2 + $0x40] sm:$0xff]  ;;  %v3049_v4 = vor.u32 %v3045_v22, %v17538_v37  ;;  %v14067_v22 = vld [vmem:[%s16930_s3 + $0x1a8] sm:$0xff]  }
 0x207   : > { %12345 = vmatprep.mubr.bf16.mxu0 %v17507_v35  ;;  %v8145_v60 = vsel %vm2994_vm4, %v8140_v25, %v8144_v29  ;;  %v16247_v14 = vshll.u32 %v8099_v47, 16  ;;  %v14064_v29 = vld [vmem:[%s16930_s3 + $0x1a0] sm:$0xff]   ;;  %v8180_v46 = vor.u32 %v16245_v52, %v8176_v19 }
 0x208   : > { %v8160_v43 = vrot.slane %v16197_v3, 1  ;;  %v3054_v21 = vsel %vm2994_vm4, %v3049_v4, %v3053_v44 }
 0x209   : > { %v8184_v12 = vrot.slane %v16247_v14, 1 }
 0x20a   : > { %v8161_v6 = vsel %vm2994_vm4, %v8156_v32, %v8160_v43  ;;  %v8164_v7 = vor.u32 %v16217_v27, %v8160_v43  ;;  %v8102_v43 = vld [vmem:[#allocation2 + $0x58] sm:$0xff] }
 0x20d   : > { %12918 = vmatmul.mubr.bf16.gmra.mrb[40].mxu1 %v16044_v23  ;;  %v3014_v23 = vsel %vm2994_vm4, %v3009_v34, %v3013_v58  ;;  %v8177_v34 = vsel %vm2994_vm4, %v8172_v51, %v8176_v19  ;;  %v16251_v58 = vshrl.u32 %v8099_v47, 16  ;;  %v14070_v51 = vld [vmem:[%s16930_s3 + $0x1b8] sm:$0xff]  }
 0x20e   : > { %12346 = vmatmul.mubr.bf16.gmra.mrb[44].mxu0 %v16041_v11  ;;  %12921 = vmatprep.mubr.bf16.mxu1 %v16050_v63  ;;  %v17545_v19 = vld [vmem:[#allocation82_spill] sm:$0xff] }
 0x20f   : > { %12365 = vmatprep.mubr.bf16.mxu0 %v3006_v62  ;;  %v8169_v62 = vsel %vm2994_vm4, %v8164_v7, %v8168_v50  ;;  %v8188_v38 = vor.u32 %v16251_v58, %v8184_v12  ;;  %v17573_v11 = vld [vmem:[#allocation70_spill] sm:$0xff] }
 0x215   : > { %12922 = vmatmul.mubr.bf16.gmra.mrb[44].mxu1 %v14128_v54 }
 0x216   : > { %12366 = vmatmul.mubr.bf16.vlgmr.msra.gmra.mrb[0].mxu0 %v3014_v23  ;;  %12941 = vmatprep.mubr.bf16.mxu1 %v8145_v60  ;;  %v3061_v23 = vrot.slane %v17540_v17, 1  ;;  %v8101_v60 = vld [vmem:[#allocation2 + $0x50] sm:$0xff]  ;;  %v16315_v17 = vshrl.u32 %v8103_v30, 16 }
 0x217   : > { %12414 = vmatpush3.bf16.msra.mxu0 %v16140_v41  ;;  %12369 = vmatprep.mubr.bf16.mxu0 %v3022_v1  ;;  %v3033_v41 = vor.u32 %v3029_v16, %v17449_v55  ;;  %v17541_v1 = vld [vmem:[#allocation74_spill] sm:$0xff]  ;;  %v17543_v16 = vld [vmem:[#allocation83_spill] sm:$0xff]  ;;  %v16273_v2 = vshll.u32 %v8101_v60, 16 }
 0x218   : > { %12415 = vmatprep.subr.bf16.mxu0 %v14058_v8  ;;  %v3057_v54 = vor.u32 %v3053_v44, %v17541_v1  ;;  %v3065_v36 = vor.u32 %v3061_v23, %v17542_v13  ;;  %v3069_v32 = vrot.slane %v17543_v16, 1  ;;  %v17546_v44 = vld [vmem:[#allocation84_spill] sm:$0xff]  ;;  %v14071_v1 = vld [vmem:[%s16930_s3 + $0x1b8] sm:$0xff]   ;;  %v17549_v16 = vld [vmem:[#allocation89_spill] sm:$0xff] }
 0x219   : > { %v3038_v55 = vsel %vm2994_vm4, %v3033_v41, %v3037_v31  ;;  %v8185_v41 = vsel %vm2994_vm4, %v8180_v46, %v8184_v12  ;;  %v8200_v7 = vrot.slane %v16273_v2, 1 }
 0x21a   : > { %v3070_v50 = vsel %vm2994_vm4, %v3065_v36, %v3069_v32  ;;  %v3073_v47 = vor.u32 %v3069_v32, %v17545_v19  ;;  %v8105_v36 = vld [vmem:[#allocation2 + $0x70] sm:$0xff] }
 0x21b   : > { %12416 = vmatpush3.bf16.msra.mxu0 %v14058_v8  ;;  %v14066_v8 = vld [vmem:[%s16930_s3 + $0x1a8] sm:$0xff]  }
 0x21c   : > { %12417 = vmatprep.subr.bf16.mxu0 %v14060_v15  ;;  %v3078_v46 = vsel %vm2994_vm4, %v3073_v47, %v3077_v56 }
 0x21d   : > { %12942 = vmatmul.mubr.bf16.vlgmr.msra.gmra.mrb[0].mxu1 %v8153_v26  ;;  %v3062_v26 = vsel %vm2994_vm4, %v3057_v54, %v3061_v23 }
 0x21e   : > { %12370 = vmatmul.mubr.bf16.gmra.mrb[4].mxu0 %v3030_v59  ;;  %12990 = vmatpush3.bf16.msra.mxu1 %v16153_v33  ;;  %v8100_v33 = vld [vmem:[#allocation2 + $0x48] sm:$0xff]  ;;  %v16282_v59 = vshrl.u32 %v8101_v60, 16 }
 0x21f   : > { %12945 = vmatprep.mubr.bf16.mxu1 %v8161_v6  ;;  %12991 = vmatprep.subr.bf16.mxu1 %v14059_v20  ;;  %v16254_v25 = vshll.u32 %v8100_v33, 16  ;;  %v16279_v31 = vshrl.u32 %v8100_v33, 16  ;;  %v16284_v6 = vshll.u32 %v8102_v43, 16  ;;  %v17547_v33 = vld [vmem:[#allocation91_spill] sm:$0xff] }
 0x220   : > { %12373 = vmatprep.mubr.bf16.mxu0 %v3038_v55  ;;  %12418 = vmatpush3.bf16.msra.mxu0 %v14060_v15  ;;  %v14065_v15 = vld [vmem:[%s16930_s3 + $0x1a0] sm:$0xff]   ;;  %v14068_v55 = vld [vmem:[%s16930_s3 + $0x1b0] sm:$0xff]   ;;  %v8204_v37 = vor.u32 %v16282_v59, %v8200_v7 }
 0x221   : > { %12419 = vmatprep.subr.bf16.mxu0 %v14062_v5  ;;  %v8192_v49 = vrot.slane %v16254_v25, 1  ;;  %v8208_v4 = vrot.slane %v16284_v6, 1 }
 0x222   : > { %12992 = vmatpush3.bf16.msra.mxu1 %v14059_v20 }
 0x223   : > { %12993 = vmatprep.subr.bf16.mxu1 %v14061_v40  ;;  %v8193_v20 = vsel %vm2994_vm4, %v8188_v38, %v8192_v49  ;;  %v8209_v12 = vsel %vm2994_vm4, %v8204_v37, %v8208_v4 }
 0x224   : > { %12420 = vmatpush3.bf16.msra.mxu0 %v14062_v5  ;;  %v8196_v5 = vor.u32 %v16279_v31, %v8192_v49  ;;  %v17548_v49 = vld [vmem:[#allocation94_spill] sm:$0xff] }
 0x225   : > { %12946 = vmatmul.mubr.bf16.gmra.mrb[4].mxu1 %v8169_v62  ;;  %12421 = vmatprep.subr.bf16.mxu0 %v14064_v29  ;;  %v3085_v62 = vrot.slane %v17547_v33, 1  ;;  %v3093_v13 = vrot.slane %v17548_v49, 1  ;;  %v17553_v33 = vld [vmem:[#allocation98_spill] sm:$0xff] }
 0x226   : > { %12374 = vmatmul.mubr.bf16.gmra.mrb[8].mxu0 %v3046_v45  ;;  %12949 = vmatprep.mubr.bf16.mxu1 %v8177_v34  ;;  %v8104_v45 = vld [vmem:[#allocation2 + $0x68] sm:$0xff]  ;;  %v14069_v34 = vld [vmem:[%s16930_s3 + $0x1b0] sm:$0xff]  }
 0x227   : > { %12377 = vmatprep.mubr.bf16.mxu0 %v3054_v21  ;;  %12994 = vmatpush3.bf16.msra.mxu1 %v14061_v40  ;;  %v3081_v40 = vor.u32 %v3077_v56, %v17546_v44  ;;  %v8201_v21 = vsel %vm2994_vm4, %v8196_v5, %v8200_v7  ;;  %v16318_v60 = vshll.u32 %v8104_v45, 16  ;;  %v3089_v32 = vor.u32 %v3085_v62, %v17549_v16  ;;  %v17552_v44 = vld [vmem:[#allocation101_spill] sm:$0xff] }
 0x228   : > { %12995 = vmatprep.subr.bf16.mxu1 %v14063_v24  ;;  %12422 = vmatpush3.bf16.msra.mxu0 %v14064_v29  ;;  %v16309_v29 = vshrl.u32 %v8102_v43, 16  ;;  %v16337_v7 = vshll.u32 %v8105_v36, 16  ;;  %v16345_v39 = vshrl.u32 %v8104_v45, 16 }
 0x229   : > { %12423 = vmatprep.subr.bf16.mxu0 %v14066_v8  ;;  %v3086_v23 = vsel %vm2994_vm4, %v3081_v40, %v3085_v62  ;;  %v3094_v56 = vsel %vm2994_vm4, %v3089_v32, %v3093_v13  ;;  %v3109_v40 = vrot.slane %v17552_v44, 1  ;;  %v17559_v44 = vld [vmem:[#allocation112_spill] sm:$0xff] }
 0x22a   : > { %v8212_v54 = vor.u32 %v16309_v29, %v8208_v4  ;;  %v8232_v4 = vrot.slane %v16337_v7, 1 }
 0x22b   : > { %12996 = vmatpush3.bf16.msra.mxu1 %v14063_v24  ;;  %v16311_v24 = vshll.u32 %v8103_v30, 16 }
 0x22c   : > { %12997 = vmatprep.subr.bf16.mxu1 %v14065_v15  ;;  %12424 = vmatpush3.bf16.msra.mxu0 %v14066_v8  ;;  %v16323_v8 = vld [vmem:[%s16930_s3 + $0x1c0] sm:$0xff]  }
 0x22d   : > { %12950 = vmatmul.mubr.bf16.gmra.mrb[8].mxu1 %v8185_v41  ;;  %12425 = vmatprep.subr.bf16.mxu0 %v14068_v55  ;;  %v8216_v38 = vrot.slane %v16311_v24, 1  ;;  %v17550_v41 = vld [vmem:[#allocation93_spill] sm:$0xff] }
 0x22e   : > { %12378 = vmatmul.mubr.bf16.gmra.mrb[12].mxu0 %v3062_v26  ;;  %12953 = vmatprep.mubr.bf16.mxu1 %v8193_v20  ;;  %v3097_v26 = vor.u32 %v3093_v13, %v17550_v41  ;;  %v17551_v20 = vld [vmem:[#allocation99_spill] sm:$0xff] }
 0x22f   : > { %12381 = vmatprep.mubr.bf16.mxu0 %v3070_v50  ;;  %12998 = vmatpush3.bf16.msra.mxu1 %v14065_v15  ;;  %v8220_v43 = vor.u32 %v16315_v17, %v8216_v38  ;;  %v8224_v15 = vrot.slane %v16318_v60, 1  ;;  %v3101_v50 = vrot.slane %v17551_v20, 1  ;;  %v8217_v5 = vsel %vm2994_vm4, %v8212_v54, %v8216_v38  ;;  %v8108_v54 = vld [vmem:[#allocation2 + $0x88] sm:$0xff] }
 0x230   : > { %12999 = vmatprep.subr.bf16.mxu1 %v14067_v22  ;;  %12426 = vmatpush3.bf16.msra.mxu0 %v14068_v55  ;;  %v8106_v55 = vld [vmem:[#allocation2 + $0x78] sm:$0xff]  ;;  %v17556_v20 = vld [vmem:[#allocation108_spill] sm:$0xff] }
 0x231   : > { %12427 = vmatprep.subr.bf16.mxu0 %v14070_v51  ;;  %v16350_v19 = vshll.u32 %v8106_v55, 16  ;;  %v8225_v47 = vsel %vm2994_vm4, %v8220_v43, %v8224_v15  ;;  %v3102_v37 = vsel %vm2994_vm4, %v3097_v26, %v3101_v50  ;;  %v8228_v30 = vor.u32 %v16345_v39, %v8224_v15 }
 0x232   : > { %v3105_v62 = vor.u32 %v3101_v50, %v17553_v33  ;;  %v16364_v49 = vshrl.u32 %v8106_v55, 16  ;;  %v16373_v15 = vshll.u32 %v8108_v54, 16  ;;  %v3125_v50 = vrot.slane %v17556_v20, 1  ;;  %v8109_v55 = vld [vmem:[#allocation2 + $0x90] sm:$0xff]  ;;  %v8110_v33 = vld [vmem:[#allocation2 + $0x98] sm:$0xff] }
 0x233   : > { %13000 = vmatpush3.bf16.msra.mxu1 %v14067_v22  ;;  %v16342_v22 = vld [vmem:[%s16930_s3 + $0x1c0] sm:$0xff]   ;;  %v8233_v38 = vsel %vm2994_vm4, %v8228_v30, %v8232_v4 }
 0x234   : > { %13001 = vmatprep.subr.bf16.mxu1 %v14069_v34  ;;  %12428 = vmatpush3.bf16.msra.mxu0 %v14070_v51  ;;  %v16348_v51 = vshrl.u32 %v8105_v36, 16  ;;  %v3110_v36 = vsel %vm2994_vm4, %v3105_v62, %v3109_v40  ;;  %v16383_v62 = vshll.u32 %v8109_v55, 16 }
 0x235   : > { %12954 = vmatmul.mubr.bf16.gmra.mrb[12].mxu1 %v8201_v21  ;;  %12477 = vmatprep.subr.bf16.mxu0 %v16323_v8  ;;  %v8107_v21 = vld [vmem:[#allocation2 + $0x80] sm:$0xff] }
 0x236   : > { %12382 = vmatmul.mubr.bf16.gmra.mrb[16].mxu0 %v3078_v46  ;;  %12957 = vmatprep.mubr.bf16.mxu1 %v8209_v12  ;;  %v8236_v45 = vor.u32 %v16348_v51, %v8232_v4  ;;  %v17554_v46 = vld [vmem:[#allocation100_spill] sm:$0xff]  ;;  %v16366_v13 = vshll.u32 %v8107_v21, 16  ;;  %v16370_v32 = vshrl.u32 %v8107_v21, 16  ;;  %v17558_v4 = vld [vmem:[#allocation107_spill] sm:$0xff] }
 0x237   : > { %12385 = vmatprep.mubr.bf16.mxu0 %v3086_v23  ;;  %13002 = vmatpush3.bf16.msra.mxu1 %v14069_v34  ;;  %v8240_v34 = vrot.slane %v16350_v19, 1  ;;  %v3113_v12 = vor.u32 %v3109_v40, %v17554_v46  ;;  %v17555_v23 = vld [vmem:[#allocation106_spill] sm:$0xff]  ;;  %v3129_v30 = vor.u32 %v3125_v50, %v17558_v4  ;;  %v3133_v40 = vrot.slane %v17559_v44, 1  ;;  %v8112_v4 = vld [vmem:[#allocation2 + $0xa8] sm:$0xff] }
 0x238   : > { %13003 = vmatprep.subr.bf16.mxu1 %v14071_v1  ;;  %v8248_v26 = vrot.slane %v16366_v13, 1  ;;  %v16389_v46 = vshrl.u32 %v8109_v55, 16  ;;  %v17562_v55 = vld [vmem:[#allocation114_spill] sm:$0xff]  ;;  %v16404_v44 = vshrl.u32 %v8110_v33, 16  ;;  %v16425_v57 = vshrl.u32 %v8112_v4, 16 }
 0x239   : > { %v8241_v16 = vsel %vm2994_vm4, %v8236_v45, %v8240_v34  ;;  %v8244_v41 = vor.u32 %v16364_v49, %v8240_v34  ;;  %v16386_v34 = vshrl.u32 %v8108_v54, 16  ;;  %v17561_v54 = vld [vmem:[#allocation111_spill] sm:$0xff] }
 0x23a   : > { %17570 = vst [vmem:[#allocation53_spill] sm:$0xff] %v16425_v57 }
 0x23b   : > { %13004 = vmatpush3.bf16.msra.mxu1 %v14071_v1  ;;  %v3117_v1 = vrot.slane %v17555_v23, 1  ;;  %v8249_v45 = vsel %vm2994_vm4, %v8244_v41, %v8248_v26  ;;  %v3137_v41 = vor.u32 %v3133_v40, %v17561_v54 }
 0x23c   : > { %13053 = vmatprep.subr.bf16.mxu1 %v16342_v22 }
 0x23d   : > { %12958 = vmatmul.mubr.bf16.gmra.mrb[16].mxu1 %v8217_v5  ;;  %v3118_v43 = vsel %vm2994_vm4, %v3113_v12, %v3117_v1  ;;  %v17557_v5 = vld [vmem:[#allocation105_spill] sm:$0xff]  ;;  %v16391_v12 = vshll.u32 %v8110_v33, 16 }
 0x23e   : > { %12386 = vmatmul.mubr.bf16.gmra.mrb[20].mxu0 %v3094_v56  ;;  %12961 = vmatprep.mubr.bf16.mxu1 %v8225_v47  ;;  %v3121_v56 = vor.u32 %v3117_v1, %v17557_v5  ;;  %v8252_v47 = vor.u32 %v16370_v32, %v8248_v26  ;;  %v3134_v1 = vsel %vm2994_vm4, %v3129_v30, %v3133_v40 }
 0x23f   : > { %12389 = vmatprep.mubr.bf16.mxu0 %v3102_v37  ;;  %v8256_v37 = vrot.slane %v16373_v15, 1  ;;  %v8272_v20 = vrot.slane %v16391_v12, 1 }
 0x240   : > { %v3126_v21 = vsel %vm2994_vm4, %v3121_v56, %v3125_v50  ;;  %v8111_v50 = vld [vmem:[#allocation2 + $0xa0] sm:$0xff]  ;;  %v17563_v56 = vld [vmem:[#allocation118_spill] sm:$0xff] }
 0x241   : > { %v8257_v23 = vsel %vm2994_vm4, %v8252_v47, %v8256_v37  ;;  %v3149_v47 = vrot.slane %v17563_v56, 1  ;;  %v17569_v56 = vld [vmem:[#allocation121_spill] sm:$0xff] }
 0x245   : > { %12962 = vmatmul.mubr.bf16.gmra.mrb[20].mxu1 %v8233_v38  ;;  %v8264_v38 = vrot.slane %v16383_v62, 1 }
 0x246   : > { %12390 = vmatmul.mubr.bf16.gmra.mrb[24].mxu0 %v3110_v36  ;;  %12965 = vmatprep.mubr.bf16.mxu1 %v8241_v16  ;;  %v8260_v36 = vor.u32 %v16386_v34, %v8256_v37  ;;  %v17560_v16 = vld [vmem:[#allocation115_spill] sm:$0xff]  ;;  %v16406_v37 = vshll.u32 %v8111_v50, 16 }
 0x247   : > { %12393 = vmatprep.mubr.bf16.mxu0 %v3118_v43  ;;  %v3141_v43 = vrot.slane %v17560_v16, 1  ;;  %v8268_v26 = vor.u32 %v16389_v46, %v8264_v38  ;;  %v8113_v16 = vld [vmem:[#allocation2 + $0xb0] sm:$0xff] }
 0x248   : > { %v8265_v30 = vsel %vm2994_vm4, %v8260_v36, %v8264_v38  ;;  %17564 = vst [vmem:[#allocation55_spill] sm:$0xff] %v16406_v37  ;;  %v8280_v54 = vrot.slane %v16406_v37, 1  ;;  %v17566_v38 = vld [vmem:[#allocation124_spill] sm:$0xff]  ;;  %v8276_v36 = vor.u32 %v16404_v44, %v8272_v20 }
 0x249   : > { %v3145_v5 = vor.u32 %v3141_v43, %v17562_v55  ;;  %v8273_v40 = vsel %vm2994_vm4, %v8268_v26, %v8272_v20  ;;  %v3157_v33 = vrot.slane %v17566_v38, 1  ;;  %v16419_v26 = vshll.u32 %v8113_v16, 16 }
 0x24a   : > { %v16427_v38 = vshrl.u32 %v8113_v16, 16  ;;  %v8281_v20 = vsel %vm2994_vm4, %v8276_v36, %v8280_v54 }
 0x24b   : > { %17568 = vst [vmem:[#allocation52_spill] sm:$0xff] %v16419_v26 }
 0x24c   : > { %17571 = vst [vmem:[#allocation54_spill] sm:$0xff] %v16427_v38 }
 0x24d   : > { %12966 = vmatmul.mubr.bf16.gmra.mrb[24].mxu1 %v8249_v45  ;;  %v3142_v45 = vsel %vm2994_vm4, %v3137_v41, %v3141_v43  ;;  %v17567_v43 = vld [vmem:[#allocation117_spill] sm:$0xff] }
 0x24e   : > { %12394 = vmatmul.mubr.bf16.gmra.mrb[28].mxu0 %v3126_v21  ;;  %12969 = vmatprep.mubr.bf16.mxu1 %v8257_v23  ;;  %v16410_v21 = vshrl.u32 %v8111_v50, 16  ;;  %v3150_v23 = vsel %vm2994_vm4, %v3145_v5, %v3149_v47  ;;  %v3153_v41 = vor.u32 %v3149_v47, %v17567_v43  ;;  %v8114_v50 = vld [vmem:[#allocation2 + $0xb8] sm:$0xff]  ;;  %v8296_v43 = vrot.slane %v16419_v26, 1  ;;  %v17576_v26 = vld [vmem:[#allocation8_spill] sm:$0xff] }
 0x24f   : > { %12397 = vmatprep.mubr.bf16.mxu0 %v3134_v1  ;;  %v16413_v1 = vshll.u32 %v8112_v4, 16  ;;  %v17574_v4 = vld [vmem:[#allocation127_spill] sm:$0xff] }
 0x250   : > { %v8284_v55 = vor.u32 %v16410_v21, %v8280_v54  ;;  %v3158_v47 = vsel %vm2994_vm4, %v3153_v41, %v3157_v33  ;;  %v8300_v35 = vor.u32 %v16427_v38, %v8296_v43  ;;  %v3181_v41 = vrot.slane %v16064_v9, 1 }
 0x251   : > { %17565 = vst [vmem:[#allocation51_spill] sm:$0xff] %v16413_v1  ;;  %v8288_v5 = vrot.slane %v16413_v1, 1  ;;  %v17578_v38 = vshll.u32 %v16050_v63, 16 }
 0x253   : > { %v8312_v1 = vrot.slane %v17578_v38, 1 }
 0x255   : > { %12970 = vmatmul.mubr.bf16.gmra.mrb[28].mxu1 %v8265_v30  ;;  %v3161_v30 = vor.u32 %v3157_v33, %v17569_v56  ;;  %v8292_v56 = vor.u32 %v16425_v57, %v8288_v5  ;;  %v17575_v33 = vld [vmem:[#allocation110_spill] sm:$0xff] }
 0x256   : > { %12398 = vmatmul.mubr.bf16.gmra.mrb[32].mxu0 %v3142_v45  ;;  %12973 = vmatprep.mubr.bf16.mxu1 %v8273_v40  ;;  %v3165_v45 = vrot.slane %v17512_v53, 1  ;;  %v16429_v40 = vshll.u32 %v8114_v50, 16  ;;  %v3173_v53 = vrot.slane %v17573_v11, 1  ;;  %v3581_v11 = vshll.u32 %v17576_v26, 16  ;;  %v8675_v57 = vld [vmem:[#allocation2 + $0x18] sm:$0xf8] }
 0x257   : > { %12401 = vmatprep.mubr.bf16.mxu0 %v3150_v23  ;;  %v8289_v23 = vsel %vm2994_vm4, %v8284_v55, %v8288_v5  ;;  %v2977_v55 = vld [vmem:[#allocation2 + $0xd0] sm:$0x1]  ;;  %v3578_v5 = vshrl.u32 %v17576_v26, 16 }
 0x258   : > { %17572 = vst [vmem:[#allocation128_spill] sm:$0xff] %v16429_v40  ;;  %v3166_v0 = vsel %vm2994_vm4, %v3161_v30, %v3165_v45  ;;  %v3169_v16 = vor.u32 %v3165_v45, %v17574_v4  ;;  %v8304_v54 = vrot.slane %v16429_v40, 1  ;;  %v3177_v36 = vor.u32 %v3173_v53, %v17575_v33  ;;  %v8116_v30 = vld [vmem:[#allocation2 + $0xc8] sm:$0xff] }
 0x259   : > { %v16448_v4 = vshrl.u32 %v8114_v50, 16  ;;  %v16451_v40 = vshll.u32 %v8116_v30, 16  ;;  %v3580_v9 = vrot.slane %v3578_v5, 3  ;;  %v3583_v33 = vrot.slane %v3581_v11, 4 }
 0x25a   : > { %v3174_v45 = vsel %vm2994_vm4, %v3169_v16, %v3173_v53  ;;  %v8117_v16 = vld [vmem:[#allocation2 + $0xd0] sm:$0x1]  ;;  %v16460_v38 = vshrl.u32 %v8116_v30, 16 }
 0x25b   : > { %17577 = vst [vmem:[#allocation3_spill] sm:$0xff] %v16448_v4  ;;  %v8308_v26 = vor.u32 %v16448_v4, %v8304_v54  ;;  %v8320_v53 = vrot.slane %v16451_v40, 1  ;;  %v3584_v11 = vor.u32 %v3583_v33, %v3580_v9  ;;  %v8326_v5 = vshll.u32 %v8117_v16, 16 }
 0x25c   : > { %v8730_v9 = vrot.slane %v16191_v61, 4 }
 0x25d   : > { %12974 = vmatmul.mubr.bf16.gmra.mrb[32].mxu1 %v8281_v20  ;;  %v8297_v20 = vsel %vm2994_vm4, %v8292_v56, %v8296_v43  ;;  %v17579_v43 = vshrl.u32 %v16050_v63, 16  ;;  %v8328_v33 = vrot.slane %v8326_v5, 1  ;;  %v17582_v5 = vld [vmem:[#allocation79_spill] sm:$0xff] }
 0x25e   : > { %12402 = vmatmul.mubr.bf16.gmra.mrb[36].mxu0 %v3158_v47  ;;  %12977 = vmatprep.mubr.bf16.mxu1 %v8289_v23  ;;  %v8305_v47 = vsel %vm2994_vm4, %v8300_v35, %v8304_v54  ;;  %v3187_v23 = vshll.u32 %v2977_v55, 16  ;;  %v3185_v35 = vor.u32 %v3181_v41, %v16055_v10  ;;  %v8720_v55 = vshll.u32 %v8675_v57, 16 }
 0x25f   : > { %12405 = vmatprep.mubr.bf16.mxu0 %v3166_v0  ;;  %v3182_v0 = vsel %vm2994_vm4, %v3177_v36, %v3181_v41  ;;  %v8316_v56 = vor.u32 %v8312_v1, %v17579_v43  ;;  %v8717_v36 = vshrl.u32 %v8675_v57, 16  ;;  %v8727_v41 = vrot.slane %v16195_v28, 3 }
 0x260   : > { %v3189_v50 = vrot.slane %v3187_v23, 1  ;;  %v8722_v23 = vrot.slane %v8720_v55, 4  ;;  %v8324_v57 = vor.u32 %v16460_v38, %v8320_v53  ;;  %v8745_v43 = vrot.slane %v16220_v18, 3 }
 0x261   : > { %v8731_v30 = vor.u32 %v8730_v9, %v8727_v41  ;;  %v8757_v41 = vrot.slane %v16222_v42, 4  ;;  %v14078_v9 = vld [vmem:[%s16930_s3 + $0x1d8] sm:$0xff]  }
 0x262   : > { %v3190_v54 = vsel %vm2994_vm4, %v3185_v35, %v3189_v50  ;;  %v8736_v35 = vrot.slane %v16217_v27, 3  ;;  %v8739_v50 = vrot.slane %v16197_v3, 4 }
 0x265   : > { %12978 = vmatmul.mubr.bf16.gmra.mrb[36].mxu1 %v8297_v20  ;;  %v8313_v20 = vsel %vm2994_vm4, %v8308_v26, %v8312_v1  ;;  %v8329_v26 = vsel %vm2994_vm4, %v8324_v57, %v8328_v33  ;;  %v17584_v33 = vld [vmem:[#allocation88_spill] sm:$0xff] }
 0x266   : > { %12406 = vmatmul.mubr.bf16.gmra.mrb[40].mxu0 %v3174_v45  ;;  %12981 = vmatprep.mubr.bf16.mxu1 %v8305_v47  ;;  %v8321_v45 = vsel %vm2994_vm4, %v8316_v56, %v8320_v53  ;;  %v17580_v47 = vld [vmem:[#allocation66_spill] sm:$0xff]  ;;  %v8748_v56 = vrot.slane %v16212_v48, 4  ;;  %v14074_v53 = vld [vmem:[%s16930_s3 + $0x1c8] sm:$0xff]  }
 0x267   : > { %12409 = vmatprep.mubr.bf16.mxu0 %v3182_v0  ;;  %v3593_v63 = vsel %vm1039_vm1, %v3584_v11, %v17580_v47  ;;  %v8719_v0 = vrot.slane %v8717_v36, 3  ;;  %v17581_v11 = vld [vmem:[#allocation72_spill] sm:$0xff]  ;;  %v8740_v36 = vor.u32 %v8739_v50, %v8736_v35  ;;  %v8775_v35 = vrot.slane %v16254_v25, 4 }
 0x268   : > { %v8749_v55 = vor.u32 %v8748_v56, %v8745_v43  ;;  %v8784_v43 = vrot.slane %v16273_v2, 4 }
 0x269   : > { %v8723_v1 = vor.u32 %v8722_v23, %v8719_v0  ;;  %v8766_v0 = vrot.slane %v16247_v14, 4  ;;  %v17583_v23 = vld [vmem:[#allocation81_spill] sm:$0xff] }
 0x26a   : > { %v8750_v47 = vsel %vm1039_vm1, %v8740_v36, %v8749_v55 }
 0x26b   : > { %v8732_v16 = vsel %vm1039_vm1, %v8723_v1, %v8731_v30 }
 0x26d   : > { %12982 = vmatmul.mubr.bf16.gmra.mrb[40].mxu1 %v8313_v20  ;;  %v14076_v20 = vld [vmem:[%s16930_s3 + $0x1d0] sm:$0xff]  }
 0x26e   : > { %12410 = vmatmul.mubr.bf16.gmra.mrb[44].mxu0 %v3190_v54  ;;  %12985 = vmatprep.mubr.bf16.mxu1 %v8321_v45  ;;  %v8741_v54 = vsel %vm1039_vm1, %v8731_v30, %v8740_v36  ;;  %v8754_v45 = vrot.slane %v16245_v52, 3  ;;  %v14077_v30 = vld [vmem:[%s16930_s3 + $0x1d0] sm:$0xff]  }
 0x26f   : > { %12429 = vmatprep.mubr.bf16.mxu0 %v3593_v63  ;;  %v8763_v63 = vrot.slane %v16251_v58, 3 }
 0x270   : > { %v8758_v57 = vor.u32 %v8757_v41, %v8754_v45  ;;  %v8790_v41 = vrot.slane %v16309_v29, 3 }
 0x271   : > { %v8767_v1 = vor.u32 %v8766_v0, %v8763_v63  ;;  %v8799_v63 = vrot.slane %v16315_v17, 3  ;;  %v8802_v0 = vrot.slane %v16311_v24, 4 }
 0x272   : > { %v8759_v50 = vsel %vm1039_vm1, %v8749_v55, %v8758_v57  ;;  %v14082_v55 = vld [vmem:[%s16930_s3 + $0x1e8] sm:$0xff]  }
 0x273   : > { %v8768_v56 = vsel %vm1039_vm1, %v8758_v57, %v8767_v1  ;;  %v17587_v57 = vld [vmem:[#allocation97_spill] sm:$0xff] }
 0x275   : > { %12986 = vmatmul.mubr.bf16.gmra.mrb[44].mxu1 %v8329_v26  ;;  %v8772_v26 = vrot.slane %v16279_v31, 3 }
 0x276   : > { %12430 = vmatmul.mubr.bf16.vlgmr.msra.gmra.mrb[0].mxu0 %v17581_v11  ;;  %13005 = vmatprep.mubr.bf16.mxu1 %v8732_v16  ;;  %v14080_v16 = vld [vmem:[%s16930_s3 + $0x1e0] sm:$0xff]   ;;  %v17585_v11 = vld [vmem:[#allocation90_spill] sm:$0xff] }
 0x277   : > { %12478 = vmatpush3.bf16.msra.mxu0 %v16323_v8  ;;  %12433 = vmatprep.mubr.bf16.mxu0 %v17582_v5  ;;  %v14075_v8 = vld [vmem:[%s16930_s3 + $0x1c8] sm:$0xff]   ;;  %v8776_v36 = vor.u32 %v8775_v35, %v8772_v26  ;;  %v8803_v26 = vor.u32 %v8802_v0, %v8799_v63  ;;  %v14085_v35 = vld [vmem:[%s16930_s3 + $0x1f0] sm:$0xff]   ;;  %v8835_v0 = vrot.slane %v16370_v32, 3 }
 0x278   : > { %12479 = vmatprep.subr.bf16.mxu0 %v14074_v53  ;;  %v17586_v5 = vld [vmem:[#allocation92_spill] sm:$0xff] }
 0x279   : > { %v8777_v45 = vsel %vm1039_vm1, %v8767_v1, %v8776_v36 }
 0x27b   : > { %12480 = vmatpush3.bf16.msra.mxu0 %v14074_v53  ;;  %v14079_v53 = vld [vmem:[%s16930_s3 + $0x1d8] sm:$0xff]  }
 0x27c   : > { %12481 = vmatprep.subr.bf16.mxu0 %v14076_v20 }
 0x27d   : > { %13006 = vmatmul.mubr.bf16.vlgmr.msra.gmra.mrb[0].mxu1 %v8741_v54  ;;  %v14081_v54 = vld [vmem:[%s16930_s3 + $0x1e0] sm:$0xff]  }
 0x27e   : > { %12434 = vmatmul.mubr.bf16.gmra.mrb[4].mxu0 %v17583_v23  ;;  %13054 = vmatpush3.bf16.msra.mxu1 %v16342_v22  ;;  %v8781_v22 = vrot.slane %v16282_v59, 3  ;;  %v14084_v23 = vld [vmem:[%s16930_s3 + $0x1f0] sm:$0xff]  }
 0x27f   : > { %13009 = vmatprep.mubr.bf16.mxu1 %v8750_v47  ;;  %13055 = vmatprep.subr.bf16.mxu1 %v14075_v8  ;;  %v8793_v47 = vrot.slane %v16284_v6, 4 }
 0x280   : > { %12437 = vmatprep.mubr.bf16.mxu0 %v17584_v33  ;;  %12482 = vmatpush3.bf16.msra.mxu0 %v14076_v20  ;;  %v8785_v20 = vor.u32 %v8784_v43, %v8781_v22  ;;  %v14086_v33 = vld [vmem:[%s16930_s3 + $0x1f8] sm:$0xff]   ;;  %v8811_v22 = vrot.slane %v16318_v60, 4 }
 0x281   : > { %12483 = vmatprep.subr.bf16.mxu0 %v14078_v9  ;;  %v8794_v1 = vor.u32 %v8793_v47, %v8790_v41  ;;  %v8826_v47 = vrot.slane %v16364_v49, 3 }
 0x282   : > { %13056 = vmatpush3.bf16.msra.mxu1 %v14075_v8  ;;  %v8786_v8 = vsel %vm1039_vm1, %v8776_v36, %v8785_v20  ;;  %v14087_v36 = vld [vmem:[%s16930_s3 + $0x1f8] sm:$0xff]  }
 0x283   : > { %13057 = vmatprep.subr.bf16.mxu1 %v14077_v30  ;;  %v8795_v43 = vsel %vm1039_vm1, %v8785_v20, %v8794_v1  ;;  %v17590_v20 = vld [vmem:[#allocation116_spill] sm:$0xff] }
 0x284   : > { %12484 = vmatpush3.bf16.msra.mxu0 %v14078_v9  ;;  %v14083_v9 = vld [vmem:[%s16930_s3 + $0x1e8] sm:$0xff]  }
 0x285   : > { %13010 = vmatmul.mubr.bf16.gmra.mrb[4].mxu1 %v8759_v50  ;;  %12485 = vmatprep.subr.bf16.mxu0 %v14080_v16  ;;  %v8808_v50 = vrot.slane %v16345_v39, 3 }
 0x286   : > { %12438 = vmatmul.mubr.bf16.gmra.mrb[8].mxu0 %v17585_v11  ;;  %13013 = vmatprep.mubr.bf16.mxu1 %v8768_v56  ;;  %v8817_v56 = vrot.slane %v16348_v51, 3  ;;  %v16552_v11 = vld [vmem:[%s16930_s3 + $0x200] sm:$0xff]  }
 0x287   : > { %12441 = vmatprep.mubr.bf16.mxu0 %v17586_v5  ;;  %13058 = vmatpush3.bf16.msra.mxu1 %v14077_v30  ;;  %v17588_v30 = vld [vmem:[#allocation102_spill] sm:$0xff]  ;;  %v8812_v5 = vor.u32 %v8811_v22, %v8808_v50  ;;  %v8853_v50 = vrot.slane %v16389_v46, 3  ;;  %v8856_v22 = vrot.slane %v16383_v62, 4 }
 0x288   : > { %13059 = vmatprep.subr.bf16.mxu1 %v14079_v53  ;;  %12486 = vmatpush3.bf16.msra.mxu0 %v14080_v16  ;;  %v8820_v16 = vrot.slane %v16337_v7, 4 }
 0x289   : > { %12487 = vmatprep.subr.bf16.mxu0 %v14082_v55  ;;  %v8813_v41 = vsel %vm1039_vm1, %v8803_v26, %v8812_v5 }
 0x28b   : > { %13060 = vmatpush3.bf16.msra.mxu1 %v14079_v53  ;;  %v8804_v53 = vsel %vm1039_vm1, %v8794_v1, %v8803_v26  ;;  %v8847_v26 = vrot.slane %v16373_v15, 4 }
 0x28c   : > { %13061 = vmatprep.subr.bf16.mxu1 %v14081_v54  ;;  %12488 = vmatpush3.bf16.msra.mxu0 %v14082_v55  ;;  %v17589_v55 = vld [vmem:[#allocation113_spill] sm:$0xff] }
 0x28d   : > { %13014 = vmatmul.mubr.bf16.gmra.mrb[8].mxu1 %v8777_v45  ;;  %12489 = vmatprep.subr.bf16.mxu0 %v14084_v23  ;;  %v16563_v45 = vld [vmem:[%s16930_s3 + $0x200] sm:$0xff]  }
 0x28e   : > { %12442 = vmatmul.mubr.bf16.gmra.mrb[12].mxu0 %v17587_v57  ;;  %13017 = vmatprep.mubr.bf16.mxu1 %v8786_v8  ;;  %v8829_v8 = vrot.slane %v16350_v19, 4 }
 0x28f   : > { %12445 = vmatprep.mubr.bf16.mxu0 %v17588_v30  ;;  %13062 = vmatpush3.bf16.msra.mxu1 %v14081_v54  ;;  %v8821_v54 = vor.u32 %v8820_v16, %v8817_v56  ;;  %v8844_v30 = vrot.slane %v16386_v34, 3  ;;  %v17593_v56 = vld [vmem:[#allocation122_spill] sm:$0xff] }
 0x290   : > { %13063 = vmatprep.subr.bf16.mxu1 %v14083_v9  ;;  %12490 = vmatpush3.bf16.msra.mxu0 %v14084_v23  ;;  %v8838_v23 = vrot.slane %v16366_v13, 4  ;;  %v8830_v57 = vor.u32 %v8829_v8, %v8826_v47  ;;  %v8874_v47 = vrot.slane %v16406_v37, 4  ;;  %v17595_v8 = vld [vmem:[#allocation125_spill] sm:$0xff] }
 0x291   : > { %12491 = vmatprep.subr.bf16.mxu0 %v14086_v33  ;;  %v8822_v63 = vsel %vm1039_vm1, %v8812_v5, %v8821_v54  ;;  %v8848_v16 = vor.u32 %v8847_v26, %v8844_v30  ;;  %v8862_v5 = vrot.slane %v16404_v44, 3  ;;  %v17599_v26 = vld [vmem:[#allocation54_spill] sm:$0xff] }
 0x292   : > { %v8839_v1 = vor.u32 %v8838_v23, %v8835_v0  ;;  %v17596_v0 = vld [vmem:[#allocation126_spill] sm:$0xff] }
 0x293   : > { %13064 = vmatpush3.bf16.msra.mxu1 %v14083_v9  ;;  %v17591_v9 = vld [vmem:[#allocation119_spill] sm:$0xff] }
 0x294   : > { %13065 = vmatprep.subr.bf16.mxu1 %v14085_v35  ;;  %12492 = vmatpush3.bf16.msra.mxu0 %v14086_v33  ;;  %v17592_v33 = vld [vmem:[#allocation120_spill] sm:$0xff] }
 0x295   : > { %13018 = vmatmul.mubr.bf16.gmra.mrb[12].mxu1 %v8795_v43  ;;  %12541 = vmatprep.subr.bf16.mxu0 %v16552_v11  ;;  %v8840_v43 = vsel %vm1039_vm1, %v8830_v57, %v8839_v1 }
 0x296   : > { %12446 = vmatmul.mubr.bf16.gmra.mrb[16].mxu0 %v17589_v55  ;;  %13021 = vmatprep.mubr.bf16.mxu1 %v8804_v53  ;;  %v17594_v53 = vld [vmem:[#allocation123_spill] sm:$0xff]  ;;  %v8849_v55 = vsel %vm1039_vm1, %v8839_v1, %v8848_v16 }
 0x297   : > { %12449 = vmatprep.mubr.bf16.mxu0 %v17590_v20  ;;  %13066 = vmatpush3.bf16.msra.mxu1 %v14085_v35  ;;  %v8831_v35 = vsel %vm1039_vm1, %v8821_v54, %v8830_v57  ;;  %v8865_v20 = vrot.slane %v16391_v12, 4 }
 0x298   : > { %13067 = vmatprep.subr.bf16.mxu1 %v14087_v36 }
 0x29b   : > { %13068 = vmatpush3.bf16.msra.mxu1 %v14087_v36  ;;  %v8857_v36 = vor.u32 %v8856_v22, %v8853_v50  ;;  %v17600_v50 = vld [vmem:[#allocation52_spill] sm:$0xff] }
 0x29c   : > { %13117 = vmatprep.subr.bf16.mxu1 %v16563_v45  ;;  %v8892_v22 = vrot.slane %v17600_v50, 4 }
 0x29d   : > { %13022 = vmatmul.mubr.bf16.gmra.mrb[16].mxu1 %v8813_v41  ;;  %v8858_v54 = vsel %vm1039_vm1, %v8848_v16, %v8857_v36  ;;  %v8871_v41 = vrot.slane %v16410_v21, 3 }
 0x29e   : > { %12450 = vmatmul.mubr.bf16.gmra.mrb[20].mxu0 %v17591_v9  ;;  %13025 = vmatprep.mubr.bf16.mxu1 %v8822_v63  ;;  %v8866_v63 = vor.u32 %v8865_v20, %v8862_v5  ;;  %v17597_v9 = vld [vmem:[#allocation53_spill] sm:$0xff]  ;;  %v16598_v5 = vld [vmem:[#allocation2 + $0xc0] sm:$0xff] }
 0x29f   : > { %12453 = vmatprep.mubr.bf16.mxu0 %v17592_v33  ;;  %v8875_v23 = vor.u32 %v8874_v47, %v8871_v41  ;;  %v8880_v57 = vrot.slane %v17597_v9, 3  ;;  %v17598_v33 = vld [vmem:[#allocation51_spill] sm:$0xff]  ;;  %v17603_v20 = vld [vmem:[#allocation129_spill] sm:$0xff]  ;;  %v17604_v41 = vld [vmem:[#allocation130_spill] sm:$0xff]  ;;  %v17180_v47 = vshrl.u32 %v16598_v5, 16  ;;  %v8916_v9 = vrot.slane %v16460_v38, 3 }
 0x2a0   : > { %v8883_v1 = vrot.slane %v17598_v33, 4  ;;  %v8867_v30 = vsel %vm1039_vm1, %v8857_v36, %v8866_v63 }
 0x2a5   : > { %13026 = vmatmul.mubr.bf16.gmra.mrb[20].mxu1 %v8831_v35  ;;  %v8889_v35 = vrot.slane %v17599_v26, 3 }
 0x2a6   : > { %12454 = vmatmul.mubr.bf16.gmra.mrb[24].mxu0 %v17593_v56  ;;  %13029 = vmatprep.mubr.bf16.mxu1 %v8840_v43  ;;  %v8876_v43 = vsel %vm1039_vm1, %v8866_v63, %v8875_v23  ;;  %v17601_v56 = vld [vmem:[#allocation110_spill] sm:$0xff]  ;;  %v16604_v63 = vld [vmem:[#allocation2] sm:$0xff] }
 0x2a7   : > { %12457 = vmatprep.mubr.bf16.mxu0 %v17594_v53  ;;  %v3768_v16 = vrot.slane %v17601_v56, 3  ;;  %v17602_v53 = vld [vmem:[#allocation70_spill] sm:$0xff]  ;;  %v8893_v36 = vor.u32 %v8892_v22, %v8889_v35  ;;  %v3777_v35 = vrot.slane %v16055_v10, 3  ;;  %v17606_v22 = vld [vmem:[#allocation73_spill] sm:$0xff]  ;;  %v17610_v10 = vld [vmem:[#allocation132_spill] sm:$0xff] }
 0x2ad   : > { %13030 = vmatmul.mubr.bf16.gmra.mrb[24].mxu1 %v8849_v55  ;;  %v3771_v55 = vrot.slane %v17602_v53, 4 }
 0x2ae   : > { %12458 = vmatmul.mubr.bf16.gmra.mrb[28].mxu0 %v17595_v8  ;;  %13033 = vmatprep.mubr.bf16.mxu1 %v8858_v54  ;;  %v8884_v54 = vor.u32 %v8883_v1, %v8880_v57  ;;  %v17605_v57 = vld [vmem:[#allocation128_spill] sm:$0xff] }
 0x2af   : > { %12461 = vmatprep.mubr.bf16.mxu0 %v17596_v0  ;;  %v3772_v8 = vor.u32 %v3771_v55, %v3768_v16  ;;  %v17181_v0 = vshll.u32 %v16598_v5, 16  ;;  %v8901_v1 = vrot.slane %v17605_v57, 4  ;;  %v3780_v16 = vrot.slane %v17606_v22, 4 }
 0x2b0   : > { %v8907_v55 = vrot.slane %v17180_v47, 3  ;;  %v17609_v57 = vshll.u32 %v16604_v63, 16 }
 0x2b1   : > { %v8910_v53 = vrot.slane %v17181_v0, 4  ;;  %v3781_v47 = vor.u32 %v3780_v16, %v3777_v35 }
 0x2b2   : > { %v3789_v50 = vrot.slane %v17609_v57, 4 }
 0x2b3   : > { %v8911_v0 = vor.u32 %v8910_v53, %v8907_v55  ;;  %v3782_v57 = vsel %vm1039_vm1, %v3772_v8, %v3781_v47  ;;  %v17612_v55 = vld [vmem:[#allocation6_spill] sm:$0xff] }
 0x2b5   : > { %13034 = vmatmul.mubr.bf16.gmra.mrb[28].mxu1 %v8867_v30  ;;  %v8885_v30 = vsel %vm1039_vm1, %v8875_v23, %v8884_v54  ;;  %v17608_v23 = vshrl.u32 %v16604_v63, 16 }
 0x2b6   : > { %12462 = vmatmul.mubr.bf16.gmra.mrb[32].mxu0 %v17603_v20  ;;  %13037 = vmatprep.mubr.bf16.mxu1 %v8876_v43  ;;  %v8898_v20 = vrot.slane %v16448_v4, 3  ;;  %v8894_v43 = vsel %vm1039_vm1, %v8884_v54, %v8893_v36  ;;  %v16624_v54 = vld [vmem:[#allocation2 + $0xd8] sm:$0xf] }
 0x2b7   : > { %12465 = vmatprep.mubr.bf16.mxu0 %v17604_v41  ;;  %v17607_v41 = vld [vmem:[#allocation131_spill] sm:$0xff]  ;;  %v3786_v4 = vrot.slane %v17608_v23, 3  ;;  %v3796_v26 = vshll.u32 %v16624_v54, 16 }
 0x2b8   : > { %v3773_v56 = vsel %vm1039_vm1, %v17607_v41, %v3772_v8  ;;  %v8902_v22 = vor.u32 %v8901_v1, %v8898_v20  ;;  %v3793_v41 = vshrl.u32 %v16624_v54, 16  ;;  %v16635_v1 = vld [vmem:[#allocation2 + $0xd8] sm:$0xf]  ;;  %v17611_v8 = vld [vmem:[#allocation9_spill] sm:$0xff] }
 0x2b9   : > { %v3790_v33 = vor.u32 %v3789_v50, %v3786_v4  ;;  %v8932_v53 = vshrl.u32 %v16635_v1, 16 }
 0x2ba   : > { %v8903_v23 = vsel %vm1039_vm1, %v8893_v36, %v8902_v22  ;;  %v3795_v37 = vrot.slane %v3793_v41, 3  ;;  %v8912_v20 = vsel %vm1039_vm1, %v8902_v22, %v8911_v0  ;;  %v8935_v36 = vshll.u32 %v16635_v1, 16 }
 0x2bb   : > { %v8934_v22 = vrot.slane %v8932_v53, 3  ;;  %v17614_v53 = vld [vmem:[#allocation13_spill] sm:$0xff] }
 0x2bd   : > { %13038 = vmatmul.mubr.bf16.gmra.mrb[32].mxu1 %v8885_v30  ;;  %v8919_v30 = vrot.slane %v16451_v40, 4 }
 0x2be   : > { %12466 = vmatmul.mubr.bf16.gmra.mrb[36].mxu0 %v17610_v10  ;;  %13041 = vmatprep.mubr.bf16.mxu1 %v8894_v43  ;;  %v3798_v10 = vrot.slane %v3796_v26, 4  ;;  %v4188_v43 = vrot.slane %v17611_v8, 4 }
 0x2bf   : > { %12469 = vmatprep.mubr.bf16.mxu0 %v3773_v56  ;;  %v3791_v56 = vsel %vm1039_vm1, %v3781_v47, %v3790_v33  ;;  %v8920_v4 = vor.u32 %v8919_v30, %v8916_v9  ;;  %v8937_v47 = vrot.slane %v8935_v36, 4  ;;  %v16645_v9 = vld [vmem:[#allocation2 + $0x18] sm:$0xf0]  ;;  %v14132_v36 = vld [vmem:[#allocation2 + $0x30] sm:$0xff] }
 0x2c0   : > { %v3799_v50 = vor.u32 %v3798_v10, %v3795_v37  ;;  %v4190_v41 = vsel %vm692_vm0, %v4188_v43, %v17612_v55  ;;  %v9332_v43 = vrot.slane %v14132_v36, 4  ;;  %v14136_v36 = vld [vmem:[#allocation2 + $0x50] sm:$0xff] }
 0x2c1   : > { %v8921_v26 = vsel %vm1039_vm1, %v8911_v0, %v8920_v4  ;;  %v8930_v16 = vsel %vm1039_vm1, %v8920_v4, %v3790_v33  ;;  %v8938_v37 = vor.u32 %v8937_v47, %v8934_v22  ;;  %v14131_v4 = vld [vmem:[#allocation2 + $0x28] sm:$0xff]  ;;  %v17615_v22 = vld [vmem:[#allocation15_spill] sm:$0xff]  ;;  %v14094_v47 = vld [vmem:[%s16930_s3 + $0x218] sm:$0xff]  }
 0x2c2   : > { %v3800_v35 = vsel %vm1039_vm1, %v3790_v33, %v3799_v50  ;;  %v9330_v50 = vrot.slane %v14131_v4, 4  ;;  %v14135_v4 = vld [vmem:[#allocation2 + $0x48] sm:$0xff] }
 0x2c3   : > { %v8939_v30 = vsel %vm1039_vm1, %v3790_v33, %v8938_v37  ;;  %v14092_v33 = vld [vmem:[%s16930_s3 + $0x210] sm:$0xff]   ;;  %v14134_v37 = vld [vmem:[#allocation2 + $0x40] sm:$0xff] }
 0x2c5   : > { %13042 = vmatmul.mubr.bf16.gmra.mrb[36].mxu1 %v8903_v23  ;;  %v9327_v23 = vrot.slane %v16645_v9, 4 }
 0x2c6   : > { %12470 = vmatmul.mubr.bf16.gmra.mrb[40].mxu0 %v3782_v57  ;;  %13045 = vmatprep.mubr.bf16.mxu1 %v8912_v20  ;;  %v14130_v57 = vld [vmem:[#allocation2 + $0x20] sm:$0xff]  ;;  %v14090_v20 = vld [vmem:[%s16930_s3 + $0x208] sm:$0xff]  }
 0x2c7   : > { %12473 = vmatprep.mubr.bf16.mxu0 %v3791_v56  ;;  %v9328_v0 = vrot.slane %v14130_v57, 4  ;;  %v17613_v56 = vld [vmem:[#allocation10_spill] sm:$0xff]  ;;  %v14093_v57 = vld [vmem:[%s16930_s3 + $0x210] sm:$0xff]  }
 0x2c9   : > { %v9329_v10 = vsel %vm692_vm0, %v9327_v23, %v9328_v0  ;;  %v9336_v23 = vrot.slane %v14134_v37, 4  ;;  %v17620_v37 = vld [vmem:[#allocation25_spill] sm:$0xff] }
 0x2cd   : > { %13046 = vmatmul.mubr.bf16.gmra.mrb[40].mxu1 %v8921_v26  ;;  %v9331_v26 = vsel %vm692_vm0, %v9328_v0, %v9330_v50 }
 0x2ce   : > { %12474 = vmatmul.mubr.bf16.gmra.mrb[44].mxu0 %v3800_v35  ;;  %13049 = vmatprep.mubr.bf16.mxu1 %v8930_v16  ;;  %v9333_v35 = vsel %vm692_vm0, %v9330_v50, %v9332_v43  ;;  %v14133_v16 = vld [vmem:[#allocation2 + $0x38] sm:$0xff]  ;;  %v9338_v50 = vrot.slane %v14135_v4, 4 }
 0x2cf   : > { %12493 = vmatprep.mubr.bf16.mxu0 %v4190_v41  ;;  %v9334_v55 = vrot.slane %v14133_v16, 4  ;;  %v17616_v41 = vld [vmem:[#allocation16_spill] sm:$0xff]  ;;  %v14102_v16 = vld [vmem:[%s16930_s3 + $0x238] sm:$0xff]  }
 0x2d1   : > { %v9335_v0 = vsel %vm692_vm0, %v9332_v43, %v9334_v55  ;;  %v9340_v43 = vrot.slane %v14136_v36, 4 }
 0x2d5   : > { %13050 = vmatmul.mubr.bf16.gmra.mrb[44].mxu1 %v8939_v30  ;;  %v9337_v30 = vsel %vm692_vm0, %v9334_v55, %v9336_v23  ;;  %v14137_v55 = vld [vmem:[#allocation2 + $0x58] sm:$0xff] }
 0x2d6   : > { %12494 = vmatmul.mubr.bf16.vlgmr.msra.gmra.mrb[0].mxu0 %v17613_v56  ;;  %13069 = vmatprep.mubr.bf16.mxu1 %v9329_v10  ;;  %v14095_v10 = vld [vmem:[%s16930_s3 + $0x218] sm:$0xff]   ;;  %v14098_v56 = vld [vmem:[%s16930_s3 + $0x228] sm:$0xff]  }
 0x2d7   : > { %12542 = vmatpush3.bf16.msra.mxu0 %v16552_v11  ;;  %12497 = vmatprep.mubr.bf16.mxu0 %v17614_v53  ;;  %v14091_v11 = vld [vmem:[%s16930_s3 + $0x208] sm:$0xff]   ;;  %v17618_v53 = vld [vmem:[#allocation21_spill] sm:$0xff] }
 0x2d8   : > { %12543 = vmatprep.subr.bf16.mxu0 %v14090_v20 }
 0x2db   : > { %12544 = vmatpush3.bf16.msra.mxu0 %v14090_v20  ;;  %v17617_v20 = vld [vmem:[#allocation19_spill] sm:$0xff] }
 0x2dc   : > { %12545 = vmatprep.subr.bf16.mxu0 %v14092_v33 }
 0x2dd   : > { %13070 = vmatmul.mubr.bf16.vlgmr.msra.gmra.mrb[0].mxu1 %v9331_v26  ;;  %v9339_v26 = vsel %vm692_vm0, %v9336_v23, %v9338_v50  ;;  %v14138_v23 = vld [vmem:[#allocation2 + $0x60] sm:$0xff] }
 0x2de   : > { %12498 = vmatmul.mubr.bf16.gmra.mrb[4].mxu0 %v17615_v22  ;;  %13118 = vmatpush3.bf16.msra.mxu1 %v16563_v45  ;;  %v14096_v45 = vld [vmem:[%s16930_s3 + $0x220] sm:$0xff]   ;;  %v14099_v22 = vld [vmem:[%s16930_s3 + $0x228] sm:$0xff]  }
 0x2df   : > { %13073 = vmatprep.mubr.bf16.mxu1 %v9333_v35  ;;  %13119 = vmatprep.subr.bf16.mxu1 %v14091_v11  ;;  %v9341_v35 = vsel %vm692_vm0, %v9338_v50, %v9340_v43  ;;  %v17622_v50 = vld [vmem:[#allocation28_spill] sm:$0xff] }
 0x2e0   : > { %12501 = vmatprep.mubr.bf16.mxu0 %v17616_v41  ;;  %12546 = vmatpush3.bf16.msra.mxu0 %v14092_v33  ;;  %v14097_v33 = vld [vmem:[%s16930_s3 + $0x220] sm:$0xff]   ;;  %v9342_v41 = vrot.slane %v14137_v55, 4 }
 0x2e1   : > { %12547 = vmatprep.subr.bf16.mxu0 %v14094_v47 }
 0x2e2   : > { %13120 = vmatpush3.bf16.msra.mxu1 %v14091_v11  ;;  %v14100_v11 = vld [vmem:[%s16930_s3 + $0x230] sm:$0xff]  }
 0x2e3   : > { %13121 = vmatprep.subr.bf16.mxu1 %v14093_v57 }
 0x2e4   : > { %12548 = vmatpush3.bf16.msra.mxu0 %v14094_v47  ;;  %v17619_v47 = vld [vmem:[#allocation22_spill] sm:$0xff] }
 0x2e5   : > { %13074 = vmatmul.mubr.bf16.gmra.mrb[4].mxu1 %v9335_v0  ;;  %12549 = vmatprep.subr.bf16.mxu0 %v14096_v45  ;;  %v14101_v0 = vld [vmem:[%s16930_s3 + $0x230] sm:$0xff]  }
 0x2e6   : > { %12502 = vmatmul.mubr.bf16.gmra.mrb[8].mxu0 %v17617_v20  ;;  %13077 = vmatprep.mubr.bf16.mxu1 %v9337_v30  ;;  %v9343_v30 = vsel %vm692_vm0, %v9340_v43, %v9342_v41  ;;  %v17621_v20 = vld [vmem:[#allocation27_spill] sm:$0xff] }
 0x2e7   : > { %12505 = vmatprep.mubr.bf16.mxu0 %v17618_v53  ;;  %13122 = vmatpush3.bf16.msra.mxu1 %v14093_v57  ;;  %v9344_v57 = vrot.slane %v14138_v23, 4  ;;  %v14140_v53 = vld [vmem:[#allocation2 + $0x70] sm:$0xff]  ;;  %v14143_v23 = vld [vmem:[#allocation2 + $0x88] sm:$0xff] }
 0x2e8   : > { %13123 = vmatprep.subr.bf16.mxu1 %v14095_v10  ;;  %12550 = vmatpush3.bf16.msra.mxu0 %v14096_v45  ;;  %v9348_v36 = vrot.slane %v14140_v53, 4  ;;  %v17628_v53 = vld [vmem:[#allocation40_spill] sm:$0xff] }
 0x2e9   : > { %12551 = vmatprep.subr.bf16.mxu0 %v14098_v56  ;;  %v9345_v45 = vsel %vm692_vm0, %v9342_v41, %v9344_v57 }
 0x2eb   : > { %13124 = vmatpush3.bf16.msra.mxu1 %v14095_v10  ;;  %v14103_v10 = vld [vmem:[%s16930_s3 + $0x238] sm:$0xff]  }
 0x2ec   : > { %13125 = vmatprep.subr.bf16.mxu1 %v14097_v33  ;;  %12552 = vmatpush3.bf16.msra.mxu0 %v14098_v56  ;;  %v14139_v56 = vld [vmem:[#allocation2 + $0x68] sm:$0xff] }
 0x2ed   : > { %13078 = vmatmul.mubr.bf16.gmra.mrb[8].mxu1 %v9339_v26  ;;  %12553 = vmatprep.subr.bf16.mxu0 %v14100_v11  ;;  %v9346_v4 = vrot.slane %v14139_v56, 4  ;;  %v17623_v26 = vld [vmem:[#allocation31_spill] sm:$0xff] }
 0x2ee   : > { %12506 = vmatmul.mubr.bf16.gmra.mrb[12].mxu0 %v17619_v47  ;;  %13081 = vmatprep.mubr.bf16.mxu1 %v9341_v35  ;;  %v14141_v35 = vld [vmem:[#allocation2 + $0x78] sm:$0xff]  ;;  %v14142_v47 = vld [vmem:[#allocation2 + $0x80] sm:$0xff] }
 0x2ef   : > { %12509 = vmatprep.mubr.bf16.mxu0 %v17620_v37  ;;  %13126 = vmatpush3.bf16.msra.mxu1 %v14097_v33  ;;  %v9347_v43 = vsel %vm692_vm0, %v9344_v57, %v9346_v4  ;;  %v9349_v33 = vsel %vm692_vm0, %v9346_v4, %v9348_v36  ;;  %v17625_v37 = vld [vmem:[#allocation34_spill] sm:$0xff]  ;;  %v9354_v57 = vrot.slane %v14143_v23, 4  ;;  %v17627_v56 = vld [vmem:[#allocation39_spill] sm:$0xff] }
 0x2f0   : > { %13127 = vmatprep.subr.bf16.mxu1 %v14099_v22  ;;  %12554 = vmatpush3.bf16.msra.mxu0 %v14100_v11  ;;  %v9350_v11 = vrot.slane %v14141_v35, 4  ;;  %v14145_v4 = vld [vmem:[#allocation2 + $0x98] sm:$0xff]  ;;  %v17629_v35 = vld [vmem:[#allocation43_spill] sm:$0xff] }
 0x2f1   : > { %12555 = vmatprep.subr.bf16.mxu0 %v14102_v16 }
 0x2f2   : > { %v9351_v55 = vsel %vm692_vm0, %v9348_v36, %v9350_v11  ;;  %v14146_v36 = vld [vmem:[#allocation2 + $0xa0] sm:$0xff] }
 0x2f3   : > { %13128 = vmatpush3.bf16.msra.mxu1 %v14099_v22  ;;  %v17624_v22 = vld [vmem:[#allocation33_spill] sm:$0xff] }
 0x2f4   : > { %13129 = vmatprep.subr.bf16.mxu1 %v14101_v0  ;;  %12556 = vmatpush3.bf16.msra.mxu0 %v14102_v16  ;;  %v9352_v16 = vrot.slane %v14142_v47, 4  ;;  %v17630_v47 = vld [vmem:[#allocation46_spill] sm:$0xff] }
 0x2f5   : > { %13082 = vmatmul.mubr.bf16.gmra.mrb[12].mxu1 %v9343_v30  ;;  %v14144_v30 = vld [vmem:[#allocation2 + $0x90] sm:$0xff] }
 0x2f6   : > { %12510 = vmatmul.mubr.bf16.gmra.mrb[16].mxu0 %v17621_v20  ;;  %13085 = vmatprep.mubr.bf16.mxu1 %v9345_v45  ;;  %v9353_v41 = vsel %vm692_vm0, %v9350_v11, %v9352_v16  ;;  %v9356_v45 = vrot.slane %v14144_v30, 4  ;;  %v14147_v11 = vld [vmem:[#allocation2 + $0xa8] sm:$0xff] }
 0x2f7   : > { %12513 = vmatprep.mubr.bf16.mxu0 %v17622_v50  ;;  %13130 = vmatpush3.bf16.msra.mxu1 %v14101_v0  ;;  %v17626_v0 = vld [vmem:[#allocation37_spill] sm:$0xff]  ;;  %v9358_v50 = vrot.slane %v14145_v4, 4 }
 0x2f8   : > { %13131 = vmatprep.subr.bf16.mxu1 %v14103_v10  ;;  %v9357_v20 = vsel %vm692_vm0, %v9354_v57, %v9356_v45 }
 0x2fb   : > { %13132 = vmatpush3.bf16.msra.mxu1 %v14103_v10  ;;  %v9355_v10 = vsel %vm692_vm0, %v9352_v16, %v9354_v57  ;;  %v14148_v16 = vld [vmem:[#allocation2 + $0xb0] sm:$0xff] }
 0x2fd   : > { %13086 = vmatmul.mubr.bf16.gmra.mrb[16].mxu1 %v9347_v43  ;;  %v9360_v43 = vrot.slane %v14146_v36, 4  ;;  %v4600_v36 = vshrl.u32 %v17611_v8, 16 }
 0x2fe   : > { %12514 = vmatmul.mubr.bf16.gmra.mrb[20].mxu0 %v17623_v26  ;;  %13089 = vmatprep.mubr.bf16.mxu1 %v9349_v33  ;;  %v9359_v33 = vsel %vm692_vm0, %v9356_v45, %v9358_v50  ;;  %v17633_v45 = vld [vmem:[#allocation49_spill] sm:$0xff] }
 0x2ff   : > { %12517 = vmatprep.mubr.bf16.mxu0 %v17624_v22  ;;  %v9361_v26 = vsel %vm692_vm0, %v9358_v50, %v9360_v43  ;;  %v9362_v22 = vrot.slane %v14147_v11, 4  ;;  %v9368_v50 = vrot.slane %v16598_v5, 4 }
 0x301   : > { %v9363_v23 = vsel %vm692_vm0, %v9360_v43, %v9362_v22  ;;  %v4603_v43 = vshll.u32 %v17611_v8, 16  ;;  %v9739_v8 = vshrl.u32 %v16645_v9, 16 }
 0x305   : > { %13090 = vmatmul.mubr.bf16.gmra.mrb[20].mxu1 %v9351_v55  ;;  %v9364_v55 = vrot.slane %v14148_v16, 4  ;;  %v14150_v16 = vld [vmem:[#allocation2 + $0xc8] sm:$0xff] }
 0x306   : > { %12518 = vmatmul.mubr.bf16.gmra.mrb[24].mxu0 %v17625_v37  ;;  %13093 = vmatprep.mubr.bf16.mxu1 %v9353_v41  ;;  %v17631_v41 = vld [vmem:[#allocation50_spill] sm:$0xff] }
 0x307   : > { %12521 = vmatprep.mubr.bf16.mxu0 %v17626_v0  ;;  %v4229_v37 = vrot.slane %v17631_v41, 4  ;;  %v9365_v57 = vsel %vm692_vm0, %v9362_v22, %v9364_v55  ;;  %v17632_v0 = vld [vmem:[#allocation47_spill] sm:$0xff]  ;;  %v4602_v22 = vrot.slane %v4600_v36, 4  ;;  %v9370_v41 = vrot.slane %v14150_v16, 4 }
 0x308   : > { %v9763_v16 = vrot.slane %v16247_v14, 5 }
 0x309   : > { %v4230_v30 = vsel %vm692_vm0, %v17632_v0, %v4229_v37 }
 0x30d   : > { %13094 = vmatmul.mubr.bf16.gmra.mrb[24].mxu1 %v9355_v10  ;;  %v14149_v10 = vld [vmem:[#allocation2 + $0xb8] sm:$0xff] }
 0x30e   : > { %12522 = vmatmul.mubr.bf16.gmra.mrb[28].mxu0 %v17627_v56  ;;  %13097 = vmatprep.mubr.bf16.mxu1 %v9357_v20  ;;  %v9366_v20 = vrot.slane %v14149_v10, 4  ;;  %v17634_v56 = vld [vmem:[#allocation65_spill] sm:$0xff] }
 0x30f   : > { %12525 = vmatprep.mubr.bf16.mxu0 %v17628_v53  ;;  %v4231_v4 = vrot.slane %v17634_v56, 4  ;;  %v4233_v53 = vrot.slane %v16604_v63, 4  ;;  %v17635_v56 = vld [vmem:[#allocation61_spill] sm:$0xff] }
 0x311   : > { %v4234_v11 = vsel %vm692_vm0, %v4231_v4, %v4233_v53 }
 0x315   : > { %13098 = vmatmul.mubr.bf16.gmra.mrb[28].mxu1 %v9359_v33  ;;  %v9367_v33 = vsel %vm692_vm0, %v9364_v55, %v9366_v20  ;;  %v9742_v55 = vshll.u32 %v16645_v9, 16  ;;  %v9374_v9 = vrot.slane %v16635_v1, 4  ;;  %v17637_v1 = vld [vmem:[#allocation62_spill] sm:$0xff] }
 0x316   : > { %12526 = vmatmul.mubr.bf16.gmra.mrb[32].mxu0 %v17629_v35  ;;  %13101 = vmatprep.mubr.bf16.mxu1 %v9361_v26  ;;  %v4232_v26 = vsel %vm692_vm0, %v4229_v37, %v4231_v4  ;;  %v9369_v35 = vsel %vm692_vm0, %v9366_v20, %v9368_v50  ;;  %v9371_v37 = vsel %vm692_vm0, %v9368_v50, %v9370_v41  ;;  %v9746_v20 = vrot.slane %v16195_v28, 4 }
 0x317   : > { %12529 = vmatprep.mubr.bf16.mxu0 %v17630_v47  ;;  %v4605_v47 = vrot.slane %v4603_v43, 5  ;;  %v9744_v10 = vrot.slane %v9742_v55, 5  ;;  %v9747_v4 = vrot.slane %v16191_v61, 5  ;;  %v9750_v43 = vrot.slane %v16217_v27, 4 }
 0x318   : > { %v9754_v28 = vrot.slane %v16220_v18, 4 }
 0x319   : > { %v9748_v36 = vor.u32 %v9747_v4, %v9746_v20  ;;  %v9775_v20 = vrot.slane %v16284_v6, 5 }
 0x31d   : > { %13102 = vmatmul.mubr.bf16.gmra.mrb[32].mxu1 %v9363_v23  ;;  %v4235_v23 = vrot.slane %v16624_v54, 4 }
 0x31e   : > { %12530 = vmatmul.mubr.bf16.gmra.mrb[36].mxu0 %v17633_v45  ;;  %13105 = vmatprep.mubr.bf16.mxu1 %v9365_v57  ;;  %v4606_v57 = vor.u32 %v4605_v47, %v4602_v22  ;;  %v9741_v45 = vrot.slane %v9739_v8, 4  ;;  %v17639_v8 = vld [vmem:[#allocation64_spill] sm:$0xff] }
 0x31f   : > { %12533 = vmatprep.mubr.bf16.mxu0 %v4230_v30  ;;  %v4236_v0 = vsel %vm692_vm0, %v4233_v53, %v4235_v23  ;;  %v9373_v30 = vsel %vm692_vm0, %v9370_v41, %v4233_v53  ;;  %v17638_v41 = vld [vmem:[#allocation63_spill] sm:$0xff] }
 0x320   : > { %v4610_v54 = vsel %vm1578_vm2, %v4606_v57, %v17635_v56  ;;  %v9745_v50 = vor.u32 %v9744_v10, %v9741_v45  ;;  %v9766_v57 = vrot.slane %v16279_v31, 4  ;;  %v17641_v45 = vld [vmem:[#allocation56_spill] sm:$0xff]  ;;  %v9779_v56 = vrot.slane %v16311_v24, 5 }
 0x322   : > { %v9749_v61 = vsel %vm1578_vm2, %v9745_v50, %v9748_v36 }
 0x325   : > { %13106 = vmatmul.mubr.bf16.gmra.mrb[36].mxu1 %v9367_v33  ;;  %v9751_v33 = vrot.slane %v16197_v3, 5  ;;  %v9758_v3 = vrot.slane %v16245_v52, 4  ;;  %v9767_v52 = vrot.slane %v16254_v25, 5  ;;  %v9774_v25 = vrot.slane %v16309_v29, 4 }
 0x326   : > { %12534 = vmatmul.mubr.bf16.gmra.mrb[40].mxu0 %v4232_v26  ;;  %13109 = vmatprep.mubr.bf16.mxu1 %v9369_v35  ;;  %v9375_v26 = vsel %vm692_vm0, %v4233_v53, %v9374_v9  ;;  %v9755_v35 = vrot.slane %v16212_v48, 5  ;;  %v9759_v53 = vrot.slane %v16222_v42, 5  ;;  %v9762_v48 = vrot.slane %v16251_v58, 4  ;;  %v17643_v9 = vld [vmem:[#allocation58_spill] sm:$0xff] }
 0x327   : > { %12537 = vmatprep.mubr.bf16.mxu0 %v4234_v11  ;;  %v17636_v11 = vld [vmem:[#allocation59_spill] sm:$0xff]  ;;  %v9752_v22 = vor.u32 %v9751_v33, %v9750_v43  ;;  %v9771_v58 = vrot.slane %v16273_v2, 5  ;;  %v9778_v2 = vrot.slane %v16315_v17, 4  ;;  %v9776_v4 = vor.u32 %v9775_v20, %v9774_v25  ;;  %v17644_v33 = vld [vmem:[#allocation78_spill] sm:$0xff] }
 0x328   : > { %v9756_v47 = vor.u32 %v9755_v35, %v9754_v28  ;;  %v9760_v23 = vor.u32 %v9759_v53, %v9758_v3  ;;  %v9764_v55 = vor.u32 %v9763_v16, %v9762_v48  ;;  %v9783_v29 = vrot.slane %v16318_v60, 5  ;;  %v17645_v28 = vld [vmem:[#allocation80_spill] sm:$0xff]  ;;  %v17649_v16 = vld [vmem:[#allocation95_spill] sm:$0xff]  ;;  %v17657_v25 = vld [vmem:[#allocation110_spill] sm:$0xff] }
 0x329   : > { %v9753_v27 = vsel %vm1578_vm2, %v9748_v36, %v9752_v22  ;;  %v9780_v50 = vor.u32 %v9779_v56, %v9778_v2  ;;  %v9782_v36 = vrot.slane %v16345_v39, 4  ;;  %v9786_v43 = vrot.slane %v16348_v51, 4  ;;  %v17659_v56 = vld [vmem:[#allocation109_spill] sm:$0xff] }
 0x32a   : > { %v9757_v18 = vsel %vm1578_vm2, %v9752_v22, %v9756_v47  ;;  %v9761_v42 = vsel %vm1578_vm2, %v9756_v47, %v9760_v23  ;;  %v9765_v14 = vsel %vm1578_vm2, %v9760_v23, %v9764_v55  ;;  %v9787_v17 = vrot.slane %v16337_v7, 5  ;;  %v17646_v22 = vld [vmem:[#allocation60_spill] sm:$0xff]  ;;  %v17647_v47 = vld [vmem:[#allocation86_spill] sm:$0xff] }
 0x32b   : > { %v9781_v24 = vsel %vm1578_vm2, %v9776_v4, %v9780_v50  ;;  %v9790_v60 = vrot.slane %v16364_v49, 4  ;;  %v9794_v7 = vrot.slane %v16370_v32, 4  ;;  %v9798_v3 = vrot.slane %v16386_v34, 4 }
 0x32c   : > { %v9788_v35 = vor.u32 %v9787_v17, %v9786_v43  ;;  %v9799_v49 = vrot.slane %v16373_v15, 5  ;;  %v9802_v53 = vrot.slane %v16389_v46, 4  ;;  %v9803_v32 = vrot.slane %v16383_v62, 5  ;;  %v17662_v43 = vld [vmem:[#allocation128_spill] sm:$0xff] }
 0x32d   : > { %13110 = vmatmul.mubr.bf16.gmra.mrb[40].mxu1 %v9371_v37  ;;  %v9770_v37 = vrot.slane %v16282_v59, 4  ;;  %v9806_v15 = vrot.slane %v16404_v44, 4  ;;  %v9807_v23 = vrot.slane %v16391_v12, 5  ;;  %v9810_v62 = vrot.slane %v16410_v21, 4 }
 0x32e   : > { %12538 = vmatmul.mubr.bf16.gmra.mrb[44].mxu0 %v4236_v0  ;;  %13113 = vmatprep.mubr.bf16.mxu1 %v9373_v30  ;;  %v17640_v0 = vld [vmem:[#allocation68_spill] sm:$0xff]  ;;  %v9768_v30 = vor.u32 %v9767_v52, %v9766_v57  ;;  %v9800_v48 = vor.u32 %v9799_v49, %v9798_v3  ;;  %v4687_v20 = vrot.slane %v17657_v25, 4  ;;  %v9823_v17 = vrot.slane %v17662_v43, 5  ;;  %v4582_v3 = vld [vmem:[#allocation2 + $0xd8] sm:$0x1f] }
 0x32f   : > { %12557 = vmatprep.mubr.bf16.mxu0 %v4610_v54  ;;  %v9772_v10 = vor.u32 %v9771_v58, %v9770_v37  ;;  %v17642_v54 = vld [vmem:[#allocation57_spill] sm:$0xff]  ;;  %v17651_v57 = vld [vmem:[#allocation96_spill] sm:$0xff]  ;;  %v9808_v52 = vor.u32 %v9807_v23, %v9806_v15 }
 0x330   : > { %v9769_v31 = vsel %vm1578_vm2, %v9764_v55, %v9768_v30  ;;  %v17653_v58 = vld [vmem:[#allocation53_spill] sm:$0xff]  ;;  %v17670_v49 = vld [vmem:[#allocation104_spill] sm:$0xff] }
 0x331   : > { %v9773_v59 = vsel %vm1578_vm2, %v9768_v30, %v9772_v10  ;;  %v9777_v6 = vsel %vm1578_vm2, %v9772_v10, %v9776_v4  ;;  %v17655_v30 = vld [vmem:[#allocation54_spill] sm:$0xff]  ;;  %v17656_v10 = vld [vmem:[#allocation52_spill] sm:$0xff] }
 0x332   : > { %v9819_v21 = vrot.slane %v17656_v10, 5  ;;  %v17660_v4 = vld [vmem:[#allocation44_spill] sm:$0xff] }
 0x335   : > { %13114 = vmatmul.mubr.bf16.gmra.mrb[44].mxu1 %v9375_v26  ;;  %v9784_v26 = vor.u32 %v9783_v29, %v9782_v36  ;;  %v17661_v29 = vld [vmem:[#allocation3_spill] sm:$0xff] }
 0x336   : > { %12558 = vmatmul.mubr.bf16.vlgmr.msra.gmra.mrb[0].mxu0 %v17636_v11  ;;  %13133 = vmatprep.mubr.bf16.mxu1 %v9749_v61  ;;  %v9791_v61 = vrot.slane %v16350_v19, 5  ;;  %v9795_v11 = vrot.slane %v16366_v13, 5 }
 0x337   : > { %12561 = vmatprep.mubr.bf16.mxu0 %v17637_v1  ;;  %v9785_v39 = vsel %vm1578_vm2, %v9780_v50, %v9784_v26  ;;  %v9789_v51 = vsel %vm1578_vm2, %v9784_v26, %v9788_v35 }
 0x338   : > { %v9792_v1 = vor.u32 %v9791_v61, %v9790_v60  ;;  %v17666_v61 = vld [vmem:[#allocation48_spill] sm:$0xff] }
 0x33a   : > { %v9793_v19 = vsel %vm1578_vm2, %v9788_v35, %v9792_v1 }
 0x33d   : > { %13134 = vmatmul.mubr.bf16.vlgmr.msra.gmra.mrb[0].mxu1 %v9753_v27  ;;  %v9796_v27 = vor.u32 %v9795_v11, %v9794_v7  ;;  %v17667_v7 = vshll.u32 %v16598_v5, 16 }
 0x33e   : > { %12562 = vmatmul.mubr.bf16.gmra.mrb[4].mxu0 %v17638_v41  ;;  %13137 = vmatprep.mubr.bf16.mxu1 %v9757_v18  ;;  %v17648_v18 = vld [vmem:[#allocation87_spill] sm:$0xff]  ;;  %v9804_v41 = vor.u32 %v9803_v32, %v9802_v53  ;;  %v4700_v32 = vshrl.u32 %v4582_v3, 16 }
 0x33f   : > { %12565 = vmatprep.mubr.bf16.mxu0 %v17639_v8  ;;  %v9797_v13 = vsel %vm1578_vm2, %v9792_v1, %v9796_v27  ;;  %v9801_v34 = vsel %vm1578_vm2, %v9796_v27, %v9800_v48  ;;  %v17650_v8 = vld [vmem:[#allocation55_spill] sm:$0xff]  ;;  %v9827_v11 = vrot.slane %v17667_v7, 5 }
 0x340   : > { %v9805_v46 = vsel %vm1578_vm2, %v9800_v48, %v9804_v41  ;;  %v9811_v55 = vrot.slane %v17650_v8, 5  ;;  %v9809_v12 = vsel %vm1578_vm2, %v9804_v41, %v9808_v52 }
 0x342   : > { %v9812_v37 = vor.u32 %v9811_v55, %v9810_v62  ;;  %v9721_v62 = vld [vmem:[#allocation2 + $0xd8] sm:$0x1f] }
 0x345   : > { %13138 = vmatmul.mubr.bf16.gmra.mrb[4].mxu1 %v9761_v42  ;;  %v17652_v42 = vld [vmem:[#allocation103_spill] sm:$0xff] }
 0x346   : > { %12566 = vmatmul.mubr.bf16.gmra.mrb[8].mxu0 %v17640_v0  ;;  %13141 = vmatprep.mubr.bf16.mxu1 %v9765_v14  ;;  %v9814_v14 = vrot.slane %v17653_v58, 4  ;;  %v17654_v0 = vld [vmem:[#allocation51_spill] sm:$0xff] }
 0x347   : > { %12569 = vmatprep.mubr.bf16.mxu0 %v17641_v45  ;;  %v9815_v44 = vrot.slane %v17654_v0, 5  ;;  %v9818_v45 = vrot.slane %v17655_v30, 4 }
 0x34d   : > { %13142 = vmatmul.mubr.bf16.gmra.mrb[8].mxu1 %v9769_v31  ;;  %v9813_v31 = vsel %vm1578_vm2, %v9808_v52, %v9812_v37 }
 0x34e   : > { %12570 = vmatmul.mubr.bf16.gmra.mrb[12].mxu0 %v17642_v54  ;;  %13145 = vmatprep.mubr.bf16.mxu1 %v9773_v59  ;;  %v17658_v59 = vld [vmem:[#allocation70_spill] sm:$0xff]  ;;  %v9816_v54 = vor.u32 %v9815_v44, %v9814_v14  ;;  %v17671_v44 = vmov 0.0  }
 0x34f   : > { %12573 = vmatprep.mubr.bf16.mxu0 %v17643_v9  ;;  %v4688_v2 = vrot.slane %v17658_v59, 5  ;;  %v9820_v9 = vor.u32 %v9819_v21, %v9818_v45  ;;  %5401 = vst [vmem:[%s16859_s27 + $0x2] sm:$0x3f] %v17671_v44  ;;  %10988 = vst [vmem:[%s16859_s27 + $0xa] sm:$0x3f] %v17671_v44 }
 0x350   : > { %v9817_v36 = vsel %vm1578_vm2, %v9812_v37, %v9816_v54 }
 0x351   : > { %v4689_v50 = vor.u32 %v4688_v2, %v4687_v20 }
 0x355   : > { %13146 = vmatmul.mubr.bf16.gmra.mrb[12].mxu1 %v9777_v6  ;;  %v9822_v6 = vrot.slane %v17661_v29, 4 }
 0x356   : > { %12574 = vmatmul.mubr.bf16.gmra.mrb[16].mxu0 %v17644_v33  ;;  %13149 = vmatprep.mubr.bf16.mxu1 %v9781_v24  ;;  %v9821_v24 = vsel %vm1578_vm2, %v9816_v54, %v9820_v9  ;;  %v17663_v33 = vld [vmem:[#allocation71_spill] sm:$0xff] }
 0x357   : > { %12577 = vmatprep.mubr.bf16.mxu0 %v17645_v28  ;;  %v4691_v26 = vrot.slane %v17663_v33, 4  ;;  %v17664_v28 = vld [vmem:[#allocation73_spill] sm:$0xff] }
 0x358   : > { %v4692_v35 = vrot.slane %v17664_v28, 5 }
 0x35a   : > { %v4693_v53 = vor.u32 %v4692_v35, %v4691_v26 }
 0x35c   : > { %v4694_v41 = vsel %vm1578_vm2, %v4689_v50, %v4693_v53 }
 0x35d   : > { %13150 = vmatmul.mubr.bf16.gmra.mrb[16].mxu1 %v9785_v39  ;;  %v17665_v39 = vshrl.u32 %v16598_v5, 16 }
 0x35e   : > { %12578 = vmatmul.mubr.bf16.gmra.mrb[20].mxu0 %v17646_v22  ;;  %13153 = vmatprep.mubr.bf16.mxu1 %v9789_v51  ;;  %v4690_v51 = vsel %vm1578_vm2, %v17666_v61, %v4689_v50  ;;  %v17668_v22 = vshrl.u32 %v16604_v63, 16 }
 0x35f   : > { %12581 = vmatprep.mubr.bf16.mxu0 %v17647_v47  ;;  %v9826_v60 = vrot.slane %v17665_v39, 4  ;;  %v17669_v47 = vshll.u32 %v16604_v63, 16  ;;  %v9831_v63 = vrot.slane %v16451_v40, 5 }
 0x360   : > { %v4695_v1 = vrot.slane %v17668_v22, 4 }
 0x361   : > { %v4696_v27 = vrot.slane %v17669_v47, 5 }
 0x363   : > { %v4697_v48 = vor.u32 %v4696_v27, %v4695_v1 }
 0x365   : > { %13154 = vmatmul.mubr.bf16.gmra.mrb[20].mxu1 %v9793_v19  ;;  %v9824_v19 = vor.u32 %v9823_v17, %v9822_v6 }
 0x366   : > { %12582 = vmatmul.mubr.bf16.gmra.mrb[24].mxu0 %v17648_v18  ;;  %13157 = vmatprep.mubr.bf16.mxu1 %v9797_v13  ;;  %v4703_v13 = vshll.u32 %v4582_v3, 16  ;;  %v9828_v18 = vor.u32 %v9827_v11, %v9826_v60 }
 0x367   : > { %12585 = vmatprep.mubr.bf16.mxu0 %v17649_v16  ;;  %v9825_v5 = vsel %vm1578_vm2, %v9820_v9, %v9824_v19  ;;  %v9830_v16 = vrot.slane %v16460_v38, 4  ;;  %v9842_v38 = vshll.u32 %v9721_v62, 16 }
 0x368   : > { %v4705_v15 = vrot.slane %v4703_v13, 5  ;;  %v9829_v23 = vsel %vm1578_vm2, %v9824_v19, %v9828_v18 }
 0x369   : > { %v9832_v8 = vor.u32 %v9831_v63, %v9830_v16  ;;  %v9844_v37 = vrot.slane %v9842_v38, 5 }
 0x36b   : > { %v9833_v52 = vsel %vm1578_vm2, %v9828_v18, %v9832_v8  ;;  %v9837_v58 = vsel %vm1578_vm2, %v9832_v8, %v4697_v48 }
 0x36d   : > { %13158 = vmatmul.mubr.bf16.gmra.mrb[24].mxu1 %v9801_v34  ;;  %v4702_v34 = vrot.slane %v4700_v32, 4 }
 0x36e   : > { %12586 = vmatmul.mubr.bf16.gmra.mrb[28].mxu0 %v17651_v57  ;;  %13161 = vmatprep.mubr.bf16.mxu1 %v9805_v46  ;;  %v4698_v46 = vsel %vm1578_vm2, %v4693_v53, %v4697_v48  ;;  %v9839_v57 = vshrl.u32 %v9721_v62, 16 }
 0x36f   : > { %12589 = vmatprep.mubr.bf16.mxu0 %v17652_v42  ;;  %v4706_v55 = vor.u32 %v4705_v15, %v4702_v34 }
 0x370   : > { %v9841_v42 = vrot.slane %v9839_v57, 4 }
 0x371   : > { %v4707_v40 = vsel %vm1578_vm2, %v4697_v48, %v4706_v55 }
 0x372   : > { %v9845_v14 = vor.u32 %v9844_v37, %v9841_v42 }
 0x374   : > { %v9846_v0 = vsel %vm1578_vm2, %v4697_v48, %v9845_v14 }
 0x375   : > { %13162 = vmatmul.mubr.bf16.gmra.mrb[28].mxu1 %v9809_v12 }
 0x376   : > { %12590 = vmatmul.mubr.bf16.gmra.mrb[32].mxu0 %v17659_v56  ;;  %13165 = vmatprep.mubr.bf16.mxu1 %v9813_v31 }
 0x377   : > { %12593 = vmatprep.mubr.bf16.mxu0 %v17660_v4 }
 0x37d   : > { %13166 = vmatmul.mubr.bf16.gmra.mrb[32].mxu1 %v9817_v36 }
 0x37e   : > { %12594 = vmatmul.mubr.bf16.gmra.mrb[36].mxu0 %v17670_v49  ;;  %13169 = vmatprep.mubr.bf16.mxu1 %v9821_v24 }
 0x37f   : > { %12597 = vmatprep.mubr.bf16.mxu0 %v4690_v51 }
 0x385   : > { %13170 = vmatmul.mubr.bf16.gmra.mrb[36].mxu1 %v9825_v5 }
 0x386   : > { %12598 = vmatmul.mubr.bf16.gmra.mrb[40].mxu0 %v4694_v41  ;;  %13173 = vmatprep.mubr.bf16.mxu1 %v9829_v23 }
 0x387   : > { %12601 = vmatprep.mubr.bf16.mxu0 %v4698_v46 }
 0x38d   : > { %13174 = vmatmul.mubr.bf16.gmra.mrb[40].mxu1 %v9833_v52 }
 0x38e   : > { %12602 = vmatmul.mubr.bf16.gmra.mrb[44].mxu0 %v4707_v40  ;;  %13177 = vmatprep.mubr.bf16.mxu1 %v9837_v58 }
 0x395   : > { %13178 = vmatmul.mubr.bf16.gmra.mrb[44].mxu1 %v9846_v0 }
 0x409   : > { %v12559_v12 = vpop.f32.mrb[0].mxu0 }
 0x40a   : > { %v4814_v30 = vpop.f32.mrb[1].mxu0 }
 0x40b   : > { %v12560_v45 = vpop.f32.mrb[2].mxu0  ;;  %v5331_v31 = vmul.f32 %v4814_v30, %v4814_v30 }
 0x40c   : > { %v11127_v10 = vpack.c.bf16 %v12560_v45, %v12559_v12  ;;  %v4817_v21 = vpop.f32.mrb[3].mxu0  ;;  %v5333_v2 = vmul.f32 %v12560_v45, %v12560_v45 }
 0x40d   : > { %v11122_v25 = vpack.c.bf16 %v4817_v21, %v4814_v30  ;;  %v5293_v20 = vadd.f32 %v4817_v21, %v4814_v30  ;;  %v5332_v59 = vmul.f32 %v4817_v21, %v4817_v21 }
 0x40e   : > { %11398 = vst [vmem:[%s16870_s30 + $0x8] sm:$0xff] %v11127_v10  }
 0x40f   : > { %11123 = vst [vmem:[%s16870_s30] sm:$0xff] %v11122_v25   ;;  %v5363_v56 = vadd.f32 %v5332_v59, %v5331_v31  ;;  %v5294_v54 = vadd.f32 %v12560_v45, %v5293_v20 }
 0x410   : > { %v13135_v4 = vpop.f32.mrb[0].mxu1 }
 0x411   : > { %v12563_v9 = vpop.f32.mrb[4].mxu0  ;;  %v5364_v50 = vadd.f32 %v5363_v56, %v5333_v2  ;;  %v9953_v36 = vpop.f32.mrb[1].mxu1 }
 0x412   : > { %v4830_v29 = vpop.f32.mrb[5].mxu0  ;;  %v13136_v6 = vpop.f32.mrb[2].mxu1  ;;  %v10472_v33 = vmul.f32 %v9953_v36, %v9953_v36  ;;  %v5335_v35 = vmul.f32 %v12563_v9, %v12563_v9 }
 0x413   : > { %v5295_v43 = vadd.f32 %v5294_v54, %v4830_v29  ;;  %v5334_v17 = vmul.f32 %v4830_v29, %v4830_v29  ;;  %v12564_v24 = vpop.f32.mrb[6].mxu0  ;;  %v11279_v26 = vpack.c.bf16 %v13136_v6, %v13135_v4  ;;  %v9956_v28 = vpop.f32.mrb[3].mxu1  ;;  %v10474_v22 = vmul.f32 %v13136_v6, %v13136_v6 }
 0x414   : > { %v11137_v39 = vpack.c.bf16 %v12564_v24, %v12563_v9  ;;  %v4833_v60 = vpop.f32.mrb[7].mxu0  ;;  %v11274_v61 = vpack.c.bf16 %v9956_v28, %v9953_v36  ;;  %v10433_v51 = vadd.f32 %v9956_v28, %v9953_v36  ;;  %v10473_v7 = vmul.f32 %v9956_v28, %v9956_v28 }
 0x415   : > { %v5365_v11 = vadd.f32 %v5364_v50, %v5334_v17  ;;  %11430 = vst [vmem:[%s16870_s30 + $0xc8] sm:$0xff] %v11279_v26   ;;  %v5296_v1 = vadd.f32 %v12563_v9, %v5295_v43  ;;  %v11132_v47 = vpack.c.bf16 %v4833_v60, %v4830_v29  ;;  %v5336_v3 = vmul.f32 %v12564_v24, %v12564_v24 }
 0x416   : > { %11400 = vst [vmem:[%s16870_s30 + $0x18] sm:$0xff] %v11137_v39   ;;  %11429 = vst [vmem:[%s16870_s30 + $0xc0] sm:$0xff] %v11274_v61   ;;  %v10504_v27 = vadd.f32 %v10473_v7, %v10472_v33  ;;  %v10434_v19 = vadd.f32 %v13136_v6, %v10433_v51 }
 0x417   : > { %v5366_v49 = vadd.f32 %v5365_v11, %v5335_v35  ;;  %v5297_v53 = vadd.f32 %v12564_v24, %v5296_v1  ;;  %11399 = vst [vmem:[%s16870_s30 + $0x10] sm:$0xff] %v11132_v47  }
 0x418   : > { %v13139_v13 = vpop.f32.mrb[4].mxu1  ;;  %v10505_v18 = vadd.f32 %v10504_v27, %v10474_v22 }
 0x419   : > { %v5367_v32 = vadd.f32 %v5366_v49, %v5336_v3  ;;  %v12567_v48 = vpop.f32.mrb[8].mxu0  ;;  %v9969_v5 = vpop.f32.mrb[5].mxu1  ;;  %v10476_v23 = vmul.f32 %v13139_v13, %v13139_v13 }
 0x41a   : > { %v4846_v16 = vpop.f32.mrb[9].mxu0  ;;  %v10435_v41 = vadd.f32 %v10434_v19, %v9969_v5  ;;  %v10475_v63 = vmul.f32 %v9969_v5, %v9969_v5  ;;  %v13140_v34 = vpop.f32.mrb[6].mxu1  ;;  %v5338_v44 = vmul.f32 %v12567_v48, %v12567_v48 }
 0x41b   : > { %v12568_v15 = vpop.f32.mrb[10].mxu0  ;;  %v11289_v46 = vpack.c.bf16 %v13140_v34, %v13139_v13  ;;  %v9972_v62 = vpop.f32.mrb[7].mxu1  ;;  %v10477_v14 = vmul.f32 %v13140_v34, %v13140_v34 }
 0x41c   : > { %v11147_v8 = vpack.c.bf16 %v12568_v15, %v12567_v48  ;;  %v4849_v55 = vpop.f32.mrb[11].mxu0  ;;  %v10506_v57 = vadd.f32 %v10505_v18, %v10475_v63  ;;  %v10436_v38 = vadd.f32 %v13139_v13, %v10435_v41  ;;  %v11284_v52 = vpack.c.bf16 %v9972_v62, %v9969_v5 }
 0x41d   : > { %v11142_v40 = vpack.c.bf16 %v4849_v55, %v4846_v16  ;;  %11432 = vst [vmem:[%s16870_s30 + $0xd8] sm:$0xff] %v11289_v46   ;;  %v5298_v42 = vadd.f32 %v5297_v53, %v4849_v55  ;;  %v5337_v37 = vmul.f32 %v4849_v55, %v4849_v55 }
 0x41e   : > { %11402 = vst [vmem:[%s16870_s30 + $0x28] sm:$0xff] %v11147_v8   ;;  %v10437_v58 = vadd.f32 %v13140_v34, %v10436_v38  ;;  %v10507_v0 = vadd.f32 %v10506_v57, %v10476_v23  ;;  %11431 = vst [vmem:[%s16870_s30 + $0xd0] sm:$0xff] %v11284_v52  }
 0x41f   : > { %11401 = vst [vmem:[%s16870_s30 + $0x20] sm:$0xff] %v11142_v40   ;;  %v5368_v12 = vadd.f32 %v5367_v32, %v5337_v37  ;;  %v5299_v30 = vadd.f32 %v12567_v48, %v5298_v42 }
 0x420   : > { %v10508_v45 = vadd.f32 %v10507_v0, %v10477_v14  ;;  %v13143_v10 = vpop.f32.mrb[8].mxu1 }
 0x421   : > { %v12571_v21 = vpop.f32.mrb[12].mxu0  ;;  %v9985_v31 = vpop.f32.mrb[9].mxu1  ;;  %v5369_v20 = vadd.f32 %v5368_v12, %v5338_v44  ;;  %v10479_v28 = vmul.f32 %v13143_v10, %v13143_v10 }
 0x422   : > { %v4862_v25 = vpop.f32.mrb[13].mxu0  ;;  %v13144_v59 = vpop.f32.mrb[10].mxu1 }
 0x423   : > { %v5300_v2 = vadd.f32 %v5299_v30, %v4862_v25  ;;  %v5339_v56 = vmul.f32 %v4862_v25, %v4862_v25  ;;  %v12572_v54 = vpop.f32.mrb[14].mxu0  ;;  %v11299_v4 = vpack.c.bf16 %v13144_v59, %v13143_v10  ;;  %v9988_v9 = vpop.f32.mrb[11].mxu1 }
 0x424   : > { %v11157_v50 = vpack.c.bf16 %v12572_v54, %v12571_v21  ;;  %v4865_v36 = vpop.f32.mrb[15].mxu0  ;;  %v11294_v29 = vpack.c.bf16 %v9988_v9, %v9985_v31  ;;  %v10438_v6 = vadd.f32 %v10437_v58, %v9988_v9  ;;  %v10478_v43 = vmul.f32 %v9988_v9, %v9988_v9 }
 0x425   : > { %v5370_v17 = vadd.f32 %v5369_v20, %v5339_v56  ;;  %11434 = vst [vmem:[%s16870_s30 + $0xe8] sm:$0xff] %v11299_v4   ;;  %v11152_v24 = vpack.c.bf16 %v4865_v36, %v4862_v25  ;;  %v5301_v33 = vadd.f32 %v5300_v2, %v4865_v36  ;;  %v5340_v26 = vmul.f32 %v4865_v36, %v4865_v36 }
 0x426   : > { %11404 = vst [vmem:[%s16870_s30 + $0x38] sm:$0xff] %v11157_v50   ;;  %11433 = vst [vmem:[%s16870_s30 + $0xe0] sm:$0xff] %v11294_v29   ;;  %v10509_v35 = vadd.f32 %v10508_v45, %v10478_v43  ;;  %v10439_v39 = vadd.f32 %v13143_v10, %v10438_v6  ;;  %v5341_v60 = vmul.f32 %v12572_v54, %v12572_v54 }
 0x427   : > { %11403 = vst [vmem:[%s16870_s30 + $0x30] sm:$0xff] %v11152_v24   ;;  %v5371_v61 = vadd.f32 %v5370_v17, %v5340_v26  ;;  %v5302_v51 = vadd.f32 %v12572_v54, %v5301_v33 }
 0x428   : > { %v13147_v7 = vpop.f32.mrb[12].mxu1  ;;  %v10510_v11 = vadd.f32 %v10509_v35, %v10479_v28 }
 0x429   : > { %v12575_v22 = vpop.f32.mrb[16].mxu0  ;;  %v10001_v1 = vpop.f32.mrb[13].mxu1  ;;  %v5372_v27 = vadd.f32 %v5371_v61, %v5341_v60 }
 0x42a   : > { %v4878_v47 = vpop.f32.mrb[17].mxu0  ;;  %v10440_v3 = vadd.f32 %v10439_v39, %v10001_v1  ;;  %v10480_v49 = vmul.f32 %v10001_v1, %v10001_v1  ;;  %v13148_v19 = vpop.f32.mrb[14].mxu1  ;;  %v5343_v23 = vmul.f32 %v12575_v22, %v12575_v22 }
 0x42b   : > { %v5303_v53 = vadd.f32 %v5302_v51, %v4878_v47  ;;  %v5342_v32 = vmul.f32 %v4878_v47, %v4878_v47  ;;  %v12576_v13 = vpop.f32.mrb[18].mxu0  ;;  %v11309_v18 = vpack.c.bf16 %v13148_v19, %v13147_v7  ;;  %v10004_v48 = vpop.f32.mrb[15].mxu1  ;;  %v10482_v55 = vmul.f32 %v13148_v19, %v13148_v19 }
 0x42c   : > { %v11167_v5 = vpack.c.bf16 %v12576_v13, %v12575_v22  ;;  %v4881_v16 = vpop.f32.mrb[19].mxu0  ;;  %v10511_v41 = vadd.f32 %v10510_v11, %v10480_v49  ;;  %v11304_v63 = vpack.c.bf16 %v10004_v48, %v10001_v1  ;;  %v10441_v34 = vadd.f32 %v10440_v3, %v10004_v48 }
 0x42d   : > { %v10481_v15 = vmul.f32 %v10004_v48, %v10004_v48  ;;  %11436 = vst [vmem:[%s16870_s30 + $0xf8] sm:$0xff] %v11309_v18   ;;  %v5373_v46 = vadd.f32 %v5372_v27, %v5342_v32  ;;  %v5304_v62 = vadd.f32 %v12575_v22, %v5303_v53  ;;  %v11162_v8 = vpack.c.bf16 %v4881_v16, %v4878_v47 }
 0x42e   : > { %11406 = vst [vmem:[%s16870_s30 + $0x48] sm:$0xff] %v11167_v5   ;;  %11435 = vst [vmem:[%s16870_s30 + $0xf0] sm:$0xff] %v11304_v63   ;;  %v10442_v38 = vadd.f32 %v13148_v19, %v10441_v34  ;;  %v5344_v40 = vmul.f32 %v12576_v13, %v12576_v13 }
 0x42f   : > { %v10512_v57 = vadd.f32 %v10511_v41, %v10481_v15  ;;  %v5305_v52 = vadd.f32 %v12576_v13, %v5304_v62  ;;  %v5374_v42 = vadd.f32 %v5373_v46, %v5343_v23  ;;  %11405 = vst [vmem:[%s16870_s30 + $0x40] sm:$0xff] %v11162_v8  }
 0x430   : > { %v13151_v37 = vpop.f32.mrb[16].mxu1 }
 0x431   : > { %v10513_v58 = vadd.f32 %v10512_v57, %v10482_v55  ;;  %v12579_v14 = vpop.f32.mrb[20].mxu0  ;;  %v5375_v0 = vadd.f32 %v5374_v42, %v5344_v40  ;;  %v10017_v44 = vpop.f32.mrb[17].mxu1  ;;  %v10484_v31 = vmul.f32 %v13151_v37, %v13151_v37 }
 0x432   : > { %v4894_v12 = vpop.f32.mrb[21].mxu0  ;;  %v10443_v30 = vadd.f32 %v10442_v38, %v10017_v44  ;;  %v10483_v45 = vmul.f32 %v10017_v44, %v10017_v44  ;;  %v13152_v10 = vpop.f32.mrb[18].mxu1  ;;  %v5346_v17 = vmul.f32 %v12579_v14, %v12579_v14 }
 0x433   : > { %v12580_v21 = vpop.f32.mrb[22].mxu0  ;;  %v11319_v25 = vpack.c.bf16 %v13152_v10, %v13151_v37  ;;  %v10020_v20 = vpop.f32.mrb[19].mxu1  ;;  %v10485_v6 = vmul.f32 %v13152_v10, %v13152_v10 }
 0x434   : > { %v11177_v59 = vpack.c.bf16 %v12580_v21, %v12579_v14  ;;  %v4897_v2 = vpop.f32.mrb[23].mxu0  ;;  %v10514_v56 = vadd.f32 %v10513_v58, %v10483_v45  ;;  %v10444_v54 = vadd.f32 %v13151_v37, %v10443_v30  ;;  %v11314_v4 = vpack.c.bf16 %v10020_v20, %v10017_v44 }
 0x435   : > { %v11172_v9 = vpack.c.bf16 %v4897_v2, %v4894_v12  ;;  %11438 = vst [vmem:[%s16870_s30 + $0x108] sm:$0xff] %v11319_v25   ;;  %v5306_v50 = vadd.f32 %v5305_v52, %v4897_v2  ;;  %v5345_v36 = vmul.f32 %v4897_v2, %v4897_v2 }
 0x436   : > { %11408 = vst [vmem:[%s16870_s30 + $0x58] sm:$0xff] %v11177_v59   ;;  %v10445_v29 = vadd.f32 %v13152_v10, %v10444_v54  ;;  %v10515_v43 = vadd.f32 %v10514_v56, %v10484_v31  ;;  %11437 = vst [vmem:[%s16870_s30 + $0x100] sm:$0xff] %v11314_v4  }
 0x437   : > { %11407 = vst [vmem:[%s16870_s30 + $0x50] sm:$0xff] %v11172_v9   ;;  %v5376_v24 = vadd.f32 %v5375_v0, %v5345_v36  ;;  %v5307_v33 = vadd.f32 %v12579_v14, %v5306_v50 }
 0x438   : > { %v10516_v26 = vadd.f32 %v10515_v43, %v10485_v6  ;;  %v13155_v28 = vpop.f32.mrb[20].mxu1 }
 0x439   : > { %v12583_v35 = vpop.f32.mrb[24].mxu0  ;;  %v10033_v39 = vpop.f32.mrb[21].mxu1  ;;  %v5377_v61 = vadd.f32 %v5376_v24, %v5346_v17  ;;  %v10487_v5 = vmul.f32 %v13155_v28, %v13155_v28 }
 0x43a   : > { %v4910_v60 = vpop.f32.mrb[25].mxu0  ;;  %v13156_v51 = vpop.f32.mrb[22].mxu1 }
 0x43b   : > { %v5308_v7 = vadd.f32 %v5307_v33, %v4910_v60  ;;  %v5347_v11 = vmul.f32 %v4910_v60, %v4910_v60  ;;  %v12584_v22 = vpop.f32.mrb[26].mxu0  ;;  %v11329_v1 = vpack.c.bf16 %v13156_v51, %v13155_v28  ;;  %v10036_v47 = vpop.f32.mrb[23].mxu1 }
 0x43c   : > { %v11187_v27 = vpack.c.bf16 %v12584_v22, %v12583_v35  ;;  %v4913_v3 = vpop.f32.mrb[27].mxu0  ;;  %v11324_v49 = vpack.c.bf16 %v10036_v47, %v10033_v39  ;;  %v10446_v19 = vadd.f32 %v10445_v29, %v10036_v47  ;;  %v10486_v53 = vmul.f32 %v10036_v47, %v10036_v47 }
 0x43d   : > { %v5378_v32 = vadd.f32 %v5377_v61, %v5347_v11  ;;  %11440 = vst [vmem:[%s16870_s30 + $0x118] sm:$0xff] %v11329_v1   ;;  %v11182_v13 = vpack.c.bf16 %v4913_v3, %v4910_v60  ;;  %v5309_v18 = vadd.f32 %v5308_v7, %v4913_v3  ;;  %v5348_v48 = vmul.f32 %v4913_v3, %v4913_v3 }
 0x43e   : > { %11410 = vst [vmem:[%s16870_s30 + $0x68] sm:$0xff] %v11187_v27   ;;  %11439 = vst [vmem:[%s16870_s30 + $0x110] sm:$0xff] %v11324_v49   ;;  %v10517_v16 = vadd.f32 %v10516_v26, %v10486_v53  ;;  %v10447_v41 = vadd.f32 %v13155_v28, %v10446_v19  ;;  %v5349_v63 = vmul.f32 %v12584_v22, %v12584_v22 }
 0x43f   : > { %11409 = vst [vmem:[%s16870_s30 + $0x60] sm:$0xff] %v11182_v13   ;;  %v5379_v34 = vadd.f32 %v5378_v32, %v5348_v48  ;;  %v5310_v15 = vadd.f32 %v12584_v22, %v5309_v18 }
 0x440   : > { %v13159_v23 = vpop.f32.mrb[24].mxu1  ;;  %v10518_v46 = vadd.f32 %v10517_v16, %v10487_v5 }
 0x441   : > { %v12587_v62 = vpop.f32.mrb[28].mxu0  ;;  %v10049_v8 = vpop.f32.mrb[25].mxu1  ;;  %v5380_v57 = vadd.f32 %v5379_v34, %v5349_v63 }
 0x442   : > { %v4926_v55 = vpop.f32.mrb[29].mxu0  ;;  %v10448_v38 = vadd.f32 %v10447_v41, %v10049_v8  ;;  %v10488_v52 = vmul.f32 %v10049_v8, %v10049_v8  ;;  %v13160_v40 = vpop.f32.mrb[26].mxu1  ;;  %v5351_v31 = vmul.f32 %v12587_v62, %v12587_v62 }
 0x443   : > { %v5311_v42 = vadd.f32 %v5310_v15, %v4926_v55  ;;  %v5350_v37 = vmul.f32 %v4926_v55, %v4926_v55  ;;  %v12588_v58 = vpop.f32.mrb[30].mxu0  ;;  %v11339_v14 = vpack.c.bf16 %v13160_v40, %v13159_v23  ;;  %v10052_v0 = vpop.f32.mrb[27].mxu1  ;;  %v10490_v2 = vmul.f32 %v13160_v40, %v13160_v40 }
 0x444   : > { %v11197_v44 = vpack.c.bf16 %v12588_v58, %v12587_v62  ;;  %v4929_v12 = vpop.f32.mrb[31].mxu0  ;;  %v10519_v30 = vadd.f32 %v10518_v46, %v10488_v52  ;;  %v11334_v45 = vpack.c.bf16 %v10052_v0, %v10049_v8  ;;  %v10449_v10 = vadd.f32 %v10448_v38, %v10052_v0 }
 0x445   : > { %v10489_v21 = vmul.f32 %v10052_v0, %v10052_v0  ;;  %11442 = vst [vmem:[%s16870_s30 + $0x128] sm:$0xff] %v11339_v14   ;;  %v5381_v25 = vadd.f32 %v5380_v57, %v5350_v37  ;;  %v5312_v20 = vadd.f32 %v12587_v62, %v5311_v42  ;;  %v11192_v59 = vpack.c.bf16 %v4929_v12, %v4926_v55 }
 0x446   : > { %11412 = vst [vmem:[%s16870_s30 + $0x78] sm:$0xff] %v11197_v44   ;;  %11441 = vst [vmem:[%s16870_s30 + $0x120] sm:$0xff] %v11334_v45   ;;  %v10450_v54 = vadd.f32 %v13160_v40, %v10449_v10  ;;  %v5352_v9 = vmul.f32 %v12588_v58, %v12588_v58 }
 0x447   : > { %v10520_v56 = vadd.f32 %v10519_v30, %v10489_v21  ;;  %v5313_v4 = vadd.f32 %v12588_v58, %v5312_v20  ;;  %v5382_v50 = vadd.f32 %v5381_v25, %v5351_v31  ;;  %11411 = vst [vmem:[%s16870_s30 + $0x70] sm:$0xff] %v11192_v59  }
 0x448   : > { %v13163_v36 = vpop.f32.mrb[28].mxu1 }
 0x449   : > { %v10521_v29 = vadd.f32 %v10520_v56, %v10490_v2  ;;  %v12591_v6 = vpop.f32.mrb[32].mxu0  ;;  %v5383_v43 = vadd.f32 %v5382_v50, %v5352_v9  ;;  %v10065_v17 = vpop.f32.mrb[29].mxu1  ;;  %v10492_v39 = vmul.f32 %v13163_v36, %v13163_v36 }
 0x44a   : > { %v4942_v24 = vpop.f32.mrb[33].mxu0  ;;  %v10451_v33 = vadd.f32 %v10450_v54, %v10065_v17  ;;  %v10491_v26 = vmul.f32 %v10065_v17, %v10065_v17  ;;  %v13164_v28 = vpop.f32.mrb[30].mxu1  ;;  %v5354_v32 = vmul.f32 %v12591_v6, %v12591_v6 }
 0x44b   : > { %v12592_v35 = vpop.f32.mrb[34].mxu0  ;;  %v11349_v60 = vpack.c.bf16 %v13164_v28, %v13163_v36  ;;  %v10068_v61 = vpop.f32.mrb[31].mxu1  ;;  %v10493_v19 = vmul.f32 %v13164_v28, %v13164_v28 }
 0x44c   : > { %v11207_v51 = vpack.c.bf16 %v12592_v35, %v12591_v6  ;;  %v4945_v7 = vpop.f32.mrb[35].mxu0  ;;  %v10522_v11 = vadd.f32 %v10521_v29, %v10491_v26  ;;  %v10452_v22 = vadd.f32 %v13163_v36, %v10451_v33  ;;  %v11344_v1 = vpack.c.bf16 %v10068_v61, %v10065_v17 }
 0x44d   : > { %v11202_v47 = vpack.c.bf16 %v4945_v7, %v4942_v24  ;;  %11444 = vst [vmem:[%s16870_s30 + $0x138] sm:$0xff] %v11349_v60   ;;  %v5314_v27 = vadd.f32 %v5313_v4, %v4945_v7  ;;  %v5353_v3 = vmul.f32 %v4945_v7, %v4945_v7 }
 0x44e   : > { %11414 = vst [vmem:[%s16870_s30 + $0x88] sm:$0xff] %v11207_v51   ;;  %v10453_v49 = vadd.f32 %v13164_v28, %v10452_v22  ;;  %v10523_v53 = vadd.f32 %v10522_v11, %v10492_v39  ;;  %11443 = vst [vmem:[%s16870_s30 + $0x130] sm:$0xff] %v11344_v1  }
 0x44f   : > { %11413 = vst [vmem:[%s16870_s30 + $0x80] sm:$0xff] %v11202_v47   ;;  %v5384_v13 = vadd.f32 %v5383_v43, %v5353_v3  ;;  %v5315_v18 = vadd.f32 %v12591_v6, %v5314_v27 }
 0x450   : > { %v10524_v48 = vadd.f32 %v10523_v53, %v10493_v19  ;;  %v13167_v5 = vpop.f32.mrb[32].mxu1 }
 0x451   : > { %v12595_v16 = vpop.f32.mrb[36].mxu0  ;;  %v10081_v41 = vpop.f32.mrb[33].mxu1  ;;  %v5385_v34 = vadd.f32 %v5384_v13, %v5354_v32  ;;  %v10495_v44 = vmul.f32 %v13167_v5, %v13167_v5 }
 0x452   : > { %v4958_v63 = vpop.f32.mrb[37].mxu0  ;;  %v13168_v15 = vpop.f32.mrb[34].mxu1 }
 0x453   : > { %v5316_v23 = vadd.f32 %v5315_v18, %v4958_v63  ;;  %v5355_v46 = vmul.f32 %v4958_v63, %v4958_v63  ;;  %v12596_v62 = vpop.f32.mrb[38].mxu0  ;;  %v11359_v8 = vpack.c.bf16 %v13168_v15, %v13167_v5  ;;  %v10084_v55 = vpop.f32.mrb[35].mxu1 }
 0x454   : > { %v11217_v57 = vpack.c.bf16 %v12596_v62, %v12595_v16  ;;  %v4961_v38 = vpop.f32.mrb[39].mxu0  ;;  %v11354_v52 = vpack.c.bf16 %v10084_v55, %v10081_v41  ;;  %v10454_v40 = vadd.f32 %v10453_v49, %v10084_v55  ;;  %v10494_v42 = vmul.f32 %v10084_v55, %v10084_v55 }
 0x455   : > { %v5386_v37 = vadd.f32 %v5385_v34, %v5355_v46  ;;  %11446 = vst [vmem:[%s16870_s30 + $0x148] sm:$0xff] %v11359_v8   ;;  %v11212_v58 = vpack.c.bf16 %v4961_v38, %v4958_v63  ;;  %v5317_v14 = vadd.f32 %v5316_v23, %v4961_v38  ;;  %v5356_v0 = vmul.f32 %v4961_v38, %v4961_v38 }
 0x456   : > { %11416 = vst [vmem:[%s16870_s30 + $0x98] sm:$0xff] %v11217_v57   ;;  %11445 = vst [vmem:[%s16870_s30 + $0x140] sm:$0xff] %v11354_v52   ;;  %v10525_v12 = vadd.f32 %v10524_v48, %v10494_v42  ;;  %v10455_v30 = vadd.f32 %v13167_v5, %v10454_v40  ;;  %v5357_v45 = vmul.f32 %v12596_v62, %v12596_v62 }
 0x457   : > { %11415 = vst [vmem:[%s16870_s30 + $0x90] sm:$0xff] %v11212_v58   ;;  %v5387_v10 = vadd.f32 %v5386_v37, %v5356_v0  ;;  %v5318_v21 = vadd.f32 %v12596_v62, %v5317_v14 }
 0x458   : > { %v13171_v31 = vpop.f32.mrb[36].mxu1  ;;  %v10526_v25 = vadd.f32 %v10525_v12, %v10495_v44 }
 0x459   : > { %v12599_v20 = vpop.f32.mrb[40].mxu0  ;;  %v10097_v59 = vpop.f32.mrb[37].mxu1  ;;  %v5388_v56 = vadd.f32 %v5387_v10, %v5357_v45 }
 0x45a   : > { %v4974_v2 = vpop.f32.mrb[41].mxu0  ;;  %v10456_v54 = vadd.f32 %v10455_v30, %v10097_v59  ;;  %v10496_v4 = vmul.f32 %v10097_v59, %v10097_v59  ;;  %v13172_v9 = vpop.f32.mrb[38].mxu1  ;;  %v5359_v39 = vmul.f32 %v12599_v20, %v12599_v20 }
 0x45b   : > { %v5319_v50 = vadd.f32 %v5318_v21, %v4974_v2  ;;  %v5358_v36 = vmul.f32 %v4974_v2, %v4974_v2  ;;  %v12600_v29 = vpop.f32.mrb[42].mxu0  ;;  %v11369_v6 = vpack.c.bf16 %v13172_v9, %v13171_v31  ;;  %v10100_v43 = vpop.f32.mrb[39].mxu1  ;;  %v10498_v7 = vmul.f32 %v13172_v9, %v13172_v9 }
 0x45c   : > { %v11227_v17 = vpack.c.bf16 %v12600_v29, %v12599_v20  ;;  %v4977_v24 = vpop.f32.mrb[43].mxu0  ;;  %v10527_v33 = vadd.f32 %v10526_v25, %v10496_v4  ;;  %v11364_v26 = vpack.c.bf16 %v10100_v43, %v10097_v59  ;;  %v10457_v28 = vadd.f32 %v10456_v54, %v10100_v43 }
 0x45d   : > { %v10497_v35 = vmul.f32 %v10100_v43, %v10100_v43  ;;  %11448 = vst [vmem:[%s16870_s30 + $0x158] sm:$0xff] %v11369_v6   ;;  %v5389_v60 = vadd.f32 %v5388_v56, %v5358_v36  ;;  %v5320_v61 = vadd.f32 %v12599_v20, %v5319_v50  ;;  %v11222_v51 = vpack.c.bf16 %v4977_v24, %v4974_v2 }
 0x45e   : > { %11418 = vst [vmem:[%s16870_s30 + $0xa8] sm:$0xff] %v11227_v17   ;;  %11447 = vst [vmem:[%s16870_s30 + $0x150] sm:$0xff] %v11364_v26   ;;  %v10458_v22 = vadd.f32 %v13172_v9, %v10457_v28  ;;  %v5360_v47 = vmul.f32 %v12600_v29, %v12600_v29 }
 0x45f   : > { %v10528_v11 = vadd.f32 %v10527_v33, %v10497_v35  ;;  %v5321_v1 = vadd.f32 %v12600_v29, %v5320_v61  ;;  %v5390_v27 = vadd.f32 %v5389_v60, %v5359_v39  ;;  %11417 = vst [vmem:[%s16870_s30 + $0xa0] sm:$0xff] %v11222_v51  }
 0x460   : > { %v13175_v3 = vpop.f32.mrb[40].mxu1 }
 0x461   : > { %v10529_v49 = vadd.f32 %v10528_v11, %v10498_v7  ;;  %v12603_v19 = vpop.f32.mrb[44].mxu0  ;;  %v5391_v53 = vadd.f32 %v5390_v27, %v5360_v47  ;;  %v10113_v32 = vpop.f32.mrb[41].mxu1  ;;  %v10500_v41 = vmul.f32 %v13175_v3, %v13175_v3 }
 0x462   : > { %v4990_v13 = vpop.f32.mrb[45].mxu0  ;;  %v10459_v18 = vadd.f32 %v10458_v22, %v10113_v32  ;;  %v10499_v48 = vmul.f32 %v10113_v32, %v10113_v32  ;;  %v13176_v5 = vpop.f32.mrb[42].mxu1  ;;  %v5362_v37 = vmul.f32 %v12603_v19, %v12603_v19 }
 0x463   : > { %v12604_v16 = vpop.f32.mrb[46].mxu0  ;;  %v11379_v63 = vpack.c.bf16 %v13176_v5, %v13175_v3  ;;  %v10116_v34 = vpop.f32.mrb[43].mxu1  ;;  %v10501_v40 = vmul.f32 %v13176_v5, %v13176_v5 }
 0x464   : > { %v11237_v15 = vpack.c.bf16 %v12604_v16, %v12603_v19  ;;  %v4993_v23 = vpop.f32.mrb[47].mxu0  ;;  %v10530_v46 = vadd.f32 %v10529_v49, %v10499_v48  ;;  %v10460_v62 = vadd.f32 %v13175_v3, %v10459_v18  ;;  %v11374_v8 = vpack.c.bf16 %v10116_v34, %v10113_v32 }
 0x465   : > { %v11232_v55 = vpack.c.bf16 %v4993_v23, %v4990_v13  ;;  %11450 = vst [vmem:[%s16870_s30 + $0x168] sm:$0xff] %v11379_v63   ;;  %v5322_v57 = vadd.f32 %v5321_v1, %v4993_v23  ;;  %v5361_v38 = vmul.f32 %v4993_v23, %v4993_v23 }
 0x466   : > { %11420 = vst [vmem:[%s16870_s30 + $0xb8] sm:$0xff] %v11237_v15   ;;  %v10461_v52 = vadd.f32 %v13176_v5, %v10460_v62  ;;  %v10531_v42 = vadd.f32 %v10530_v46, %v10500_v41  ;;  %11449 = vst [vmem:[%s16870_s30 + $0x160] sm:$0xff] %v11374_v8  }
 0x467   : > { %11419 = vst [vmem:[%s16870_s30 + $0xb0] sm:$0xff] %v11232_v55   ;;  %v5323_v58 = vadd.f32 %v12603_v19, %v5322_v57  ;;  %v5392_v14 = vadd.f32 %v5391_v53, %v5361_v38 }
 0x468   : > { %v10532_v0 = vadd.f32 %v10531_v42, %v10501_v40  ;;  %v13179_v44 = vpop.f32.mrb[44].mxu1 }
 0x469   : > { %v5324_v12 = vrot.slane %v5323_v58, 4  ;;  %v5393_v30 = vadd.f32 %v5392_v14, %v5362_v37  ;;  %v10129_v45 = vpop.f32.mrb[45].mxu1  ;;  %v10503_v9 = vmul.f32 %v13179_v44, %v13179_v44 }
 0x46a   : > { %v13180_v10 = vpop.f32.mrb[46].mxu1 }
 0x46b   : > { %v5325_v21 = vadd.f32 %v5324_v12, %v5323_v58  ;;  %v5394_v31 = vrot.slane %v5393_v30, 4  ;;  %v11389_v25 = vpack.c.bf16 %v13180_v10, %v13179_v44  ;;  %v10132_v20 = vpop.f32.mrb[47].mxu1 }
 0x46c   : > { %v11384_v59 = vpack.c.bf16 %v10132_v20, %v10129_v45  ;;  %v10462_v2 = vadd.f32 %v10461_v52, %v10132_v20  ;;  %v10502_v56 = vmul.f32 %v10132_v20, %v10132_v20 }
 0x46d   : > { %v5326_v54 = vrot.slane %v5325_v21, 2  ;;  %v5395_v4 = vadd.f32 %v5394_v31, %v5393_v30  ;;  %11452 = vst [vmem:[%s16870_s30 + $0x178] sm:$0xff] %v11389_v25  }
 0x46e   : > { %11451 = vst [vmem:[%s16870_s30 + $0x170] sm:$0xff] %v11384_v59   ;;  %v10463_v50 = vadd.f32 %v13179_v44, %v10462_v2  ;;  %v10533_v36 = vadd.f32 %v10532_v0, %v10502_v56 }
 0x46f   : > { %v5327_v29 = vadd.f32 %v5326_v54, %v5325_v21  ;;  %v5396_v6 = vrot.slane %v5395_v4, 2 }
 0x470   : > { %v10464_v43 = vrot.slane %v10463_v50, 4  ;;  %v10534_v17 = vadd.f32 %v10533_v36, %v10503_v9 }
 0x471   : > { %v5328_v24 = vrot.slane %v5327_v29, 1  ;;  %v5397_v33 = vadd.f32 %v5396_v6, %v5395_v4 }
 0x472   : > { %v10465_v26 = vadd.f32 %v10464_v43, %v10463_v50  ;;  %v10535_v28 = vrot.slane %v10534_v17, 4 }
 0x473   : > { %v5329_v35 = vadd.f32 %v5328_v24, %v5327_v29  ;;  %v5398_v39 = vrot.slane %v5397_v33, 1 }
 0x474   : > { %v10466_v60 = vrot.slane %v10465_v26, 2  ;;  %v10536_v61 = vadd.f32 %v10535_v28, %v10534_v17 }
 0x475   : > { %5330 = vst [vmem:[%s16859_s27] sm:$0x1] %v5329_v35  ;;  %v5399_v51 = vadd.f32 %v5398_v39, %v5397_v33 }
 0x476   : > { %v10467_v7 = vadd.f32 %v10466_v60, %v10465_v26  ;;  %v10537_v11 = vrot.slane %v10536_v61, 2 }
 0x477   : > { %5400 = vst [vmem:[%s16859_s27 + $0x1] sm:$0x1] %v5399_v51 }
 0x478   : > { %v10468_v22 = vrot.slane %v10467_v7, 1  ;;  %v10538_v1 = vadd.f32 %v10537_v11, %v10536_v61 }
 0x47a   : > { %v10469_v47 = vadd.f32 %v10468_v22, %v10467_v7  ;;  %v10539_v27 = vrot.slane %v10538_v1, 1 }
 0x47c   : > { %10986 = vst [vmem:[%s16859_s27 + $0x8] sm:$0x1] %v10469_v47  ;;  %v10540_v3 = vadd.f32 %v10539_v27, %v10538_v1 }
 0x47e   : > { %10987 = vst [vmem:[%s16859_s27 + $0x9] sm:$0x1] %v10540_v3 }
 0x47f PF: > { %s16_s18 = sadd.s32 1, %s14157_s18  }
 0x480   : > { %p13_p4 = scmp.ge.s32.totalorder %s16_s18, 4  }
 0x482   :  { %15 = sbr.rel (!%p13_p4) target bundleno = 1 (0x1), region = 81 }

// kernel: basic_block.3
= control target key start
LH: loop header
LB: loop body
LE: loop exit
PB: predicated region body
PF: predicated region fallthrough
CT: control target
= control target key end

     0   :  { %s14660_s12 = smov 0   ;;  %s16540_s0 = inlined_call_operand.vmem [shape: bf16[4,448,128], index: 0, kind: input, shape index: {}]   ;;  %s16541_s1 = inlined_call_operand.vmem [shape: bf16[1152,128], index: 1, kind: input, shape index: {}]   ;;  %s16542_s2 = inlined_call_operand.vmem [shape: bf16[4,384,128], index: 2, kind: output, shape index: {0}]   ;;  %s16543_s3 = inlined_call_operand.vmem [shape: f32[4,8,128], index: 3, kind: output, shape index: {1}]  }
   0x1 LB: > { %s10493_s13 = sadd.s32 4294967295, %s14637_s12   ;;  %p10497_p0 = scmp.ge.s32.totalorder %s14637_s12, 1  ;;  %s14637_s12 = sphi %s14660_s12, %s14_s12  }
   0x2   : > { %p142_p1 = scmp.lt.s32.totalorder %s14637_s12, 3 }
   0x4   : > { %p143_p2 = pnand %p10497_p0, %p142_p1 }
   0x6   : > { %146 = sbr.rel (%p143_p2) target bundleno = 1137 (0x471), region = 28 }
   0xd   : > { %v14185_v0 = vld [vmem:[%s16541_s1 + $0x40] sm:$0xff]   ;;  %s10498_s16 = sshll.u32 %s10493_s13, 1  ;;  %v14187_v2 = vld [vmem:[%s16541_s1 + $0x48] sm:$0xff]   ;;  %v14189_v4 = vld [vmem:[%s16541_s1 + $0x50] sm:$0xff]   ;;  %vm398_vm0 = vsmask.f32 7424 }
   0xe   : > { %v14186_v1 = vld [vmem:[%s16541_s1 + $0x40] sm:$0xff]   ;;  %p174_p3 = scmp.lt.s32.totalorder %s10498_s16, 3  ;;  %12254 = vmatprep.subr.bf16.mxu0 %v14185_v0  ;;  %v14188_v3 = vld [vmem:[%s16541_s1 + $0x48] sm:$0xff]   ;;  %v14190_v5 = vld [vmem:[%s16541_s1 + $0x50] sm:$0xff]   ;;  %vm1209_vm1 = vcmask 1046528  }
   0xf   : > { %12830 = vmatprep.subr.bf16.mxu1 %v14186_v1  ;;  %12255 = vmatpush3.bf16.msra.mxu0 %v14185_v0  ;;  %v14191_v6 = vld [vmem:[%s16541_s1 + $0x58] sm:$0xff]   ;;  %v14193_v8 = vld [vmem:[%s16541_s1 + $0x60] sm:$0xff]   ;;  %v14195_v10 = vld [vmem:[%s16541_s1 + $0x68] sm:$0xff]  }
  0x10   : > { %12831 = vmatpush3.bf16.msra.mxu1 %v14186_v1  ;;  %12256 = vmatprep.subr.bf16.mxu0 %v14187_v2  ;;  %s16617_s16 = smov (!%p174_p3, %s10498_s16), 3  ;;  %v14192_v7 = vld [vmem:[%s16541_s1 + $0x58] sm:$0xff]   ;;  %v14194_v9 = vld [vmem:[%s16541_s1 + $0x60] sm:$0xff]   ;;  %v14196_v11 = vld [vmem:[%s16541_s1 + $0x68] sm:$0xff]  }
  0x11   : > { %12832 = vmatprep.subr.bf16.mxu1 %v14188_v3  ;;  %s14174_s4 = smul.u32 224, %s16617_s16  ;;  %v14197_v17 = vld [vmem:[%s16541_s1 + $0x70] sm:$0xff]   ;;  %v14199_v31 = vld [vmem:[%s16541_s1 + $0x78] sm:$0xff]   ;;  %v14206_v45 = vld [vmem:[%s16541_s1] sm:$0xff]  }
  0x12   : > { %v14198_v25 = vld [vmem:[%s16541_s1 + $0x70] sm:$0xff]   ;;  %v14200_v35 = vld [vmem:[%s16541_s1 + $0x78] sm:$0xff]   ;;  %v14208_v50 = vld [vmem:[%s16541_s1] sm:$0xff]   ;;  %s14175_s21 = smul.u32 192, %s16617_s16 }
  0x13   : > { %12257 = vmatpush3.bf16.msra.mxu0 %v14187_v2  ;;  %s14704_s11 = scalar_lea.vmem %s16540_s0, %s14174_s4 }
  0x14   : > { %12833 = vmatpush3.bf16.msra.mxu1 %v14188_v3  ;;  %12258 = vmatprep.subr.bf16.mxu0 %v14189_v4  ;;  %v194_v12 = vld [vmem:[%s14704_s11] sm:$0xf]  ;;  %v195_v13 = vld [vmem:[%s14704_s11 + $0x4] sm:$0xf]  ;;  %v14202_v15 = vld [vmem:[%s14704_s11 + $0x8] sm:$0xff]   ;;  %s16483_s24 = scalar_lea.vmem %s16542_s2, %s14175_s21 }
  0x15   : > { %12834 = vmatprep.subr.bf16.mxu1 %v14190_v5  ;;  %v14714_v14 = vcombine.low %v194_v12, %v195_v13  ;;  %v14204_v16 = vld [vmem:[%s14704_s11 + $0xe8] sm:$0xff]   ;;  %v10750_v18 = vld [vmem:[%s14704_s11 + $0xe0] sm:$0xf]  ;;  %v10751_v19 = vld [vmem:[%s14704_s11 + $0xe4] sm:$0xf]  ;;  %v407_v22 = vshll.u32 %v14202_v15, 16 }
  0x16   : > { %v14725_v23 = vcombine.low %v10750_v18, %v10751_v19  ;;  %v14205_v24 = vld [vmem:[%s14704_s11 + $0x10] sm:$0xff]   ;;  %v5510_v26 = vshll.u32 %v14204_v16, 16  ;;  %v411_v32 = vshrl.u32 %v14202_v15, 16  ;;  %v5514_v39 = vshrl.u32 %v14204_v16, 16  ;;  %v14209_v47 = vld [vmem:[%s14704_s11 + $0x18] sm:$0xff]   ;;  %v14211_v55 = vld [vmem:[%s14704_s11 + $0x20] sm:$0xff]  }
  0x17   : > { %12259 = vmatpush3.bf16.msra.mxu0 %v14189_v4  ;;  %v400_v20 = vshrl.u32 %v14714_v14, 16  ;;  %v402_v21 = vshll.u32 %v14714_v14, 16  ;;  %v409_v28 = vrot.slane %v407_v22, 1  ;;  %v415_v33 = vshll.u32 %v14205_v24, 16  ;;  %v14207_v34 = vld [vmem:[%s14704_s11 + $0xf0] sm:$0xff]   ;;  %v14210_v51 = vld [vmem:[%s14704_s11 + $0xf8] sm:$0xff]  }
  0x18   : > { %12835 = vmatpush3.bf16.msra.mxu1 %v14190_v5  ;;  %12260 = vmatprep.subr.bf16.mxu0 %v14191_v6  ;;  %v5503_v29 = vshrl.u32 %v14725_v23, 16  ;;  %v5505_v30 = vshll.u32 %v14725_v23, 16  ;;  %v5512_v38 = vrot.slane %v5510_v26, 1  ;;  %v5518_v40 = vshll.u32 %v14207_v34, 16  ;;  %v14212_v56 = vld [vmem:[%s14704_s11 + $0x100] sm:$0xff]   ;;  %v14213_v3 = vld [vmem:[%s16541_s1 + $0x8] sm:$0xff]  }
  0x19   : > { %12836 = vmatprep.subr.bf16.mxu1 %v14192_v7  ;;  %v404_v27 = vrot.slane %v402_v21, 1  ;;  %v417_v43 = vrot.slane %v415_v33, 1  ;;  %v419_v44 = vshrl.u32 %v14205_v24, 16  ;;  %v413_v49 = vor.u32 %v411_v32, %v409_v28  ;;  %v14218_v18 = vld [vmem:[%s14704_s11 + $0x110] sm:$0xff]   ;;  %v14220_v32 = vld [vmem:[%s14704_s11 + $0x118] sm:$0xff]  }
  0x1a   : > { %v5507_v37 = vrot.slane %v5505_v30, 1  ;;  %v5520_v46 = vrot.slane %v5518_v40, 1  ;;  %v5522_v52 = vshrl.u32 %v14207_v34, 16  ;;  %v5516_v53 = vor.u32 %v5514_v39, %v5512_v38  ;;  %v14222_v40 = vld [vmem:[%s16541_s1 + $0x10] sm:$0xff]  }
  0x1b   : > { %12261 = vmatpush3.bf16.msra.mxu0 %v14191_v6  ;;  %v405_v36 = vor.u32 %v404_v27, %v400_v20  ;;  %v423_v54 = vshll.u32 %v14209_v47, 16  ;;  %v421_v57 = vor.u32 %v419_v44, %v417_v43  ;;  %v5526_v59 = vshll.u32 %v14210_v51, 16  ;;  %v14214_v6 = vld [vmem:[%s16541_s1 + $0x8] sm:$0xff]  }
  0x1c   : > { %12837 = vmatpush3.bf16.msra.mxu1 %v14192_v7  ;;  %12262 = vmatprep.subr.bf16.mxu0 %v14193_v8  ;;  %v5508_v42 = vor.u32 %v5507_v37, %v5503_v29  ;;  %v5524_v58 = vor.u32 %v5522_v52, %v5520_v46  ;;  %v427_v60 = vshrl.u32 %v14209_v47, 16  ;;  %v431_v62 = vshll.u32 %v14211_v55, 16  ;;  %v14224_v47 = vld [vmem:[%s16541_s1 + $0x10] sm:$0xff]  }
  0x1d   : > { %12838 = vmatprep.subr.bf16.mxu1 %v14194_v9  ;;  %v410_v41 = vsel %vm398_vm0, %v405_v36, %v409_v28  ;;  %v425_v61 = vrot.slane %v423_v54, 1  ;;  %v5530_v63 = vshrl.u32 %v14210_v51, 16  ;;  %v5534_v0 = vshll.u32 %v14212_v56, 16 }
  0x1e   : > { %12270 = vmatprep.mubr.bf16.mxu0 %v410_v41  ;;  %v5513_v48 = vsel %vm398_vm0, %v5508_v42, %v5512_v38  ;;  %v418_v1 = vsel %vm398_vm0, %v413_v49, %v417_v43  ;;  %v5528_v2 = vrot.slane %v5526_v59, 1  ;;  %v5521_v4 = vsel %vm398_vm0, %v5516_v53, %v5520_v46  ;;  %v14221_v42 = vld [vmem:[%s14704_s11 + $0x40] sm:$0xff]  }
  0x1f   : > { %12263 = vmatpush3.bf16.msra.mxu0 %v14193_v8  ;;  %12846 = vmatprep.mubr.bf16.mxu1 %v5513_v48  ;;  %v433_v5 = vrot.slane %v431_v62, 1  ;;  %v426_v7 = vsel %vm398_vm0, %v421_v57, %v425_v61  ;;  %v14215_v8 = vld [vmem:[%s14704_s11 + $0x28] sm:$0xff]   ;;  %v5538_v12 = vshrl.u32 %v14212_v56, 16  ;;  %v429_v13 = vor.u32 %v427_v60, %v425_v61  ;;  %v14223_v46 = vld [vmem:[%s14704_s11 + $0x120] sm:$0xff]  }
  0x20   : > { %12839 = vmatpush3.bf16.msra.mxu1 %v14194_v9  ;;  %12264 = vmatprep.subr.bf16.mxu0 %v14195_v10  ;;  %v435_v9 = vshrl.u32 %v14211_v55, 16  ;;  %v5536_v15 = vrot.slane %v5534_v0, 1  ;;  %v439_v16 = vshll.u32 %v14215_v8, 16  ;;  %v5532_v19 = vor.u32 %v5530_v63, %v5528_v2  ;;  %v14226_v55 = vld [vmem:[%s14704_s11 + $0x128] sm:$0xff]   ;;  %v14229_v0 = vld [vmem:[%s16541_s1 + $0x18] sm:$0xff]  }
  0x21   : > { %12840 = vmatprep.subr.bf16.mxu1 %v14196_v11  ;;  %v434_v28 = vsel %vm398_vm0, %v429_v13, %v433_v5  ;;  %v443_v29 = vshrl.u32 %v14215_v8, 16  ;;  %v5554_v38 = vshrl.u32 %v14218_v18, 16  ;;  %v5558_v39 = vshll.u32 %v14220_v32, 16 }
  0x22   : > { %v437_v20 = vor.u32 %v435_v9, %v433_v5  ;;  %v441_v22 = vrot.slane %v439_v16, 1  ;;  %v5540_v24 = vor.u32 %v5538_v12, %v5536_v15  ;;  %v5537_v33 = vsel %vm398_vm0, %v5532_v19, %v5536_v15  ;;  %v14228_v5 = vld [vmem:[%s14704_s11 + $0x130] sm:$0xff]   ;;  %v14230_v9 = vld [vmem:[%s16541_s1 + $0x18] sm:$0xff]  }
  0x23   : > { %12265 = vmatpush3.bf16.msra.mxu0 %v14195_v10  ;;  %v5529_v10 = vsel %vm398_vm0, %v5524_v58, %v5528_v2  ;;  %v5560_v52 = vrot.slane %v5558_v39, 1  ;;  %v463_v54 = vshll.u32 %v14221_v42, 16  ;;  %v5562_v58 = vshrl.u32 %v14220_v32, 16  ;;  %v14231_v12 = vld [vmem:[%s14704_s11 + $0x58] sm:$0xff]  }
  0x24   : > { %12841 = vmatpush3.bf16.msra.mxu1 %v14196_v11  ;;  %12266 = vmatprep.subr.bf16.mxu0 %v14197_v17  ;;  %v14216_v11 = vld [vmem:[%s14704_s11 + $0x108] sm:$0xff]   ;;  %v442_v34 = vsel %vm398_vm0, %v437_v20, %v441_v22  ;;  %v445_v43 = vor.u32 %v443_v29, %v441_v22  ;;  %v5566_v59 = vshll.u32 %v14223_v46, 16  ;;  %v467_v61 = vshrl.u32 %v14221_v42, 16  ;;  %v14232_v16 = vld [vmem:[%s14704_s11 + $0x138] sm:$0xff]   ;;  %v14238_v42 = vld [vmem:[%s16541_s1 + $0x20] sm:$0xff]  }
  0x25   : > { %12842 = vmatprep.subr.bf16.mxu1 %v14198_v25  ;;  %v5542_v21 = vshll.u32 %v14216_v11, 16  ;;  %v5546_v30 = vshrl.u32 %v14216_v11, 16  ;;  %v5570_v63 = vshrl.u32 %v14223_v46, 16  ;;  %v5574_v2 = vshll.u32 %v14226_v55, 16 }
  0x26   : > { %v5568_v8 = vrot.slane %v5566_v59, 1  ;;  %v5590_v29 = vshll.u32 %v14232_v16, 16  ;;  %v5594_v46 = vshrl.u32 %v14232_v16, 16 }
  0x27   : > { %12267 = vmatpush3.bf16.msra.mxu0 %v14197_v17  ;;  %v14217_v17 = vld [vmem:[%s14704_s11 + $0x30] sm:$0xff]   ;;  %v5544_v26 = vrot.slane %v5542_v21, 1  ;;  %v5576_v15 = vrot.slane %v5574_v2, 1  ;;  %v5582_v21 = vshll.u32 %v14228_v5, 16 }
  0x28   : > { %12843 = vmatpush3.bf16.msra.mxu1 %v14198_v25  ;;  %12268 = vmatprep.subr.bf16.mxu0 %v14199_v31  ;;  %v14219_v25 = vld [vmem:[%s14704_s11 + $0x38] sm:$0xff]   ;;  %v447_v27 = vshll.u32 %v14217_v17, 16  ;;  %v5572_v13 = vor.u32 %v5570_v63, %v5568_v8 }
  0x29   : > { %12844 = vmatprep.subr.bf16.mxu1 %v14200_v35  ;;  %v455_v36 = vshll.u32 %v14219_v25, 16  ;;  %v5545_v37 = vsel %vm398_vm0, %v5540_v24, %v5544_v26  ;;  %v5548_v44 = vor.u32 %v5546_v30, %v5544_v26  ;;  %v459_v53 = vshrl.u32 %v14219_v25, 16 }
  0x2a   : > { %v449_v41 = vrot.slane %v447_v27, 1  ;;  %v5578_v24 = vshrl.u32 %v14226_v55, 16  ;;  %v487_v26 = vshll.u32 %v14231_v12, 16  ;;  %v5577_v27 = vsel %vm398_vm0, %v5572_v13, %v5576_v15 }
  0x2b   : > { %12269 = vmatpush3.bf16.msra.mxu0 %v14199_v31  ;;  %v5550_v31 = vshll.u32 %v14218_v18, 16  ;;  %v457_v49 = vrot.slane %v455_v36, 1 }
  0x2c   : > { %12845 = vmatpush3.bf16.msra.mxu1 %v14200_v35  ;;  %12318 = vmatprep.subr.bf16.mxu0 %v14206_v45  ;;  %v451_v35 = vshrl.u32 %v14217_v17, 16  ;;  %v450_v56 = vsel %vm398_vm0, %v445_v43, %v449_v41  ;;  %v491_v43 = vshrl.u32 %v14231_v12, 16 }
  0x2d   : > { %12894 = vmatprep.subr.bf16.mxu1 %v14208_v50 }
  0x2e   : > { %12271 = vmatmul.mubr.bf16.vlgmr.msra.gmra.mrb[0].mxu0 %v418_v1  ;;  %v453_v48 = vor.u32 %v451_v35, %v449_v41  ;;  %v5580_v35 = vor.u32 %v5578_v24, %v5576_v15  ;;  %v14804_v41 = vld [vmem:[%s14704_s11 + $0x148] sm:$0xff]   ;;  %v14843_v24 = vld [vmem:[%s14704_s11 + $0x160] sm:$0xff]  }
  0x2f   : > { %12847 = vmatmul.mubr.bf16.vlgmr.msra.gmra.mrb[0].mxu1 %v5521_v4  ;;  %12319 = vmatpush3.bf16.msra.mxu0 %v14206_v45  ;;  %v5552_v45 = vrot.slane %v5550_v31, 1  ;;  %v465_v4 = vrot.slane %v463_v54, 1  ;;  %v14233_v31 = vld [vmem:[%s14704_s11 + $0x60] sm:$0xff]  }
  0x30   : > { %12895 = vmatpush3.bf16.msra.mxu1 %v14208_v50  ;;  %12274 = vmatprep.mubr.bf16.mxu0 %v426_v7  ;;  %v14225_v50 = vld [vmem:[%s14704_s11 + $0x48] sm:$0xff]   ;;  %v458_v60 = vsel %vm398_vm0, %v453_v48, %v457_v49  ;;  %v5564_v7 = vor.u32 %v5562_v58, %v5560_v52  ;;  %v499_v48 = vshrl.u32 %v14233_v31, 16 }
  0x31   : > { %12850 = vmatprep.mubr.bf16.mxu1 %v5529_v10  ;;  %12320 = vmatprep.subr.bf16.mxu0 %v14213_v3  ;;  %v5556_v51 = vor.u32 %v5554_v38, %v5552_v45  ;;  %v5553_v57 = vsel %vm398_vm0, %v5548_v44, %v5552_v45  ;;  %v471_v62 = vshll.u32 %v14225_v50, 16  ;;  %v469_v10 = vor.u32 %v467_v61, %v465_v4  ;;  %v14235_v38 = vld [vmem:[%s14704_s11 + $0x68] sm:$0xff]   ;;  %v14822_v61 = vld [vmem:[%s14704_s11 + $0x78] sm:$0xff]  }
  0x32   : > { %12896 = vmatprep.subr.bf16.mxu1 %v14214_v6  ;;  %v5569_v19 = vsel %vm398_vm0, %v5564_v7, %v5568_v8  ;;  %v475_v20 = vshrl.u32 %v14225_v50, 16  ;;  %v495_v44 = vshll.u32 %v14233_v31, 16  ;;  %v507_v8 = vshrl.u32 %v14235_v38, 16  ;;  %v14849_v31 = vld [vmem:[%s14704_s11 + $0x168] sm:$0xff]  }
  0x33   : > { %12321 = vmatpush3.bf16.msra.mxu0 %v14213_v3  ;;  %v5561_v1 = vsel %vm398_vm0, %v5556_v51, %v5560_v52  ;;  %v14227_v3 = vld [vmem:[%s14704_s11 + $0x50] sm:$0xff]   ;;  %v473_v11 = vrot.slane %v471_v62, 1  ;;  %v503_v52 = vshll.u32 %v14235_v38, 16  ;;  %v519_v15 = vshll.u32 %v14822_v61, 16 }
  0x34   : > { %12897 = vmatpush3.bf16.msra.mxu1 %v14214_v6  ;;  %12322 = vmatprep.subr.bf16.mxu0 %v14222_v40  ;;  %v461_v6 = vor.u32 %v459_v53, %v457_v49  ;;  %v479_v17 = vshll.u32 %v14227_v3, 16  ;;  %v483_v25 = vshrl.u32 %v14227_v3, 16  ;;  %v14240_v49 = vld [vmem:[%s16541_s1 + $0x20] sm:$0xff]   ;;  %v14237_v53 = vld [vmem:[%s14704_s11 + $0x70] sm:$0xff]  }
  0x35   : > { %12898 = vmatprep.subr.bf16.mxu1 %v14224_v47  ;;  %v474_v22 = vsel %vm398_vm0, %v469_v10, %v473_v11  ;;  %v477_v32 = vor.u32 %v475_v20, %v473_v11  ;;  %v515_v13 = vshrl.u32 %v14237_v53, 16  ;;  %v14840_v20 = vld [vmem:[%s14704_s11 + $0x80] sm:$0xff]  }
  0x36   : > { %12275 = vmatmul.mubr.bf16.gmra.mrb[4].mxu0 %v434_v28  ;;  %v466_v18 = vsel %vm398_vm0, %v461_v6, %v465_v4  ;;  %v5586_v28 = vshrl.u32 %v14228_v5, 16  ;;  %v481_v30 = vrot.slane %v479_v17, 1  ;;  %v511_v4 = vshll.u32 %v14237_v53, 16  ;;  %v14245_v5 = vld [vmem:[%s16541_s1 + $0x28] sm:$0xff]  }
  0x37   : > { %12851 = vmatmul.mubr.bf16.gmra.mrb[4].mxu1 %v5537_v33  ;;  %12278 = vmatprep.mubr.bf16.mxu0 %v442_v34  ;;  %v5584_v33 = vrot.slane %v5582_v21, 1  ;;  %v14234_v34 = vld [vmem:[%s14704_s11 + $0x140] sm:$0xff]   ;;  %v14246_v6 = vld [vmem:[%s16541_s1 + $0x28] sm:$0xff]  }
  0x38   : > { %12854 = vmatprep.mubr.bf16.mxu1 %v5545_v37  ;;  %12323 = vmatpush3.bf16.msra.mxu0 %v14222_v40  ;;  %v485_v36 = vor.u32 %v483_v25, %v481_v30  ;;  %v489_v37 = vrot.slane %v487_v26, 1  ;;  %v5592_v40 = vrot.slane %v5590_v29, 1  ;;  %v482_v45 = vsel %vm398_vm0, %v477_v32, %v481_v30 }
  0x39   : > { %12899 = vmatpush3.bf16.msra.mxu1 %v14224_v47  ;;  %12324 = vmatprep.subr.bf16.mxu0 %v14229_v0  ;;  %v5588_v39 = vor.u32 %v5586_v28, %v5584_v33  ;;  %v5598_v47 = vshll.u32 %v14234_v34, 16  ;;  %v5585_v50 = vsel %vm398_vm0, %v5580_v35, %v5584_v33  ;;  %v5602_v55 = vshrl.u32 %v14234_v34, 16  ;;  %v14846_v28 = vld [vmem:[%s14704_s11 + $0x88] sm:$0xff]  }
  0x3a   : > { %12900 = vmatprep.subr.bf16.mxu1 %v14230_v9  ;;  %v490_v51 = vsel %vm398_vm0, %v485_v36, %v489_v37  ;;  %v493_v58 = vor.u32 %v491_v43, %v489_v37  ;;  %v5596_v62 = vor.u32 %v5594_v46, %v5592_v40  ;;  %v527_v32 = vshll.u32 %v14840_v20, 16  ;;  %v14254_v37 = vld [vmem:[%s16541_s1 + $0x30] sm:$0xff]  }
  0x3b   : > { %v5593_v54 = vsel %vm398_vm0, %v5588_v39, %v5592_v40  ;;  %v5600_v59 = vrot.slane %v5598_v47, 1  ;;  %v523_v34 = vshrl.u32 %v14822_v61, 16  ;;  %v5630_v36 = vshll.u32 %v14843_v24, 16  ;;  %v14256_v46 = vld [vmem:[%s16541_s1 + $0x30] sm:$0xff]  }
  0x3c   : > { %12325 = vmatpush3.bf16.msra.mxu0 %v14229_v0  ;;  %v505_v0 = vrot.slane %v503_v52, 1  ;;  %v531_v40 = vshrl.u32 %v14840_v20, 16  ;;  %v5634_v43 = vshrl.u32 %v14843_v24, 16  ;;  %v529_v47 = vrot.slane %v527_v32, 1 }
  0x3d   : > { %12901 = vmatpush3.bf16.msra.mxu1 %v14230_v9  ;;  %12326 = vmatprep.subr.bf16.mxu0 %v14238_v42  ;;  %v5604_v2 = vor.u32 %v5602_v55, %v5600_v59  ;;  %v5610_v9 = vshrl.u32 %v14804_v41, 16  ;;  %v5601_v11 = vsel %vm398_vm0, %v5596_v62, %v5600_v59  ;;  %v539_v59 = vshrl.u32 %v14846_v28, 16 }
  0x3e   : > { %12279 = vmatmul.mubr.bf16.gmra.mrb[8].mxu0 %v450_v56  ;;  %v5606_v56 = vshll.u32 %v14804_v41, 16  ;;  %12902 = vmatprep.subr.bf16.mxu1 %v14240_v49  ;;  %v509_v21 = vor.u32 %v507_v8, %v505_v0  ;;  %v535_v41 = vshll.u32 %v14846_v28, 16  ;;  %v533_v52 = vor.u32 %v531_v40, %v529_v47 }
  0x3f   : > { %12855 = vmatmul.mubr.bf16.gmra.mrb[8].mxu1 %v5553_v57  ;;  %12282 = vmatprep.mubr.bf16.mxu0 %v458_v60  ;;  %v497_v57 = vrot.slane %v495_v44, 1  ;;  %v14819_v60 = vld [vmem:[%s14704_s11 + $0x150] sm:$0xff]   ;;  %v5638_v44 = vshll.u32 %v14849_v31, 16  ;;  %v5642_v62 = vshrl.u32 %v14849_v31, 16 }
  0x40   : > { %12858 = vmatprep.mubr.bf16.mxu1 %v5561_v1  ;;  %12327 = vmatpush3.bf16.msra.mxu0 %v14238_v42  ;;  %v14242_v1 = vld [vmem:[%s14704_s11 + $0x158] sm:$0xff]   ;;  %v5608_v3 = vrot.slane %v5606_v56, 1  ;;  %v5614_v10 = vshll.u32 %v14819_v60, 16  ;;  %v5618_v17 = vshrl.u32 %v14819_v60, 16  ;;  %v537_v53 = vrot.slane %v535_v41, 1 }
  0x41   : > { %12903 = vmatpush3.bf16.msra.mxu1 %v14240_v49  ;;  %v501_v63 = vor.u32 %v499_v48, %v497_v57  ;;  %v498_v7 = vsel %vm398_vm0, %v493_v58, %v497_v57  ;;  %12328 = vmatprep.subr.bf16.mxu0 %v14245_v5  ;;  %v5626_v35 = vshrl.u32 %v14242_v1, 16  ;;  %v5632_v49 = vrot.slane %v5630_v36, 1  ;;  %v14879_v58 = vld [vmem:[%s14704_s11 + $0x178] sm:$0xff]  }
  0x42   : > { %12904 = vmatprep.subr.bf16.mxu1 %v14246_v6  ;;  %v5609_v16 = vsel %vm398_vm0, %v5604_v2, %v5608_v3  ;;  %v5612_v25 = vor.u32 %v5610_v9, %v5608_v3  ;;  %v5640_v56 = vrot.slane %v5638_v44, 1  ;;  %v538_v3 = vsel %vm398_vm0, %v533_v52, %v537_v53 }
  0x43   : > { %v506_v12 = vsel %vm398_vm0, %v501_v63, %v505_v0  ;;  %v5636_v55 = vor.u32 %v5634_v43, %v5632_v49  ;;  %v5654_v9 = vshll.u32 %v14879_v58, 16 }
  0x44   : > { %12329 = vmatpush3.bf16.msra.mxu0 %v14245_v5  ;;  %v14262_v5 = vld [vmem:[%s16541_s1 + $0x38] sm:$0xff]  }
  0x45   : > { %12905 = vmatpush3.bf16.msra.mxu1 %v14246_v6  ;;  %12330 = vmatprep.subr.bf16.mxu0 %v14254_v37  ;;  %v5641_v6 = vsel %vm398_vm0, %v5636_v55, %v5640_v56  ;;  %v14944_v55 = vld [vmem:[%s14704_s11 + $0x198] sm:$0xff]  }
  0x46   : > { %12283 = vmatmul.mubr.bf16.gmra.mrb[12].mxu0 %v466_v18  ;;  %v5622_v18 = vshll.u32 %v14242_v1, 16  ;;  %12906 = vmatprep.subr.bf16.mxu1 %v14256_v46  ;;  %v14261_v1 = vld [vmem:[%s16541_s1 + $0x38] sm:$0xff]  }
  0x47   : > { %12859 = vmatmul.mubr.bf16.gmra.mrb[12].mxu1 %v5569_v19  ;;  %12286 = vmatprep.mubr.bf16.mxu0 %v474_v22  ;;  %v513_v19 = vrot.slane %v511_v4, 1  ;;  %v5616_v22 = vrot.slane %v5614_v10, 1  ;;  %v14899_v10 = vld [vmem:[%s14704_s11 + $0xa0] sm:$0xff]  }
  0x48   : > { %12862 = vmatprep.mubr.bf16.mxu1 %v5577_v27  ;;  %v521_v27 = vrot.slane %v519_v15, 1  ;;  %v5624_v30 = vrot.slane %v5622_v18, 1  ;;  %12331 = vmatpush3.bf16.msra.mxu0 %v14254_v37  ;;  %v5644_v15 = vor.u32 %v5642_v62, %v5640_v56  ;;  %v14905_v18 = vld [vmem:[%s14704_s11 + $0xa8] sm:$0xff]   ;;  %v14928_v37 = vld [vmem:[%s16541_s1 + $0x80] sm:$0xff]  }
  0x49   : > { %v517_v26 = vor.u32 %v515_v13, %v513_v19  ;;  %v5620_v29 = vor.u32 %v5618_v17, %v5616_v22  ;;  %v514_v33 = vsel %vm398_vm0, %v509_v21, %v513_v19  ;;  %v5617_v38 = vsel %vm398_vm0, %v5612_v25, %v5616_v22  ;;  %12907 = vmatpush3.bf16.msra.mxu1 %v14256_v46  ;;  %v14902_v13 = vld [vmem:[%s14704_s11 + $0x180] sm:$0xff]   ;;  %v14908_v22 = vld [vmem:[%s14704_s11 + $0x188] sm:$0xff]   ;;  %v14938_v46 = vld [vmem:[%s14704_s11 + $0x190] sm:$0xff]  }
  0x4a   : > { %v525_v48 = vor.u32 %v523_v34, %v521_v27  ;;  %12332 = vmatprep.subr.bf16.mxu0 %v14261_v1  ;;  %12908 = vmatprep.subr.bf16.mxu1 %v14262_v5  ;;  %v5656_v21 = vrot.slane %v5654_v9, 1  ;;  %v5662_v32 = vshll.u32 %v14902_v13, 16  ;;  %v567_v36 = vshll.u32 %v14905_v18, 16 }
  0x4b   : > { %v522_v39 = vsel %vm398_vm0, %v517_v26, %v521_v27  ;;  %v5625_v42 = vsel %vm398_vm0, %v5620_v29, %v5624_v30  ;;  %v559_v26 = vshll.u32 %v14899_v10, 16  ;;  %v5658_v27 = vshrl.u32 %v14879_v58, 16  ;;  %v14916_v29 = vld [vmem:[%s16541_s1 + $0x80] sm:$0xff]  }
  0x4c   : > { %v530_v61 = vsel %vm398_vm0, %v525_v48, %v529_v47  ;;  %12333 = vmatpush3.bf16.msra.mxu0 %v14261_v1  ;;  %v5670_v40 = vshll.u32 %v14908_v22, 16  ;;  %v5664_v44 = vrot.slane %v5662_v32, 1  ;;  %v571_v56 = vshrl.u32 %v14905_v18, 16 }
  0x4d   : > { %12909 = vmatpush3.bf16.msra.mxu1 %v14262_v5  ;;  %12382 = vmatprep.subr.bf16.mxu0 %v14916_v29  ;;  %v561_v41 = vrot.slane %v559_v26, 1  ;;  %v5660_v47 = vor.u32 %v5658_v27, %v5656_v21  ;;  %v5678_v62 = vshll.u32 %v14938_v46, 16  ;;  %v5686_v5 = vshll.u32 %v14944_v55, 16 }
  0x4e   : > { %12287 = vmatmul.mubr.bf16.gmra.mrb[16].mxu0 %v482_v45  ;;  %v14866_v45 = vld [vmem:[%s14704_s11 + $0x90] sm:$0xff]   ;;  %12958 = vmatprep.subr.bf16.mxu1 %v14928_v37  ;;  %v5690_v32 = vshrl.u32 %v14944_v55, 16 }
  0x4f   : > { %12863 = vmatmul.mubr.bf16.gmra.mrb[16].mxu1 %v5585_v50  ;;  %12290 = vmatprep.mubr.bf16.mxu0 %v490_v51  ;;  %v14872_v50 = vld [vmem:[%s14704_s11 + $0x170] sm:$0xff]   ;;  %v5628_v51 = vor.u32 %v5626_v35, %v5624_v30  ;;  %v543_v57 = vshll.u32 %v14866_v45, 16  ;;  %v547_v0 = vshrl.u32 %v14866_v45, 16 }
  0x50   : > { %12866 = vmatprep.mubr.bf16.mxu1 %v5593_v54  ;;  %v14875_v54 = vld [vmem:[%s14704_s11 + $0x98] sm:$0xff]   ;;  %v5646_v63 = vshll.u32 %v14872_v50, 16  ;;  %v5650_v8 = vshrl.u32 %v14872_v50, 16 }
  0x51   : > { %v5633_v2 = vsel %vm398_vm0, %v5628_v51, %v5632_v49  ;;  %v551_v4 = vshll.u32 %v14875_v54, 16  ;;  %v555_v25 = vshrl.u32 %v14875_v54, 16  ;;  %v569_v49 = vrot.slane %v567_v36, 1  ;;  %v14941_v51 = vld [vmem:[%s14704_s11 + $0xb8] sm:$0xff]  }
  0x53   : > { %v553_v17 = vrot.slane %v551_v4, 1  ;;  %v5682_v4 = vshrl.u32 %v14938_v46, 16  ;;  %v573_v9 = vor.u32 %v571_v56, %v569_v49  ;;  %v15011_v56 = vld [vmem:[%s14704_s11 + $0xf8] sm:$0xff]  }
  0x55   : > { %v557_v43 = vor.u32 %v555_v25, %v553_v17  ;;  %v587_v25 = vshrl.u32 %v14941_v51, 16 }
  0x56   : > { %12291 = vmatmul.mubr.bf16.gmra.mrb[20].mxu0 %v498_v7  ;;  %v545_v7 = vrot.slane %v543_v57, 1 }
  0x57   : > { %12867 = vmatmul.mubr.bf16.gmra.mrb[20].mxu1 %v5601_v11  ;;  %12294 = vmatprep.mubr.bf16.mxu0 %v506_v12  ;;  %v541_v11 = vor.u32 %v539_v59, %v537_v53  ;;  %v5648_v12 = vrot.slane %v5646_v63, 1  ;;  %v5672_v53 = vrot.slane %v5670_v40, 1  ;;  %v562_v59 = vsel %vm398_vm0, %v557_v43, %v561_v41  ;;  %v14269_v43 = vld [vmem:[%s16541_s1 + $0x88] sm:$0xff]  }
  0x58   : > { %12870 = vmatprep.mubr.bf16.mxu1 %v5609_v16  ;;  %v549_v16 = vor.u32 %v547_v0, %v545_v7  ;;  %v5665_v63 = vsel %vm398_vm0, %v5660_v47, %v5664_v44  ;;  %v14977_v47 = vld [vmem:[%s14704_s11 + $0x8] sm:$0xff]  }
  0x59   : > { %v5652_v19 = vor.u32 %v5650_v8, %v5648_v12  ;;  %v546_v30 = vsel %vm398_vm0, %v541_v11, %v545_v7  ;;  %v5649_v34 = vsel %vm398_vm0, %v5644_v15, %v5648_v12  ;;  %v14266_v8 = vld [vmem:[%s14704_s11 + $0x1a0] ss:$0 sps:$4 sm:$0x11]   ;;  %v5680_v11 = vrot.slane %v5678_v62, 1 }
  0x5a   : > { %v554_v35 = vsel %vm398_vm0, %v549_v16, %v553_v17  ;;  %v14276_v62 = vld [vmem:[%s16541_s1 + $0xa0] sm:$0xff]  }
  0x5b   : > { %v5684_v17 = vor.u32 %v5682_v4, %v5680_v11  ;;  %v14279_v4 = vld [vmem:[%s16541_s1 + $0xb0] sm:$0xff]  }
  0x5e   : > { %12295 = vmatmul.mubr.bf16.gmra.mrb[24].mxu0 %v514_v33  ;;  %v563_v33 = vshrl.u32 %v14899_v10, 16 }
  0x5f   : > { %12871 = vmatmul.mubr.bf16.gmra.mrb[24].mxu1 %v5617_v38  ;;  %12298 = vmatprep.mubr.bf16.mxu0 %v522_v39  ;;  %v5657_v38 = vsel %vm398_vm0, %v5652_v19, %v5656_v21  ;;  %v5666_v39 = vshrl.u32 %v14902_v13, 16  ;;  %v5688_v19 = vrot.slane %v5686_v5, 1  ;;  %v15050_v5 = vld [vmem:[%s14704_s11 + $0x110] sm:$0xff]  }
  0x60   : > { %12874 = vmatprep.mubr.bf16.mxu1 %v5625_v42  ;;  %v14934_v42 = vld [vmem:[%s14704_s11 + $0xb0] sm:$0xff]   ;;  %v565_v48 = vor.u32 %v563_v33, %v561_v41  ;;  %v5694_v33 = vshll.u32 %v14266_v8, 16  ;;  %v14282_v8 = vld [vmem:[%s16541_s1 + $0xb8] sm:$0xff]  }
  0x61   : > { %v5668_v52 = vor.u32 %v5666_v39, %v5664_v44  ;;  %v575_v57 = vshll.u32 %v14934_v42, 16  ;;  %v579_v1 = vshrl.u32 %v14934_v42, 16  ;;  %v14270_v44 = vld [vmem:[%s16541_s1 + $0x88] sm:$0xff]  }
  0x62   : > { %v570_v0 = vsel %vm398_vm0, %v565_v48, %v569_v49  ;;  %v5696_v39 = vrot.slane %v5694_v33, 1  ;;  %v14981_v48 = vld [vmem:[%s14704_s11 + $0xe8] sm:$0xff]   ;;  %v14272_v49 = vld [vmem:[%s16541_s1 + $0x90] sm:$0xff]   ;;  %v15119_v33 = vld [vmem:[%s14704_s11 + $0x140] sm:$0xff]  }
  0x63   : > { %v577_v7 = vrot.slane %v575_v57, 1  ;;  %v15015_v57 = vld [vmem:[%s14704_s11 + $0x20] sm:$0xff]  }
  0x65   : > { %v581_v15 = vor.u32 %v579_v1, %v577_v7  ;;  %v578_v21 = vsel %vm398_vm0, %v573_v9, %v577_v7  ;;  %v14278_v1 = vld [vmem:[%s16541_s1 + $0xa8] sm:$0xff]   ;;  %v14281_v7 = vld [vmem:[%s16541_s1 + $0xb8] sm:$0xff]  }
  0x66   : > { %12299 = vmatmul.mubr.bf16.gmra.mrb[28].mxu0 %v530_v61  ;;  %v5674_v61 = vshrl.u32 %v14908_v22, 16  ;;  %v15063_v9 = vld [vmem:[%s14704_s11 + $0x38] sm:$0xff]  }
  0x67   : > { %12875 = vmatmul.mubr.bf16.gmra.mrb[28].mxu1 %v5633_v2  ;;  %12302 = vmatprep.mubr.bf16.mxu0 %v538_v3  ;;  %v583_v2 = vshll.u32 %v14941_v51, 16  ;;  %v5673_v3 = vsel %vm398_vm0, %v5668_v52, %v5672_v53  ;;  %v14997_v52 = vld [vmem:[%s14704_s11 + $0xf0] sm:$0xff]  }
  0x68   : > { %12878 = vmatprep.mubr.bf16.mxu1 %v5641_v6  ;;  %v14265_v6 = vld [vmem:[%s14704_s11 + $0xc0] ss:$0 sps:$4 sm:$0x11]   ;;  %v5676_v12 = vor.u32 %v5674_v61, %v5672_v53  ;;  %v15007_v53 = vld [vmem:[%s14704_s11 + $0x18] sm:$0xff]  }
  0x69   : > { %v585_v16 = vrot.slane %v583_v2, 1  ;;  %v591_v26 = vshll.u32 %v14265_v6, 16  ;;  %v15022_v61 = vld [vmem:[%s14704_s11 + $0x100] sm:$0xff]   ;;  %v15039_v2 = vld [vmem:[%s14704_s11 + $0x108] sm:$0xff]   ;;  %v14280_v6 = vld [vmem:[%s16541_s1 + $0xb0] sm:$0xff]  }
  0x6a   : > { %v5681_v27 = vsel %vm398_vm0, %v5676_v12, %v5680_v11  ;;  %v15067_v11 = vld [vmem:[%s14704_s11 + $0x118] sm:$0xff]   ;;  %v15071_v12 = vld [vmem:[%s14704_s11 + $0x40] sm:$0xff]  }
  0x6b   : > { %v593_v36 = vrot.slane %v591_v26, 1  ;;  %v15103_v26 = vld [vmem:[%s14704_s11 + $0x130] sm:$0xff]  }
  0x6e   : > { %12303 = vmatmul.mubr.bf16.gmra.mrb[32].mxu0 %v546_v30  ;;  %v586_v30 = vsel %vm398_vm0, %v581_v15, %v585_v16  ;;  %v15077_v15 = vld [vmem:[%s16541_s1 + $0xc0] sm:$0xff]  }
  0x6f   : > { %12879 = vmatmul.mubr.bf16.gmra.mrb[32].mxu1 %v5649_v34  ;;  %12306 = vmatprep.mubr.bf16.mxu0 %v554_v35  ;;  %v5689_v34 = vsel %vm398_vm0, %v5684_v17, %v5688_v19  ;;  %v589_v35 = vor.u32 %v587_v25, %v585_v16  ;;  %v15080_v16 = vld [vmem:[%s14704_s11 + $0x120] sm:$0xff]   ;;  %v15099_v25 = vld [vmem:[%s14704_s11 + $0x50] sm:$0xff]  }
  0x70   : > { %12882 = vmatprep.mubr.bf16.mxu1 %v5657_v38  ;;  %v5692_v38 = vor.u32 %v5690_v32, %v5688_v19  ;;  %v15086_v17 = vld [vmem:[%s16541_s1 + $0xc0] sm:$0xff]   ;;  %v15090_v19 = vld [vmem:[%s14704_s11 + $0x48] sm:$0xff]  }
  0x71   : > { %v594_v40 = vsel %vm398_vm0, %v589_v35, %v593_v36  ;;  %v15115_v32 = vld [vmem:[%s14704_s11 + $0x60] sm:$0xff]   ;;  %v15127_v35 = vld [vmem:[%s14704_s11 + $0x148] sm:$0xff]   ;;  %v15131_v36 = vld [vmem:[%s14704_s11 + $0x70] sm:$0xff]  }
  0x72   : > { %v5697_v41 = vsel %vm398_vm0, %v5692_v38, %v5696_v39  ;;  %v15136_v38 = vld [vmem:[%s14704_s11 + $0x78] sm:$0xff]  }
  0x73   : > { %v15140_v39 = vld [vmem:[%s14704_s11 + $0x158] sm:$0xff]  }
  0x76   : > { %12307 = vmatmul.mubr.bf16.gmra.mrb[36].mxu0 %v562_v59  ;;  %v14275_v59 = vld [vmem:[%s16541_s1 + $0xa0] sm:$0xff]  }
  0x77   : > { %12883 = vmatmul.mubr.bf16.gmra.mrb[36].mxu1 %v5665_v63  ;;  %12310 = vmatprep.mubr.bf16.mxu0 %v570_v0  ;;  %v14277_v63 = vld [vmem:[%s16541_s1 + $0xa8] sm:$0xff]  }
  0x78   : > { %12886 = vmatprep.mubr.bf16.mxu1 %v5673_v3  ;;  %v15032_v0 = vld [vmem:[%s14704_s11 + $0x28] sm:$0xff]   ;;  %v15043_v3 = vld [vmem:[%s14704_s11 + $0x30] sm:$0xff]  }
  0x7e   : > { %12311 = vmatmul.mubr.bf16.gmra.mrb[40].mxu0 %v578_v21  ;;  %v15095_v21 = vld [vmem:[%s14704_s11 + $0x128] sm:$0xff]  }
  0x7f   : > { %12887 = vmatmul.mubr.bf16.gmra.mrb[40].mxu1 %v5681_v27  ;;  %12314 = vmatprep.mubr.bf16.mxu0 %v586_v30  ;;  %v15107_v27 = vld [vmem:[%s14704_s11 + $0x58] sm:$0xff]  }
  0x80   : > { %12890 = vmatprep.mubr.bf16.mxu1 %v5689_v34  ;;  %v15111_v30 = vld [vmem:[%s14704_s11 + $0x138] sm:$0xff]   ;;  %v15123_v34 = vld [vmem:[%s14704_s11 + $0x68] sm:$0xff]  }
  0x86   : > { %12315 = vmatmul.mubr.bf16.gmra.mrb[44].mxu0 %v594_v40  ;;  %v14610_v40 = vld [vmem:[%s14704_s11 + $0x4] sm:$0xf] }
  0x87   : > { %12891 = vmatmul.mubr.bf16.gmra.mrb[44].mxu1 %v5697_v41  ;;  %12334 = vmatprep.mubr.bf16.mxu0 %v14714_v14  ;;  %v14271_v14 = vld [vmem:[%s16541_s1 + $0x90] sm:$0xff]   ;;  %v14611_v41 = vld [vmem:[%s14704_s11 + $0xe4] sm:$0xf] }
  0x88   : > { %12910 = vmatprep.mubr.bf16.mxu1 %v14725_v23  ;;  %v14990_v23 = vld [vmem:[%s14704_s11 + $0x10] sm:$0xff]  }
  0x8e   : > { %12335 = vmatmul.mubr.bf16.vlgmr.msra.gmra.mrb[0].mxu0 %v14977_v47 }
  0x8f   : > { %12911 = vmatmul.mubr.bf16.vlgmr.msra.gmra.mrb[0].mxu1 %v14981_v48  ;;  %12383 = vmatpush3.bf16.msra.mxu0 %v14916_v29  ;;  %v14273_v29 = vld [vmem:[%s16541_s1 + $0x98] sm:$0xff]  }
  0x90   : > { %12959 = vmatpush3.bf16.msra.mxu1 %v14928_v37  ;;  %12338 = vmatprep.mubr.bf16.mxu0 %v14990_v23  ;;  %v14274_v37 = vld [vmem:[%s16541_s1 + $0x98] sm:$0xff]  }
  0x91   : > { %12914 = vmatprep.mubr.bf16.mxu1 %v14997_v52  ;;  %12384 = vmatprep.subr.bf16.mxu0 %v14269_v43 }
  0x92   : > { %12960 = vmatprep.subr.bf16.mxu1 %v14270_v44 }
  0x93   : > { %12385 = vmatpush3.bf16.msra.mxu0 %v14269_v43  ;;  %v14287_v43 = vld [vmem:[%s16541_s1 + $0xc8] sm:$0xff]  }
  0x94   : > { %12961 = vmatpush3.bf16.msra.mxu1 %v14270_v44  ;;  %12386 = vmatprep.subr.bf16.mxu0 %v14271_v14  ;;  %v14288_v44 = vld [vmem:[%s16541_s1 + $0xc8] sm:$0xff]  }
  0x95   : > { %12962 = vmatprep.subr.bf16.mxu1 %v14272_v49 }
  0x96   : > { %12339 = vmatmul.mubr.bf16.gmra.mrb[4].mxu0 %v15007_v53 }
  0x97   : > { %12915 = vmatmul.mubr.bf16.gmra.mrb[4].mxu1 %v15011_v56  ;;  %12342 = vmatprep.mubr.bf16.mxu0 %v15015_v57 }
  0x98   : > { %12918 = vmatprep.mubr.bf16.mxu1 %v15022_v61  ;;  %12387 = vmatpush3.bf16.msra.mxu0 %v14271_v14  ;;  %v6319_v14 = vrot.slane %v15022_v61, 1  ;;  %v14292_v61 = vld [vmem:[%s16541_s1 + $0xd8] sm:$0xff]  }
  0x99   : > { %12963 = vmatpush3.bf16.msra.mxu1 %v14272_v49  ;;  %12388 = vmatprep.subr.bf16.mxu0 %v14273_v29  ;;  %v6321_v49 = vrot.slane %v15039_v2, 1 }
  0x9a   : > { %12964 = vmatprep.subr.bf16.mxu1 %v14274_v37 }
  0x9c   : > { %12389 = vmatpush3.bf16.msra.mxu0 %v14273_v29  ;;  %v14290_v29 = vld [vmem:[%s16541_s1 + $0xd0] sm:$0xff]  }
  0x9d   : > { %12965 = vmatpush3.bf16.msra.mxu1 %v14274_v37  ;;  %12390 = vmatprep.subr.bf16.mxu0 %v14275_v59 }
  0x9e   : > { %12343 = vmatmul.mubr.bf16.gmra.mrb[8].mxu0 %v15032_v0  ;;  %12966 = vmatprep.subr.bf16.mxu1 %v14276_v62 }
  0x9f   : > { %12919 = vmatmul.mubr.bf16.gmra.mrb[8].mxu1 %v15039_v2  ;;  %12346 = vmatprep.mubr.bf16.mxu0 %v15043_v3  ;;  %v6325_v2 = vrot.slane %v15067_v11, 1 }
  0xa0   : > { %12922 = vmatprep.mubr.bf16.mxu1 %v15050_v5  ;;  %12391 = vmatpush3.bf16.msra.mxu0 %v14275_v59  ;;  %v6322_v59 = vsel %vm1209_vm1, %v6319_v14, %v6321_v49 }
  0xa1   : > { %12967 = vmatpush3.bf16.msra.mxu1 %v14276_v62  ;;  %12392 = vmatprep.subr.bf16.mxu0 %v14277_v63  ;;  %v1221_v62 = vrot.slane %v15043_v3, 1 }
  0xa2   : > { %12968 = vmatprep.subr.bf16.mxu1 %v14278_v1 }
  0xa4   : > { %12393 = vmatpush3.bf16.msra.mxu0 %v14277_v63  ;;  %v6323_v63 = vrot.slane %v15050_v5, 1 }
  0xa5   : > { %12969 = vmatpush3.bf16.msra.mxu1 %v14278_v1  ;;  %12394 = vmatprep.subr.bf16.mxu0 %v14279_v4  ;;  %v14293_v1 = vld [vmem:[%s16541_s1 + $0xe0] sm:$0xff]  }
  0xa6   : > { %12347 = vmatmul.mubr.bf16.gmra.mrb[12].mxu0 %v15063_v9  ;;  %12970 = vmatprep.subr.bf16.mxu1 %v14280_v6  ;;  %v6324_v5 = vsel %vm1209_vm1, %v6321_v49, %v6323_v63  ;;  %v14614_v49 = vld [vmem:[%s14704_s11 + $0x160] sm:$0xff]  }
  0xa7   : > { %12923 = vmatmul.mubr.bf16.gmra.mrb[12].mxu1 %v15067_v11  ;;  %12350 = vmatprep.mubr.bf16.mxu0 %v15071_v12  ;;  %v1225_v11 = vrot.slane %v15071_v12, 1 }
  0xa8   : > { %12926 = vmatprep.mubr.bf16.mxu1 %v15080_v16  ;;  %12395 = vmatpush3.bf16.msra.mxu0 %v14279_v4  ;;  %v14294_v4 = vld [vmem:[%s16541_s1 + $0xe0] sm:$0xff]  }
  0xa9   : > { %12971 = vmatpush3.bf16.msra.mxu1 %v14280_v6  ;;  %12396 = vmatprep.subr.bf16.mxu0 %v14281_v7 }
  0xaa   : > { %12972 = vmatprep.subr.bf16.mxu1 %v14282_v8 }
  0xac   : > { %12397 = vmatpush3.bf16.msra.mxu0 %v14281_v7  ;;  %v6326_v7 = vsel %vm1209_vm1, %v6323_v63, %v6325_v2  ;;  %v14618_v63 = vld [vmem:[%s14704_s11 + $0x170] sm:$0xff]  }
  0xad   : > { %12973 = vmatpush3.bf16.msra.mxu1 %v14282_v8  ;;  %12446 = vmatprep.subr.bf16.mxu0 %v15077_v15  ;;  %v14295_v8 = vld [vmem:[%s16541_s1 + $0xe8] sm:$0xff]  }
  0xae   : > { %12351 = vmatmul.mubr.bf16.gmra.mrb[16].mxu0 %v15090_v19  ;;  %13022 = vmatprep.subr.bf16.mxu1 %v15086_v17 }
  0xaf   : > { %12927 = vmatmul.mubr.bf16.gmra.mrb[16].mxu1 %v15095_v21  ;;  %12354 = vmatprep.mubr.bf16.mxu0 %v15099_v25 }
  0xb0   : > { %12930 = vmatprep.mubr.bf16.mxu1 %v15103_v26 }
  0xb6   : > { %12355 = vmatmul.mubr.bf16.gmra.mrb[20].mxu0 %v15107_v27 }
  0xb7   : > { %12931 = vmatmul.mubr.bf16.gmra.mrb[20].mxu1 %v15111_v30  ;;  %12358 = vmatprep.mubr.bf16.mxu0 %v15115_v32 }
  0xb8   : > { %12934 = vmatprep.mubr.bf16.mxu1 %v15119_v33 }
  0xbe   : > { %12359 = vmatmul.mubr.bf16.gmra.mrb[24].mxu0 %v15123_v34 }
  0xbf   : > { %12935 = vmatmul.mubr.bf16.gmra.mrb[24].mxu1 %v15127_v35  ;;  %12362 = vmatprep.mubr.bf16.mxu0 %v15131_v36 }
  0xc0   : > { %12938 = vmatprep.mubr.bf16.mxu1 %v14819_v60  ;;  %v1189_v60 = vld [vmem:[%s14704_s11] sm:$0xe] }
  0xc6   : > { %12363 = vmatmul.mubr.bf16.gmra.mrb[28].mxu0 %v15136_v38 }
  0xc7   : > { %12939 = vmatmul.mubr.bf16.gmra.mrb[28].mxu1 %v15140_v39  ;;  %12366 = vmatprep.mubr.bf16.mxu0 %v14840_v20  ;;  %v10840_v20 = vld [vmem:[%s14704_s11 + $0xe0] sm:$0xe] }
  0xc8   : > { %12942 = vmatprep.mubr.bf16.mxu1 %v14843_v24  ;;  %v10545_v24 = vcombine.low %v1189_v60, %v14610_v40  ;;  %v14297_v60 = vld [vmem:[%s16541_s1 + $0xf0] sm:$0xff]  }
  0xc9   : > { %v14298_v40 = vld [vmem:[%s16541_s1 + $0xf0] sm:$0xff]  }
  0xce   : > { %12367 = vmatmul.mubr.bf16.gmra.mrb[32].mxu0 %v14846_v28  ;;  %v10841_v28 = vcombine.low %v10840_v20, %v14611_v41  ;;  %v6329_v20 = vrot.slane %v15095_v21, 1  ;;  %v14300_v41 = vld [vmem:[%s16541_s1 + $0xf8] sm:$0xff]  }
  0xcf   : > { %12943 = vmatmul.mubr.bf16.gmra.mrb[32].mxu1 %v14849_v31  ;;  %12370 = vmatprep.mubr.bf16.mxu0 %v14866_v45  ;;  %v1211_v31 = vrot.slane %v14977_v47, 1  ;;  %v6313_v45 = vrot.slane %v14981_v48, 1  ;;  %v1217_v48 = vrot.slane %v15015_v57, 1 }
  0xd0   : > { %12946 = vmatprep.mubr.bf16.mxu1 %v14872_v50  ;;  %v1210_v50 = vrot.slane %v10545_v24, 1 }
  0xd6   : > { %12371 = vmatmul.mubr.bf16.gmra.mrb[36].mxu0 %v14875_v54  ;;  %v6312_v54 = vrot.slane %v10841_v28, 1  ;;  %v1229_v28 = vrot.slane %v15099_v25, 1 }
  0xd7   : > { %12947 = vmatmul.mubr.bf16.gmra.mrb[36].mxu1 %v14879_v58  ;;  %12374 = vmatprep.mubr.bf16.mxu0 %v14899_v10  ;;  %v1212_v58 = vsel %vm1209_vm1, %v1210_v50, %v1211_v31  ;;  %v6333_v50 = vrot.slane %v15111_v30, 1 }
  0xd8   : > { %12950 = vmatprep.mubr.bf16.mxu1 %v14902_v13  ;;  %v6314_v10 = vsel %vm1209_vm1, %v6312_v54, %v6313_v45  ;;  %v1213_v13 = vrot.slane %v14990_v23, 1  ;;  %v1219_v23 = vrot.slane %v15032_v0, 1  ;;  %v1223_v0 = vrot.slane %v15063_v9, 1  ;;  %v14296_v9 = vld [vmem:[%s16541_s1 + $0xe8] sm:$0xff]   ;;  %v15250_v54 = vld [vmem:[%s16541_s1 + $0x100] sm:$0xff]  }
  0xda   : > { %v1220_v57 = vsel %vm1209_vm1, %v1217_v48, %v1219_v23  ;;  %v1222_v3 = vsel %vm1209_vm1, %v1219_v23, %v1221_v62  ;;  %v1224_v6 = vsel %vm1209_vm1, %v1221_v62, %v1223_v0  ;;  %v1226_v12 = vsel %vm1209_vm1, %v1223_v0, %v1225_v11 }
  0xdb   : > { %v6347_v0 = vrot.slane %v14618_v63, 1  ;;  %v14319_v63 = vld [vmem:[%s14704_s11 + $0x44] sm:$0xff]  }
  0xde   : > { %12375 = vmatmul.mubr.bf16.gmra.mrb[40].mxu0 %v14905_v18  ;;  %v6315_v18 = vrot.slane %v14997_v52, 1  ;;  %v14289_v52 = vld [vmem:[%s16541_s1 + $0xd0] sm:$0xff]  }
  0xdf   : > { %12951 = vmatmul.mubr.bf16.gmra.mrb[40].mxu1 %v14908_v22  ;;  %12378 = vmatprep.mubr.bf16.mxu0 %v14934_v42  ;;  %v1215_v22 = vrot.slane %v15007_v53, 1  ;;  %v6317_v42 = vrot.slane %v15011_v56, 1  ;;  %v14291_v53 = vld [vmem:[%s16541_s1 + $0xd8] sm:$0xff]  }
  0xe0   : > { %12954 = vmatprep.mubr.bf16.mxu1 %v14938_v46  ;;  %v1214_v46 = vsel %vm1209_vm1, %v1211_v31, %v1213_v13  ;;  %v6331_v31 = vrot.slane %v15103_v26, 1 }
  0xe1   : > { %v6318_v47 = vsel %vm1209_vm1, %v6315_v18, %v6317_v42  ;;  %v1218_v37 = vsel %vm1209_vm1, %v1215_v22, %v1217_v48  ;;  %v6320_v56 = vsel %vm1209_vm1, %v6317_v42, %v6319_v14 }
  0xe2   : > { %v6332_v26 = vsel %vm1209_vm1, %v6329_v20, %v6331_v31  ;;  %v6334_v30 = vsel %vm1209_vm1, %v6331_v31, %v6333_v50  ;;  %v14626_v31 = vld [vmem:[%s14704_s11 + $0x190] sm:$0xff]  }
  0xe6   : > { %12379 = vmatmul.mubr.bf16.gmra.mrb[44].mxu0 %v14941_v51  ;;  %v6316_v51 = vsel %vm1209_vm1, %v6313_v45, %v6315_v18  ;;  %v1231_v45 = vrot.slane %v15107_v27, 1  ;;  %v1235_v18 = vrot.slane %v15123_v34, 1  ;;  %v1239_v34 = vrot.slane %v15136_v38, 1 }
  0xe7   : > { %12955 = vmatmul.mubr.bf16.gmra.mrb[44].mxu1 %v14944_v55  ;;  %12398 = vmatprep.mubr.bf16.mxu0 %v1212_v58  ;;  %v1216_v55 = vsel %vm1209_vm1, %v1213_v13, %v1215_v22  ;;  %v15255_v58 = vld [vmem:[%s16541_s1 + $0x100] sm:$0xff]   ;;  %v6335_v13 = vrot.slane %v15119_v33, 1  ;;  %v6337_v22 = vrot.slane %v15127_v35, 1  ;;  %v14612_v33 = vld [vmem:[%s14704_s11 + $0x150] sm:$0xff]   ;;  %v6341_v35 = vrot.slane %v15140_v39, 1 }
  0xe8   : > { %12974 = vmatprep.mubr.bf16.mxu1 %v6314_v10  ;;  %v1232_v27 = vsel %vm1209_vm1, %v1229_v28, %v1231_v45  ;;  %v1233_v10 = vrot.slane %v15115_v32, 1  ;;  %v1237_v32 = vrot.slane %v15131_v36, 1  ;;  %v14613_v36 = vld [vmem:[%s14704_s11 + $0x80] sm:$0xff]   ;;  %v6343_v38 = vrot.slane %v14614_v49, 1 }
  0xe9   : > { %v1241_v23 = vrot.slane %v14613_v36, 1  ;;  %v14320_v36 = vld [vmem:[%s16541_s1 + $0x110] sm:$0xff]   ;;  %v14309_v49 = vld [vmem:[%s14704_s11 + $0x24] sm:$0xff]  }
  0xea   : > { %v1234_v42 = vsel %vm1209_vm1, %v1231_v45, %v1233_v10  ;;  %v1240_v48 = vsel %vm1209_vm1, %v1237_v32, %v1239_v34  ;;  %v6355_v45 = vrot.slane %v14626_v31, 1  ;;  %v14345_v31 = vld [vmem:[%s14704_s11 + $0x8c] sm:$0xff]  }
  0xee   : > { %12399 = vmatmul.mubr.bf16.vlgmr.msra.gmra.mrb[0].mxu0 %v1214_v46  ;;  %v6336_v46 = vsel %vm1209_vm1, %v6333_v50, %v6335_v13  ;;  %v14627_v50 = vld [vmem:[%s14704_s11 + $0xb8] sm:$0xff]  }
  0xef   : > { %12975 = vmatmul.mubr.bf16.vlgmr.msra.gmra.mrb[0].mxu1 %v6316_v51  ;;  %12447 = vmatpush3.bf16.msra.mxu0 %v15077_v15  ;;  %v6327_v15 = vrot.slane %v15080_v16, 1  ;;  %v14299_v16 = vld [vmem:[%s16541_s1 + $0xf8] sm:$0xff]   ;;  %v6338_v51 = vsel %vm1209_vm1, %v6335_v13, %v6337_v22 }
  0xf0   : > { %13023 = vmatpush3.bf16.msra.mxu1 %v15086_v17  ;;  %12402 = vmatprep.mubr.bf16.mxu0 %v1216_v55  ;;  %v1227_v17 = vrot.slane %v15090_v19, 1  ;;  %v6339_v55 = vrot.slane %v14612_v33, 1 }
  0xf1   : > { %12978 = vmatprep.mubr.bf16.mxu1 %v6318_v47  ;;  %12448 = vmatprep.subr.bf16.mxu0 %v14287_v43  ;;  %v6328_v19 = vsel %vm1209_vm1, %v6325_v2, %v6327_v15  ;;  %v6330_v21 = vsel %vm1209_vm1, %v6327_v15, %v6329_v20  ;;  %v14622_v15 = vld [vmem:[%s14704_s11 + $0x180] sm:$0xff]  }
  0xf2   : > { %13024 = vmatprep.subr.bf16.mxu1 %v14288_v44  ;;  %v1228_v24 = vsel %vm1209_vm1, %v1225_v11, %v1227_v17  ;;  %v1230_v25 = vsel %vm1209_vm1, %v1227_v17, %v1229_v28  ;;  %v6340_v47 = vsel %vm1209_vm1, %v6337_v22, %v6339_v55  ;;  %v6342_v14 = vsel %vm1209_vm1, %v6339_v55, %v6341_v35  ;;  %v14629_v22 = vld [vmem:[%s14704_s11 + $0xc0] ss:$0 sps:$4 sm:$0x11]   ;;  %v14302_v55 = vld [vmem:[%s14704_s11 + $0xec] sm:$0xff]  }
  0xf3   : > { %12449 = vmatpush3.bf16.msra.mxu0 %v14287_v43  ;;  %v1236_v43 = vsel %vm1209_vm1, %v1233_v10, %v1235_v18  ;;  %v6351_v17 = vrot.slane %v14622_v15, 1  ;;  %v14329_v15 = vld [vmem:[%s14704_s11 + $0x5c] sm:$0xff]  }
  0xf4   : > { %13025 = vmatpush3.bf16.msra.mxu1 %v14288_v44  ;;  %12450 = vmatprep.subr.bf16.mxu0 %v14289_v52  ;;  %v1238_v44 = vsel %vm1209_vm1, %v1235_v18, %v1237_v32  ;;  %v14301_v32 = vld [vmem:[%s14704_s11 + $0xc] sm:$0xff]  }
  0xf5   : > { %13026 = vmatprep.subr.bf16.mxu1 %v14290_v29 }
  0xf6   : > { %12403 = vmatmul.mubr.bf16.gmra.mrb[4].mxu0 %v1218_v37 }
  0xf7   : > { %12979 = vmatmul.mubr.bf16.gmra.mrb[4].mxu1 %v6320_v56  ;;  %12406 = vmatprep.mubr.bf16.mxu0 %v1220_v57  ;;  %v6344_v56 = vsel %vm1209_vm1, %v6341_v35, %v6343_v38  ;;  %v14305_v35 = vld [vmem:[%s14704_s11 + $0xf4] sm:$0xff]  }
  0xf8   : > { %12982 = vmatprep.mubr.bf16.mxu1 %v6322_v59  ;;  %12451 = vmatpush3.bf16.msra.mxu0 %v14289_v52  ;;  %v14615_v52 = vld [vmem:[%s14704_s11 + $0x88] sm:$0xff]  }
  0xf9   : > { %13027 = vmatpush3.bf16.msra.mxu1 %v14290_v29  ;;  %12452 = vmatprep.subr.bf16.mxu0 %v14291_v53  ;;  %v1243_v39 = vrot.slane %v14615_v52, 1  ;;  %v14616_v29 = vld [vmem:[%s14704_s11 + $0x168] sm:$0xff]  }
  0xfa   : > { %13028 = vmatprep.subr.bf16.mxu1 %v14292_v61  ;;  %v6345_v37 = vrot.slane %v14616_v29, 1  ;;  %v14313_v52 = vld [vmem:[%s14704_s11 + $0x2c] sm:$0xff]   ;;  %v14315_v29 = vld [vmem:[%s14704_s11 + $0x34] sm:$0xff]  }
  0xfb   : > { %v1244_v57 = vsel %vm1209_vm1, %v1241_v23, %v1243_v39 }
  0xfc   : > { %12453 = vmatpush3.bf16.msra.mxu0 %v14291_v53  ;;  %v1242_v53 = vsel %vm1209_vm1, %v1239_v34, %v1241_v23  ;;  %v6346_v59 = vsel %vm1209_vm1, %v6343_v38, %v6345_v37  ;;  %v14303_v34 = vld [vmem:[%s14704_s11 + $0x14] sm:$0xff]   ;;  %v14310_v38 = vld [vmem:[%s14704_s11 + $0x104] sm:$0xff]  }
  0xfd   : > { %13029 = vmatpush3.bf16.msra.mxu1 %v14292_v61  ;;  %12454 = vmatprep.subr.bf16.mxu0 %v14293_v1  ;;  %v14617_v61 = vld [vmem:[%s14704_s11 + $0x90] sm:$0xff]  }
  0xfe   : > { %12407 = vmatmul.mubr.bf16.gmra.mrb[8].mxu0 %v1222_v3  ;;  %13030 = vmatprep.subr.bf16.mxu1 %v14294_v4  ;;  %v1245_v62 = vrot.slane %v14617_v61, 1  ;;  %v14322_v23 = vld [vmem:[%s16541_s1 + $0x110] sm:$0xff]   ;;  %v14343_v61 = vld [vmem:[%s16541_s1 + $0x128] sm:$0xff]  }
  0xff   : > { %12983 = vmatmul.mubr.bf16.gmra.mrb[8].mxu1 %v6324_v5  ;;  %12410 = vmatprep.mubr.bf16.mxu0 %v1224_v6  ;;  %v6348_v6 = vsel %vm1209_vm1, %v6345_v37, %v6347_v0  ;;  %v14336_v37 = vld [vmem:[%s16541_s1 + $0x120] sm:$0xff]  }
 0x100   : > { %12986 = vmatprep.mubr.bf16.mxu1 %v6326_v7  ;;  %12455 = vmatpush3.bf16.msra.mxu0 %v14293_v1  ;;  %v14619_v1 = vld [vmem:[%s14704_s11 + $0x98] sm:$0xff]   ;;  %v1246_v5 = vsel %vm1209_vm1, %v1243_v39, %v1245_v62 }
 0x101   : > { %13031 = vmatpush3.bf16.msra.mxu1 %v14294_v4  ;;  %12456 = vmatprep.subr.bf16.mxu0 %v14295_v8  ;;  %v1247_v2 = vrot.slane %v14619_v1, 1  ;;  %v14620_v4 = vld [vmem:[%s14704_s11 + $0x178] sm:$0xff]   ;;  %v14321_v1 = vld [vmem:[%s14704_s11 + $0x124] sm:$0xff]  }
 0x102   : > { %13032 = vmatprep.subr.bf16.mxu1 %v14296_v9  ;;  %v6349_v3 = vrot.slane %v14620_v4, 1  ;;  %v14328_v39 = vld [vmem:[%s16541_s1 + $0x118] sm:$0xff]   ;;  %v14323_v4 = vld [vmem:[%s14704_s11 + $0x4c] sm:$0xff]  }
 0x103   : > { %v1248_v7 = vsel %vm1209_vm1, %v1245_v62, %v1247_v2  ;;  %v14344_v62 = vld [vmem:[%s16541_s1 + $0x128] sm:$0xff]  }
 0x104   : > { %12457 = vmatpush3.bf16.msra.mxu0 %v14295_v8  ;;  %v6350_v8 = vsel %vm1209_vm1, %v6347_v0, %v6349_v3  ;;  %v14352_v0 = vld [vmem:[%s16541_s1 + $0x130] sm:$0xff]  }
 0x105   : > { %13033 = vmatpush3.bf16.msra.mxu1 %v14296_v9  ;;  %12458 = vmatprep.subr.bf16.mxu0 %v14297_v60  ;;  %v14621_v9 = vld [vmem:[%s14704_s11 + $0xa0] sm:$0xff]  }
 0x106   : > { %12411 = vmatmul.mubr.bf16.gmra.mrb[12].mxu0 %v1226_v12  ;;  %13034 = vmatprep.subr.bf16.mxu1 %v14298_v40  ;;  %v1249_v11 = vrot.slane %v14621_v9, 1  ;;  %v14326_v9 = vld [vmem:[%s14704_s11 + $0x134] sm:$0xff]  }
 0x107   : > { %12987 = vmatmul.mubr.bf16.gmra.mrb[12].mxu1 %v6328_v19  ;;  %12414 = vmatprep.mubr.bf16.mxu0 %v1228_v24  ;;  %v6352_v19 = vsel %vm1209_vm1, %v6349_v3, %v6351_v17  ;;  %v14324_v3 = vld [vmem:[%s14704_s11 + $0x12c] sm:$0xff]  }
 0x108   : > { %12990 = vmatprep.mubr.bf16.mxu1 %v6330_v21  ;;  %12459 = vmatpush3.bf16.msra.mxu0 %v14297_v60  ;;  %v14623_v60 = vld [vmem:[%s14704_s11 + $0xa8] sm:$0xff]  }
 0x109   : > { %13035 = vmatpush3.bf16.msra.mxu1 %v14298_v40  ;;  %12460 = vmatprep.subr.bf16.mxu0 %v14299_v16  ;;  %v1251_v20 = vrot.slane %v14623_v60, 1  ;;  %v14624_v40 = vld [vmem:[%s14704_s11 + $0x188] sm:$0xff]  }
 0x10a   : > { %13036 = vmatprep.subr.bf16.mxu1 %v14300_v41  ;;  %v6353_v12 = vrot.slane %v14624_v40, 1  ;;  %v14331_v60 = vld [vmem:[%s14704_s11 + $0x64] sm:$0xff]   ;;  %v14333_v40 = vld [vmem:[%s14704_s11 + $0x6c] sm:$0xff]  }
 0x10b   : > { %v1252_v24 = vsel %vm1209_vm1, %v1249_v11, %v1251_v20 }
 0x10c   : > { %12461 = vmatpush3.bf16.msra.mxu0 %v14299_v16  ;;  %v1250_v16 = vsel %vm1209_vm1, %v1247_v2, %v1249_v11  ;;  %v6354_v21 = vsel %vm1209_vm1, %v6351_v17, %v6353_v12  ;;  %v6356_v10 = vsel %vm1209_vm1, %v6353_v12, %v6355_v45  ;;  %v14354_v2 = vld [vmem:[%s16541_s1 + $0x130] sm:$0xff]   ;;  %v15387_v11 = vld [vmem:[%s16541_s1 + $0x140] sm:$0xff]  }
 0x10d   : > { %13037 = vmatpush3.bf16.msra.mxu1 %v14300_v41  ;;  %12510 = vmatprep.subr.bf16.mxu0 %v15250_v54  ;;  %v14625_v41 = vld [vmem:[%s14704_s11 + $0xb0] sm:$0xff]   ;;  %v14330_v17 = vld [vmem:[%s14704_s11 + $0x13c] sm:$0xff]  }
 0x10e   : > { %12415 = vmatmul.mubr.bf16.gmra.mrb[16].mxu0 %v1230_v25  ;;  %13086 = vmatprep.subr.bf16.mxu1 %v15255_v58  ;;  %v1253_v28 = vrot.slane %v14625_v41, 1  ;;  %v1255_v25 = vrot.slane %v14627_v50, 1  ;;  %v14334_v12 = vld [vmem:[%s14704_s11 + $0x14c] sm:$0xff]   ;;  %v14341_v41 = vld [vmem:[%s14704_s11 + $0x84] sm:$0xff]   ;;  %v14347_v50 = vld [vmem:[%s14704_s11 + $0x94] sm:$0xff]  }
 0x10f   : > { %12991 = vmatmul.mubr.bf16.gmra.mrb[16].mxu1 %v6332_v26  ;;  %12418 = vmatprep.mubr.bf16.mxu0 %v1232_v27  ;;  %v14628_v26 = vld [vmem:[%s14704_s11 + $0x198] sm:$0xff]  }
 0x110   : > { %12994 = vmatprep.mubr.bf16.mxu1 %v6334_v30  ;;  %v6357_v27 = vrot.slane %v14628_v26, 1  ;;  %v1254_v30 = vsel %vm1209_vm1, %v1251_v20, %v1253_v28  ;;  %v1256_v13 = vsel %vm1209_vm1, %v1253_v28, %v1255_v25  ;;  %v14332_v20 = vld [vmem:[%s14704_s11 + $0x144] sm:$0xff]   ;;  %v14349_v26 = vld [vmem:[%s14704_s11 + $0x9c] sm:$0xff]  }
 0x111   : > { %v14342_v28 = vld [vmem:[%s14704_s11 + $0x164] sm:$0xff]  }
 0x112   : > { %v6358_v18 = vsel %vm1209_vm1, %v6355_v45, %v6357_v27  ;;  %v14346_v45 = vld [vmem:[%s14704_s11 + $0x16c] sm:$0xff]  }
 0x116   : > { %12419 = vmatmul.mubr.bf16.gmra.mrb[20].mxu0 %v1234_v42  ;;  %v1257_v42 = vrot.slane %v14629_v22, 1  ;;  %v15416_v22 = vld [vmem:[%s14704_s11 + $0xf0] sm:$0xf] }
 0x117   : > { %12995 = vmatmul.mubr.bf16.gmra.mrb[20].mxu1 %v6336_v46  ;;  %12422 = vmatprep.mubr.bf16.mxu0 %v1236_v43  ;;  %v14630_v46 = vld [vmem:[%s14704_s11 + $0x1a0] ss:$0 sps:$4 sm:$0x11]  }
 0x118   : > { %12998 = vmatprep.mubr.bf16.mxu1 %v6338_v51  ;;  %v6359_v43 = vrot.slane %v14630_v46, 1  ;;  %v1258_v51 = vsel %vm1209_vm1, %v1255_v25, %v1257_v42  ;;  %v14348_v25 = vld [vmem:[%s14704_s11 + $0x174] sm:$0xff]   ;;  %v14353_v42 = vld [vmem:[%s14704_s11 + $0x184] sm:$0xff]   ;;  %v14355_v46 = vld [vmem:[%s14704_s11 + $0xac] sm:$0xff]  }
 0x11a   : > { %v6360_v33 = vsel %vm1209_vm1, %v6357_v27, %v6359_v43  ;;  %v14350_v27 = vld [vmem:[%s14704_s11 + $0x17c] sm:$0xff]   ;;  %v14356_v43 = vld [vmem:[%s14704_s11 + $0x18c] sm:$0xff]  }
 0x11e   : > { %12423 = vmatmul.mubr.bf16.gmra.mrb[24].mxu0 %v1238_v44  ;;  %v14307_v44 = vld [vmem:[%s14704_s11 + $0x1c] sm:$0xff]  }
 0x11f   : > { %12999 = vmatmul.mubr.bf16.gmra.mrb[24].mxu1 %v6340_v47  ;;  %12426 = vmatprep.mubr.bf16.mxu0 %v1240_v48  ;;  %v14308_v47 = vld [vmem:[%s14704_s11 + $0xfc] sm:$0xff]   ;;  %v14311_v48 = vld [vmem:[%s16541_s1 + $0x108] sm:$0xff]  }
 0x120   : > { %13002 = vmatprep.mubr.bf16.mxu1 %v6342_v14  ;;  %v14312_v14 = vld [vmem:[%s16541_s1 + $0x108] sm:$0xff]  }
 0x126   : > { %12427 = vmatmul.mubr.bf16.gmra.mrb[28].mxu0 %v1242_v53  ;;  %v14316_v53 = vld [vmem:[%s14704_s11 + $0x114] sm:$0xff]  }
 0x127   : > { %13003 = vmatmul.mubr.bf16.gmra.mrb[28].mxu1 %v6344_v56  ;;  %12430 = vmatprep.mubr.bf16.mxu0 %v1244_v57  ;;  %v14338_v56 = vld [vmem:[%s16541_s1 + $0x120] sm:$0xff]  }
 0x128   : > { %13006 = vmatprep.mubr.bf16.mxu1 %v6346_v59  ;;  %v14317_v57 = vld [vmem:[%s14704_s11 + $0x3c] sm:$0xff]  }
 0x129   : > { %v14318_v59 = vld [vmem:[%s14704_s11 + $0x11c] sm:$0xff]  }
 0x12e   : > { %12431 = vmatmul.mubr.bf16.gmra.mrb[32].mxu0 %v1246_v5  ;;  %v14359_v5 = vld [vmem:[%s16541_s1 + $0x138] sm:$0xff]  }
 0x12f   : > { %13007 = vmatmul.mubr.bf16.gmra.mrb[32].mxu1 %v6348_v6  ;;  %12434 = vmatprep.mubr.bf16.mxu0 %v1248_v7  ;;  %v14360_v6 = vld [vmem:[%s16541_s1 + $0x138] sm:$0xff]  }
 0x130   : > { %13010 = vmatprep.mubr.bf16.mxu1 %v6350_v8  ;;  %v14325_v7 = vld [vmem:[%s14704_s11 + $0x54] sm:$0xff]   ;;  %v15381_v8 = vld [vmem:[%s16541_s1 + $0x140] sm:$0xff]  }
 0x136   : > { %12435 = vmatmul.mubr.bf16.gmra.mrb[36].mxu0 %v1250_v16  ;;  %v14335_v16 = vld [vmem:[%s14704_s11 + $0x74] sm:$0xff]  }
 0x137   : > { %13011 = vmatmul.mubr.bf16.gmra.mrb[36].mxu1 %v6352_v19  ;;  %12438 = vmatprep.mubr.bf16.mxu0 %v1252_v24  ;;  %v14337_v19 = vld [vmem:[%s14704_s11 + $0x154] sm:$0xff]   ;;  %v14339_v24 = vld [vmem:[%s14704_s11 + $0x7c] sm:$0xff]  }
 0x138   : > { %13014 = vmatprep.mubr.bf16.mxu1 %v6354_v21  ;;  %v14340_v21 = vld [vmem:[%s14704_s11 + $0x15c] sm:$0xff]  }
 0x13e   : > { %12439 = vmatmul.mubr.bf16.gmra.mrb[40].mxu0 %v1254_v30  ;;  %v14351_v30 = vld [vmem:[%s14704_s11 + $0xa4] sm:$0xff]  }
 0x13f   : > { %13015 = vmatmul.mubr.bf16.gmra.mrb[40].mxu1 %v6356_v10  ;;  %12442 = vmatprep.mubr.bf16.mxu0 %v1256_v13  ;;  %v2133_v10 = vld [vmem:[%s14704_s11 + $0xc] sm:$0xf]  ;;  %v15412_v13 = vld [vmem:[%s14704_s11 + $0x10] sm:$0xf] }
 0x140   : > { %13018 = vmatprep.mubr.bf16.mxu1 %v6358_v18  ;;  %v10930_v18 = vld [vmem:[%s14704_s11 + $0xec] sm:$0xf] }
 0x146   : > { %12443 = vmatmul.mubr.bf16.gmra.mrb[44].mxu0 %v1258_v51  ;;  %v10586_v51 = vcombine.low %v2133_v10, %v15412_v13 }
 0x147   : > { %13019 = vmatmul.mubr.bf16.gmra.mrb[44].mxu1 %v6360_v33  ;;  %12462 = vmatprep.mubr.bf16.mxu0 %v14301_v32  ;;  %v10979_v32 = vcombine.low %v10930_v18, %v15416_v22  ;;  %v15424_v33 = vld [vmem:[%s14704_s11 + $0x14] sm:$0xff]  }
 0x148   : > { %13038 = vmatprep.mubr.bf16.mxu1 %v14302_v55  ;;  %v2324_v55 = vshll.u32 %v10586_v51, 16 }
 0x14e   : > { %12463 = vmatmul.mubr.bf16.vlgmr.msra.gmra.mrb[0].mxu0 %v14303_v34  ;;  %v15427_v34 = vld [vmem:[%s14704_s11 + $0xf4] sm:$0xff]  }
 0x14f   : > { %13039 = vmatmul.mubr.bf16.vlgmr.msra.gmra.mrb[0].mxu1 %v14305_v35  ;;  %12511 = vmatpush3.bf16.msra.mxu0 %v15250_v54  ;;  %v14314_v54 = vld [vmem:[%s14704_s11 + $0x10c] sm:$0xff]   ;;  %v7426_v35 = vshll.u32 %v10979_v32, 16 }
 0x150   : > { %13087 = vmatpush3.bf16.msra.mxu1 %v15255_v58  ;;  %12466 = vmatprep.mubr.bf16.mxu0 %v14307_v44  ;;  %v14327_v58 = vld [vmem:[%s16541_s1 + $0x118] sm:$0xff]  }
 0x151   : > { %13042 = vmatprep.mubr.bf16.mxu1 %v14308_v47  ;;  %12512 = vmatprep.subr.bf16.mxu0 %v14311_v48  ;;  %v14357_v44 = vld [vmem:[%s14704_s11 + $0xb4] sm:$0xff]  }
 0x152   : > { %13088 = vmatprep.subr.bf16.mxu1 %v14312_v14  ;;  %v14358_v47 = vld [vmem:[%s14704_s11 + $0x194] sm:$0xff]  }
 0x153   : > { %12513 = vmatpush3.bf16.msra.mxu0 %v14311_v48  ;;  %v14361_v48 = vld [vmem:[%s14704_s11 + $0xbc] sm:$0xff]  }
 0x154   : > { %13089 = vmatpush3.bf16.msra.mxu1 %v14312_v14  ;;  %12514 = vmatprep.subr.bf16.mxu0 %v14320_v36  ;;  %v14362_v14 = vld [vmem:[%s14704_s11 + $0x19c] sm:$0xff]  }
 0x155   : > { %13090 = vmatprep.subr.bf16.mxu1 %v14322_v23 }
 0x156   : > { %12467 = vmatmul.mubr.bf16.gmra.mrb[4].mxu0 %v14309_v49  ;;  %v2329_v49 = vshll.u32 %v15424_v33, 16 }
 0x157   : > { %13043 = vmatmul.mubr.bf16.gmra.mrb[4].mxu1 %v14310_v38  ;;  %12470 = vmatprep.mubr.bf16.mxu0 %v14313_v52  ;;  %v7424_v38 = vshrl.u32 %v10979_v32, 16  ;;  %v7428_v52 = vrot.slane %v7426_v35, 1  ;;  %v15490_v35 = vld [vmem:[%s14704_s11 + $0x3c] sm:$0xff]  }
 0x158   : > { %13046 = vmatprep.mubr.bf16.mxu1 %v14314_v54  ;;  %12515 = vmatpush3.bf16.msra.mxu0 %v14320_v36  ;;  %v2322_v36 = vshrl.u32 %v10586_v51, 16  ;;  %v7431_v54 = vshll.u32 %v15427_v34, 16 }
 0x159   : > { %13091 = vmatpush3.bf16.msra.mxu1 %v14322_v23  ;;  %12516 = vmatprep.subr.bf16.mxu0 %v14327_v58  ;;  %v2326_v23 = vrot.slane %v2324_v55, 1  ;;  %v14378_v55 = vld [vmem:[%s16541_s1 + $0x148] sm:$0xff]  }
 0x15a   : > { %13092 = vmatprep.subr.bf16.mxu1 %v14328_v39 }
 0x15c   : > { %12517 = vmatpush3.bf16.msra.mxu0 %v14327_v58  ;;  %v15436_v58 = vld [vmem:[%s14704_s11 + $0x1c] sm:$0xff]  }
 0x15d   : > { %13093 = vmatpush3.bf16.msra.mxu1 %v14328_v39  ;;  %12518 = vmatprep.subr.bf16.mxu0 %v14336_v37  ;;  %v2327_v39 = vor.u32 %v2326_v23, %v2322_v36 }
 0x15e   : > { %12471 = vmatmul.mubr.bf16.gmra.mrb[8].mxu0 %v14315_v29  ;;  %13094 = vmatprep.subr.bf16.mxu1 %v14338_v56  ;;  %v2331_v29 = vrot.slane %v2329_v49, 1  ;;  %v15498_v49 = vld [vmem:[%s14704_s11 + $0x44] sm:$0xff]  }
 0x15f   : > { %13047 = vmatmul.mubr.bf16.gmra.mrb[8].mxu1 %v14316_v53  ;;  %12474 = vmatprep.mubr.bf16.mxu0 %v14317_v57  ;;  %v7429_v53 = vor.u32 %v7428_v52, %v7424_v38  ;;  %v15442_v57 = vld [vmem:[%s14704_s11 + $0x24] sm:$0xff]   ;;  %v14386_v38 = vld [vmem:[%s16541_s1 + $0x150] sm:$0xff]  }
 0x160   : > { %13050 = vmatprep.mubr.bf16.mxu1 %v14318_v59  ;;  %12519 = vmatpush3.bf16.msra.mxu0 %v14336_v37  ;;  %v15439_v37 = vld [vmem:[%s14704_s11 + $0xfc] sm:$0xff]   ;;  %v14363_v59 = vld [vmem:[%s14704_s11 + $0xc4] sm:$0xff]  }
 0x161   : > { %13095 = vmatpush3.bf16.msra.mxu1 %v14338_v56  ;;  %12520 = vmatprep.subr.bf16.mxu0 %v14343_v61  ;;  %v7433_v56 = vrot.slane %v7431_v54, 1  ;;  %v15504_v54 = vld [vmem:[%s14704_s11 + $0x124] sm:$0xff]  }
 0x162   : > { %13096 = vmatprep.subr.bf16.mxu1 %v14344_v62 }
 0x164   : > { %12521 = vmatpush3.bf16.msra.mxu0 %v14343_v61  ;;  %v15446_v61 = vld [vmem:[%s14704_s11 + $0x104] sm:$0xff]  }
 0x165   : > { %13097 = vmatpush3.bf16.msra.mxu1 %v14344_v62  ;;  %12522 = vmatprep.subr.bf16.mxu0 %v14352_v0  ;;  %v14364_v62 = vld [vmem:[%s14704_s11 + $0x1a4] sm:$0xff]  }
 0x166   : > { %12475 = vmatmul.mubr.bf16.gmra.mrb[12].mxu0 %v14319_v63  ;;  %13098 = vmatprep.subr.bf16.mxu1 %v14354_v2  ;;  %v2333_v63 = vshrl.u32 %v15424_v33, 16 }
 0x167   : > { %13051 = vmatmul.mubr.bf16.gmra.mrb[12].mxu1 %v14321_v1  ;;  %12478 = vmatprep.mubr.bf16.mxu0 %v14323_v4  ;;  %v2332_v1 = vsel %vm398_vm0, %v2327_v39, %v2331_v29  ;;  %v7439_v4 = vshll.u32 %v15439_v37, 16  ;;  %v2369_v39 = vshll.u32 %v15490_v35, 16 }
 0x168   : > { %13054 = vmatprep.mubr.bf16.mxu1 %v14324_v3  ;;  %12523 = vmatpush3.bf16.msra.mxu0 %v14352_v0  ;;  %v2337_v0 = vshll.u32 %v15436_v58, 16  ;;  %v7434_v3 = vsel %vm398_vm0, %v7429_v53, %v7433_v56 }
 0x169   : > { %13099 = vmatpush3.bf16.msra.mxu1 %v14354_v2  ;;  %12524 = vmatprep.subr.bf16.mxu0 %v14359_v5  ;;  %v7435_v2 = vshrl.u32 %v15427_v34, 16 }
 0x16a   : > { %13100 = vmatprep.subr.bf16.mxu1 %v14360_v6 }
 0x16c   : > { %12525 = vmatpush3.bf16.msra.mxu0 %v14359_v5  ;;  %v2341_v5 = vshrl.u32 %v15436_v58, 16 }
 0x16d   : > { %13101 = vmatpush3.bf16.msra.mxu1 %v14360_v6  ;;  %12574 = vmatprep.subr.bf16.mxu0 %v15381_v8  ;;  %v2345_v6 = vshll.u32 %v15442_v57, 16 }
 0x16e   : > { %12479 = vmatmul.mubr.bf16.gmra.mrb[16].mxu0 %v14325_v7  ;;  %13150 = vmatprep.subr.bf16.mxu1 %v15387_v11  ;;  %v7443_v7 = vshrl.u32 %v15439_v37, 16 }
 0x16f   : > { %13055 = vmatmul.mubr.bf16.gmra.mrb[16].mxu1 %v14326_v9  ;;  %12482 = vmatprep.mubr.bf16.mxu0 %v14329_v15  ;;  %v7447_v9 = vshll.u32 %v15446_v61, 16  ;;  %v15460_v15 = vld [vmem:[%s14704_s11 + $0x2c] sm:$0xff]  }
 0x170   : > { %13058 = vmatprep.mubr.bf16.mxu1 %v14330_v17  ;;  %v2335_v17 = vor.u32 %v2333_v63, %v2331_v29 }
 0x176   : > { %12483 = vmatmul.mubr.bf16.gmra.mrb[20].mxu0 %v14331_v60  ;;  %v2339_v60 = vrot.slane %v2337_v0, 1  ;;  %v2373_v0 = vshrl.u32 %v15490_v35, 16 }
 0x177   : > { %13059 = vmatmul.mubr.bf16.gmra.mrb[20].mxu1 %v14332_v20  ;;  %12486 = vmatprep.mubr.bf16.mxu0 %v14333_v40  ;;  %v15463_v20 = vld [vmem:[%s14704_s11 + $0x10c] sm:$0xff]   ;;  %v7437_v40 = vor.u32 %v7435_v2, %v7433_v56 }
 0x178   : > { %13062 = vmatprep.mubr.bf16.mxu1 %v14334_v12  ;;  %v7441_v12 = vrot.slane %v7439_v4, 1 }
 0x17e   : > { %12487 = vmatmul.mubr.bf16.gmra.mrb[24].mxu0 %v14335_v16  ;;  %v15466_v16 = vld [vmem:[%s14704_s11 + $0x34] sm:$0xff]  }
 0x17f   : > { %13063 = vmatmul.mubr.bf16.gmra.mrb[24].mxu1 %v14337_v19  ;;  %12490 = vmatprep.mubr.bf16.mxu0 %v14339_v24  ;;  %v2343_v19 = vor.u32 %v2341_v5, %v2339_v60  ;;  %v2347_v24 = vrot.slane %v2345_v6, 1  ;;  %v2361_v10 = vshll.u32 %v15466_v16, 16  ;;  %v2365_v53 = vshrl.u32 %v15466_v16, 16  ;;  %v14393_v5 = vld [vmem:[%s16541_s1 + $0x158] sm:$0xff]  }
 0x180   : > { %13066 = vmatprep.mubr.bf16.mxu1 %v14340_v21  ;;  %v15469_v21 = vld [vmem:[%s14704_s11 + $0x114] sm:$0xff]   ;;  %v2371_v6 = vrot.slane %v2369_v39, 1 }
 0x181   : > { %v2348_v18 = vsel %vm398_vm0, %v2343_v19, %v2347_v24  ;;  %v2363_v23 = vrot.slane %v2361_v10, 1  ;;  %v7467_v56 = vshrl.u32 %v15469_v21, 16  ;;  %v2381_v10 = vshrl.u32 %v15498_v49, 16 }
 0x182   : > { %v2375_v19 = vor.u32 %v2373_v0, %v2371_v6 }
 0x186   : > { %12491 = vmatmul.mubr.bf16.gmra.mrb[28].mxu0 %v14341_v41  ;;  %v7445_v41 = vor.u32 %v7443_v7, %v7441_v12  ;;  %v15525_v7 = vld [vmem:[%s14704_s11 + $0x4c] sm:$0xff]  }
 0x187   : > { %13067 = vmatmul.mubr.bf16.gmra.mrb[28].mxu1 %v14342_v28  ;;  %12494 = vmatprep.mubr.bf16.mxu0 %v14345_v31  ;;  %v7449_v28 = vrot.slane %v7447_v9, 1  ;;  %v2353_v31 = vshll.u32 %v15460_v15, 16  ;;  %v14394_v9 = vld [vmem:[%s16541_s1 + $0x158] sm:$0xff]  }
 0x188   : > { %13070 = vmatprep.mubr.bf16.mxu1 %v14346_v45  ;;  %v2340_v45 = vsel %vm398_vm0, %v2335_v17, %v2339_v60  ;;  %v2367_v17 = vor.u32 %v2365_v53, %v2363_v23  ;;  %v15570_v53 = vld [vmem:[%s14704_s11 + $0x64] sm:$0xff]  }
 0x189   : > { %v7450_v51 = vsel %vm398_vm0, %v7445_v41, %v7449_v28  ;;  %v2355_v32 = vrot.slane %v2353_v31, 1  ;;  %v15534_v41 = vld [vmem:[%s14704_s11 + $0x54] sm:$0xff]  }
 0x18e   : > { %12495 = vmatmul.mubr.bf16.gmra.mrb[32].mxu0 %v14347_v50  ;;  %v2349_v50 = vshrl.u32 %v15442_v57, 16 }
 0x18f   : > { %13071 = vmatmul.mubr.bf16.gmra.mrb[32].mxu1 %v14348_v25  ;;  %12498 = vmatprep.mubr.bf16.mxu0 %v14349_v26  ;;  %v7455_v25 = vshll.u32 %v15463_v20, 16  ;;  %v7442_v26 = vsel %vm398_vm0, %v7437_v40, %v7441_v12  ;;  %v15531_v12 = vld [vmem:[%s14704_s11 + $0x12c] sm:$0xff]  }
 0x190   : > { %13074 = vmatprep.mubr.bf16.mxu1 %v14350_v27  ;;  %v7451_v27 = vshrl.u32 %v15446_v61, 16 }
 0x196   : > { %12499 = vmatmul.mubr.bf16.gmra.mrb[36].mxu0 %v14351_v30  ;;  %v2357_v30 = vshrl.u32 %v15460_v15, 16 }
 0x197   : > { %13075 = vmatmul.mubr.bf16.gmra.mrb[36].mxu1 %v14353_v42  ;;  %12502 = vmatprep.mubr.bf16.mxu0 %v14355_v46  ;;  %v14377_v42 = vld [vmem:[%s16541_s1 + $0x148] sm:$0xff]   ;;  %v7459_v46 = vshrl.u32 %v15463_v20, 16 }
 0x198   : > { %13078 = vmatprep.mubr.bf16.mxu1 %v14356_v43  ;;  %v7463_v43 = vshll.u32 %v15469_v21, 16  ;;  %v2359_v36 = vor.u32 %v2357_v30, %v2355_v32 }
 0x19a   : > { %v2364_v63 = vsel %vm398_vm0, %v2359_v36, %v2363_v23  ;;  %v15561_v36 = vld [vmem:[%s14704_s11 + $0x5c] sm:$0xff]   ;;  %v14410_v23 = vld [vmem:[%s16541_s1 + $0x168] sm:$0xff]  }
 0x19b   : > { %v2401_v0 = vshll.u32 %v15561_v36, 16 }
 0x19e   : > { %12503 = vmatmul.mubr.bf16.gmra.mrb[40].mxu0 %v14357_v44  ;;  %v2351_v44 = vor.u32 %v2349_v50, %v2347_v24  ;;  %v14402_v50 = vld [vmem:[%s16541_s1 + $0x160] sm:$0xff]  }
 0x19f   : > { %13079 = vmatmul.mubr.bf16.gmra.mrb[40].mxu1 %v14358_v47  ;;  %12506 = vmatprep.mubr.bf16.mxu0 %v14361_v48  ;;  %v7457_v47 = vrot.slane %v7455_v25, 1  ;;  %v15494_v48 = vld [vmem:[%s14704_s11 + $0x11c] sm:$0xff]   ;;  %v2385_v25 = vshll.u32 %v15525_v7, 16 }
 0x1a0   : > { %13082 = vmatprep.mubr.bf16.mxu1 %v14362_v14  ;;  %v7453_v14 = vor.u32 %v7451_v27, %v7449_v28  ;;  %v2356_v29 = vsel %vm398_vm0, %v2351_v44, %v2355_v32  ;;  %v7475_v4 = vshrl.u32 %v15494_v48, 16  ;;  %v2372_v27 = vsel %vm398_vm0, %v2367_v17, %v2371_v6 }
 0x1a1   : > { %v7461_v52 = vor.u32 %v7459_v46, %v7457_v47  ;;  %v7483_v46 = vshrl.u32 %v15504_v54, 16  ;;  %v2405_v17 = vshrl.u32 %v15561_v36, 16 }
 0x1a6   : > { %12507 = vmatmul.mubr.bf16.gmra.mrb[44].mxu0 %v14363_v59  ;;  %v7471_v59 = vshll.u32 %v15494_v48, 16 }
 0x1a7   : > { %13083 = vmatmul.mubr.bf16.gmra.mrb[44].mxu1 %v14364_v62  ;;  %12526 = vmatprep.mubr.bf16.mxu0 %v2332_v1  ;;  %v7458_v62 = vsel %vm398_vm0, %v7453_v14, %v7457_v47  ;;  %v2377_v1 = vshll.u32 %v15498_v49, 16  ;;  %v14409_v47 = vld [vmem:[%s16541_s1 + $0x168] sm:$0xff]   ;;  %v2387_v14 = vrot.slane %v2385_v25, 1  ;;  %v14426_v25 = vld [vmem:[%s16541_s1 + $0x178] sm:$0xff]  }
 0x1a8   : > { %13102 = vmatprep.mubr.bf16.mxu1 %v7434_v3  ;;  %v7479_v3 = vshll.u32 %v15504_v54, 16  ;;  %v7473_v40 = vrot.slane %v7471_v59, 1 }
 0x1a9   : > { %v2379_v24 = vrot.slane %v2377_v1, 1  ;;  %v14420_v1 = vld [vmem:[%s16541_s1 + $0x170] sm:$0xff]  }
 0x1aa   : > { %v7477_v28 = vor.u32 %v7475_v4, %v7473_v40  ;;  %v7481_v31 = vrot.slane %v7479_v3, 1  ;;  %v2397_v4 = vshrl.u32 %v15534_v41, 16 }
 0x1ac   : > { %v7482_v32 = vsel %vm398_vm0, %v7477_v28, %v7481_v31  ;;  %v14425_v28 = vld [vmem:[%s16541_s1 + $0x178] sm:$0xff]  }
 0x1ae   : > { %12527 = vmatmul.mubr.bf16.vlgmr.msra.gmra.mrb[0].mxu0 %v2340_v45  ;;  %v15537_v45 = vld [vmem:[%s14704_s11 + $0x134] sm:$0xff]  }
 0x1af   : > { %13103 = vmatmul.mubr.bf16.vlgmr.msra.gmra.mrb[0].mxu1 %v7442_v26  ;;  %12575 = vmatpush3.bf16.msra.mxu0 %v15381_v8  ;;  %v7465_v8 = vrot.slane %v7463_v43, 1  ;;  %v14404_v26 = vld [vmem:[%s16541_s1 + $0x160] sm:$0xff]   ;;  %v2389_v43 = vshrl.u32 %v15525_v7, 16  ;;  %v7495_v44 = vshll.u32 %v15537_v45, 16  ;;  %v7499_v3 = vshrl.u32 %v15537_v45, 16 }
 0x1b0   : > { %13151 = vmatpush3.bf16.msra.mxu1 %v15387_v11  ;;  %12530 = vmatprep.mubr.bf16.mxu0 %v2348_v18  ;;  %v14388_v11 = vld [vmem:[%s16541_s1 + $0x150] sm:$0xff]   ;;  %v7487_v18 = vshll.u32 %v15531_v12, 16 }
 0x1b1   : > { %13106 = vmatprep.mubr.bf16.mxu1 %v7450_v51  ;;  %12576 = vmatprep.subr.bf16.mxu0 %v14377_v42  ;;  %v7466_v2 = vsel %vm398_vm0, %v7461_v52, %v7465_v8  ;;  %v7469_v60 = vor.u32 %v7467_v56, %v7465_v8  ;;  %v2393_v51 = vshll.u32 %v15534_v41, 16  ;;  %v15567_v8 = vld [vmem:[%s14704_s11 + $0x13c] sm:$0xff]   ;;  %v2391_v39 = vor.u32 %v2389_v43, %v2387_v14 }
 0x1b2   : > { %13152 = vmatprep.subr.bf16.mxu1 %v14378_v55  ;;  %v7489_v52 = vrot.slane %v7487_v18, 1  ;;  %v7497_v59 = vrot.slane %v7495_v44, 1 }
 0x1b3   : > { %12577 = vmatpush3.bf16.msra.mxu0 %v14377_v42  ;;  %v7474_v30 = vsel %vm398_vm0, %v7469_v60, %v7473_v40  ;;  %v2380_v42 = vsel %vm398_vm0, %v2375_v19, %v2379_v24  ;;  %v2409_v60 = vshll.u32 %v15570_v53, 16  ;;  %v7507_v19 = vshrl.u32 %v15567_v8, 16 }
 0x1b4   : > { %13153 = vmatpush3.bf16.msra.mxu1 %v14378_v55  ;;  %12578 = vmatprep.subr.bf16.mxu0 %v14386_v38  ;;  %v7491_v55 = vshrl.u32 %v15531_v12, 16 }
 0x1b5   : > { %13154 = vmatprep.subr.bf16.mxu1 %v14388_v11 }
 0x1b6   : > { %12531 = vmatmul.mubr.bf16.gmra.mrb[4].mxu0 %v2356_v29  ;;  %v2395_v29 = vrot.slane %v2393_v51, 1  ;;  %v7493_v56 = vor.u32 %v7491_v55, %v7489_v52  ;;  %v15614_v55 = vld [vmem:[%s16541_s1 + $0x180] sm:$0xff]  }
 0x1b7   : > { %13107 = vmatmul.mubr.bf16.gmra.mrb[4].mxu1 %v7458_v62  ;;  %12534 = vmatprep.mubr.bf16.mxu0 %v2364_v63  ;;  %v15573_v62 = vld [vmem:[%s14704_s11 + $0x144] sm:$0xff]   ;;  %v14418_v63 = vld [vmem:[%s16541_s1 + $0x170] sm:$0xff]  }
 0x1b8   : > { %13110 = vmatprep.mubr.bf16.mxu1 %v7466_v2  ;;  %12579 = vmatpush3.bf16.msra.mxu0 %v14386_v38  ;;  %v2383_v38 = vor.u32 %v2381_v10, %v2379_v24  ;;  %v7498_v40 = vsel %vm398_vm0, %v7493_v56, %v7497_v59  ;;  %v7511_v24 = vshll.u32 %v15573_v62, 16  ;;  %v15603_v10 = vld [vmem:[%s14704_s11 + $0x14c] sm:$0xff]  }
 0x1b9   : > { %13155 = vmatpush3.bf16.msra.mxu1 %v14388_v11  ;;  %12580 = vmatprep.subr.bf16.mxu0 %v14393_v5  ;;  %v7485_v11 = vor.u32 %v7483_v46, %v7481_v31  ;;  %v2403_v31 = vrot.slane %v2401_v0, 1  ;;  %v15606_v46 = vld [vmem:[%s14704_s11 + $0x74] sm:$0xff]  }
 0x1ba   : > { %13156 = vmatprep.subr.bf16.mxu1 %v14394_v9  ;;  %v2388_v2 = vsel %vm398_vm0, %v2383_v38, %v2387_v14  ;;  %v7513_v51 = vrot.slane %v7511_v24, 1  ;;  %v2413_v38 = vshrl.u32 %v15570_v53, 16  ;;  %v2425_v56 = vshll.u32 %v15606_v46, 16  ;;  %v15645_v24 = vld [vmem:[%s14704_s11 + $0x164] sm:$0xff]  }
 0x1bb   : > { %v7490_v6 = vsel %vm398_vm0, %v7485_v11, %v7489_v52  ;;  %v2407_v18 = vor.u32 %v2405_v17, %v2403_v31  ;;  %v7519_v52 = vshll.u32 %v15603_v10, 16 }
 0x1bc   : > { %12581 = vmatpush3.bf16.msra.mxu0 %v14393_v5  ;;  %v7503_v5 = vshll.u32 %v15567_v8, 16  ;;  %v2427_v17 = vrot.slane %v2425_v56, 1 }
 0x1bd   : > { %13157 = vmatpush3.bf16.msra.mxu1 %v14394_v9  ;;  %12582 = vmatprep.subr.bf16.mxu0 %v14402_v50  ;;  %v2396_v9 = vsel %vm398_vm0, %v2391_v39, %v2395_v29  ;;  %v7515_v39 = vshrl.u32 %v15573_v62, 16 }
 0x1be   : > { %12535 = vmatmul.mubr.bf16.gmra.mrb[8].mxu0 %v2372_v27  ;;  %13158 = vmatprep.subr.bf16.mxu1 %v14404_v26  ;;  %v7501_v27 = vor.u32 %v7499_v3, %v7497_v59  ;;  %v7521_v3 = vrot.slane %v7519_v52, 1 }
 0x1bf   : > { %13111 = vmatmul.mubr.bf16.gmra.mrb[8].mxu1 %v7474_v30  ;;  %12538 = vmatprep.mubr.bf16.mxu0 %v2380_v42  ;;  %v7505_v30 = vrot.slane %v7503_v5, 1  ;;  %v2411_v42 = vrot.slane %v2409_v60, 1  ;;  %v15639_v5 = vld [vmem:[%s14704_s11 + $0x15c] sm:$0xff]   ;;  %v15642_v60 = vld [vmem:[%s14704_s11 + $0x84] sm:$0xff]  }
 0x1c0   : > { %13114 = vmatprep.mubr.bf16.mxu1 %v7482_v32  ;;  %12583 = vmatpush3.bf16.msra.mxu0 %v14402_v50  ;;  %v15597_v50 = vld [vmem:[%s14704_s11 + $0x6c] sm:$0xff]   ;;  %v15609_v32 = vld [vmem:[%s14704_s11 + $0x154] sm:$0xff]  }
 0x1c1   : > { %13159 = vmatpush3.bf16.msra.mxu1 %v14404_v26  ;;  %12584 = vmatprep.subr.bf16.mxu0 %v14409_v47  ;;  %v2399_v26 = vor.u32 %v2397_v4, %v2395_v29  ;;  %v7509_v43 = vor.u32 %v7507_v19, %v7505_v30  ;;  %v2417_v44 = vshll.u32 %v15597_v50, 16  ;;  %v2412_v11 = vsel %vm398_vm0, %v2407_v18, %v2411_v42 }
 0x1c2   : > { %13160 = vmatprep.subr.bf16.mxu1 %v14410_v23  ;;  %v2421_v29 = vshrl.u32 %v15597_v50, 16  ;;  %v7527_v0 = vshll.u32 %v15609_v32, 16  ;;  %v2415_v4 = vor.u32 %v2413_v38, %v2411_v42  ;;  %v15660_v38 = vld [vmem:[%s14704_s11 + $0x8c] sm:$0xff]  }
 0x1c3   : > { %v2404_v14 = vsel %vm398_vm0, %v2399_v26, %v2403_v31  ;;  %v7514_v59 = vsel %vm398_vm0, %v7509_v43, %v7513_v51  ;;  %v7531_v26 = vshrl.u32 %v15609_v32, 16  ;;  %v2441_v43 = vshll.u32 %v15642_v60, 16 }
 0x1c4   : > { %12585 = vmatpush3.bf16.msra.mxu0 %v14409_v47  ;;  %v15620_v47 = vld [vmem:[%s16541_s1 + $0x180] sm:$0xff]   ;;  %v7529_v19 = vrot.slane %v7527_v0, 1 }
 0x1c5   : > { %13161 = vmatpush3.bf16.msra.mxu1 %v14410_v23  ;;  %12586 = vmatprep.subr.bf16.mxu0 %v14418_v63  ;;  %v7506_v23 = vsel %vm398_vm0, %v7501_v27, %v7505_v30  ;;  %v7535_v27 = vshll.u32 %v15639_v5, 16 }
 0x1c6   : > { %12539 = vmatmul.mubr.bf16.gmra.mrb[12].mxu0 %v2388_v2  ;;  %13162 = vmatprep.subr.bf16.mxu1 %v14420_v1  ;;  %v15635_v2 = vld [vmem:[%s14704_s11 + $0x7c] sm:$0xff]  }
 0x1c7   : > { %13115 = vmatmul.mubr.bf16.gmra.mrb[12].mxu1 %v7490_v6  ;;  %12542 = vmatprep.mubr.bf16.mxu0 %v2396_v9  ;;  %v7517_v6 = vor.u32 %v7515_v39, %v7513_v51  ;;  %v2437_v42 = vshrl.u32 %v15635_v2, 16  ;;  %v7537_v39 = vrot.slane %v7535_v27, 1 }
 0x1c8   : > { %13118 = vmatprep.mubr.bf16.mxu1 %v7498_v40  ;;  %12587 = vmatpush3.bf16.msra.mxu0 %v14418_v63  ;;  %v7523_v63 = vshrl.u32 %v15603_v10, 16 }
 0x1c9   : > { %13163 = vmatpush3.bf16.msra.mxu1 %v14420_v1  ;;  %12588 = vmatprep.subr.bf16.mxu0 %v14425_v28  ;;  %v2419_v1 = vrot.slane %v2417_v44, 1  ;;  %v7522_v30 = vsel %vm398_vm0, %v7517_v6, %v7521_v3  ;;  %v7539_v44 = vshrl.u32 %v15639_v5, 16 }
 0x1ca   : > { %13164 = vmatprep.subr.bf16.mxu1 %v14426_v25  ;;  %v7525_v40 = vor.u32 %v7523_v63, %v7521_v3  ;;  %v15666_v63 = vld [vmem:[%s14704_s11 + $0x94] sm:$0xff]   ;;  %v2449_v3 = vshll.u32 %v15660_v38, 16 }
 0x1cb   : > { %v2423_v9 = vor.u32 %v2421_v29, %v2419_v1  ;;  %v2420_v31 = vsel %vm398_vm0, %v2415_v4, %v2419_v1  ;;  %v15663_v29 = vld [vmem:[%s14704_s11 + $0x16c] sm:$0xff]   ;;  %16569 = vst [vmem:[#allocation3_spill] sm:$0xff] %v15666_v63  ;;  %v7541_v0 = vor.u32 %v7539_v44, %v7537_v39  ;;  %v15669_v4 = vld [vmem:[%s14704_s11 + $0x174] sm:$0xff]   ;;  %v15687_v44 = vld [vmem:[%s14704_s11 + $0x17c] sm:$0xff]  }
 0x1cc   : > { %12589 = vmatpush3.bf16.msra.mxu0 %v14425_v28  ;;  %v2433_v28 = vshll.u32 %v15635_v2, 16  ;;  %v7530_v51 = vsel %vm398_vm0, %v7525_v40, %v7529_v19  ;;  %16568 = vst [vmem:[#allocation2_spill] sm:$0xff] %v15663_v29  ;;  %16570 = vst [vmem:[#allocation4_spill] sm:$0xff] %v15669_v4  ;;  %v7551_v40 = vshll.u32 %v15663_v29, 16  ;;  %v7555_v27 = vshrl.u32 %v15663_v29, 16 }
 0x1cd   : > { %13165 = vmatpush3.bf16.msra.mxu1 %v14426_v25  ;;  %12638 = vmatprep.subr.bf16.mxu0 %v15614_v55  ;;  %v2429_v25 = vshrl.u32 %v15606_v46, 16  ;;  %v2428_v18 = vsel %vm398_vm0, %v2423_v9, %v2427_v17  ;;  %16572 = vst [vmem:[#allocation6_spill] sm:$0xff] %v15687_v44 }
 0x1ce   : > { %12543 = vmatmul.mubr.bf16.gmra.mrb[16].mxu0 %v2404_v14  ;;  %13214 = vmatprep.subr.bf16.mxu1 %v15620_v47  ;;  %v7543_v14 = vshll.u32 %v15645_v24, 16 }
 0x1cf   : > { %13119 = vmatmul.mubr.bf16.gmra.mrb[16].mxu1 %v7506_v23  ;;  %12546 = vmatprep.mubr.bf16.mxu0 %v2412_v11  ;;  %v2435_v23 = vrot.slane %v2433_v28, 1  ;;  %v2431_v52 = vor.u32 %v2429_v25, %v2427_v17  ;;  %v7533_v11 = vor.u32 %v7531_v26, %v7529_v19  ;;  %v2445_v17 = vshrl.u32 %v15642_v60, 16 }
 0x1d0   : > { %13122 = vmatprep.mubr.bf16.mxu1 %v7514_v59  ;;  %v2443_v59 = vrot.slane %v2441_v43, 1  ;;  %v7545_v1 = vrot.slane %v7543_v14, 1  ;;  %v7547_v28 = vshrl.u32 %v15645_v24, 16  ;;  %v2457_v25 = vshll.u32 %v15666_v63, 16 }
 0x1d1   : > { %v2439_v56 = vor.u32 %v2437_v42, %v2435_v23  ;;  %v2436_v6 = vsel %vm398_vm0, %v2431_v52, %v2435_v23  ;;  %v7538_v9 = vsel %vm398_vm0, %v7533_v11, %v7537_v39  ;;  %v15684_v42 = vld [vmem:[%s14704_s11 + $0x9c] sm:$0xff]   ;;  %v15690_v11 = vld [vmem:[%s14704_s11 + $0xa4] sm:$0xff]  }
 0x1d2   : > { %v7546_v26 = vsel %vm398_vm0, %v7541_v0, %v7545_v1  ;;  %16571 = vst [vmem:[#allocation5_spill] sm:$0xff] %v15684_v42  ;;  %v2447_v43 = vor.u32 %v2445_v17, %v2443_v59  ;;  %v7549_v14 = vor.u32 %v7547_v28, %v7545_v1  ;;  %v2459_v52 = vrot.slane %v2457_v25, 1  ;;  %16573 = vst [vmem:[#allocation7_spill] sm:$0xff] %v15690_v11  ;;  %v15693_v0 = vld [vmem:[%s14704_s11 + $0x184] sm:$0xff]  }
 0x1d3   : > { %v2444_v19 = vsel %vm398_vm0, %v2439_v56, %v2443_v59  ;;  %16574 = vst [vmem:[#allocation8_spill] sm:$0xff] %v15693_v0  ;;  %v2461_v59 = vshrl.u32 %v15666_v63, 16  ;;  %v7567_v17 = vshll.u32 %v15687_v44, 16  ;;  %v2473_v28 = vshll.u32 %v15690_v11, 16  ;;  %v15717_v63 = vld [vmem:[%s14704_s11 + $0x194] sm:$0xff]  }
 0x1d4   : > { %v7571_v25 = vshrl.u32 %v15687_v44, 16  ;;  %16578 = vst [vmem:[#allocation12_spill] sm:$0xff] %v15717_v63 }
 0x1d6   : > { %12547 = vmatmul.mubr.bf16.gmra.mrb[20].mxu0 %v2420_v31  ;;  %v2453_v31 = vshrl.u32 %v15660_v38, 16 }
 0x1d7   : > { %13123 = vmatmul.mubr.bf16.gmra.mrb[20].mxu1 %v7522_v30  ;;  %12550 = vmatprep.mubr.bf16.mxu0 %v2428_v18  ;;  %v7559_v30 = vshll.u32 %v15669_v4, 16  ;;  %v2451_v18 = vrot.slane %v2449_v3, 1  ;;  %v2465_v3 = vshll.u32 %v15684_v42, 16 }
 0x1d8   : > { %13126 = vmatprep.mubr.bf16.mxu1 %v7530_v51  ;;  %v7553_v51 = vrot.slane %v7551_v40, 1 }
 0x1d9   : > { %v2455_v23 = vor.u32 %v2453_v31, %v2451_v18  ;;  %v7561_v56 = vrot.slane %v7559_v30, 1  ;;  %v15708_v30 = vld [vmem:[%s14704_s11 + $0xac] sm:$0xff]  }
 0x1da   : > { %v7557_v39 = vor.u32 %v7555_v27, %v7553_v51  ;;  %v7554_v1 = vsel %vm398_vm0, %v7549_v14, %v7553_v51  ;;  %v2467_v27 = vrot.slane %v2465_v3, 1  ;;  %16575 = vst [vmem:[#allocation9_spill] sm:$0xff] %v15708_v30  ;;  %v7569_v51 = vrot.slane %v7567_v17, 1  ;;  %v15711_v14 = vld [vmem:[%s14704_s11 + $0x18c] sm:$0xff]  }
 0x1db   : > { %v2460_v40 = vsel %vm398_vm0, %v2455_v23, %v2459_v52  ;;  %16576 = vst [vmem:[#allocation10_spill] sm:$0xff] %v15711_v14  ;;  %v2481_v3 = vshll.u32 %v15708_v30, 16  ;;  %v7579_v17 = vshrl.u32 %v15693_v0, 16 }
 0x1dc   : > { %v7562_v31 = vsel %vm398_vm0, %v7557_v39, %v7561_v56  ;;  %v15714_v39 = vld [vmem:[%s14704_s11 + $0xb4] sm:$0xff]   ;;  %v7573_v44 = vor.u32 %v7571_v25, %v7569_v51 }
 0x1dd   : > { %16577 = vst [vmem:[#allocation11_spill] sm:$0xff] %v15714_v39  ;;  %v2483_v25 = vrot.slane %v2481_v3, 1 }
 0x1de   : > { %12551 = vmatmul.mubr.bf16.gmra.mrb[24].mxu0 %v2436_v6  ;;  %v2452_v6 = vsel %vm398_vm0, %v2447_v43, %v2451_v18  ;;  %v2463_v18 = vor.u32 %v2461_v59, %v2459_v52  ;;  %v7583_v59 = vshll.u32 %v15711_v14, 16 }
 0x1df   : > { %13127 = vmatmul.mubr.bf16.gmra.mrb[24].mxu1 %v7538_v9  ;;  %12554 = vmatprep.mubr.bf16.mxu0 %v2444_v19  ;;  %v7563_v9 = vshrl.u32 %v15669_v4, 16  ;;  %v2469_v19 = vshrl.u32 %v15684_v42, 16  ;;  %v2475_v42 = vrot.slane %v2473_v28, 1  ;;  %v7587_v28 = vshrl.u32 %v15711_v14, 16 }
 0x1e0   : > { %13130 = vmatprep.mubr.bf16.mxu1 %v7546_v26  ;;  %v7575_v26 = vshll.u32 %v15693_v0, 16 }
 0x1e1   : > { %v7565_v43 = vor.u32 %v7563_v9, %v7561_v56  ;;  %v2471_v23 = vor.u32 %v2469_v19, %v2467_v27  ;;  %v2477_v56 = vshrl.u32 %v15690_v11, 16  ;;  %v15741_v11 = vld [vmem:[%s14704_s11 + $0x1a4] sm:$0xff]  }
 0x1e2   : > { %v7577_v4 = vrot.slane %v7575_v26, 1  ;;  %v15732_v26 = vld [vmem:[%s14704_s11 + $0xbc] sm:$0xff]  }
 0x1e3   : > { %v7570_v52 = vsel %vm398_vm0, %v7565_v43, %v7569_v51  ;;  %v2476_v9 = vsel %vm398_vm0, %v2471_v23, %v2475_v42  ;;  %16579 = vst [vmem:[#allocation13_spill] sm:$0xff] %v15732_v26  ;;  %v15735_v43 = vld [vmem:[%s14704_s11 + $0x19c] sm:$0xff]   ;;  %v2497_v3 = vshll.u32 %v15732_v26, 16 }
 0x1e4   : > { %v7578_v19 = vsel %vm398_vm0, %v7573_v44, %v7577_v4  ;;  %16580 = vst [vmem:[#allocation14_spill] sm:$0xff] %v15735_v43  ;;  %v7581_v51 = vor.u32 %v7579_v17, %v7577_v4  ;;  %v15738_v44 = vld [vmem:[%s14704_s11 + $0xc4] sm:$0xff]  }
 0x1e5   : > { %v2505_v17 = vshll.u32 %v15738_v44, 16 }
 0x1e6   : > { %12555 = vmatmul.mubr.bf16.gmra.mrb[28].mxu0 %v2452_v6  ;;  %v2468_v6 = vsel %vm398_vm0, %v2463_v18, %v2467_v27  ;;  %v2479_v27 = vor.u32 %v2477_v56, %v2475_v42  ;;  %v7585_v18 = vrot.slane %v7583_v59, 1  ;;  %v7595_v42 = vshrl.u32 %v15717_v63, 16 }
 0x1e7   : > { %13131 = vmatmul.mubr.bf16.gmra.mrb[28].mxu1 %v7554_v1  ;;  %12558 = vmatprep.mubr.bf16.mxu0 %v2460_v40  ;;  %v2485_v1 = vshrl.u32 %v15708_v30, 16  ;;  %v2489_v40 = vshll.u32 %v15714_v39, 16  ;;  %v7599_v56 = vshll.u32 %v15735_v43, 16 }
 0x1e8   : > { %13134 = vmatprep.mubr.bf16.mxu1 %v7562_v31  ;;  %v7591_v31 = vshll.u32 %v15717_v63, 16  ;;  %v7589_v14 = vor.u32 %v7587_v28, %v7585_v18  ;;  %v7586_v4 = vsel %vm398_vm0, %v7581_v51, %v7585_v18  ;;  %v2499_v28 = vrot.slane %v2497_v3, 1  ;;  %v15756_v18 = vld [vmem:[%s14704_s11 + $0xcc] ss:$0 sps:$4 sm:$0x11]  }
 0x1e9   : > { %v2487_v23 = vor.u32 %v2485_v1, %v2483_v25  ;;  %v2491_v30 = vrot.slane %v2489_v40, 1  ;;  %v7603_v40 = vshrl.u32 %v15735_v43, 16  ;;  %v2862_v63 = vld [vmem:[%s14704_s11 + $0xc] sm:$0xe] }
 0x1ea   : > { %v7593_v0 = vrot.slane %v7591_v31, 1 }
 0x1eb   : > { %v2492_v59 = vsel %vm398_vm0, %v2487_v23, %v2491_v30  ;;  %v2507_v23 = vrot.slane %v2505_v17, 1 }
 0x1ec   : > { %v7594_v1 = vsel %vm398_vm0, %v7589_v14, %v7593_v0 }
 0x1ee   : > { %12559 = vmatmul.mubr.bf16.gmra.mrb[32].mxu0 %v2468_v6  ;;  %v2484_v6 = vsel %vm398_vm0, %v2479_v27, %v2483_v25  ;;  %v7597_v25 = vor.u32 %v7595_v42, %v7593_v0  ;;  %v7601_v27 = vrot.slane %v7599_v56, 1  ;;  %v2513_v0 = vshll.u32 %v15756_v18, 16 }
 0x1ef   : > { %13135 = vmatmul.mubr.bf16.gmra.mrb[32].mxu1 %v7570_v52  ;;  %12562 = vmatprep.mubr.bf16.mxu0 %v2476_v9  ;;  %v2493_v52 = vshrl.u32 %v15714_v39, 16  ;;  %v2501_v9 = vshrl.u32 %v15732_v26, 16  ;;  %v15759_v26 = vld [vmem:[%s14704_s11 + $0x1ac] ss:$0 sps:$4 sm:$0x11]   ;;  %v10619_v56 = vcombine.low %v2862_v63, %v15412_v13 }
 0x1f0   : > { %13138 = vmatprep.mubr.bf16.mxu1 %v7578_v19  ;;  %v7607_v19 = vshll.u32 %v15741_v11, 16  ;;  %v7605_v14 = vor.u32 %v7603_v40, %v7601_v27  ;;  %v11012_v39 = vld [vmem:[%s14704_s11 + $0xec] sm:$0xe]  ;;  %v7602_v3 = vsel %vm398_vm0, %v7597_v25, %v7601_v27  ;;  %v7615_v42 = vshll.u32 %v15759_v26, 16 }
 0x1f1   : > { %v2495_v31 = vor.u32 %v2493_v52, %v2491_v30  ;;  %v2503_v51 = vor.u32 %v2501_v9, %v2499_v28  ;;  %v7611_v52 = vshrl.u32 %v15741_v11, 16  ;;  %v2515_v17 = vrot.slane %v2513_v0, 1 }
 0x1f2   : > { %v7609_v43 = vrot.slane %v7607_v19, 1  ;;  %v7617_v40 = vrot.slane %v7615_v42, 1  ;;  %v2882_v19 = vrot.slane %v10619_v56, 1  ;;  %v7985_v25 = vrot.slane %v15427_v34, 1 }
 0x1f3   : > { %v2500_v29 = vsel %vm398_vm0, %v2495_v31, %v2499_v28  ;;  %v2508_v30 = vsel %vm398_vm0, %v2503_v51, %v2507_v23  ;;  %v2883_v28 = vrot.slane %v15424_v33, 1  ;;  %v2887_v33 = vrot.slane %v15442_v57, 1 }
 0x1f4   : > { %v7989_v34 = vrot.slane %v15446_v61, 1  ;;  %v2889_v57 = vrot.slane %v15460_v15, 1  ;;  %v7991_v61 = vrot.slane %v15463_v20, 1  ;;  %v7993_v0 = vrot.slane %v15469_v21, 1  ;;  %v14439_v21 = vld [vmem:[%s16541_s1 + $0x198] sm:$0xff]  }
 0x1f5   : > { %v7995_v42 = vrot.slane %v15494_v48, 1  ;;  %v2895_v56 = vrot.slane %v15498_v49, 1 }
 0x1f6   : > { %12563 = vmatmul.mubr.bf16.gmra.mrb[36].mxu0 %v2484_v6  ;;  %v2509_v6 = vshrl.u32 %v15738_v44, 16  ;;  %v2890_v15 = vsel %vm1209_vm1, %v2887_v33, %v2889_v57  ;;  %v7992_v20 = vsel %vm1209_vm1, %v7989_v34, %v7991_v61 }
 0x1f7   : > { %13139 = vmatmul.mubr.bf16.gmra.mrb[36].mxu1 %v7586_v4  ;;  %12566 = vmatprep.mubr.bf16.mxu0 %v2492_v59  ;;  %v7610_v4 = vsel %vm398_vm0, %v7605_v14, %v7609_v43  ;;  %v11013_v59 = vcombine.low %v11012_v39, %v15416_v22  ;;  %v2884_v22 = vsel %vm1209_vm1, %v2882_v19, %v2883_v28  ;;  %v2885_v39 = vrot.slane %v15436_v58, 1  ;;  %v14435_v14 = vld [vmem:[%s16541_s1 + $0x188] sm:$0xff]  }
 0x1f8   : > { %13142 = vmatprep.mubr.bf16.mxu1 %v7594_v1  ;;  %v2511_v9 = vor.u32 %v2509_v6, %v2507_v23  ;;  %v7613_v1 = vor.u32 %v7611_v52, %v7609_v43  ;;  %v7987_v43 = vrot.slane %v15439_v37, 1  ;;  %v14436_v37 = vld [vmem:[%s16541_s1 + $0x188] sm:$0xff]   ;;  %v14437_v6 = vld [vmem:[%s16541_s1 + $0x190] sm:$0xff]   ;;  %v2893_v52 = vrot.slane %v15490_v35, 1 }
 0x1f9   : > { %v7984_v31 = vrot.slane %v11013_v59, 1  ;;  %v2886_v27 = vsel %vm1209_vm1, %v2883_v28, %v2885_v39  ;;  %v2888_v23 = vsel %vm1209_vm1, %v2885_v39, %v2887_v33  ;;  %v14441_v59 = vld [vmem:[%s16541_s1 + $0x1a0] sm:$0xff]   ;;  %v7996_v48 = vsel %vm1209_vm1, %v7993_v0, %v7995_v42 }
 0x1fa   : > { %v2516_v13 = vsel %vm398_vm0, %v2511_v9, %v2515_v17  ;;  %v7618_v63 = vsel %vm398_vm0, %v7613_v1, %v7617_v40  ;;  %v7988_v51 = vsel %vm1209_vm1, %v7985_v25, %v7987_v43  ;;  %v7990_v58 = vsel %vm1209_vm1, %v7987_v43, %v7989_v34  ;;  %v14442_v9 = vld [vmem:[%s16541_s1 + $0x1a0] sm:$0xff]   ;;  %v14443_v17 = vld [vmem:[%s16541_s1 + $0x1a8] sm:$0xff]  }
 0x1fb   : > { %v2896_v49 = vsel %vm1209_vm1, %v2893_v52, %v2895_v56  ;;  %v14444_v1 = vld [vmem:[%s16541_s1 + $0x1a8] sm:$0xff]   ;;  %v2897_v40 = vrot.slane %v15525_v7, 1  ;;  %v7999_v19 = vrot.slane %v15531_v12, 1  ;;  %v2899_v28 = vrot.slane %v15534_v41, 1  ;;  %v15862_v34 = vld [vmem:[%s16541_s1 + $0x1c0] sm:$0xff]  }
 0x1fc   : > { %v8003_v39 = vrot.slane %v15567_v8, 1  ;;  %v2903_v43 = vrot.slane %v15570_v53, 1  ;;  %v8005_v33 = vrot.slane %v15573_v62, 1 }
 0x1fd   : > { %v2898_v7 = vsel %vm1209_vm1, %v2895_v56, %v2897_v40  ;;  %v2900_v41 = vsel %vm1209_vm1, %v2897_v40, %v2899_v28  ;;  %v16584_v56 = vld [vmem:[#allocation5_spill] sm:$0xff] }
 0x1fe   : > { %12567 = vmatmul.mubr.bf16.gmra.mrb[40].mxu0 %v2500_v29  ;;  %v7986_v29 = vsel %vm1209_vm1, %v7984_v31, %v7985_v25  ;;  %v8001_v31 = vrot.slane %v15537_v45, 1  ;;  %v14445_v25 = vld [vmem:[%s16541_s1 + $0x1b0] sm:$0xff]   ;;  %v8006_v62 = vsel %vm1209_vm1, %v8003_v39, %v8005_v33 }
 0x1ff   : > { %13143 = vmatmul.mubr.bf16.gmra.mrb[40].mxu1 %v7602_v3  ;;  %12570 = vmatprep.mubr.bf16.mxu0 %v2508_v30  ;;  %v2891_v3 = vrot.slane %v15466_v16, 1  ;;  %v14440_v30 = vld [vmem:[%s16541_s1 + $0x198] sm:$0xff]  }
 0x200   : > { %13146 = vmatprep.mubr.bf16.mxu1 %v7610_v4  ;;  %v7997_v4 = vrot.slane %v15504_v54, 1  ;;  %v8002_v45 = vsel %vm1209_vm1, %v7999_v19, %v8001_v31  ;;  %v8004_v53 = vsel %vm1209_vm1, %v8001_v31, %v8003_v39  ;;  %v16589_v31 = vld [vmem:[#allocation10_spill] sm:$0xff]  ;;  %v16592_v39 = vld [vmem:[#allocation13_spill] sm:$0xff] }
 0x201   : > { %v2892_v16 = vsel %vm1209_vm1, %v2889_v57, %v2891_v3  ;;  %v2894_v35 = vsel %vm1209_vm1, %v2891_v3, %v2893_v52 }
 0x202   : > { %v7998_v54 = vsel %vm1209_vm1, %v7995_v42, %v7997_v4  ;;  %v8000_v12 = vsel %vm1209_vm1, %v7997_v4, %v7999_v19  ;;  %v16585_v4 = vld [vmem:[#allocation6_spill] sm:$0xff]  ;;  %v16588_v19 = vld [vmem:[#allocation9_spill] sm:$0xff] }
 0x206   : > { %12571 = vmatmul.mubr.bf16.gmra.mrb[44].mxu0 %v2516_v13  ;;  %v14446_v13 = vld [vmem:[%s16541_s1 + $0x1b0] sm:$0xff]  }
 0x207   : > { %13147 = vmatmul.mubr.bf16.gmra.mrb[44].mxu1 %v7618_v63  ;;  %12590 = vmatprep.mubr.bf16.mxu0 %v2884_v22  ;;  %v14447_v63 = vld [vmem:[%s16541_s1 + $0x1b8] sm:$0xff]  }
 0x208   : > { %13166 = vmatprep.mubr.bf16.mxu1 %v7986_v29  ;;  %v14448_v22 = vld [vmem:[%s16541_s1 + $0x1b8] sm:$0xff]   ;;  %v2901_v29 = vrot.slane %v15561_v36, 1  ;;  %v15867_v36 = vld [vmem:[%s16541_s1 + $0x1c0] sm:$0xff]  }
 0x20a   : > { %v2902_v8 = vsel %vm1209_vm1, %v2899_v28, %v2901_v29  ;;  %v2921_v28 = vrot.slane %v16588_v19, 1  ;;  %v14479_v19 = vld [vmem:[%s14704_s11 + $0x70] sm:$0xff]  }
 0x20e   : > { %12591 = vmatmul.mubr.bf16.vlgmr.msra.gmra.mrb[0].mxu0 %v2886_v27  ;;  %v2904_v27 = vsel %vm1209_vm1, %v2901_v29, %v2903_v43 }
 0x20f   : > { %13167 = vmatmul.mubr.bf16.vlgmr.msra.gmra.mrb[0].mxu1 %v7988_v51  ;;  %12639 = vmatpush3.bf16.msra.mxu0 %v15614_v55  ;;  %v14438_v55 = vld [vmem:[%s16541_s1 + $0x190] sm:$0xff]   ;;  %v2905_v51 = vrot.slane %v15597_v50, 1  ;;  %v2909_v50 = vrot.slane %v15635_v2, 1  ;;  %v2913_v2 = vrot.slane %v15660_v38, 1  ;;  %v2917_v38 = vrot.slane %v16584_v56, 1 }
 0x210   : > { %13215 = vmatpush3.bf16.msra.mxu1 %v15620_v47  ;;  %12594 = vmatprep.mubr.bf16.mxu0 %v2888_v23  ;;  %v7994_v47 = vsel %vm1209_vm1, %v7991_v61, %v7993_v0  ;;  %v8007_v23 = vrot.slane %v15603_v10, 1  ;;  %v8011_v10 = vrot.slane %v15639_v5, 1  ;;  %v14502_v56 = vld [vmem:[%s16541_s1 + $0x1f0] sm:$0xff]  }
 0x211   : > { %13170 = vmatprep.mubr.bf16.mxu1 %v7990_v58  ;;  %12640 = vmatprep.subr.bf16.mxu0 %v14435_v14  ;;  %v8009_v58 = vrot.slane %v15609_v32, 1  ;;  %v8013_v32 = vrot.slane %v15645_v24, 1 }
 0x212   : > { %13216 = vmatprep.subr.bf16.mxu1 %v14436_v37  ;;  %v8008_v57 = vsel %vm1209_vm1, %v8005_v33, %v8007_v23  ;;  %v16593_v33 = vld [vmem:[#allocation14_spill] sm:$0xff] }
 0x213   : > { %12641 = vmatpush3.bf16.msra.mxu0 %v14435_v14  ;;  %v2907_v14 = vrot.slane %v15606_v46, 1  ;;  %v8010_v3 = vsel %vm1209_vm1, %v8007_v23, %v8009_v58  ;;  %v2911_v46 = vrot.slane %v15642_v60, 1  ;;  %v8012_v0 = vsel %vm1209_vm1, %v8009_v58, %v8011_v10 }
 0x214   : > { %13217 = vmatpush3.bf16.msra.mxu1 %v14436_v37  ;;  %12642 = vmatprep.subr.bf16.mxu0 %v14437_v6  ;;  %v2906_v37 = vsel %vm1209_vm1, %v2903_v43, %v2905_v51  ;;  %v2925_v43 = vrot.slane %v16592_v39, 1  ;;  %v2929_v58 = vrot.slane %v15756_v18, 1  ;;  %v14460_v18 = vld [vmem:[%s16541_s1 + $0x1c8] sm:$0xff]   ;;  %v14495_v39 = vld [vmem:[%s14704_s11 + $0xa0] sm:$0xff]  }
 0x215   : > { %13218 = vmatprep.subr.bf16.mxu1 %v14438_v55  ;;  %v2908_v61 = vsel %vm1209_vm1, %v2905_v51, %v2907_v14 }
 0x216   : > { %12595 = vmatmul.mubr.bf16.gmra.mrb[4].mxu0 %v2890_v15  ;;  %v8014_v15 = vsel %vm1209_vm1, %v8011_v10, %v8013_v32  ;;  %v14455_v10 = vld [vmem:[%s14704_s11 + $0x28] sm:$0xff]  }
 0x217   : > { %13171 = vmatmul.mubr.bf16.gmra.mrb[4].mxu1 %v7992_v20  ;;  %12598 = vmatprep.mubr.bf16.mxu0 %v2892_v16  ;;  %v16581_v20 = vld [vmem:[#allocation2_spill] sm:$0xff]  ;;  %v16582_v16 = vld [vmem:[#allocation3_spill] sm:$0xff] }
 0x218   : > { %13174 = vmatprep.mubr.bf16.mxu1 %v7994_v47  ;;  %12643 = vmatpush3.bf16.msra.mxu0 %v14437_v6  ;;  %v2910_v6 = vsel %vm1209_vm1, %v2907_v14, %v2909_v50  ;;  %v8015_v5 = vrot.slane %v16581_v20, 1  ;;  %v2915_v60 = vrot.slane %v16582_v16, 1  ;;  %v16583_v47 = vld [vmem:[#allocation4_spill] sm:$0xff]  ;;  %v14484_v20 = vld [vmem:[%s16541_s1 + $0x1e0] sm:$0xff]  }
 0x219   : > { %13219 = vmatpush3.bf16.msra.mxu1 %v14438_v55  ;;  %12644 = vmatprep.subr.bf16.mxu0 %v14439_v21  ;;  %v2912_v55 = vsel %vm1209_vm1, %v2909_v50, %v2911_v46  ;;  %v8017_v24 = vrot.slane %v16583_v47, 1  ;;  %v14453_v50 = vld [vmem:[%s14704_s11 + $0x100] sm:$0xff]   ;;  %v14465_v47 = vld [vmem:[%s14704_s11 + $0x48] sm:$0xff]  }
 0x21a   : > { %13220 = vmatprep.subr.bf16.mxu1 %v14440_v30  ;;  %v2916_v52 = vsel %vm1209_vm1, %v2913_v2, %v2915_v60  ;;  %v14486_v16 = vld [vmem:[%s16541_s1 + $0x1e0] sm:$0xff]  }
 0x21b   : > { %v8018_v42 = vsel %vm1209_vm1, %v8015_v5, %v8017_v24 }
 0x21c   : > { %12645 = vmatpush3.bf16.msra.mxu0 %v14439_v21  ;;  %v2914_v21 = vsel %vm1209_vm1, %v2911_v46, %v2913_v2  ;;  %v14456_v46 = vld [vmem:[%s14704_s11 + $0x108] sm:$0xff]   ;;  %v14476_v2 = vld [vmem:[%s16541_s1 + $0x1d8] sm:$0xff]  }
 0x21d   : > { %13221 = vmatpush3.bf16.msra.mxu1 %v14440_v30  ;;  %12646 = vmatprep.subr.bf16.mxu0 %v14441_v59  ;;  %v8016_v30 = vsel %vm1209_vm1, %v8013_v32, %v8015_v5  ;;  %v14468_v32 = vld [vmem:[%s16541_s1 + $0x1d0] sm:$0xff]   ;;  %v14463_v5 = vld [vmem:[%s14704_s11 + $0x40] sm:$0xff]  }
 0x21e   : > { %12599 = vmatmul.mubr.bf16.gmra.mrb[8].mxu0 %v2894_v35  ;;  %13222 = vmatprep.subr.bf16.mxu1 %v14442_v9 }
 0x21f   : > { %13175 = vmatmul.mubr.bf16.gmra.mrb[8].mxu1 %v7996_v48  ;;  %12602 = vmatprep.mubr.bf16.mxu0 %v2896_v49  ;;  %v16587_v48 = vld [vmem:[#allocation8_spill] sm:$0xff] }
 0x220   : > { %13178 = vmatprep.mubr.bf16.mxu1 %v7998_v54  ;;  %12647 = vmatpush3.bf16.msra.mxu0 %v14441_v59  ;;  %v8019_v59 = vrot.slane %v16585_v4, 1  ;;  %v8021_v49 = vrot.slane %v16587_v48, 1  ;;  %v2918_v54 = vsel %vm1209_vm1, %v2915_v60, %v2917_v38  ;;  %v14464_v60 = vld [vmem:[%s14704_s11 + $0x120] sm:$0xff]   ;;  %v14471_v4 = vld [vmem:[%s14704_s11 + $0x58] sm:$0xff]  }
 0x221   : > { %13223 = vmatpush3.bf16.msra.mxu1 %v14442_v9  ;;  %12648 = vmatprep.subr.bf16.mxu0 %v14443_v17  ;;  %v16586_v9 = vld [vmem:[#allocation7_spill] sm:$0xff]  ;;  %v15992_v48 = vld [vmem:[%s16541_s1 + $0x200] sm:$0xff]  }
 0x222   : > { %13224 = vmatprep.subr.bf16.mxu1 %v14444_v1  ;;  %v2919_v35 = vrot.slane %v16586_v9, 1  ;;  %v8022_v40 = vsel %vm1209_vm1, %v8019_v59, %v8021_v49  ;;  %v14507_v9 = vld [vmem:[%s16541_s1 + $0x1f8] sm:$0xff]  }
 0x224   : > { %12649 = vmatpush3.bf16.msra.mxu0 %v14443_v17  ;;  %v8020_v17 = vsel %vm1209_vm1, %v8017_v24, %v8019_v59  ;;  %v14466_v24 = vld [vmem:[%s14704_s11 + $0x128] sm:$0xff]   ;;  %v14472_v59 = vld [vmem:[%s14704_s11 + $0x138] sm:$0xff]  }
 0x225   : > { %13225 = vmatpush3.bf16.msra.mxu1 %v14444_v1  ;;  %12650 = vmatprep.subr.bf16.mxu0 %v14445_v25  ;;  %v2920_v1 = vsel %vm1209_vm1, %v2917_v38, %v2919_v35  ;;  %v14469_v38 = vld [vmem:[%s14704_s11 + $0x130] sm:$0xff]  }
 0x226   : > { %12603 = vmatmul.mubr.bf16.gmra.mrb[12].mxu0 %v2898_v7  ;;  %13226 = vmatprep.subr.bf16.mxu1 %v14446_v13 }
 0x227   : > { %13179 = vmatmul.mubr.bf16.gmra.mrb[12].mxu1 %v8000_v12  ;;  %12606 = vmatprep.mubr.bf16.mxu0 %v2900_v41  ;;  %v16591_v12 = vld [vmem:[#allocation12_spill] sm:$0xff] }
 0x228   : > { %13182 = vmatprep.mubr.bf16.mxu1 %v8002_v45  ;;  %12651 = vmatpush3.bf16.msra.mxu0 %v14445_v25  ;;  %v8023_v25 = vrot.slane %v16589_v31, 1  ;;  %v8025_v41 = vrot.slane %v16591_v12, 1  ;;  %v2922_v45 = vsel %vm1209_vm1, %v2919_v35, %v2921_v28  ;;  %v14508_v35 = vld [vmem:[%s16541_s1 + $0x1f8] sm:$0xff]   ;;  %v14487_v12 = vld [vmem:[%s14704_s11 + $0x88] sm:$0xff]  }
 0x229   : > { %13227 = vmatpush3.bf16.msra.mxu1 %v14446_v13  ;;  %12652 = vmatprep.subr.bf16.mxu0 %v14447_v63  ;;  %v16590_v13 = vld [vmem:[#allocation11_spill] sm:$0xff]  ;;  %v14481_v31 = vld [vmem:[%s14704_s11 + $0x78] sm:$0xff]  }
 0x22a   : > { %13228 = vmatprep.subr.bf16.mxu1 %v14448_v22  ;;  %v2923_v7 = vrot.slane %v16590_v13, 1  ;;  %v8026_v29 = vsel %vm1209_vm1, %v8023_v25, %v8025_v41  ;;  %v14483_v13 = vld [vmem:[%s14704_s11 + $0x80] sm:$0xff]  }
 0x22c   : > { %12653 = vmatpush3.bf16.msra.mxu0 %v14447_v63  ;;  %v8024_v63 = vsel %vm1209_vm1, %v8021_v49, %v8023_v25  ;;  %v14473_v49 = vld [vmem:[%s14704_s11 + $0x60] sm:$0xff]   ;;  %v14482_v25 = vld [vmem:[%s14704_s11 + $0x158] sm:$0xff]  }
 0x22d   : > { %13229 = vmatpush3.bf16.msra.mxu1 %v14448_v22  ;;  %12702 = vmatprep.subr.bf16.mxu0 %v15862_v34  ;;  %v2924_v22 = vsel %vm1209_vm1, %v2921_v28, %v2923_v7  ;;  %v14480_v28 = vld [vmem:[%s14704_s11 + $0x150] sm:$0xff]  }
 0x22e   : > { %12607 = vmatmul.mubr.bf16.gmra.mrb[16].mxu0 %v2902_v8  ;;  %13278 = vmatprep.subr.bf16.mxu1 %v15867_v36  ;;  %v8027_v8 = vrot.slane %v16593_v33, 1  ;;  %v14497_v33 = vld [vmem:[%s14704_s11 + $0xa8] sm:$0xff]  }
 0x22f   : > { %13183 = vmatmul.mubr.bf16.gmra.mrb[16].mxu1 %v8004_v53  ;;  %12610 = vmatprep.mubr.bf16.mxu0 %v2904_v27  ;;  %v2927_v53 = vrot.slane %v15738_v44, 1  ;;  %v8029_v27 = vrot.slane %v15741_v11, 1  ;;  %v8031_v11 = vrot.slane %v15759_v26, 1  ;;  %v14459_v26 = vld [vmem:[%s16541_s1 + $0x1c8] sm:$0xff]  }
 0x230   : > { %13186 = vmatprep.mubr.bf16.mxu1 %v8006_v62  ;;  %v2926_v62 = vsel %vm1209_vm1, %v2923_v7, %v2925_v43  ;;  %v8028_v51 = vsel %vm1209_vm1, %v8025_v41, %v8027_v8  ;;  %v14485_v7 = vld [vmem:[%s14704_s11 + $0x160] sm:$0xff]   ;;  %v14488_v41 = vld [vmem:[%s14704_s11 + $0x168] sm:$0xff]  }
 0x231   : > { %v2928_v23 = vsel %vm1209_vm1, %v2925_v43, %v2927_v53  ;;  %v8030_v14 = vsel %vm1209_vm1, %v8027_v8, %v8029_v27  ;;  %v2930_v44 = vsel %vm1209_vm1, %v2927_v53, %v2929_v58  ;;  %v14496_v43 = vld [vmem:[%s14704_s11 + $0x180] sm:$0xff]   ;;  %v14498_v8 = vld [vmem:[%s14704_s11 + $0x188] sm:$0xff]   ;;  %v3805_v53 = vld [vmem:[%s14704_s11 + $0x18] sm:$0xf] }
 0x232   : > { %v14503_v58 = vld [vmem:[%s14704_s11 + $0xb8] sm:$0xff]  }
 0x236   : > { %12611 = vmatmul.mubr.bf16.gmra.mrb[20].mxu0 %v2906_v37  ;;  %v14449_v37 = vld [vmem:[%s14704_s11 + $0x18] sm:$0xff]  }
 0x237   : > { %13187 = vmatmul.mubr.bf16.gmra.mrb[20].mxu1 %v8008_v57  ;;  %12614 = vmatprep.mubr.bf16.mxu0 %v2908_v61  ;;  %v8032_v57 = vsel %vm1209_vm1, %v8029_v27, %v8031_v11  ;;  %v14450_v61 = vld [vmem:[%s14704_s11 + $0xf8] sm:$0xff]  }
 0x238   : > { %13190 = vmatprep.mubr.bf16.mxu1 %v8010_v3  ;;  %v14451_v3 = vld [vmem:[%s14704_s11 + $0x20] sm:$0xff]   ;;  %v16023_v27 = vld [vmem:[%s14704_s11 + $0x1c] sm:$0xf] }
 0x239   : > { %v14504_v11 = vld [vmem:[%s14704_s11 + $0x198] sm:$0xff]  }
 0x23e   : > { %12615 = vmatmul.mubr.bf16.gmra.mrb[24].mxu0 %v2910_v6  ;;  %v14470_v6 = vld [vmem:[%s16541_s1 + $0x1d0] sm:$0xff]  }
 0x23f   : > { %13191 = vmatmul.mubr.bf16.gmra.mrb[24].mxu1 %v8012_v0  ;;  %12618 = vmatprep.mubr.bf16.mxu0 %v2912_v55  ;;  %v14457_v0 = vld [vmem:[%s14704_s11 + $0x30] sm:$0xff]  }
 0x240   : > { %13194 = vmatprep.mubr.bf16.mxu1 %v8014_v15  ;;  %v14458_v55 = vld [vmem:[%s14704_s11 + $0x110] sm:$0xff]   ;;  %v14461_v15 = vld [vmem:[%s14704_s11 + $0x38] sm:$0xff]  }
 0x246   : > { %12619 = vmatmul.mubr.bf16.gmra.mrb[28].mxu0 %v2914_v21  ;;  %v14491_v21 = vld [vmem:[%s16541_s1 + $0x1e8] sm:$0xff]  }
 0x247   : > { %13195 = vmatmul.mubr.bf16.gmra.mrb[28].mxu1 %v8016_v30  ;;  %12622 = vmatprep.mubr.bf16.mxu0 %v2916_v52  ;;  %v14492_v30 = vld [vmem:[%s16541_s1 + $0x1e8] sm:$0xff]   ;;  %v14500_v52 = vld [vmem:[%s16541_s1 + $0x1f0] sm:$0xff]  }
 0x248   : > { %13198 = vmatprep.mubr.bf16.mxu1 %v8018_v42  ;;  %v14467_v42 = vld [vmem:[%s14704_s11 + $0x50] sm:$0xff]  }
 0x24e   : > { %12623 = vmatmul.mubr.bf16.gmra.mrb[32].mxu0 %v2918_v54  ;;  %v15998_v54 = vld [vmem:[%s16541_s1 + $0x200] sm:$0xff]  }
 0x24f   : > { %13199 = vmatmul.mubr.bf16.gmra.mrb[32].mxu1 %v8020_v17  ;;  %12626 = vmatprep.mubr.bf16.mxu0 %v2920_v1  ;;  %v14474_v17 = vld [vmem:[%s14704_s11 + $0x140] sm:$0xff]   ;;  %v14477_v1 = vld [vmem:[%s14704_s11 + $0x68] sm:$0xff]  }
 0x250   : > { %13202 = vmatprep.mubr.bf16.mxu1 %v8022_v40  ;;  %v14478_v40 = vld [vmem:[%s14704_s11 + $0x148] sm:$0xff]  }
 0x256   : > { %12627 = vmatmul.mubr.bf16.gmra.mrb[36].mxu0 %v2922_v45  ;;  %v14489_v45 = vld [vmem:[%s14704_s11 + $0x90] sm:$0xff]  }
 0x257   : > { %13203 = vmatmul.mubr.bf16.gmra.mrb[36].mxu1 %v8024_v63  ;;  %12630 = vmatprep.mubr.bf16.mxu0 %v2924_v22  ;;  %v14490_v63 = vld [vmem:[%s14704_s11 + $0x170] sm:$0xff]   ;;  %v14493_v22 = vld [vmem:[%s14704_s11 + $0x98] sm:$0xff]  }
 0x258   : > { %13206 = vmatprep.mubr.bf16.mxu1 %v8026_v29  ;;  %v14494_v29 = vld [vmem:[%s14704_s11 + $0x178] sm:$0xff]  }
 0x25e   : > { %12631 = vmatmul.mubr.bf16.gmra.mrb[40].mxu0 %v2926_v62  ;;  %v14499_v62 = vld [vmem:[%s14704_s11 + $0xb0] sm:$0xff]  }
 0x25f   : > { %13207 = vmatmul.mubr.bf16.gmra.mrb[40].mxu1 %v8028_v51  ;;  %12634 = vmatprep.mubr.bf16.mxu0 %v2928_v23  ;;  %v11102_v51 = vld [vmem:[%s14704_s11 + $0xf8] sm:$0xf]  ;;  %v16028_v23 = vld [vmem:[%s14704_s11 + $0xfc] sm:$0xf] }
 0x260   : > { %13210 = vmatprep.mubr.bf16.mxu1 %v8030_v14  ;;  %v14501_v14 = vld [vmem:[%s14704_s11 + $0x190] sm:$0xff]  }
 0x266   : > { %12635 = vmatmul.mubr.bf16.gmra.mrb[44].mxu0 %v2930_v44  ;;  %v10660_v44 = vcombine.low %v3805_v53, %v16023_v27 }
 0x267   : > { %13211 = vmatmul.mubr.bf16.gmra.mrb[44].mxu1 %v8032_v57  ;;  %12654 = vmatprep.mubr.bf16.mxu0 %v14449_v37  ;;  %v11151_v37 = vcombine.low %v11102_v51, %v16028_v23  ;;  %v16036_v57 = vld [vmem:[%s14704_s11 + $0x20] sm:$0xff]  }
 0x268   : > { %13230 = vmatprep.mubr.bf16.mxu1 %v14450_v61  ;;  %v3996_v61 = vshll.u32 %v10660_v44, 16 }
 0x26e   : > { %12655 = vmatmul.mubr.bf16.vlgmr.msra.gmra.mrb[0].mxu0 %v14451_v3  ;;  %v16039_v3 = vld [vmem:[%s14704_s11 + $0x100] sm:$0xff]  }
 0x26f   : > { %13231 = vmatmul.mubr.bf16.vlgmr.msra.gmra.mrb[0].mxu1 %v14453_v50  ;;  %12703 = vmatpush3.bf16.msra.mxu0 %v15862_v34  ;;  %v14462_v34 = vld [vmem:[%s14704_s11 + $0x118] sm:$0xff]   ;;  %v9098_v50 = vshll.u32 %v11151_v37, 16 }
 0x270   : > { %13279 = vmatpush3.bf16.msra.mxu1 %v15867_v36  ;;  %12658 = vmatprep.mubr.bf16.mxu0 %v14455_v10  ;;  %v14475_v36 = vld [vmem:[%s16541_s1 + $0x1d8] sm:$0xff]   ;;  %v14505_v10 = vld [vmem:[%s14704_s11 + $0xc0] sm:$0xff]  }
 0x271   : > { %13234 = vmatprep.mubr.bf16.mxu1 %v14456_v46  ;;  %12704 = vmatprep.subr.bf16.mxu0 %v14459_v26  ;;  %v14506_v46 = vld [vmem:[%s14704_s11 + $0x1a0] sm:$0xff]  }
 0x272   : > { %13280 = vmatprep.subr.bf16.mxu1 %v14460_v18 }
 0x273   : > { %12705 = vmatpush3.bf16.msra.mxu0 %v14459_v26  ;;  %v14509_v26 = vld [vmem:[%s14704_s11 + $0xc8] sm:$0xff]  }
 0x274   : > { %13281 = vmatpush3.bf16.msra.mxu1 %v14460_v18  ;;  %12706 = vmatprep.subr.bf16.mxu0 %v14468_v32  ;;  %v14510_v18 = vld [vmem:[%s14704_s11 + $0x1a8] sm:$0xff]  }
 0x275   : > { %13282 = vmatprep.subr.bf16.mxu1 %v14470_v6 }
 0x276   : > { %12659 = vmatmul.mubr.bf16.gmra.mrb[4].mxu0 %v14457_v0  ;;  %v4001_v0 = vshll.u32 %v16036_v57, 16 }
 0x277   : > { %13235 = vmatmul.mubr.bf16.gmra.mrb[4].mxu1 %v14458_v55  ;;  %12662 = vmatprep.mubr.bf16.mxu0 %v14461_v15  ;;  %v9096_v55 = vshrl.u32 %v11151_v37, 16  ;;  %v9100_v15 = vrot.slane %v9098_v50, 1  ;;  %v16102_v50 = vld [vmem:[%s14704_s11 + $0x48] sm:$0xff]  }
 0x278   : > { %13238 = vmatprep.mubr.bf16.mxu1 %v14462_v34  ;;  %12707 = vmatpush3.bf16.msra.mxu0 %v14468_v32  ;;  %v3994_v32 = vshrl.u32 %v10660_v44, 16  ;;  %v9103_v34 = vshll.u32 %v16039_v3, 16 }
 0x279   : > { %13283 = vmatpush3.bf16.msra.mxu1 %v14470_v6  ;;  %12708 = vmatprep.subr.bf16.mxu0 %v14475_v36  ;;  %v3998_v6 = vrot.slane %v3996_v61, 1  ;;  %v14526_v61 = vld [vmem:[%s16541_s1 + $0x208] sm:$0xff]  }
 0x27a   : > { %13284 = vmatprep.subr.bf16.mxu1 %v14476_v2 }
 0x27c   : > { %12709 = vmatpush3.bf16.msra.mxu0 %v14475_v36  ;;  %v16048_v36 = vld [vmem:[%s14704_s11 + $0x28] sm:$0xff]  }
 0x27d   : > { %13285 = vmatpush3.bf16.msra.mxu1 %v14476_v2  ;;  %12710 = vmatprep.subr.bf16.mxu0 %v14484_v20  ;;  %v3999_v2 = vor.u32 %v3998_v6, %v3994_v32 }
 0x27e   : > { %12663 = vmatmul.mubr.bf16.gmra.mrb[8].mxu0 %v14463_v5  ;;  %13286 = vmatprep.subr.bf16.mxu1 %v14486_v16  ;;  %v16051_v5 = vld [vmem:[%s14704_s11 + $0x108] sm:$0xff]  }
 0x27f   : > { %13239 = vmatmul.mubr.bf16.gmra.mrb[8].mxu1 %v14464_v60  ;;  %12666 = vmatprep.mubr.bf16.mxu0 %v14465_v47  ;;  %v9105_v60 = vrot.slane %v9103_v34, 1  ;;  %v16054_v47 = vld [vmem:[%s14704_s11 + $0x30] sm:$0xff]  }
 0x280   : > { %13242 = vmatprep.mubr.bf16.mxu1 %v14466_v24  ;;  %12711 = vmatpush3.bf16.msra.mxu0 %v14484_v20  ;;  %v4003_v20 = vrot.slane %v4001_v0, 1  ;;  %v14511_v24 = vld [vmem:[%s14704_s11 + $0xd0] sm:$0xff]  }
 0x281   : > { %13287 = vmatpush3.bf16.msra.mxu1 %v14486_v16  ;;  %12712 = vmatprep.subr.bf16.mxu0 %v14491_v21  ;;  %v9101_v16 = vor.u32 %v9100_v15, %v9096_v55  ;;  %v16110_v0 = vld [vmem:[%s14704_s11 + $0x50] sm:$0xff]  }
 0x282   : > { %13288 = vmatprep.subr.bf16.mxu1 %v14492_v30  ;;  %v14534_v55 = vld [vmem:[%s16541_s1 + $0x210] sm:$0xff]  }
 0x283   : > { %v16116_v34 = vld [vmem:[%s14704_s11 + $0x130] sm:$0xff]  }
 0x284   : > { %12713 = vmatpush3.bf16.msra.mxu0 %v14491_v21  ;;  %v16058_v21 = vld [vmem:[%s14704_s11 + $0x110] sm:$0xff]  }
 0x285   : > { %13289 = vmatpush3.bf16.msra.mxu1 %v14492_v30  ;;  %12714 = vmatprep.subr.bf16.mxu0 %v14500_v52  ;;  %v14512_v30 = vld [vmem:[%s14704_s11 + $0x1b0] sm:$0xff]  }
 0x286   : > { %12667 = vmatmul.mubr.bf16.gmra.mrb[12].mxu0 %v14467_v42  ;;  %13290 = vmatprep.subr.bf16.mxu1 %v14502_v56  ;;  %v4009_v42 = vshll.u32 %v16048_v36, 16 }
 0x287   : > { %13243 = vmatmul.mubr.bf16.gmra.mrb[12].mxu1 %v14469_v38  ;;  %12670 = vmatprep.mubr.bf16.mxu0 %v14471_v4  ;;  %v9107_v38 = vshrl.u32 %v16039_v3, 16  ;;  %v9111_v4 = vshll.u32 %v16051_v5, 16 }
 0x288   : > { %13246 = vmatprep.mubr.bf16.mxu1 %v14472_v59  ;;  %12715 = vmatpush3.bf16.msra.mxu0 %v14500_v52  ;;  %v4005_v52 = vshrl.u32 %v16036_v57, 16  ;;  %v9106_v59 = vsel %vm398_vm0, %v9101_v16, %v9105_v60 }
 0x289   : > { %13291 = vmatpush3.bf16.msra.mxu1 %v14502_v56  ;;  %12716 = vmatprep.subr.bf16.mxu0 %v14507_v9  ;;  %v4004_v56 = vsel %vm398_vm0, %v3999_v2, %v4003_v20  ;;  %v4041_v2 = vshll.u32 %v16102_v50, 16 }
 0x28a   : > { %13292 = vmatprep.subr.bf16.mxu1 %v14508_v35 }
 0x28c   : > { %12717 = vmatpush3.bf16.msra.mxu0 %v14507_v9  ;;  %v4013_v9 = vshrl.u32 %v16048_v36, 16 }
 0x28d   : > { %13293 = vmatpush3.bf16.msra.mxu1 %v14508_v35  ;;  %12766 = vmatprep.subr.bf16.mxu0 %v15992_v48  ;;  %v4017_v35 = vshll.u32 %v16054_v47, 16 }
 0x28e   : > { %12671 = vmatmul.mubr.bf16.gmra.mrb[16].mxu0 %v14473_v49  ;;  %13342 = vmatprep.subr.bf16.mxu1 %v15998_v54  ;;  %v9115_v49 = vshrl.u32 %v16051_v5, 16 }
 0x28f   : > { %13247 = vmatmul.mubr.bf16.gmra.mrb[16].mxu1 %v14474_v17  ;;  %12674 = vmatprep.mubr.bf16.mxu0 %v14477_v1  ;;  %v9119_v17 = vshll.u32 %v16058_v21, 16  ;;  %v16072_v1 = vld [vmem:[%s14704_s11 + $0x38] sm:$0xff]  }
 0x290   : > { %13250 = vmatprep.mubr.bf16.mxu1 %v14478_v40  ;;  %v4007_v40 = vor.u32 %v4005_v52, %v4003_v20  ;;  %v4029_v53 = vshrl.u32 %v16072_v1, 16 }
 0x296   : > { %12675 = vmatmul.mubr.bf16.gmra.mrb[20].mxu0 %v14479_v19  ;;  %v4011_v19 = vrot.slane %v4009_v42, 1  ;;  %v4045_v42 = vshrl.u32 %v16102_v50, 16 }
 0x297   : > { %13251 = vmatmul.mubr.bf16.gmra.mrb[20].mxu1 %v14480_v28  ;;  %12678 = vmatprep.mubr.bf16.mxu0 %v14481_v31  ;;  %v16075_v28 = vld [vmem:[%s14704_s11 + $0x118] sm:$0xff]   ;;  %v9109_v31 = vor.u32 %v9107_v38, %v9105_v60 }
 0x298   : > { %13254 = vmatprep.mubr.bf16.mxu1 %v14482_v25  ;;  %v9113_v25 = vrot.slane %v9111_v4, 1 }
 0x29e   : > { %12679 = vmatmul.mubr.bf16.gmra.mrb[24].mxu0 %v14483_v13  ;;  %v16078_v13 = vld [vmem:[%s14704_s11 + $0x40] sm:$0xff]  }
 0x29f   : > { %13255 = vmatmul.mubr.bf16.gmra.mrb[24].mxu1 %v14485_v7  ;;  %12682 = vmatprep.mubr.bf16.mxu0 %v14487_v12  ;;  %v4015_v7 = vor.u32 %v4013_v9, %v4011_v19  ;;  %v4019_v12 = vrot.slane %v4017_v35, 1  ;;  %v4037_v16 = vshrl.u32 %v16078_v13, 16  ;;  %v14541_v9 = vld [vmem:[%s16541_s1 + $0x218] sm:$0xff]   ;;  %v4043_v35 = vrot.slane %v4041_v2, 1 }
 0x2a0   : > { %13258 = vmatprep.mubr.bf16.mxu1 %v14488_v41  ;;  %v16081_v41 = vld [vmem:[%s14704_s11 + $0x120] sm:$0xff]  }
 0x2a1   : > { %v4020_v51 = vsel %vm398_vm0, %v4015_v7, %v4019_v12  ;;  %v9139_v60 = vshrl.u32 %v16081_v41, 16  ;;  %v4047_v7 = vor.u32 %v4045_v42, %v4043_v35 }
 0x2a6   : > { %12683 = vmatmul.mubr.bf16.gmra.mrb[28].mxu0 %v14489_v45  ;;  %v9117_v45 = vor.u32 %v9115_v49, %v9113_v25  ;;  %v16137_v49 = vld [vmem:[%s14704_s11 + $0x58] sm:$0xff]  }
 0x2a7   : > { %13259 = vmatmul.mubr.bf16.gmra.mrb[28].mxu1 %v14490_v63  ;;  %12686 = vmatprep.mubr.bf16.mxu0 %v14493_v22  ;;  %v9121_v63 = vrot.slane %v9119_v17, 1  ;;  %v4025_v22 = vshll.u32 %v16072_v1, 16  ;;  %v14542_v17 = vld [vmem:[%s16541_s1 + $0x218] sm:$0xff]  }
 0x2a8   : > { %13262 = vmatprep.mubr.bf16.mxu1 %v14494_v29  ;;  %v4012_v29 = vsel %vm398_vm0, %v4007_v40, %v4011_v19 }
 0x2a9   : > { %v9122_v44 = vsel %vm398_vm0, %v9117_v45, %v9121_v63  ;;  %v4027_v37 = vrot.slane %v4025_v22, 1  ;;  %v16146_v45 = vld [vmem:[%s14704_s11 + $0x60] sm:$0xff]  }
 0x2ab   : > { %v4031_v32 = vor.u32 %v4029_v53, %v4027_v37 }
 0x2ae   : > { %12687 = vmatmul.mubr.bf16.gmra.mrb[32].mxu0 %v14495_v39  ;;  %v4021_v39 = vshrl.u32 %v16054_v47, 16 }
 0x2af   : > { %13263 = vmatmul.mubr.bf16.gmra.mrb[32].mxu1 %v14496_v43  ;;  %12690 = vmatprep.mubr.bf16.mxu0 %v14497_v33  ;;  %v9127_v43 = vshll.u32 %v16075_v28, 16  ;;  %v9114_v33 = vsel %vm398_vm0, %v9109_v31, %v9113_v25  ;;  %v16143_v25 = vld [vmem:[%s14704_s11 + $0x138] sm:$0xff]  }
 0x2b0   : > { %13266 = vmatprep.mubr.bf16.mxu1 %v14498_v8  ;;  %v9123_v8 = vshrl.u32 %v16058_v21, 16 }
 0x2b6   : > { %12691 = vmatmul.mubr.bf16.gmra.mrb[36].mxu0 %v14499_v62  ;;  %v4033_v62 = vshll.u32 %v16078_v13, 16 }
 0x2b7   : > { %13267 = vmatmul.mubr.bf16.gmra.mrb[36].mxu1 %v14501_v14  ;;  %12694 = vmatprep.mubr.bf16.mxu0 %v14503_v58  ;;  %v14525_v14 = vld [vmem:[%s16541_s1 + $0x208] sm:$0xff]   ;;  %v9131_v58 = vshrl.u32 %v16075_v28, 16 }
 0x2b8   : > { %13270 = vmatprep.mubr.bf16.mxu1 %v14504_v11  ;;  %v9135_v11 = vshll.u32 %v16081_v41, 16  ;;  %v4035_v6 = vrot.slane %v4033_v62, 1  ;;  %v4053_v62 = vshrl.u32 %v16110_v0, 16 }
 0x2ba   : > { %v4036_v52 = vsel %vm398_vm0, %v4031_v32, %v4035_v6  ;;  %v4039_v40 = vor.u32 %v4037_v16, %v4035_v6  ;;  %v16173_v32 = vld [vmem:[%s14704_s11 + $0x68] sm:$0xff]   ;;  %v16182_v16 = vld [vmem:[%s14704_s11 + $0x70] sm:$0xff]  }
 0x2bb   : > { %v14558_v6 = vld [vmem:[%s16541_s1 + $0x228] sm:$0xff]   ;;  %v4073_v42 = vshll.u32 %v16173_v32, 16 }
 0x2be   : > { %12695 = vmatmul.mubr.bf16.gmra.mrb[40].mxu0 %v14505_v10  ;;  %v4023_v10 = vor.u32 %v4021_v39, %v4019_v12  ;;  %v14550_v39 = vld [vmem:[%s16541_s1 + $0x220] sm:$0xff]  }
 0x2bf   : > { %13271 = vmatmul.mubr.bf16.gmra.mrb[40].mxu1 %v14506_v46  ;;  %12698 = vmatprep.mubr.bf16.mxu0 %v14509_v26  ;;  %v9129_v46 = vrot.slane %v9127_v43, 1  ;;  %v16106_v26 = vld [vmem:[%s14704_s11 + $0x128] sm:$0xff]   ;;  %v4057_v43 = vshll.u32 %v16137_v49, 16 }
 0x2c0   : > { %13274 = vmatprep.mubr.bf16.mxu1 %v14510_v18  ;;  %v9125_v18 = vor.u32 %v9123_v8, %v9121_v63  ;;  %v4028_v20 = vsel %vm398_vm0, %v4023_v10, %v4027_v37  ;;  %v9147_v4 = vshrl.u32 %v16106_v26, 16  ;;  %v4044_v8 = vsel %vm398_vm0, %v4039_v40, %v4043_v35 }
 0x2c1   : > { %v9133_v15 = vor.u32 %v9131_v58, %v9129_v46  ;;  %v9155_v58 = vshrl.u32 %v16116_v34, 16  ;;  %v4077_v40 = vshrl.u32 %v16173_v32, 16 }
 0x2c6   : > { %12699 = vmatmul.mubr.bf16.gmra.mrb[44].mxu0 %v14511_v24  ;;  %v9143_v24 = vshll.u32 %v16106_v26, 16 }
 0x2c7   : > { %13275 = vmatmul.mubr.bf16.gmra.mrb[44].mxu1 %v14512_v30  ;;  %12718 = vmatprep.mubr.bf16.mxu0 %v4004_v56  ;;  %v9130_v30 = vsel %vm398_vm0, %v9125_v18, %v9129_v46  ;;  %v4049_v56 = vshll.u32 %v16110_v0, 16  ;;  %v14557_v46 = vld [vmem:[%s16541_s1 + $0x228] sm:$0xff]   ;;  %v4059_v18 = vrot.slane %v4057_v43, 1  ;;  %v14574_v43 = vld [vmem:[%s16541_s1 + $0x238] sm:$0xff]  }
 0x2c8   : > { %13294 = vmatprep.mubr.bf16.mxu1 %v9106_v59  ;;  %v9151_v59 = vshll.u32 %v16116_v34, 16  ;;  %v9145_v31 = vrot.slane %v9143_v24, 1 }
 0x2c9   : > { %v4051_v12 = vrot.slane %v4049_v56, 1  ;;  %v14568_v56 = vld [vmem:[%s16541_s1 + $0x230] sm:$0xff]  }
 0x2ca   : > { %v9149_v63 = vor.u32 %v9147_v4, %v9145_v31  ;;  %v9153_v22 = vrot.slane %v9151_v59, 1  ;;  %v4069_v4 = vshrl.u32 %v16146_v45, 16 }
 0x2cc   : > { %v9154_v37 = vsel %vm398_vm0, %v9149_v63, %v9153_v22  ;;  %v14573_v63 = vld [vmem:[%s16541_s1 + $0x238] sm:$0xff]  }
 0x2ce   : > { %12719 = vmatmul.mubr.bf16.vlgmr.msra.gmra.mrb[0].mxu0 %v4012_v29  ;;  %v16149_v29 = vld [vmem:[%s14704_s11 + $0x140] sm:$0xff]  }
 0x2cf   : > { %13295 = vmatmul.mubr.bf16.vlgmr.msra.gmra.mrb[0].mxu1 %v9114_v33  ;;  %12767 = vmatpush3.bf16.msra.mxu0 %v15992_v48  ;;  %v9137_v48 = vrot.slane %v9135_v11, 1  ;;  %v14552_v33 = vld [vmem:[%s16541_s1 + $0x220] sm:$0xff]   ;;  %v4061_v11 = vshrl.u32 %v16137_v49, 16  ;;  %v9167_v10 = vshll.u32 %v16149_v29, 16  ;;  %v9171_v59 = vshrl.u32 %v16149_v29, 16 }
 0x2d0   : > { %13343 = vmatpush3.bf16.msra.mxu1 %v15998_v54  ;;  %12722 = vmatprep.mubr.bf16.mxu0 %v4020_v51  ;;  %v14536_v54 = vld [vmem:[%s16541_s1 + $0x210] sm:$0xff]   ;;  %v9159_v51 = vshll.u32 %v16143_v25, 16 }
 0x2d1   : > { %13298 = vmatprep.mubr.bf16.mxu1 %v9122_v44  ;;  %12768 = vmatprep.subr.bf16.mxu0 %v14525_v14  ;;  %v9138_v38 = vsel %vm398_vm0, %v9133_v15, %v9137_v48  ;;  %v9141_v19 = vor.u32 %v9139_v60, %v9137_v48  ;;  %v4065_v44 = vshll.u32 %v16146_v45, 16  ;;  %v16179_v48 = vld [vmem:[%s14704_s11 + $0x148] sm:$0xff]   ;;  %v4063_v2 = vor.u32 %v4061_v11, %v4059_v18 }
 0x2d2   : > { %13344 = vmatprep.subr.bf16.mxu1 %v14526_v61  ;;  %v9161_v15 = vrot.slane %v9159_v51, 1  ;;  %v9169_v24 = vrot.slane %v9167_v10, 1 }
 0x2d3   : > { %12769 = vmatpush3.bf16.msra.mxu0 %v14525_v14  ;;  %v9146_v53 = vsel %vm398_vm0, %v9141_v19, %v9145_v31  ;;  %v4052_v14 = vsel %vm398_vm0, %v4047_v7, %v4051_v12  ;;  %v4081_v19 = vshll.u32 %v16182_v16, 16  ;;  %v9179_v7 = vshrl.u32 %v16179_v48, 16 }
 0x2d4   : > { %13345 = vmatpush3.bf16.msra.mxu1 %v14526_v61  ;;  %12770 = vmatprep.subr.bf16.mxu0 %v14534_v55  ;;  %v9163_v61 = vshrl.u32 %v16143_v25, 16 }
 0x2d5   : > { %13346 = vmatprep.subr.bf16.mxu1 %v14536_v54 }
 0x2d6   : > { %12723 = vmatmul.mubr.bf16.gmra.mrb[4].mxu0 %v4028_v20  ;;  %v4067_v20 = vrot.slane %v4065_v44, 1  ;;  %v9165_v60 = vor.u32 %v9163_v61, %v9161_v15 }
 0x2d7   : > { %13299 = vmatmul.mubr.bf16.gmra.mrb[4].mxu1 %v9130_v30  ;;  %12726 = vmatprep.mubr.bf16.mxu0 %v4036_v52  ;;  %v16185_v30 = vld [vmem:[%s14704_s11 + $0x150] sm:$0xff]  }
 0x2d8   : > { %13302 = vmatprep.mubr.bf16.mxu1 %v9138_v38  ;;  %12771 = vmatpush3.bf16.msra.mxu0 %v14534_v55  ;;  %v4055_v55 = vor.u32 %v4053_v62, %v4051_v12  ;;  %v14566_v52 = vld [vmem:[%s16541_s1 + $0x230] sm:$0xff]   ;;  %v9170_v31 = vsel %vm398_vm0, %v9165_v60, %v9169_v24  ;;  %v9183_v12 = vshll.u32 %v16185_v30, 16  ;;  %v16215_v62 = vld [vmem:[%s14704_s11 + $0x158] sm:$0xff]  }
 0x2d9   : > { %13347 = vmatpush3.bf16.msra.mxu1 %v14536_v54  ;;  %12772 = vmatprep.subr.bf16.mxu0 %v14541_v9  ;;  %v9157_v54 = vor.u32 %v9155_v58, %v9153_v22  ;;  %v4075_v22 = vrot.slane %v4073_v42, 1  ;;  %v16218_v58 = vld [vmem:[%s14704_s11 + $0x80] sm:$0xff]   ;;  %v9195_v60 = vshrl.u32 %v16215_v62, 16  ;;  %v16236_v42 = vld [vmem:[%s14704_s11 + $0x88] sm:$0xff]  }
 0x2da   : > { %13348 = vmatprep.subr.bf16.mxu1 %v14542_v17  ;;  %v4060_v38 = vsel %vm398_vm0, %v4055_v55, %v4059_v18  ;;  %v9185_v44 = vrot.slane %v9183_v12, 1  ;;  %v4085_v18 = vshrl.u32 %v16182_v16, 16 }
 0x2db   : > { %v9162_v35 = vsel %vm398_vm0, %v9157_v54, %v9161_v15  ;;  %v4079_v51 = vor.u32 %v4077_v40, %v4075_v22  ;;  %v9187_v15 = vshrl.u32 %v16185_v30, 16 }
 0x2dc   : > { %12773 = vmatpush3.bf16.msra.mxu0 %v14541_v9  ;;  %v9175_v9 = vshll.u32 %v16179_v48, 16 }
 0x2dd   : > { %13349 = vmatpush3.bf16.msra.mxu1 %v14542_v17  ;;  %12774 = vmatprep.subr.bf16.mxu0 %v14550_v39  ;;  %v4068_v17 = vsel %vm398_vm0, %v4063_v2, %v4067_v20  ;;  %v4097_v2 = vshll.u32 %v16218_v58, 16 }
 0x2de   : > { %12727 = vmatmul.mubr.bf16.gmra.mrb[8].mxu0 %v4044_v8  ;;  %13350 = vmatprep.subr.bf16.mxu1 %v14552_v33  ;;  %v9173_v8 = vor.u32 %v9171_v59, %v9169_v24  ;;  %v9189_v59 = vor.u32 %v9187_v15, %v9185_v44 }
 0x2df   : > { %13303 = vmatmul.mubr.bf16.gmra.mrb[8].mxu1 %v9146_v53  ;;  %12730 = vmatprep.mubr.bf16.mxu0 %v4052_v14  ;;  %v9177_v53 = vrot.slane %v9175_v9, 1  ;;  %v4083_v14 = vrot.slane %v4081_v19, 1 }
 0x2e0   : > { %13306 = vmatprep.mubr.bf16.mxu1 %v9154_v37  ;;  %12775 = vmatpush3.bf16.msra.mxu0 %v14550_v39  ;;  %v16209_v39 = vld [vmem:[%s14704_s11 + $0x78] sm:$0xff]   ;;  %v16221_v37 = vld [vmem:[%s14704_s11 + $0x160] sm:$0xff]  }
 0x2e1   : > { %13351 = vmatpush3.bf16.msra.mxu1 %v14552_v33  ;;  %12776 = vmatprep.subr.bf16.mxu0 %v14557_v46  ;;  %v4071_v33 = vor.u32 %v4069_v4, %v4067_v20  ;;  %v9181_v11 = vor.u32 %v9179_v7, %v9177_v53  ;;  %v4089_v61 = vshll.u32 %v16209_v39, 16  ;;  %v4084_v55 = vsel %vm398_vm0, %v4079_v51, %v4083_v14  ;;  %v16239_v4 = vld [vmem:[%s14704_s11 + $0x168] sm:$0xff]  }
 0x2e2   : > { %13352 = vmatprep.subr.bf16.mxu1 %v14558_v6  ;;  %v4093_v54 = vshrl.u32 %v16209_v39, 16  ;;  %v9199_v24 = vshll.u32 %v16221_v37, 16  ;;  %v4105_v7 = vshll.u32 %v16236_v42, 16 }
 0x2e3   : > { %v4076_v10 = vsel %vm398_vm0, %v4071_v33, %v4075_v22  ;;  %v9186_v20 = vsel %vm398_vm0, %v9181_v11, %v9185_v44  ;;  %v9203_v22 = vshrl.u32 %v16221_v37, 16  ;;  %v9211_v11 = vshrl.u32 %v16239_v4, 16 }
 0x2e4   : > { %12777 = vmatpush3.bf16.msra.mxu0 %v14557_v46  ;;  %v9178_v46 = vsel %vm398_vm0, %v9173_v8, %v9177_v53  ;;  %v9201_v19 = vrot.slane %v9199_v24, 1  ;;  %v4109_v53 = vshrl.u32 %v16236_v42, 16  ;;  %v16269_v24 = vld [vmem:[%s14704_s11 + $0x180] sm:$0xff]  }
 0x2e5   : > { %13353 = vmatpush3.bf16.msra.mxu1 %v14558_v6  ;;  %12778 = vmatprep.subr.bf16.mxu0 %v14566_v52  ;;  %v9191_v6 = vshll.u32 %v16215_v62, 16  ;;  %16594 = vst [vmem:[#allocation2_spill] sm:$0xff] %v16269_v24 }
 0x2e6   : > { %12731 = vmatmul.mubr.bf16.gmra.mrb[12].mxu0 %v4060_v38  ;;  %13354 = vmatprep.subr.bf16.mxu1 %v14568_v56 }
 0x2e7   : > { %13307 = vmatmul.mubr.bf16.gmra.mrb[12].mxu1 %v9162_v35  ;;  %12734 = vmatprep.mubr.bf16.mxu0 %v4068_v17  ;;  %v9193_v38 = vrot.slane %v9191_v6, 1  ;;  %v4099_v35 = vrot.slane %v4097_v2, 1  ;;  %v16242_v17 = vld [vmem:[%s14704_s11 + $0x90] sm:$0xff]   ;;  %v16266_v2 = vld [vmem:[%s14704_s11 + $0xa0] sm:$0xff]  }
 0x2e8   : > { %13310 = vmatprep.mubr.bf16.mxu1 %v9170_v31  ;;  %12779 = vmatpush3.bf16.msra.mxu0 %v14566_v52  ;;  %v4091_v52 = vrot.slane %v4089_v61, 1  ;;  %v16245_v31 = vld [vmem:[%s14704_s11 + $0x170] sm:$0xff]   ;;  %v4113_v51 = vshll.u32 %v16242_v17, 16  ;;  %v4107_v61 = vrot.slane %v4105_v7, 1  ;;  %v4129_v7 = vshll.u32 %v16266_v2, 16 }
 0x2e9   : > { %13355 = vmatpush3.bf16.msra.mxu1 %v14568_v56  ;;  %12780 = vmatprep.subr.bf16.mxu0 %v14573_v63  ;;  %v4087_v56 = vor.u32 %v4085_v18, %v4083_v14  ;;  %v9197_v40 = vor.u32 %v9195_v60, %v9193_v38  ;;  %v9194_v33 = vsel %vm398_vm0, %v9189_v59, %v9193_v38  ;;  %v9215_v44 = vshll.u32 %v16245_v31, 16 }
 0x2ea   : > { %13356 = vmatprep.subr.bf16.mxu1 %v14574_v43  ;;  %v4095_v9 = vor.u32 %v4093_v54, %v4091_v52  ;;  %v9205_v18 = vor.u32 %v9203_v22, %v9201_v19  ;;  %v4111_v15 = vor.u32 %v4109_v53, %v4107_v61  ;;  %v4115_v54 = vrot.slane %v4113_v51, 1  ;;  %v16287_v51 = vld [vmem:[%s14704_s11 + $0x188] sm:$0xff]  }
 0x2eb   : > { %v4092_v12 = vsel %vm398_vm0, %v4087_v56, %v4091_v52  ;;  %v9202_v14 = vsel %vm398_vm0, %v9197_v40, %v9201_v19  ;;  %v9217_v60 = vrot.slane %v9215_v44, 1  ;;  %v4117_v59 = vshrl.u32 %v16242_v17, 16  ;;  %16596 = vst [vmem:[#allocation4_spill] sm:$0xff] %v16287_v51 }
 0x2ec   : > { %12781 = vmatpush3.bf16.msra.mxu0 %v14573_v63  ;;  %v4101_v63 = vshrl.u32 %v16218_v58, 16  ;;  %v4100_v8 = vsel %vm398_vm0, %v4095_v9, %v4099_v35  ;;  %v9219_v40 = vshrl.u32 %v16245_v31, 16  ;;  %v9231_v22 = vshll.u32 %v16269_v24, 16 }
 0x2ed   : > { %13357 = vmatpush3.bf16.msra.mxu1 %v14574_v43  ;;  %v9207_v43 = vshll.u32 %v16239_v4, 16  ;;  %v4131_v44 = vrot.slane %v4129_v7, 1 }
 0x2ee   : > { %12735 = vmatmul.mubr.bf16.gmra.mrb[16].mxu0 %v4076_v10  ;;  %v16260_v10 = vld [vmem:[%s14704_s11 + $0x98] sm:$0xff]  }
 0x2ef   : > { %13311 = vmatmul.mubr.bf16.gmra.mrb[16].mxu1 %v9178_v46  ;;  %12738 = vmatprep.mubr.bf16.mxu0 %v4084_v55  ;;  %v4103_v46 = vor.u32 %v4101_v63, %v4099_v35  ;;  %v9209_v6 = vrot.slane %v9207_v43, 1  ;;  %v16263_v55 = vld [vmem:[%s14704_s11 + $0x178] sm:$0xff]   ;;  %v4121_v52 = vshll.u32 %v16260_v10, 16  ;;  %v4116_v35 = vsel %vm398_vm0, %v4111_v15, %v4115_v54 }
 0x2f0   : > { %13314 = vmatprep.mubr.bf16.mxu1 %v9186_v20  ;;  %v9223_v9 = vshll.u32 %v16263_v55, 16  ;;  %v4125_v19 = vshrl.u32 %v16260_v10, 16  ;;  %v9227_v63 = vshrl.u32 %v16263_v55, 16 }
 0x2f1   : > { %v9213_v20 = vor.u32 %v9211_v11, %v9209_v6  ;;  %v4108_v56 = vsel %vm398_vm0, %v4103_v46, %v4107_v61  ;;  %v9210_v38 = vsel %vm398_vm0, %v9205_v18, %v9209_v6  ;;  %v4123_v43 = vrot.slane %v4121_v52, 1  ;;  %v16290_v61 = vld [vmem:[%s14704_s11 + $0xb0] sm:$0xff]  }
 0x2f2   : > { %v9225_v53 = vrot.slane %v9223_v9, 1  ;;  %16597 = vst [vmem:[#allocation5_spill] sm:$0xff] %v16290_v61  ;;  %v9233_v18 = vrot.slane %v9231_v22, 1  ;;  %v16293_v6 = vld [vmem:[%s14704_s11 + $0x190] sm:$0xff]   ;;  %v9235_v52 = vshrl.u32 %v16269_v24, 16  ;;  %v4145_v9 = vshll.u32 %v16290_v61, 16 }
 0x2f3   : > { %v4127_v11 = vor.u32 %v4125_v19, %v4123_v43  ;;  %16598 = vst [vmem:[#allocation6_spill] sm:$0xff] %v16293_v6  ;;  %v9247_v19 = vshll.u32 %v16293_v6, 16 }
 0x2f4   : > { %v9229_v46 = vor.u32 %v9227_v63, %v9225_v53  ;;  %v9237_v22 = vor.u32 %v9235_v52, %v9233_v18 }
 0x2f6   : > { %12739 = vmatmul.mubr.bf16.gmra.mrb[20].mxu0 %v4092_v12  ;;  %v9218_v12 = vsel %vm398_vm0, %v9213_v20, %v9217_v60 }
 0x2f7   : > { %13315 = vmatmul.mubr.bf16.gmra.mrb[20].mxu1 %v9194_v33  ;;  %12742 = vmatprep.mubr.bf16.mxu0 %v4100_v8  ;;  %v16284_v33 = vld [vmem:[%s14704_s11 + $0xa8] sm:$0xff]   ;;  %v4119_v8 = vor.u32 %v4117_v59, %v4115_v54  ;;  %v4133_v54 = vshrl.u32 %v16266_v2, 16 }
 0x2f8   : > { %13318 = vmatprep.mubr.bf16.mxu1 %v9202_v14  ;;  %16595 = vst [vmem:[#allocation3_spill] sm:$0xff] %v16284_v33  ;;  %v9221_v14 = vor.u32 %v9219_v40, %v9217_v60  ;;  %v4137_v15 = vshll.u32 %v16284_v33, 16  ;;  %v4141_v59 = vshrl.u32 %v16284_v33, 16  ;;  %v9243_v40 = vshrl.u32 %v16287_v51, 16  ;;  %v16317_v33 = vld [vmem:[%s14704_s11 + $0x1a0] sm:$0xff]  }
 0x2f9   : > { %v4124_v20 = vsel %vm398_vm0, %v4119_v8, %v4123_v43  ;;  %v4135_v63 = vor.u32 %v4133_v54, %v4131_v44  ;;  %v16311_v8 = vld [vmem:[%s14704_s11 + $0x198] sm:$0xff]   ;;  %16602 = vst [vmem:[#allocation10_spill] sm:$0xff] %v16317_v33 }
 0x2fa   : > { %v9226_v60 = vsel %vm398_vm0, %v9221_v14, %v9225_v53  ;;  %v4139_v7 = vrot.slane %v4137_v15, 1  ;;  %16600 = vst [vmem:[#allocation8_spill] sm:$0xff] %v16311_v8  ;;  %v4147_v14 = vrot.slane %v4145_v9, 1  ;;  %v9255_v54 = vshll.u32 %v16311_v8, 16 }
 0x2fb   : > { %v9259_v9 = vshrl.u32 %v16311_v8, 16 }
 0x2fc   : > { %v4143_v53 = vor.u32 %v4141_v59, %v4139_v7 }
 0x2fe   : > { %12743 = vmatmul.mubr.bf16.gmra.mrb[24].mxu0 %v4108_v56  ;;  %v9239_v56 = vshll.u32 %v16287_v51, 16  ;;  %v9249_v51 = vrot.slane %v9247_v19, 1  ;;  %v4148_v52 = vsel %vm398_vm0, %v4143_v53, %v4147_v14  ;;  %v16332_v19 = vld [vmem:[%s14704_s11 + $0xc8] sm:$0xff]  }
 0x2ff   : > { %13319 = vmatmul.mubr.bf16.gmra.mrb[24].mxu1 %v9210_v38  ;;  %12746 = vmatprep.mubr.bf16.mxu0 %v4116_v35  ;;  %v4132_v38 = vsel %vm398_vm0, %v4127_v11, %v4131_v44  ;;  %v9234_v35 = vsel %vm398_vm0, %v9229_v46, %v9233_v18  ;;  %v16314_v11 = vld [vmem:[%s14704_s11 + $0xc0] sm:$0xff]   ;;  %v4149_v18 = vshrl.u32 %v16290_v61, 16  ;;  %16603 = vst [vmem:[#allocation11_spill] sm:$0xff] %v16332_v19  ;;  %v16341_v61 = vld [vmem:[%s14704_s11 + $0x1b0] sm:$0xff]  }
 0x300   : > { %13322 = vmatprep.mubr.bf16.mxu1 %v9218_v12  ;;  %v16308_v12 = vld [vmem:[%s14704_s11 + $0xb8] sm:$0xff]   ;;  %v9241_v43 = vrot.slane %v9239_v56, 1  ;;  %16601 = vst [vmem:[#allocation9_spill] sm:$0xff] %v16314_v11  ;;  %v9251_v56 = vshrl.u32 %v16293_v6, 16 }
 0x301   : > { %16599 = vst [vmem:[#allocation7_spill] sm:$0xff] %v16308_v12  ;;  %v4153_v15 = vshll.u32 %v16308_v12, 16 }
 0x302   : > { %v9245_v46 = vor.u32 %v9243_v40, %v9241_v43  ;;  %v9242_v44 = vsel %vm398_vm0, %v9237_v22, %v9241_v43  ;;  %v16335_v22 = vld [vmem:[%s14704_s11 + $0x1a8] sm:$0xff]   ;;  %v9253_v43 = vor.u32 %v9251_v56, %v9249_v51 }
 0x303   : > { %v4155_v40 = vrot.slane %v4153_v15, 1  ;;  %16604 = vst [vmem:[#allocation12_spill] sm:$0xff] %v16335_v22  ;;  %v4169_v15 = vshll.u32 %v16332_v19, 16 }
 0x304   : > { %v9250_v59 = vsel %vm398_vm0, %v9245_v46, %v9249_v51  ;;  %v16338_v46 = vld [vmem:[%s14704_s11 + $0xd0] sm:$0xff]  }
 0x305   : > { %v4177_v56 = vshll.u32 %v16338_v46, 16 }
 0x306   : > { %12747 = vmatmul.mubr.bf16.gmra.mrb[28].mxu0 %v4124_v20  ;;  %v4140_v20 = vsel %vm398_vm0, %v4135_v63, %v4139_v7  ;;  %v4151_v7 = vor.u32 %v4149_v18, %v4147_v14  ;;  %v9257_v63 = vrot.slane %v9255_v54, 1  ;;  %v9267_v14 = vshrl.u32 %v16317_v33, 16 }
 0x307   : > { %13323 = vmatmul.mubr.bf16.gmra.mrb[28].mxu1 %v9226_v60  ;;  %12750 = vmatprep.mubr.bf16.mxu0 %v4132_v38  ;;  %v4157_v60 = vshrl.u32 %v16308_v12, 16  ;;  %v4161_v38 = vshll.u32 %v16314_v11, 16  ;;  %v9271_v18 = vshll.u32 %v16335_v22, 16 }
 0x308   : > { %13326 = vmatprep.mubr.bf16.mxu1 %v9234_v35  ;;  %v9263_v35 = vshll.u32 %v16317_v33, 16  ;;  %v9261_v8 = vor.u32 %v9259_v9, %v9257_v63  ;;  %v9258_v51 = vsel %vm398_vm0, %v9253_v43, %v9257_v63  ;;  %v4171_v9 = vrot.slane %v4169_v15, 1  ;;  %v16356_v63 = vld [vmem:[%s14704_s11 + $0xd8] ss:$0 sps:$4 sm:$0x11]  }
 0x309   : > { %v4159_v53 = vor.u32 %v4157_v60, %v4155_v40  ;;  %v4163_v12 = vrot.slane %v4161_v38, 1  ;;  %v9275_v38 = vshrl.u32 %v16335_v22, 16  ;;  %v4534_v33 = vld [vmem:[%s14704_s11 + $0x18] sm:$0xe] }
 0x30a   : > { %v9265_v6 = vrot.slane %v9263_v35, 1 }
 0x30b   : > { %v4164_v54 = vsel %vm398_vm0, %v4159_v53, %v4163_v12  ;;  %v4179_v53 = vrot.slane %v4177_v56, 1 }
 0x30c   : > { %v9266_v60 = vsel %vm398_vm0, %v9261_v8, %v9265_v6 }
 0x30e   : > { %12751 = vmatmul.mubr.bf16.gmra.mrb[32].mxu0 %v4140_v20  ;;  %v4156_v20 = vsel %vm398_vm0, %v4151_v7, %v4155_v40  ;;  %v9269_v40 = vor.u32 %v9267_v14, %v9265_v6  ;;  %v9273_v7 = vrot.slane %v9271_v18, 1  ;;  %v4185_v6 = vshll.u32 %v16356_v63, 16 }
 0x30f   : > { %13327 = vmatmul.mubr.bf16.gmra.mrb[32].mxu1 %v9242_v44  ;;  %12754 = vmatprep.mubr.bf16.mxu0 %v4148_v52  ;;  %v4165_v44 = vshrl.u32 %v16314_v11, 16  ;;  %v4173_v52 = vshrl.u32 %v16332_v19, 16  ;;  %v16359_v19 = vld [vmem:[%s14704_s11 + $0x1b8] ss:$0 sps:$4 sm:$0x11]   ;;  %v10693_v18 = vcombine.low %v4534_v33, %v16023_v27 }
 0x310   : > { %13330 = vmatprep.mubr.bf16.mxu1 %v9250_v59  ;;  %v9279_v59 = vshll.u32 %v16341_v61, 16  ;;  %v9277_v8 = vor.u32 %v9275_v38, %v9273_v7  ;;  %v11184_v11 = vld [vmem:[%s14704_s11 + $0xf8] sm:$0xe]  ;;  %v9274_v15 = vsel %vm398_vm0, %v9269_v40, %v9273_v7  ;;  %v9287_v14 = vshll.u32 %v16359_v19, 16  ;;  %s10503_s11 = sshll.u32 %s16617_s16, 3 }
 0x311   : > { %v4167_v35 = vor.u32 %v4165_v44, %v4163_v12  ;;  %v4175_v43 = vor.u32 %v4173_v52, %v4171_v9  ;;  %v9283_v44 = vshrl.u32 %v16341_v61, 16  ;;  %v4187_v56 = vrot.slane %v4185_v6, 1  ;;  %s16475_s20 = scalar_lea.vmem %s16543_s3, %s10503_s11 }
 0x312   : > { %v9281_v22 = vrot.slane %v9279_v59, 1  ;;  %v9289_v38 = vrot.slane %v9287_v14, 1  ;;  %v4554_v59 = vrot.slane %v10693_v18, 1  ;;  %v9657_v40 = vrot.slane %v16039_v3, 1 }
 0x313   : > { %v4172_v24 = vsel %vm398_vm0, %v4167_v35, %v4171_v9  ;;  %v4180_v12 = vsel %vm398_vm0, %v4175_v43, %v4179_v53  ;;  %v4555_v9 = vrot.slane %v16036_v57, 1  ;;  %v4559_v57 = vrot.slane %v16054_v47, 1 }
 0x314   : > { %v9661_v3 = vrot.slane %v16058_v21, 1  ;;  %v4563_v47 = vrot.slane %v16078_v13, 1  ;;  %v9665_v21 = vrot.slane %v16081_v41, 1  ;;  %v4567_v13 = vrot.slane %v16110_v0, 1 }
 0x315   : > { %v9669_v41 = vrot.slane %v16116_v34, 1  ;;  %v4571_v0 = vrot.slane %v16146_v45, 1  ;;  %v9673_v34 = vrot.slane %v16149_v29, 1  ;;  %v4575_v45 = vrot.slane %v16182_v16, 1 }
 0x316   : > { %12755 = vmatmul.mubr.bf16.gmra.mrb[36].mxu0 %v4156_v20  ;;  %v4181_v20 = vshrl.u32 %v16338_v46, 16  ;;  %v9677_v29 = vrot.slane %v16185_v30, 1  ;;  %v4579_v16 = vrot.slane %v16218_v58, 1  ;;  %v9681_v30 = vrot.slane %v16221_v37, 1 }
 0x317   : > { %13331 = vmatmul.mubr.bf16.gmra.mrb[36].mxu1 %v9258_v51  ;;  %12758 = vmatprep.mubr.bf16.mxu0 %v4164_v54  ;;  %v9282_v51 = vsel %vm398_vm0, %v9277_v8, %v9281_v22  ;;  %v11185_v54 = vcombine.low %v11184_v11, %v16028_v23  ;;  %v4556_v23 = vsel %vm1209_vm1, %v4554_v59, %v4555_v9  ;;  %v4557_v11 = vrot.slane %v16048_v36, 1 }
 0x318   : > { %13334 = vmatprep.mubr.bf16.mxu1 %v9266_v60  ;;  %v4183_v52 = vor.u32 %v4181_v20, %v4179_v53  ;;  %v9285_v60 = vor.u32 %v9283_v44, %v9281_v22  ;;  %v9659_v22 = vrot.slane %v16051_v5, 1  ;;  %v4561_v36 = vrot.slane %v16072_v1, 1 }
 0x319   : > { %v9656_v35 = vrot.slane %v11185_v54, 1  ;;  %v4558_v7 = vsel %vm1209_vm1, %v4555_v9, %v4557_v11  ;;  %v4560_v53 = vsel %vm1209_vm1, %v4557_v11, %v4559_v57  ;;  %v9663_v5 = vrot.slane %v16075_v28, 1 }
 0x31a   : > { %v4188_v27 = vsel %vm398_vm0, %v4183_v52, %v4187_v56  ;;  %v9290_v33 = vsel %vm398_vm0, %v9285_v60, %v9289_v38  ;;  %v9660_v43 = vsel %vm1209_vm1, %v9657_v40, %v9659_v22  ;;  %v9662_v8 = vsel %vm1209_vm1, %v9659_v22, %v9661_v3 }
 0x31b   : > { %v9664_v20 = vsel %vm1209_vm1, %v9661_v3, %v9663_v5  ;;  %v4564_v6 = vsel %vm1209_vm1, %v4561_v36, %v4563_v47  ;;  %v4565_v1 = vrot.slane %v16102_v50, 1  ;;  %v9667_v28 = vrot.slane %v16106_v26, 1  ;;  %v16605_v3 = vld [vmem:[#allocation2_spill] sm:$0xff] }
 0x31c   : > { %v4569_v50 = vrot.slane %v16137_v49, 1  ;;  %v9671_v26 = vrot.slane %v16143_v25, 1  ;;  %v4573_v49 = vrot.slane %v16173_v32, 1  ;;  %v9675_v25 = vrot.slane %v16179_v48, 1 }
 0x31d   : > { %v4566_v44 = vsel %vm1209_vm1, %v4563_v47, %v4565_v1  ;;  %v9668_v14 = vsel %vm1209_vm1, %v9665_v21, %v9667_v28  ;;  %v4568_v18 = vsel %vm1209_vm1, %v4565_v1, %v4567_v13  ;;  %v4577_v32 = vrot.slane %v16209_v39, 1  ;;  %v16608_v47 = vld [vmem:[#allocation5_spill] sm:$0xff] }
 0x31e   : > { %12759 = vmatmul.mubr.bf16.gmra.mrb[40].mxu0 %v4172_v24  ;;  %v9658_v24 = vsel %vm1209_vm1, %v9656_v35, %v9657_v40  ;;  %v4570_v54 = vsel %vm1209_vm1, %v4567_v13, %v4569_v50  ;;  %v9672_v52 = vsel %vm1209_vm1, %v9669_v41, %v9671_v26  ;;  %v4572_v56 = vsel %vm1209_vm1, %v4569_v50, %v4571_v0 }
 0x31f   : > { %13335 = vmatmul.mubr.bf16.gmra.mrb[40].mxu1 %v9274_v15  ;;  %12762 = vmatprep.mubr.bf16.mxu0 %v4180_v12  ;;  %v4562_v15 = vsel %vm1209_vm1, %v4559_v57, %v4561_v36  ;;  %v9666_v12 = vsel %vm1209_vm1, %v9663_v5, %v9665_v21  ;;  %v9674_v60 = vsel %vm1209_vm1, %v9671_v26, %v9673_v34  ;;  %v9679_v48 = vrot.slane %v16215_v62, 1  ;;  %v16606_v36 = vld [vmem:[#allocation3_spill] sm:$0xff]  ;;  %v16607_v5 = vld [vmem:[#allocation4_spill] sm:$0xff]  ;;  %v16609_v21 = vld [vmem:[#allocation6_spill] sm:$0xff] }
 0x320   : > { %13338 = vmatprep.mubr.bf16.mxu1 %v9282_v51  ;;  %v9670_v51 = vsel %vm1209_vm1, %v9667_v28, %v9669_v41  ;;  %v4574_v38 = vsel %vm1209_vm1, %v4571_v0, %v4573_v49  ;;  %v9676_v59 = vsel %vm1209_vm1, %v9673_v34, %v9675_v25  ;;  %v4576_v9 = vsel %vm1209_vm1, %v4573_v49, %v4575_v45  ;;  %v16610_v28 = vld [vmem:[#allocation7_spill] sm:$0xff]  ;;  %v16611_v41 = vld [vmem:[#allocation8_spill] sm:$0xff] }
 0x321   : > { %v9678_v35 = vsel %vm1209_vm1, %v9675_v25, %v9677_v29  ;;  %v4578_v40 = vsel %vm1209_vm1, %v4575_v45, %v4577_v32  ;;  %v4581_v39 = vrot.slane %v16236_v42, 1  ;;  %v9683_v62 = vrot.slane %v16239_v4, 1 }
 0x322   : > { %v4583_v58 = vrot.slane %v16242_v17, 1  ;;  %v9685_v37 = vrot.slane %v16245_v31, 1  ;;  %v4585_v42 = vrot.slane %v16260_v10, 1  ;;  %v9687_v4 = vrot.slane %v16263_v55, 1 }
 0x323   : > { %v9684_v11 = vsel %vm1209_vm1, %v9681_v30, %v9683_v62  ;;  %v4587_v17 = vrot.slane %v16266_v2, 1  ;;  %v9689_v31 = vrot.slane %v16605_v3, 1  ;;  %v4589_v10 = vrot.slane %v16606_v36, 1 }
 0x324   : > { %v4584_v22 = vsel %vm1209_vm1, %v4581_v39, %v4583_v58  ;;  %v9686_v57 = vsel %vm1209_vm1, %v9683_v62, %v9685_v37  ;;  %v9691_v55 = vrot.slane %v16607_v5, 1  ;;  %v4591_v2 = vrot.slane %v16608_v47, 1 }
 0x325   : > { %v4593_v13 = vrot.slane %v16610_v28, 1  ;;  %v4599_v25 = vrot.slane %v16338_v46, 1  ;;  %v9701_v45 = vrot.slane %v16341_v61, 1  ;;  %v9703_v46 = vrot.slane %v16359_v19, 1 }
 0x326   : > { %12763 = vmatmul.mubr.bf16.gmra.mrb[44].mxu0 %v4188_v27  ;;  %v9680_v27 = vsel %vm1209_vm1, %v9677_v29, %v9679_v48 }
 0x327   : > { %13339 = vmatmul.mubr.bf16.gmra.mrb[44].mxu1 %v9290_v33  ;;  %12782 = vmatprep.mubr.bf16.mxu0 %v4556_v23  ;;  %v4580_v33 = vsel %vm1209_vm1, %v4577_v32, %v4579_v16  ;;  %v9682_v23 = vsel %vm1209_vm1, %v9679_v48, %v9681_v30  ;;  %v4594_v26 = vsel %vm1209_vm1, %v4591_v2, %v4593_v13  ;;  %v14639_v48 = vmov 0.0  }
 0x328   : > { %13358 = vmatprep.mubr.bf16.mxu1 %v9658_v24  ;;  %v4582_v24 = vsel %vm1209_vm1, %v4579_v16, %v4581_v39  ;;  %v9704_v61 = vsel %vm1209_vm1, %v9701_v45, %v9703_v46  ;;  %5296 = vst [vmem:[%s16475_s20 + $0x2] sm:$0x3f] %v14639_v48  ;;  %11292 = vst [vmem:[%s16475_s20 + $0xa] sm:$0x3f] %v14639_v48 }
 0x32e   : > { %12783 = vmatmul.mubr.bf16.vlgmr.msra.gmra.mrb[0].mxu0 %v4558_v7  ;;  %v4586_v7 = vsel %vm1209_vm1, %v4583_v58, %v4585_v42 }
 0x32f   : > { %13359 = vmatmul.mubr.bf16.vlgmr.msra.gmra.mrb[0].mxu1 %v9660_v43  ;;  %12786 = vmatprep.mubr.bf16.mxu0 %v4560_v53  ;;  %v9688_v43 = vsel %vm1209_vm1, %v9685_v37, %v9687_v4  ;;  %v4588_v53 = vsel %vm1209_vm1, %v4585_v42, %v4587_v17 }
 0x330   : > { %13362 = vmatprep.mubr.bf16.mxu1 %v9662_v8  ;;  %v9690_v8 = vsel %vm1209_vm1, %v9687_v4, %v9689_v31 }
 0x336   : > { %12787 = vmatmul.mubr.bf16.gmra.mrb[4].mxu0 %v4562_v15  ;;  %v9693_v15 = vrot.slane %v16609_v21, 1 }
 0x337   : > { %13363 = vmatmul.mubr.bf16.gmra.mrb[4].mxu1 %v9664_v20  ;;  %12790 = vmatprep.mubr.bf16.mxu0 %v4564_v6  ;;  %v4590_v20 = vsel %vm1209_vm1, %v4587_v17, %v4589_v10  ;;  %v9692_v6 = vsel %vm1209_vm1, %v9689_v31, %v9691_v55 }
 0x338   : > { %13366 = vmatprep.mubr.bf16.mxu1 %v9666_v12  ;;  %v4592_v12 = vsel %vm1209_vm1, %v4589_v10, %v4591_v2  ;;  %v9694_v1 = vsel %vm1209_vm1, %v9691_v55, %v9693_v15 }
 0x33e   : > { %12791 = vmatmul.mubr.bf16.gmra.mrb[8].mxu0 %v4566_v44  ;;  %v9695_v44 = vrot.slane %v16611_v41, 1 }
 0x33f   : > { %13367 = vmatmul.mubr.bf16.gmra.mrb[8].mxu1 %v9668_v14  ;;  %12794 = vmatprep.mubr.bf16.mxu0 %v4568_v18  ;;  %v16612_v14 = vld [vmem:[#allocation9_spill] sm:$0xff] }
 0x340   : > { %13370 = vmatprep.mubr.bf16.mxu1 %v9670_v51  ;;  %v4595_v18 = vrot.slane %v16612_v14, 1  ;;  %v16613_v51 = vld [vmem:[#allocation10_spill] sm:$0xff]  ;;  %v9696_v0 = vsel %vm1209_vm1, %v9693_v15, %v9695_v44 }
 0x341   : > { %v9697_v50 = vrot.slane %v16613_v51, 1 }
 0x342   : > { %v4596_v34 = vsel %vm1209_vm1, %v4593_v13, %v4595_v18 }
 0x346   : > { %12795 = vmatmul.mubr.bf16.gmra.mrb[12].mxu0 %v4570_v54  ;;  %v9698_v54 = vsel %vm1209_vm1, %v9695_v44, %v9697_v50 }
 0x347   : > { %13371 = vmatmul.mubr.bf16.gmra.mrb[12].mxu1 %v9672_v52  ;;  %12798 = vmatprep.mubr.bf16.mxu0 %v4572_v56  ;;  %v16614_v52 = vld [vmem:[#allocation11_spill] sm:$0xff] }
 0x348   : > { %13374 = vmatprep.mubr.bf16.mxu1 %v9674_v60  ;;  %v4597_v56 = vrot.slane %v16614_v52, 1  ;;  %v16615_v60 = vld [vmem:[#allocation12_spill] sm:$0xff] }
 0x349   : > { %v9699_v49 = vrot.slane %v16615_v60, 1 }
 0x34a   : > { %v4598_v29 = vsel %vm1209_vm1, %v4595_v18, %v4597_v56 }
 0x34e   : > { %12799 = vmatmul.mubr.bf16.gmra.mrb[16].mxu0 %v4574_v38  ;;  %v9700_v38 = vsel %vm1209_vm1, %v9697_v50, %v9699_v49 }
 0x34f   : > { %13375 = vmatmul.mubr.bf16.gmra.mrb[16].mxu1 %v9676_v59  ;;  %12802 = vmatprep.mubr.bf16.mxu0 %v4576_v9  ;;  %v4600_v59 = vsel %vm1209_vm1, %v4597_v56, %v4599_v25  ;;  %v9702_v9 = vsel %vm1209_vm1, %v9699_v49, %v9701_v45 }
 0x350   : > { %13378 = vmatprep.mubr.bf16.mxu1 %v9678_v35  ;;  %v4601_v35 = vrot.slane %v16356_v63, 1 }
 0x352   : > { %v4602_v32 = vsel %vm1209_vm1, %v4599_v25, %v4601_v35 }
 0x356   : > { %12803 = vmatmul.mubr.bf16.gmra.mrb[20].mxu0 %v4578_v40 }
 0x357   : > { %13379 = vmatmul.mubr.bf16.gmra.mrb[20].mxu1 %v9680_v27  ;;  %12806 = vmatprep.mubr.bf16.mxu0 %v4580_v33 }
 0x358   : > { %13382 = vmatprep.mubr.bf16.mxu1 %v9682_v23 }
 0x35e   : > { %12807 = vmatmul.mubr.bf16.gmra.mrb[24].mxu0 %v4582_v24 }
 0x35f   : > { %13383 = vmatmul.mubr.bf16.gmra.mrb[24].mxu1 %v9684_v11  ;;  %12810 = vmatprep.mubr.bf16.mxu0 %v4584_v22 }
 0x360   : > { %13386 = vmatprep.mubr.bf16.mxu1 %v9686_v57 }
 0x366   : > { %12811 = vmatmul.mubr.bf16.gmra.mrb[28].mxu0 %v4586_v7 }
 0x367   : > { %13387 = vmatmul.mubr.bf16.gmra.mrb[28].mxu1 %v9688_v43  ;;  %12814 = vmatprep.mubr.bf16.mxu0 %v4588_v53 }
 0x368   : > { %13390 = vmatprep.mubr.bf16.mxu1 %v9690_v8 }
 0x36e   : > { %12815 = vmatmul.mubr.bf16.gmra.mrb[32].mxu0 %v4590_v20 }
 0x36f   : > { %13391 = vmatmul.mubr.bf16.gmra.mrb[32].mxu1 %v9692_v6  ;;  %12818 = vmatprep.mubr.bf16.mxu0 %v4592_v12 }
 0x370   : > { %13394 = vmatprep.mubr.bf16.mxu1 %v9694_v1 }
 0x376   : > { %12819 = vmatmul.mubr.bf16.gmra.mrb[36].mxu0 %v4594_v26 }
 0x377   : > { %13395 = vmatmul.mubr.bf16.gmra.mrb[36].mxu1 %v9696_v0  ;;  %12822 = vmatprep.mubr.bf16.mxu0 %v4596_v34 }
 0x378   : > { %13398 = vmatprep.mubr.bf16.mxu1 %v9698_v54 }
 0x37e   : > { %12823 = vmatmul.mubr.bf16.gmra.mrb[40].mxu0 %v4598_v29 }
 0x37f   : > { %13399 = vmatmul.mubr.bf16.gmra.mrb[40].mxu1 %v9700_v38  ;;  %12826 = vmatprep.mubr.bf16.mxu0 %v4600_v59 }
 0x380   : > { %13402 = vmatprep.mubr.bf16.mxu1 %v9702_v9 }
 0x386   : > { %12827 = vmatmul.mubr.bf16.gmra.mrb[44].mxu0 %v4602_v32 }
 0x387   : > { %13403 = vmatmul.mubr.bf16.gmra.mrb[44].mxu1 %v9704_v61 }
 0x401   : > { %v12784_v63 = vpop.f32.mrb[0].mxu0 }
 0x402   : > { %v13360_v19 = vpop.f32.mrb[0].mxu1  ;;  %v4709_v16 = vpop.f32.mrb[1].mxu0 }
 0x403   : > { %v9811_v30 = vpop.f32.mrb[1].mxu1  ;;  %v12785_v40 = vpop.f32.mrb[2].mxu0  ;;  %v5226_v27 = vmul.f32 %v4709_v16, %v4709_v16 }
 0x404   : > { %v11399_v33 = vpack.c.bf16 %v12785_v40, %v12784_v63  ;;  %v13361_v23 = vpop.f32.mrb[2].mxu1  ;;  %v4712_v39 = vpop.f32.mrb[3].mxu0  ;;  %v10330_v62 = vmul.f32 %v9811_v30, %v9811_v30  ;;  %v5228_v17 = vmul.f32 %v12785_v40, %v12785_v40 }
 0x405   : > { %v11519_v58 = vpack.c.bf16 %v13361_v23, %v13360_v19  ;;  %v11394_v37 = vpack.c.bf16 %v4712_v39, %v4709_v16  ;;  %v5188_v24 = vadd.f32 %v4712_v39, %v4709_v16  ;;  %v9814_v11 = vpop.f32.mrb[3].mxu1  ;;  %v5227_v22 = vmul.f32 %v4712_v39, %v4712_v39 }
 0x406   : > { %11631 = vst [vmem:[%s16483_s24 + $0x8] sm:$0xff] %v11399_v33   ;;  %v11514_v57 = vpack.c.bf16 %v9814_v11, %v9811_v30  ;;  %v10291_v42 = vadd.f32 %v9814_v11, %v9811_v30  ;;  %v10331_v4 = vmul.f32 %v9814_v11, %v9814_v11  ;;  %v10332_v31 = vmul.f32 %v13361_v23, %v13361_v23 }
 0x407   : > { %11655 = vst [vmem:[%s16483_s24 + $0xc8] sm:$0xff] %v11519_v58   ;;  %11395 = vst [vmem:[%s16483_s24] sm:$0xff] %v11394_v37   ;;  %v5189_v3 = vadd.f32 %v12785_v40, %v5188_v24  ;;  %v5258_v7 = vadd.f32 %v5227_v22, %v5226_v27 }
 0x408   : > { %11654 = vst [vmem:[%s16483_s24 + $0xc0] sm:$0xff] %v11514_v57   ;;  %v10362_v43 = vadd.f32 %v10331_v4, %v10330_v62  ;;  %v10292_v53 = vadd.f32 %v13361_v23, %v10291_v42 }
 0x409   : > { %v12788_v8 = vpop.f32.mrb[4].mxu0  ;;  %v5259_v5 = vadd.f32 %v5258_v7, %v5228_v17 }
 0x40a   : > { %v13364_v36 = vpop.f32.mrb[4].mxu1  ;;  %v4725_v10 = vpop.f32.mrb[5].mxu0  ;;  %v10363_v55 = vadd.f32 %v10362_v43, %v10332_v31  ;;  %v5230_v20 = vmul.f32 %v12788_v8, %v12788_v8 }
 0x40b   : > { %v5190_v47 = vadd.f32 %v5189_v3, %v4725_v10  ;;  %v5229_v2 = vmul.f32 %v4725_v10, %v4725_v10  ;;  %v9827_v21 = vpop.f32.mrb[5].mxu1  ;;  %v12789_v15 = vpop.f32.mrb[6].mxu0  ;;  %v10334_v41 = vmul.f32 %v13364_v36, %v13364_v36 }
 0x40c   : > { %v10293_v6 = vadd.f32 %v10292_v53, %v9827_v21  ;;  %v10333_v12 = vmul.f32 %v9827_v21, %v9827_v21  ;;  %v11409_v1 = vpack.c.bf16 %v12789_v15, %v12788_v8  ;;  %v13365_v28 = vpop.f32.mrb[6].mxu1  ;;  %v4728_v13 = vpop.f32.mrb[7].mxu0  ;;  %v5231_v52 = vmul.f32 %v12789_v15, %v12789_v15 }
 0x40d   : > { %v5260_v44 = vadd.f32 %v5259_v5, %v5229_v2  ;;  %v5191_v14 = vadd.f32 %v12788_v8, %v5190_v47  ;;  %v11529_v18 = vpack.c.bf16 %v13365_v28, %v13364_v36  ;;  %v9830_v51 = vpop.f32.mrb[7].mxu1  ;;  %v11404_v0 = vpack.c.bf16 %v4728_v13, %v4725_v10 }
 0x40e   : > { %v10364_v50 = vadd.f32 %v10363_v55, %v10333_v12  ;;  %11633 = vst [vmem:[%s16483_s24 + $0x18] sm:$0xff] %v11409_v1   ;;  %v10294_v26 = vadd.f32 %v13364_v36, %v10293_v6  ;;  %v11524_v34 = vpack.c.bf16 %v9830_v51, %v9827_v21  ;;  %v10335_v49 = vmul.f32 %v13365_v28, %v13365_v28 }
 0x40f   : > { %v5192_v54 = vadd.f32 %v12789_v15, %v5191_v14  ;;  %v5261_v56 = vadd.f32 %v5260_v44, %v5230_v20  ;;  %11657 = vst [vmem:[%s16483_s24 + $0xd8] sm:$0xff] %v11529_v18   ;;  %11632 = vst [vmem:[%s16483_s24 + $0x10] sm:$0xff] %v11404_v0  }
 0x410   : > { %v10295_v60 = vadd.f32 %v13365_v28, %v10294_v26  ;;  %v10365_v25 = vadd.f32 %v10364_v50, %v10334_v41  ;;  %11656 = vst [vmem:[%s16483_s24 + $0xd0] sm:$0xff] %v11524_v34  }
 0x411   : > { %v5262_v45 = vadd.f32 %v5261_v56, %v5231_v52  ;;  %v12792_v29 = vpop.f32.mrb[8].mxu0 }
 0x412   : > { %v10366_v38 = vadd.f32 %v10365_v25, %v10335_v49  ;;  %v13368_v59 = vpop.f32.mrb[8].mxu1  ;;  %v4741_v9 = vpop.f32.mrb[9].mxu0  ;;  %v5233_v39 = vmul.f32 %v12792_v29, %v12792_v29 }
 0x413   : > { %v9843_v35 = vpop.f32.mrb[9].mxu1  ;;  %v12793_v46 = vpop.f32.mrb[10].mxu0  ;;  %v10337_v37 = vmul.f32 %v13368_v59, %v13368_v59 }
 0x414   : > { %v11419_v32 = vpack.c.bf16 %v12793_v46, %v12792_v29  ;;  %v13369_v61 = vpop.f32.mrb[10].mxu1  ;;  %v4744_v48 = vpop.f32.mrb[11].mxu0 }
 0x415   : > { %v11539_v63 = vpack.c.bf16 %v13369_v61, %v13368_v59  ;;  %v11414_v19 = vpack.c.bf16 %v4744_v48, %v4741_v9  ;;  %v5193_v16 = vadd.f32 %v5192_v54, %v4744_v48  ;;  %v5232_v30 = vmul.f32 %v4744_v48, %v4744_v48  ;;  %v9846_v40 = vpop.f32.mrb[11].mxu1 }
 0x416   : > { %11635 = vst [vmem:[%s16483_s24 + $0x28] sm:$0xff] %v11419_v32   ;;  %v11534_v27 = vpack.c.bf16 %v9846_v40, %v9843_v35  ;;  %v10296_v33 = vadd.f32 %v10295_v60, %v9846_v40  ;;  %v10336_v23 = vmul.f32 %v9846_v40, %v9846_v40 }
 0x417   : > { %11659 = vst [vmem:[%s16483_s24 + $0xe8] sm:$0xff] %v11539_v63   ;;  %11634 = vst [vmem:[%s16483_s24 + $0x20] sm:$0xff] %v11414_v19   ;;  %v5263_v62 = vadd.f32 %v5262_v45, %v5232_v30  ;;  %v5194_v58 = vadd.f32 %v12792_v29, %v5193_v16 }
 0x418   : > { %11658 = vst [vmem:[%s16483_s24 + $0xe0] sm:$0xff] %v11534_v27   ;;  %v10367_v24 = vadd.f32 %v10366_v38, %v10336_v23  ;;  %v10297_v11 = vadd.f32 %v13368_v59, %v10296_v33 }
 0x419   : > { %v12796_v22 = vpop.f32.mrb[12].mxu0  ;;  %v5264_v57 = vadd.f32 %v5263_v62, %v5233_v39 }
 0x41a   : > { %v13372_v42 = vpop.f32.mrb[12].mxu1  ;;  %v4757_v4 = vpop.f32.mrb[13].mxu0  ;;  %v10368_v17 = vadd.f32 %v10367_v24, %v10337_v37 }
 0x41b   : > { %v5195_v3 = vadd.f32 %v5194_v58, %v4757_v4  ;;  %v5234_v31 = vmul.f32 %v4757_v4, %v4757_v4  ;;  %v9859_v7 = vpop.f32.mrb[13].mxu1  ;;  %v12797_v43 = vpop.f32.mrb[14].mxu0 }
 0x41c   : > { %v10298_v53 = vadd.f32 %v10297_v11, %v9859_v7  ;;  %v10338_v8 = vmul.f32 %v9859_v7, %v9859_v7  ;;  %v11429_v36 = vpack.c.bf16 %v12797_v43, %v12796_v22  ;;  %v13373_v10 = vpop.f32.mrb[14].mxu1  ;;  %v4760_v5 = vpop.f32.mrb[15].mxu0  ;;  %v5236_v13 = vmul.f32 %v12797_v43, %v12797_v43 }
 0x41d   : > { %v5265_v55 = vadd.f32 %v5264_v57, %v5234_v31  ;;  %v11549_v47 = vpack.c.bf16 %v13373_v10, %v13372_v42  ;;  %v11424_v2 = vpack.c.bf16 %v4760_v5, %v4757_v4  ;;  %v9862_v21 = vpop.f32.mrb[15].mxu1  ;;  %v5196_v20 = vadd.f32 %v5195_v3, %v4760_v5 }
 0x41e   : > { %v10369_v15 = vadd.f32 %v10368_v17, %v10338_v8  ;;  %11637 = vst [vmem:[%s16483_s24 + $0x38] sm:$0xff] %v11429_v36   ;;  %v5235_v6 = vmul.f32 %v4760_v5, %v4760_v5  ;;  %v11544_v12 = vpack.c.bf16 %v9862_v21, %v9859_v7  ;;  %v10299_v1 = vadd.f32 %v10298_v53, %v9862_v21 }
 0x41f   : > { %11661 = vst [vmem:[%s16483_s24 + $0xf8] sm:$0xff] %v11549_v47   ;;  %11636 = vst [vmem:[%s16483_s24 + $0x30] sm:$0xff] %v11424_v2   ;;  %v10339_v28 = vmul.f32 %v9862_v21, %v9862_v21  ;;  %v5197_v44 = vadd.f32 %v12797_v43, %v5196_v20  ;;  %v10340_v14 = vmul.f32 %v13373_v10, %v13373_v10 }
 0x420   : > { %v5266_v41 = vadd.f32 %v5265_v55, %v5235_v6  ;;  %11660 = vst [vmem:[%s16483_s24 + $0xf0] sm:$0xff] %v11544_v12   ;;  %v10300_v50 = vadd.f32 %v13373_v10, %v10299_v1 }
 0x421   : > { %v10370_v18 = vadd.f32 %v10369_v15, %v10339_v28  ;;  %v12800_v51 = vpop.f32.mrb[16].mxu0 }
 0x422   : > { %v13376_v26 = vpop.f32.mrb[16].mxu1  ;;  %v4773_v0 = vpop.f32.mrb[17].mxu0  ;;  %v5267_v34 = vadd.f32 %v5266_v41, %v5236_v13  ;;  %v5238_v25 = vmul.f32 %v12800_v51, %v12800_v51 }
 0x423   : > { %v5198_v54 = vadd.f32 %v5197_v44, %v4773_v0  ;;  %v5237_v52 = vmul.f32 %v4773_v0, %v4773_v0  ;;  %v9875_v56 = vpop.f32.mrb[17].mxu1  ;;  %v10371_v60 = vadd.f32 %v10370_v18, %v10340_v14  ;;  %v12801_v49 = vpop.f32.mrb[18].mxu0  ;;  %v10342_v35 = vmul.f32 %v13376_v26, %v13376_v26 }
 0x424   : > { %v10301_v45 = vadd.f32 %v10300_v50, %v9875_v56  ;;  %v10341_v29 = vmul.f32 %v9875_v56, %v9875_v56  ;;  %v11439_v38 = vpack.c.bf16 %v12801_v49, %v12800_v51  ;;  %v13377_v59 = vpop.f32.mrb[18].mxu1  ;;  %v4776_v9 = vpop.f32.mrb[19].mxu0  ;;  %v5239_v27 = vmul.f32 %v12801_v49, %v12801_v49 }
 0x425   : > { %v5268_v46 = vadd.f32 %v5267_v34, %v5237_v52  ;;  %v5199_v32 = vadd.f32 %v12800_v51, %v5198_v54  ;;  %v11559_v61 = vpack.c.bf16 %v13377_v59, %v13376_v26  ;;  %v9878_v48 = vpop.f32.mrb[19].mxu1  ;;  %v11434_v16 = vpack.c.bf16 %v4776_v9, %v4773_v0 }
 0x426   : > { %v10372_v63 = vadd.f32 %v10371_v60, %v10341_v29  ;;  %11639 = vst [vmem:[%s16483_s24 + $0x48] sm:$0xff] %v11439_v38   ;;  %v10302_v19 = vadd.f32 %v13376_v26, %v10301_v45  ;;  %v11554_v30 = vpack.c.bf16 %v9878_v48, %v9875_v56  ;;  %v10343_v39 = vmul.f32 %v13377_v59, %v13377_v59 }
 0x427   : > { %v5200_v40 = vadd.f32 %v12801_v49, %v5199_v32  ;;  %v5269_v33 = vadd.f32 %v5268_v46, %v5238_v25  ;;  %11663 = vst [vmem:[%s16483_s24 + $0x108] sm:$0xff] %v11559_v61   ;;  %11638 = vst [vmem:[%s16483_s24 + $0x40] sm:$0xff] %v11434_v16  }
 0x428   : > { %v10303_v23 = vadd.f32 %v13377_v59, %v10302_v19  ;;  %v10373_v62 = vadd.f32 %v10372_v63, %v10342_v35  ;;  %11662 = vst [vmem:[%s16483_s24 + $0x100] sm:$0xff] %v11554_v30  }
 0x429   : > { %v5270_v58 = vadd.f32 %v5269_v33, %v5239_v27  ;;  %v12804_v37 = vpop.f32.mrb[20].mxu0 }
 0x42a   : > { %v10374_v24 = vadd.f32 %v10373_v62, %v10343_v39  ;;  %v13380_v11 = vpop.f32.mrb[20].mxu1  ;;  %v4789_v22 = vpop.f32.mrb[21].mxu0  ;;  %v5241_v55 = vmul.f32 %v12804_v37, %v12804_v37 }
 0x42b   : > { %v9891_v57 = vpop.f32.mrb[21].mxu1  ;;  %v12805_v42 = vpop.f32.mrb[22].mxu0  ;;  %v10345_v21 = vmul.f32 %v13380_v11, %v13380_v11 }
 0x42c   : > { %v11449_v4 = vpack.c.bf16 %v12805_v42, %v12804_v37  ;;  %v13381_v17 = vpop.f32.mrb[22].mxu1  ;;  %v4792_v3 = vpop.f32.mrb[23].mxu0 }
 0x42d   : > { %v11569_v31 = vpack.c.bf16 %v13381_v17, %v13380_v11  ;;  %v11444_v7 = vpack.c.bf16 %v4792_v3, %v4789_v22  ;;  %v5201_v43 = vadd.f32 %v5200_v40, %v4792_v3  ;;  %v5240_v53 = vmul.f32 %v4792_v3, %v4792_v3  ;;  %v9894_v8 = vpop.f32.mrb[23].mxu1 }
 0x42e   : > { %11641 = vst [vmem:[%s16483_s24 + $0x58] sm:$0xff] %v11449_v4   ;;  %v11564_v36 = vpack.c.bf16 %v9894_v8, %v9891_v57  ;;  %v10304_v10 = vadd.f32 %v10303_v23, %v9894_v8  ;;  %v10344_v5 = vmul.f32 %v9894_v8, %v9894_v8 }
 0x42f   : > { %11665 = vst [vmem:[%s16483_s24 + $0x118] sm:$0xff] %v11569_v31   ;;  %11640 = vst [vmem:[%s16483_s24 + $0x50] sm:$0xff] %v11444_v7   ;;  %v5271_v47 = vadd.f32 %v5270_v58, %v5240_v53  ;;  %v5202_v2 = vadd.f32 %v12804_v37, %v5201_v43 }
 0x430   : > { %11664 = vst [vmem:[%s16483_s24 + $0x110] sm:$0xff] %v11564_v36   ;;  %v10375_v15 = vadd.f32 %v10374_v24, %v10344_v5  ;;  %v10305_v20 = vadd.f32 %v13380_v11, %v10304_v10 }
 0x431   : > { %v12808_v6 = vpop.f32.mrb[24].mxu0  ;;  %v5272_v12 = vadd.f32 %v5271_v47, %v5241_v55 }
 0x432   : > { %v13384_v1 = vpop.f32.mrb[24].mxu1  ;;  %v4805_v28 = vpop.f32.mrb[25].mxu0  ;;  %v10376_v13 = vadd.f32 %v10375_v15, %v10345_v21 }
 0x433   : > { %v5203_v41 = vadd.f32 %v5202_v2, %v4805_v28  ;;  %v5242_v44 = vmul.f32 %v4805_v28, %v4805_v28  ;;  %v9907_v14 = vpop.f32.mrb[25].mxu1  ;;  %v12809_v18 = vpop.f32.mrb[26].mxu0 }
 0x434   : > { %v10306_v51 = vadd.f32 %v10305_v20, %v9907_v14  ;;  %v10346_v50 = vmul.f32 %v9907_v14, %v9907_v14  ;;  %v11459_v26 = vpack.c.bf16 %v12809_v18, %v12808_v6  ;;  %v13385_v0 = vpop.f32.mrb[26].mxu1  ;;  %v4808_v34 = vpop.f32.mrb[27].mxu0  ;;  %v5244_v9 = vmul.f32 %v12809_v18, %v12809_v18 }
 0x435   : > { %v5273_v54 = vadd.f32 %v5272_v12, %v5242_v44  ;;  %v11579_v52 = vpack.c.bf16 %v13385_v0, %v13384_v1  ;;  %v11454_v56 = vpack.c.bf16 %v4808_v34, %v4805_v28  ;;  %v9910_v60 = vpop.f32.mrb[27].mxu1  ;;  %v5204_v25 = vadd.f32 %v5203_v41, %v4808_v34 }
 0x436   : > { %v10377_v49 = vadd.f32 %v10376_v13, %v10346_v50  ;;  %11643 = vst [vmem:[%s16483_s24 + $0x68] sm:$0xff] %v11459_v26   ;;  %v5243_v45 = vmul.f32 %v4808_v34, %v4808_v34  ;;  %v11574_v29 = vpack.c.bf16 %v9910_v60, %v9907_v14  ;;  %v10307_v38 = vadd.f32 %v10306_v51, %v9910_v60 }
 0x437   : > { %11667 = vst [vmem:[%s16483_s24 + $0x128] sm:$0xff] %v11579_v52   ;;  %11642 = vst [vmem:[%s16483_s24 + $0x60] sm:$0xff] %v11454_v56   ;;  %v10347_v59 = vmul.f32 %v9910_v60, %v9910_v60  ;;  %v5205_v46 = vadd.f32 %v12809_v18, %v5204_v25  ;;  %v10348_v32 = vmul.f32 %v13385_v0, %v13385_v0 }
 0x438   : > { %v5274_v35 = vadd.f32 %v5273_v54, %v5243_v45  ;;  %11666 = vst [vmem:[%s16483_s24 + $0x120] sm:$0xff] %v11574_v29   ;;  %v10308_v63 = vadd.f32 %v13385_v0, %v10307_v38 }
 0x439   : > { %v10378_v61 = vadd.f32 %v10377_v49, %v10347_v59  ;;  %v12812_v48 = vpop.f32.mrb[28].mxu0 }
 0x43a   : > { %v13388_v19 = vpop.f32.mrb[28].mxu1  ;;  %v4821_v16 = vpop.f32.mrb[29].mxu0  ;;  %v5275_v30 = vadd.f32 %v5274_v35, %v5244_v9  ;;  %v5246_v62 = vmul.f32 %v12812_v48, %v12812_v48 }
 0x43b   : > { %v5206_v40 = vadd.f32 %v5205_v46, %v4821_v16  ;;  %v5245_v27 = vmul.f32 %v4821_v16, %v4821_v16  ;;  %v9923_v33 = vpop.f32.mrb[29].mxu1  ;;  %v10379_v23 = vadd.f32 %v10378_v61, %v10348_v32  ;;  %v12813_v39 = vpop.f32.mrb[30].mxu0  ;;  %v10350_v57 = vmul.f32 %v13388_v19, %v13388_v19 }
 0x43c   : > { %v10309_v58 = vadd.f32 %v10308_v63, %v9923_v33  ;;  %v10349_v37 = vmul.f32 %v9923_v33, %v9923_v33  ;;  %v11469_v24 = vpack.c.bf16 %v12813_v39, %v12812_v48  ;;  %v13389_v11 = vpop.f32.mrb[30].mxu1  ;;  %v4824_v22 = vpop.f32.mrb[31].mxu0  ;;  %v5247_v36 = vmul.f32 %v12813_v39, %v12813_v39 }
 0x43d   : > { %v5276_v42 = vadd.f32 %v5275_v30, %v5245_v27  ;;  %v5207_v4 = vadd.f32 %v12812_v48, %v5206_v40  ;;  %v11589_v17 = vpack.c.bf16 %v13389_v11, %v13388_v19  ;;  %v9926_v3 = vpop.f32.mrb[31].mxu1  ;;  %v11464_v43 = vpack.c.bf16 %v4824_v22, %v4821_v16 }
 0x43e   : > { %v10380_v31 = vadd.f32 %v10379_v23, %v10349_v37  ;;  %11645 = vst [vmem:[%s16483_s24 + $0x78] sm:$0xff] %v11469_v24   ;;  %v10310_v7 = vadd.f32 %v13388_v19, %v10309_v58  ;;  %v11584_v53 = vpack.c.bf16 %v9926_v3, %v9923_v33  ;;  %v10351_v55 = vmul.f32 %v13389_v11, %v13389_v11 }
 0x43f   : > { %v5208_v8 = vadd.f32 %v12813_v39, %v5207_v4  ;;  %v5277_v10 = vadd.f32 %v5276_v42, %v5246_v62  ;;  %11669 = vst [vmem:[%s16483_s24 + $0x138] sm:$0xff] %v11589_v17   ;;  %11644 = vst [vmem:[%s16483_s24 + $0x70] sm:$0xff] %v11464_v43  }
 0x440   : > { %v10311_v5 = vadd.f32 %v13389_v11, %v10310_v7  ;;  %v10381_v47 = vadd.f32 %v10380_v31, %v10350_v57  ;;  %11668 = vst [vmem:[%s16483_s24 + $0x130] sm:$0xff] %v11584_v53  }
 0x441   : > { %v5278_v2 = vadd.f32 %v5277_v10, %v5247_v36  ;;  %v12816_v21 = vpop.f32.mrb[32].mxu0 }
 0x442   : > { %v10382_v15 = vadd.f32 %v10381_v47, %v10351_v55  ;;  %v13392_v20 = vpop.f32.mrb[32].mxu1  ;;  %v4837_v6 = vpop.f32.mrb[33].mxu0  ;;  %v5249_v54 = vmul.f32 %v12816_v21, %v12816_v21 }
 0x443   : > { %v9939_v12 = vpop.f32.mrb[33].mxu1  ;;  %v12817_v1 = vpop.f32.mrb[34].mxu0  ;;  %v10353_v60 = vmul.f32 %v13392_v20, %v13392_v20 }
 0x444   : > { %v11479_v28 = vpack.c.bf16 %v12817_v1, %v12816_v21  ;;  %v13393_v13 = vpop.f32.mrb[34].mxu1  ;;  %v4840_v41 = vpop.f32.mrb[35].mxu0 }
 0x445   : > { %v11599_v44 = vpack.c.bf16 %v13393_v13, %v13392_v20  ;;  %v11474_v14 = vpack.c.bf16 %v4840_v41, %v4837_v6  ;;  %v5209_v18 = vadd.f32 %v5208_v8, %v4840_v41  ;;  %v5248_v51 = vmul.f32 %v4840_v41, %v4840_v41  ;;  %v9942_v50 = vpop.f32.mrb[35].mxu1 }
 0x446   : > { %11647 = vst [vmem:[%s16483_s24 + $0x88] sm:$0xff] %v11479_v28   ;;  %v11594_v26 = vpack.c.bf16 %v9942_v50, %v9939_v12  ;;  %v10312_v0 = vadd.f32 %v10311_v5, %v9942_v50  ;;  %v10352_v34 = vmul.f32 %v9942_v50, %v9942_v50 }
 0x447   : > { %11671 = vst [vmem:[%s16483_s24 + $0x148] sm:$0xff] %v11599_v44   ;;  %11646 = vst [vmem:[%s16483_s24 + $0x80] sm:$0xff] %v11474_v14   ;;  %v5279_v52 = vadd.f32 %v5278_v2, %v5248_v51  ;;  %v5210_v56 = vadd.f32 %v12816_v21, %v5209_v18 }
 0x448   : > { %11670 = vst [vmem:[%s16483_s24 + $0x140] sm:$0xff] %v11594_v26   ;;  %v10383_v49 = vadd.f32 %v10382_v15, %v10352_v34  ;;  %v10313_v25 = vadd.f32 %v13392_v20, %v10312_v0 }
 0x449   : > { %v12820_v45 = vpop.f32.mrb[36].mxu0  ;;  %v5280_v29 = vadd.f32 %v5279_v52, %v5249_v54 }
 0x44a   : > { %v13396_v38 = vpop.f32.mrb[36].mxu1  ;;  %v4853_v59 = vpop.f32.mrb[37].mxu0  ;;  %v10384_v9 = vadd.f32 %v10383_v49, %v10353_v60 }
 0x44b   : > { %v5211_v35 = vadd.f32 %v5210_v56, %v4853_v59  ;;  %v5250_v46 = vmul.f32 %v4853_v59, %v4853_v59  ;;  %v9955_v32 = vpop.f32.mrb[37].mxu1  ;;  %v12821_v61 = vpop.f32.mrb[38].mxu0 }
 0x44c   : > { %v10314_v48 = vadd.f32 %v10313_v25, %v9955_v32  ;;  %v10354_v63 = vmul.f32 %v9955_v32, %v9955_v32  ;;  %v11489_v19 = vpack.c.bf16 %v12821_v61, %v12820_v45  ;;  %v13397_v16 = vpop.f32.mrb[38].mxu1  ;;  %v4856_v30 = vpop.f32.mrb[39].mxu0  ;;  %v5252_v22 = vmul.f32 %v12821_v61, %v12821_v61 }
 0x44d   : > { %v5281_v40 = vadd.f32 %v5280_v29, %v5250_v46  ;;  %v11609_v27 = vpack.c.bf16 %v13397_v16, %v13396_v38  ;;  %v11484_v33 = vpack.c.bf16 %v4856_v30, %v4853_v59  ;;  %v9958_v23 = vpop.f32.mrb[39].mxu1  ;;  %v5212_v62 = vadd.f32 %v5211_v35, %v4856_v30 }
 0x44e   : > { %v10385_v39 = vadd.f32 %v10384_v9, %v10354_v63  ;;  %11649 = vst [vmem:[%s16483_s24 + $0x98] sm:$0xff] %v11489_v19   ;;  %v5251_v58 = vmul.f32 %v4856_v30, %v4856_v30  ;;  %v11604_v37 = vpack.c.bf16 %v9958_v23, %v9955_v32  ;;  %v10315_v24 = vadd.f32 %v10314_v48, %v9958_v23 }
 0x44f   : > { %11673 = vst [vmem:[%s16483_s24 + $0x158] sm:$0xff] %v11609_v27   ;;  %11648 = vst [vmem:[%s16483_s24 + $0x90] sm:$0xff] %v11484_v33   ;;  %v10355_v11 = vmul.f32 %v9958_v23, %v9958_v23  ;;  %v5213_v42 = vadd.f32 %v12821_v61, %v5212_v62  ;;  %v10356_v4 = vmul.f32 %v13397_v16, %v13397_v16 }
 0x450   : > { %v5282_v57 = vadd.f32 %v5281_v40, %v5251_v58  ;;  %11672 = vst [vmem:[%s16483_s24 + $0x150] sm:$0xff] %v11604_v37   ;;  %v10316_v31 = vadd.f32 %v13397_v16, %v10315_v24 }
 0x451   : > { %v10386_v17 = vadd.f32 %v10385_v39, %v10355_v11  ;;  %v12824_v3 = vpop.f32.mrb[40].mxu0 }
 0x452   : > { %v13400_v7 = vpop.f32.mrb[40].mxu1  ;;  %v4869_v43 = vpop.f32.mrb[41].mxu0  ;;  %v5283_v53 = vadd.f32 %v5282_v57, %v5252_v22  ;;  %v5254_v47 = vmul.f32 %v12824_v3, %v12824_v3 }
 0x453   : > { %v5214_v8 = vadd.f32 %v5213_v42, %v4869_v43  ;;  %v5253_v36 = vmul.f32 %v4869_v43, %v4869_v43  ;;  %v9971_v10 = vpop.f32.mrb[41].mxu1  ;;  %v10387_v5 = vadd.f32 %v10386_v17, %v10356_v4  ;;  %v12825_v55 = vpop.f32.mrb[42].mxu0  ;;  %v10358_v12 = vmul.f32 %v13400_v7, %v13400_v7 }
 0x454   : > { %v10317_v2 = vadd.f32 %v10316_v31, %v9971_v10  ;;  %v10357_v21 = vmul.f32 %v9971_v10, %v9971_v10  ;;  %v11499_v15 = vpack.c.bf16 %v12825_v55, %v12824_v3  ;;  %v13401_v20 = vpop.f32.mrb[42].mxu1  ;;  %v4872_v6 = vpop.f32.mrb[43].mxu0  ;;  %v5255_v26 = vmul.f32 %v12825_v55, %v12825_v55 }
 0x455   : > { %v5284_v1 = vadd.f32 %v5283_v53, %v5253_v36  ;;  %v5215_v28 = vadd.f32 %v12824_v3, %v5214_v8  ;;  %v11619_v13 = vpack.c.bf16 %v13401_v20, %v13400_v7  ;;  %v9974_v41 = vpop.f32.mrb[43].mxu1  ;;  %v11494_v18 = vpack.c.bf16 %v4872_v6, %v4869_v43 }
 0x456   : > { %v10388_v44 = vadd.f32 %v10387_v5, %v10357_v21  ;;  %11651 = vst [vmem:[%s16483_s24 + $0xa8] sm:$0xff] %v11499_v15   ;;  %v10318_v14 = vadd.f32 %v13400_v7, %v10317_v2  ;;  %v11614_v51 = vpack.c.bf16 %v9974_v41, %v9971_v10  ;;  %v10359_v54 = vmul.f32 %v13401_v20, %v13401_v20 }
 0x457   : > { %v5216_v50 = vadd.f32 %v12825_v55, %v5215_v28  ;;  %v5285_v0 = vadd.f32 %v5284_v1, %v5254_v47  ;;  %11675 = vst [vmem:[%s16483_s24 + $0x168] sm:$0xff] %v11619_v13   ;;  %11650 = vst [vmem:[%s16483_s24 + $0xa0] sm:$0xff] %v11494_v18  }
 0x458   : > { %v10319_v34 = vadd.f32 %v13401_v20, %v10318_v14  ;;  %v10389_v52 = vadd.f32 %v10388_v44, %v10358_v12  ;;  %11674 = vst [vmem:[%s16483_s24 + $0x160] sm:$0xff] %v11614_v51  }
 0x459   : > { %v5286_v56 = vadd.f32 %v5285_v0, %v5255_v26  ;;  %v12828_v60 = vpop.f32.mrb[44].mxu0 }
 0x45a   : > { %v10390_v49 = vadd.f32 %v10389_v52, %v10359_v54  ;;  %v13404_v25 = vpop.f32.mrb[44].mxu1  ;;  %v4885_v45 = vpop.f32.mrb[45].mxu0  ;;  %v5257_v40 = vmul.f32 %v12828_v60, %v12828_v60 }
 0x45b   : > { %v9987_v29 = vpop.f32.mrb[45].mxu1  ;;  %v12829_v38 = vpop.f32.mrb[46].mxu0  ;;  %v10361_v23 = vmul.f32 %v13404_v25, %v13404_v25 }
 0x45c   : > { %v11509_v59 = vpack.c.bf16 %v12829_v38, %v12828_v60  ;;  %v13405_v9 = vpop.f32.mrb[46].mxu1  ;;  %v4888_v35 = vpop.f32.mrb[47].mxu0 }
 0x45d   : > { %v11629_v46 = vpack.c.bf16 %v13405_v9, %v13404_v25  ;;  %v11504_v32 = vpack.c.bf16 %v4888_v35, %v4885_v45  ;;  %v5217_v61 = vadd.f32 %v5216_v50, %v4888_v35  ;;  %v5256_v48 = vmul.f32 %v4888_v35, %v4888_v35  ;;  %v9990_v63 = vpop.f32.mrb[47].mxu1 }
 0x45e   : > { %11653 = vst [vmem:[%s16483_s24 + $0xb8] sm:$0xff] %v11509_v59   ;;  %v11624_v19 = vpack.c.bf16 %v9990_v63, %v9987_v29  ;;  %v10320_v16 = vadd.f32 %v10319_v34, %v9990_v63  ;;  %v10360_v30 = vmul.f32 %v9990_v63, %v9990_v63 }
 0x45f   : > { %11677 = vst [vmem:[%s16483_s24 + $0x178] sm:$0xff] %v11629_v46   ;;  %11652 = vst [vmem:[%s16483_s24 + $0xb0] sm:$0xff] %v11504_v32   ;;  %v5218_v27 = vadd.f32 %v12828_v60, %v5217_v61  ;;  %v5287_v33 = vadd.f32 %v5286_v56, %v5256_v48 }
 0x460   : > { %11676 = vst [vmem:[%s16483_s24 + $0x170] sm:$0xff] %v11624_v19   ;;  %v10321_v39 = vadd.f32 %v13404_v25, %v10320_v16  ;;  %v10391_v62 = vadd.f32 %v10390_v49, %v10360_v30 }
 0x461   : > { %v5219_v58 = vrot.slane %v5218_v27, 4  ;;  %v5288_v37 = vadd.f32 %v5287_v33, %v5257_v40 }
 0x462   : > { %v10322_v24 = vrot.slane %v10321_v39, 4  ;;  %v10392_v11 = vadd.f32 %v10391_v62, %v10361_v23 }
 0x463   : > { %v5220_v22 = vadd.f32 %v5219_v58, %v5218_v27  ;;  %v5289_v57 = vrot.slane %v5288_v37, 4 }
 0x464   : > { %v10323_v42 = vadd.f32 %v10322_v24, %v10321_v39  ;;  %v10393_v4 = vrot.slane %v10392_v11, 4 }
 0x465   : > { %v5221_v17 = vrot.slane %v5220_v22, 2  ;;  %v5290_v3 = vadd.f32 %v5289_v57, %v5288_v37 }
 0x466   : > { %v10324_v31 = vrot.slane %v10323_v42, 2  ;;  %v10394_v7 = vadd.f32 %v10393_v4, %v10392_v11 }
 0x467   : > { %v5222_v43 = vadd.f32 %v5221_v17, %v5220_v22  ;;  %v5291_v53 = vrot.slane %v5290_v3, 2 }
 0x468   : > { %v10325_v8 = vadd.f32 %v10324_v31, %v10323_v42  ;;  %v10395_v36 = vrot.slane %v10394_v7, 2 }
 0x469   : > { %v5223_v10 = vrot.slane %v5222_v43, 1  ;;  %v5292_v5 = vadd.f32 %v5291_v53, %v5290_v3 }
 0x46a   : > { %v10326_v55 = vrot.slane %v10325_v8, 1  ;;  %v10396_v47 = vadd.f32 %v10395_v36, %v10394_v7 }
 0x46b   : > { %v5224_v2 = vadd.f32 %v5223_v10, %v5222_v43  ;;  %v5293_v21 = vrot.slane %v5292_v5, 1 }
 0x46c   : > { %v10327_v15 = vadd.f32 %v10326_v55, %v10325_v8  ;;  %v10397_v20 = vrot.slane %v10396_v47, 1 }
 0x46d   : > { %5225 = vst [vmem:[%s16475_s20] sm:$0x1] %v5224_v2  ;;  %v5294_v6 = vadd.f32 %v5293_v21, %v5292_v5 }
 0x46e   : > { %11290 = vst [vmem:[%s16475_s20 + $0x8] sm:$0x1] %v10327_v15  ;;  %v10398_v12 = vadd.f32 %v10397_v20, %v10396_v47 }
 0x46f   : > { %5295 = vst [vmem:[%s16475_s20 + $0x1] sm:$0x1] %v5294_v6 }
 0x470   : > { %11291 = vst [vmem:[%s16475_s20 + $0x9] sm:$0x1] %v10398_v12 }
 0x471 PF: > { %s14_s12 = sadd.s32 1, %s14637_s12  }
 0x472   : > { %p11_p4 = scmp.ge.s32.totalorder %s14_s12, 4  }
 0x474   :  { %13 = sbr.rel (!%p11_p4) target bundleno = 1 (0x1), region = 73 }

</bundles_post_ra>
